<compile_context>
chip_gen: v5e
topology: v5e:2x2
jax: 0.10.0
libtpu: 0.0.40
codegen_flags: <defaults>
</compile_context>

<pallas_src>
import jax
import jax.numpy as jnp
from jax.experimental import pallas as pl
from jax.experimental.pallas import tpu as pltpu

LATENT_DIM = 128
HIDDEN_DIM = 256
OUT_ROWS, OUT_COLS = 128, 256
OUTPUT_DIM = OUT_ROWS * OUT_COLS  # 32768


def decoder_kernel(x_ref, w1_ref, b1_ref, w2_ref, b2_ref, o_ref):
    """Fused MLP tile: o = relu(x @ w1 + b1) @ w2_tile + b2_tile.

    The hidden activation is recomputed per grid step (it is tiny) so there is
    no cross-iteration state -> the grid axis can be 'parallel' (v7x megacore).
    The second matmul runs bf16 x bf16 on the MXU with f32 accumulation.
    """
    h = jnp.maximum(
        jnp.dot(x_ref[...], w1_ref[...], preferred_element_type=jnp.float32)
        + b1_ref[...],
        0.0,
    )
    # w2_ref block is (1, H, tn) bf16; drop the leading slab axis.
    o_ref[...] = (
        jnp.dot(h.astype(jnp.bfloat16), w2_ref[0],
                preferred_element_type=jnp.float32)
        + b2_ref[...]
    ).astype(o_ref.dtype)


def prepare_w2_slabs(w2, tn, dtype=jnp.bfloat16):
    """One-time re-layout of w2 (H, N) -> contiguous column slabs (N//tn, H, tn).

    Slab j holds w2[:, j*tn:(j+1)*tn]; each grid step then DMAs one contiguous
    block instead of H strided row segments.  Stored in bf16 to halve the
    dominant HBM stream (f32 accumulation keeps the numerics close).
    """
    H, N = w2.shape
    assert N % tn == 0, "output dim must be divisible by the tile width"
    return w2.reshape(H, N // tn, tn).transpose(1, 0, 2).astype(dtype)


def decoder_forward(x, w1, b1, w2_slabs, b2):
    """x: (B, latent_dim) f32, w2_slabs: (N//tn, H, tn) bf16 -> (B, 128, 256) f32."""
    B, L = x.shape
    H = w1.shape[1]
    n_tiles, _, tn = w2_slabs.shape
    N = n_tiles * tn

    # Pad batch to a full f32 sublane group (8 rows): removes sublane-masked
    # partial stores and keeps MXU operand shapes clean.
    Bp = max(8, ((B + 7) // 8) * 8)
    if Bp != B:
        x = jnp.pad(x, ((0, Bp - B), (0, 0)))

    b1_2d = b1.reshape(1, H)
    b2_2d = b2.reshape(1, N)

    w2_bytes = int(w2_slabs.size) * jnp.dtype(w2_slabs.dtype).itemsize
    cost = pl.CostEstimate(
        flops=2 * Bp * H * N + 2 * Bp * L * H * n_tiles,
        transcendentals=0,
        bytes_accessed=int(
            w2_bytes + Bp * N * 4 + (Bp * L + L * H + H + N) * 4
        ),
    )

    out = pl.pallas_call(
        decoder_kernel,
        out_shape=jax.ShapeDtypeStruct((Bp, N), jnp.float32),
        grid_spec=pltpu.PrefetchScalarGridSpec(
            num_scalar_prefetch=0,
            grid=(n_tiles,),
            in_specs=[
                pl.BlockSpec((Bp, L), lambda j: (0, 0)),        # x (resident)
                pl.BlockSpec((L, H), lambda j: (0, 0)),         # w1 (resident)
                pl.BlockSpec((1, H), lambda j: (0, 0)),         # b1 (resident)
                pl.BlockSpec((1, H, tn), lambda j: (j, 0, 0)),  # w2 slab j (bf16)
                pl.BlockSpec((1, tn), lambda j: (0, j)),        # b2 column tile
            ],
            out_specs=pl.BlockSpec((Bp, tn), lambda j: (0, j)),
        ),
        compiler_params=pltpu.CompilerParams(
            # No cross-iteration state -> safe to shard output tiles across
            # TensorCores on v7x; neutral on single-TC v5e/v6e.
            dimension_semantics=("parallel",),
        ),
        cost_estimate=cost,
    )(x, w1, b1_2d, w2_slabs, b2_2d)

    return out[:B].reshape(-1, OUT_ROWS, OUT_COLS)


def init_params(key):
    """Deterministic synthetic params matching nn.Linear shapes (pre-transposed)."""
    k1, k2, k3, k4 = jax.random.split(key, 4)
    # PyTorch: Linear(in, out) weight is (out, in); we store (in, out).
    s1 = 1.0 / jnp.sqrt(LATENT_DIM)
    s2 = 1.0 / jnp.sqrt(HIDDEN_DIM)
    w1 = jax.random.uniform(k1, (LATENT_DIM, HIDDEN_DIM), jnp.float32, -s1, s1)
    b1 = jax.random.uniform(k2, (HIDDEN_DIM,), jnp.float32, -s1, s1)
    w2 = jax.random.uniform(k3, (HIDDEN_DIM, OUTPUT_DIM), jnp.float32, -s2, s2)
    b2 = jax.random.uniform(k4, (OUTPUT_DIM,), jnp.float32, -s2, s2)
    return w1, b1, w2, b2


if __name__ == "__main__":
    key = jax.random.PRNGKey(0)
    kx, kp = jax.random.split(key)

    batch = 2
    x = jax.random.normal(kx, (batch, LATENT_DIM), jnp.float32)
    w1, b1, w2, b2 = init_params(kp)

    # One-time weight re-layout (would live with the checkpoint in practice).
    # TN=8192 -> 4 grid steps; bf16 slab double-buffer = 8 MiB, fits every
    # chip's default scoped-VMEM limit.
    TN = 8192
    w2_slabs = jax.block_until_ready(prepare_w2_slabs(w2, TN))

    out = decoder_forward(x, w1, b1, w2_slabs, b2)
    out = jax.block_until_ready(out)
    assert out.shape == (batch, OUT_ROWS, OUT_COLS), out.shape

    # Pure-JAX f32 reference; tolerance loosened because w2 is stored in bf16
    # (f32 accumulation) inside the kernel.
    ref = (jnp.maximum(x @ w1 + b1, 0.0) @ w2 + b2).reshape(-1, OUT_ROWS, OUT_COLS)
    assert jnp.allclose(out, ref, atol=2e-2, rtol=2e-2), "mismatch vs reference"

    print("KERNEL_OK")
</pallas_src>

<mosaic_0001>
module attributes {stable_mosaic.version = 11 : i64} {
  func.func @decoder_kernel(%arg0: i32, %arg1: memref<8x128xf32, #tpu.memory_space<vmem>>, %arg2: memref<128x256xf32, #tpu.memory_space<vmem>>, %arg3: memref<1x256xf32, #tpu.memory_space<vmem>>, %arg4: memref<1x256x8192xbf16, #tpu.memory_space<vmem>>, %arg5: memref<1x8192xf32, #tpu.memory_space<vmem>>, %arg6: memref<8x8192xf32, #tpu.memory_space<vmem>>) attributes {dimension_semantics = [#tpu.dimension_semantics<parallel>], iteration_bounds = array<i64: 4>, scalar_prefetch = 0 : i64, scratch_operands = 0 : i64, tpu.core_type = #tpu.core_type<tc>, window_params = [{pipeline_mode = #tpu.pipeline_mode<synchronous>, transform_indices = @transform_0, window_bounds = array<i64: 8, 128>}, {pipeline_mode = #tpu.pipeline_mode<synchronous>, transform_indices = @transform_1, window_bounds = array<i64: 128, 256>}, {pipeline_mode = #tpu.pipeline_mode<synchronous>, transform_indices = @transform_2, window_bounds = array<i64: 1, 256>}, {transform_indices = @transform_3, window_bounds = array<i64: 1, 256, 8192>}, {transform_indices = @transform_4, window_bounds = array<i64: 1, 8192>}, {transform_indices = @transform_5, window_bounds = array<i64: 8, 8192>}]} {
    %c0 = arith.constant 0 : index
    %c0_0 = arith.constant 0 : index
    %0 = vector.load %arg1[%c0, %c0_0] : memref<8x128xf32, #tpu.memory_space<vmem>>, vector<8x128xf32>
    %c0_1 = arith.constant 0 : index
    %c0_2 = arith.constant 0 : index
    %1 = vector.load %arg2[%c0_1, %c0_2] : memref<128x256xf32, #tpu.memory_space<vmem>>, vector<128x256xf32>
    %cst = arith.constant dense<0.000000e+00> : vector<8x256xf32>
    %2 = tpu.matmul %0, %1, %cst {dimension_numbers = #tpu.dot_dimension_numbers<[1], [0], [0], [1], [0, 0, 1, 1], [], []>} : vector<8x128xf32>, vector<128x256xf32>, vector<8x256xf32> -> vector<8x256xf32>
    %c0_3 = arith.constant 0 : index
    %c0_4 = arith.constant 0 : index
    %3 = vector.load %arg3[%c0_3, %c0_4] : memref<1x256xf32, #tpu.memory_space<vmem>>, vector<1x256xf32>
    %4 = vector.broadcast %3 : vector<1x256xf32> to vector<8x256xf32>
    %5 = arith.addf %2, %4 : vector<8x256xf32>
    %cst_5 = arith.constant 0.000000e+00 : f32
    %6 = vector.broadcast %cst_5 : f32 to vector<8x256xf32>
    %7 = arith.maximumf %5, %6 : vector<8x256xf32>
    %8 = arith.truncf %7 : vector<8x256xf32> to vector<8x256xbf16>
    %c0_6 = arith.constant 0 : index
    %c0_7 = arith.constant 0 : index
    %c0_8 = arith.constant 0 : index
    %9 = vector.load %arg4[%c0_6, %c0_7, %c0_8] : memref<1x256x8192xbf16, #tpu.memory_space<vmem>>, vector<1x256x8192xbf16>
    %10 = vector.shape_cast %9 : vector<1x256x8192xbf16> to vector<256x8192xbf16>
    %cst_9 = arith.constant dense<0.000000e+00> : vector<8x8192xf32>
    %11 = tpu.matmul %8, %10, %cst_9 {dimension_numbers = #tpu.dot_dimension_numbers<[1], [0], [0], [1], [0, 0, 1, 1], [], []>} : vector<8x256xbf16>, vector<256x8192xbf16>, vector<8x8192xf32> -> vector<8x8192xf32>
    %c0_10 = arith.constant 0 : index
    %c0_11 = arith.constant 0 : index
    %12 = vector.load %arg5[%c0_10, %c0_11] : memref<1x8192xf32, #tpu.memory_space<vmem>>, vector<1x8192xf32>
    %13 = vector.broadcast %12 : vector<1x8192xf32> to vector<8x8192xf32>
    %14 = arith.addf %11, %13 : vector<8x8192xf32>
    %c0_12 = arith.constant 0 : index
    %c0_13 = arith.constant 0 : index
    %15 = vector.load %arg6[%c0_12, %c0_13] : memref<8x8192xf32, #tpu.memory_space<vmem>>, vector<8x8192xf32>
    tpu.vector_store %arg6[%c0_12, %c0_13], %14 {strides = array<i32>} : memref<8x8192xf32, #tpu.memory_space<vmem>>, vector<8x8192xf32>,
    return
  }
  func.func @transform_0(%arg0: i32) -> (i32, i32) {
    %c0_i32 = arith.constant 0 : i32
    %c0_i32_0 = arith.constant 0 : i32
    %c0_i32_1 = arith.constant 0 : i32
    return %c0_i32, %c0_i32_0 : i32, i32
  }
  func.func @transform_1(%arg0: i32) -> (i32, i32) {
    %c0_i32 = arith.constant 0 : i32
    %c0_i32_0 = arith.constant 0 : i32
    %c0_i32_1 = arith.constant 0 : i32
    return %c0_i32, %c0_i32_0 : i32, i32
  }
  func.func @transform_2(%arg0: i32) -> (i32, i32) {
    %c0_i32 = arith.constant 0 : i32
    %c0_i32_0 = arith.constant 0 : i32
    %c0_i32_1 = arith.constant 0 : i32
    return %c0_i32, %c0_i32_0 : i32, i32
  }
  func.func @transform_3(%arg0: i32) -> (i32, i32, i32) {
    %c0_i32 = arith.constant 0 : i32
    %c0_i32_0 = arith.constant 0 : i32
    %c0_i32_1 = arith.constant 0 : i32
    return %arg0, %c0_i32, %c0_i32_0 : i32, i32, i32
  }
  func.func @transform_4(%arg0: i32) -> (i32, i32) {
    %c0_i32 = arith.constant 0 : i32
    %c0_i32_0 = arith.constant 0 : i32
    return %c0_i32, %arg0 : i32, i32
  }
  func.func @transform_5(%arg0: i32) -> (i32, i32) {
    %c0_i32 = arith.constant 0 : i32
    %c0_i32_0 = arith.constant 0 : i32
    return %c0_i32, %arg0 : i32, i32
  }
}

</mosaic_0001>

<bundles_post_ra>
// kernel: tpu_custom_call.1
= control target key start
LH: loop header
LB: loop body
LE: loop exit
PB: predicated region body
PF: predicated region fallthrough
CT: control target
= control target key end

     0   :  { %s16591_s0 = inlined_call_operand.hbm [shape: f32[8,128], index: 0, kind: input, shape index: {}]   ;;  %s16592_s1 = inlined_call_operand.hbm [shape: f32[128,256], index: 1, kind: input, shape index: {}]   ;;  %s16593_s2 = inlined_call_operand.hbm [shape: f32[1,256], index: 2, kind: input, shape index: {}]   ;;  %s16594_s3 = inlined_call_operand.hbm [shape: bf16[4,256,8192], index: 3, kind: input, shape index: {}]   ;;  %s16595_s4 = inlined_call_operand.hbm [shape: f32[1,32768], index: 4, kind: input, shape index: {}]   ;;  %s16596_s5 = inlined_call_operand.hbm [shape: f32[8,32768], index: 5, kind: output, shape index: {}]  }
   0x1   :  { %16600 = sst [smem:[#allocation17_spill]] %s16591_s0 }
   0x2   :  { %16601 = sst [smem:[#allocation18_spill]] %s16592_s1 }
   0x3   :  { %16602 = sst [smem:[#allocation19_spill]] %s16594_s3 }
   0x4   :  { %10 = vsyncpa [#allocation3], 0 }
   0x5   :  { %11 = vsyncpa [#allocation6], 0 }
   0x6   :  { %12 = vsyncpa [#allocation9], 0 }
   0x7   :  { %14 = vsyncpa [#allocation9 + $0x1], 0 }
   0x8   :  { %15 = vsyncpa [#allocation4], 0 }
   0x9   :  { %17 = vsyncpa [#allocation4 + $0x1], 0  ;;  %s14058_s18 = smov 0   ;;  %s14060_s19 = smov 0  }
   0xa   :  { %s14062_s20 = smov 0   ;;  %s14064_s21 = smov 0  }
   0xb LB: > { %s14079_s22 = sadd.s32 4294967295, %s14020_s21   ;;  %s8566_s23 = sadd.s32 4294967294, %s14020_s21   ;;  %s14020_s21 = sphi %s14064_s21, %s16623_s21   ;;  %s14016_s20 = sphi %s14062_s20, %s16622_s20   ;;  %s14012_s19 = sphi %s14060_s19, %s16621_s19   ;;  %s14008_s18 = sphi %s14058_s18, %s16620_s18  }
   0xc   : > { %p106_p0 = scmp.ne.s32.totalorder %s14012_s19, %s14008_s18  ;;  %p16599_p1 = scmp.eq.s32.totalorder %s14079_s22, 0 }
   0xd   : > { %p156_p2 = scmp.eq.s32.totalorder %s14079_s22, 3  ;;  %p162_p3 = scmp.eq.s32.totalorder %s8566_s23, 3 }
   0xe   : > { %p14088_p4 = por %p16599_p1, %p106_p0  ;;  %p8567_p5 = scmp.ge.s32.totalorder %s14020_s21, 1 }
   0xf   : > { %p14093_p6 = por %p162_p3, %p106_p0  ;;  %p169_p7 = scmp.lt.s32.totalorder %s14020_s21, 5 }
  0x10   : > { %s16605_s1 = sld [smem:[#allocation18_spill]]  ;;  %s14022_s30 = smov [#allocation5]  }
  0x11   : > { %p14101_p8 = pnand %p8567_p5, %p169_p7  ;;  %s194_s6 = sshll.u32 %s14022_s30, 4  ;;  %s195_s6 = int_to_ptr.vmem [resolvable:$true] %s194_s6 }
  0x12   : > { %s14114_s8 = sadd.s32 1, %s14020_s21   ;;  %s16597_s9 = smov 256  }
  0x13   : > { %p13729_p9 = pneg %p14101_p8  ;;  %s14024_s10 = smov 16  }
  0x14   : > { %s90_s11 = ssub.s32 %s14020_s21, %s14114_s8  ;;  %s93_s12 = sadd.s32 1, %s14016_s20 }
  0x15   : > { %p14109_p10 = pnand %p13729_p9, %p16599_p1  ;;  %p91_p11 = scmp.eq.s32.totalorder %s90_s11, 0 }
  0x16   : > { %s192_s28 = sshll.u32 %s16605_s1, 4  ;;  %p100_p12 = scmp.ne.s32.totalorder %s14016_s20, %s14012_s19  ;;  %s193_s28 = int_to_ptr.hbm [resolvable:$true] %s192_s28 }
  0x17   : > { %13735 = dma.hbm_to_vmem [thread:$0]  (!%p14109_p10), %s193_s28, 4096, %s195_s6, [#allocation6], %s16597_s9, %s16597_s9, %s14024_s10  }
  0x18   : > { %p101_p13 = scmp.eq.s32.totalorder %s14020_s21, 0  ;;  %p13753_p0 = scmp.lt.s32.totalorder %s14020_s21, 4 }
  0x19   : > { %s14128_s13 = scalar_select %p91_p11, %s14016_s20, %s93_s12  }
  0x1a   : > { %p102_p3 = por %p101_p13, %p100_p12  ;;  %p14132_p5 = por %p156_p2, %p100_p12 }
  0x1b   : > { %16608 = sst [smem:[#allocation16_spill]] %s14128_s13  ;;  %s220_s15 = sand.u32 1, %s14020_s21  }
  0x1c   : > { %s16598_s16 = sand.u32 1, %s14016_s20   ;;  %s12685_s23 = sshll.u32 %s14020_s21, 13 }
  0x1d   : > { %s8572_s17 = sshll.u32 %s16598_s16, 13  ;;  %s16610_s3 = sld [smem:[#allocation19_spill]] }
  0x1e   : > { %s224_s30 = scalar_lea.vmem [#allocation8], %s8572_s17  ;;  %p14146_p7 = pnand %p13753_p0, %p102_p3 }
  0x1f   : > { %s232_s6 = sshll.u32 %s224_s30, 4  ;;  %s16612_s0 = sld [smem:[#allocation17_spill]]  ;;  %s233_s6 = int_to_ptr.vmem [resolvable:$true] %s232_s6 }
  0x20   : > { %s14153_s1 = scalar_lea.sflag [#allocation9], %s220_s15  ;;  %p13830_p9 = pneg %p14146_p7 }
  0x23   : > { %s229_s28 = scalar_lea.hbm %s16610_s3, %s12685_s23  ;;  %s13833_s9 = scalar_lea.hbm %s16610_s3, 32768 }
  0x24   : > { %s230_s10 = sshll.u32 %s229_s28, 4  ;;  %s231_s10 = int_to_ptr.hbm [resolvable:$true] %s230_s10 }
  0x25   : > { %s181_s16 = sshll.u32 %s16612_s0, 4  ;;  %s13826_s23 = sshra.s32 %s231_s10, 4  ;;  %s182_s16 = int_to_ptr.hbm [resolvable:$true] %s181_s16  ;;  %s13827_s23 = int_to_ptr.hbm [resolvable:$true] %s13826_s23 }
  0x26   : > { %s13828_s17 = scalar_lea.hbm %s13827_s23, 8192  ;;  %p13834_p13 = scmp.lt.s32.totalorder %s13827_s23, %s16610_s3 }
  0x27   : > { %p13829_p2 = scmp.ne.s32.totalorder %s13827_s23, %s13828_s17  ;;  %p13835_p0 = scmp.lt.s32.totalorder %s13833_s9, %s13828_s17 }
  0x29   : > { %p13831_p11 = pnand %p13830_p9, %p13829_p2  ;;  %p13836_p3 = por %p13835_p0, %p13834_p13 }
  0x2b   : > { %p13832_p12 = pneg %p13831_p11 }
  0x2d   : > { %p13837_p1 = pnand %p13836_p3, %p13832_p12 }
  0x2f   : > { %13840 = shalt.err (!%p13837_p1)
}
  0x30   : > { %s14025_s15 = smov 4096   ;;  %s16613_s12 = smov 256  }
  0x31   : > { %13742 = dma.hbm_to_vmem [thread:$0]  (!%p14146_p7), %s231_s10, 131072, %s233_s6, %s14153_s1, %s14025_s15, %s14025_s15, %s16613_s12  }
  0x32   : > { %s207_s0 = sshll.u32 %s16593_s2, 4  ;;  %s14026_s28 = smov [#allocation2]   ;;  %s208_s0 = int_to_ptr.hbm [resolvable:$true] %s207_s0 }
  0x33   : > { %s183_s23 = sshll.u32 %s14026_s28, 4  ;;  %s14027_s17 = smov [#allocation7]   ;;  %s184_s23 = int_to_ptr.vmem [resolvable:$true] %s183_s23 }
  0x34   : > { %13732 = dma.hbm_to_vmem [thread:$0]  (!%p14109_p10), %s182_s16, 128, %s184_s23, [#allocation3]  }
  0x35   : > { %s209_s9 = sshll.u32 %s14027_s17, 4  ;;  %s16614_s30 = sand.u32 1, %s14016_s20   ;;  %s210_s9 = int_to_ptr.vmem [resolvable:$true] %s209_s9 }
  0x36   : > { %s8575_s3 = sshll.u32 %s16614_s30, 6  ;;  %s8576_s13 = sshll.u32 %s14020_s21, 6 }
  0x37   : > { %13738 = dma.hbm_to_vmem [thread:$0]  (!%p14109_p10), %s208_s0, 32, %s210_s9, [#allocation6]  }
  0x38   : > { %s246_s6 = scalar_lea.vmem [#allocation10], %s8575_s3  ;;  %s250_s26 = scalar_lea.hbm %s16595_s4, %s8576_s13 }
  0x39   : > { %s254_s10 = sshll.u32 %s246_s6, 4  ;;  %s252_s27 = sshll.u32 %s250_s26, 4  ;;  %s255_s10 = int_to_ptr.vmem [resolvable:$true] %s254_s10  ;;  %s253_s27 = int_to_ptr.hbm [resolvable:$true] %s252_s27 }
  0x3a   : > { %s13916_s28 = sshra.s32 %s253_s27, 4  ;;  %s13923_s3 = scalar_lea.hbm %s16595_s4, 256  ;;  %s13917_s28 = int_to_ptr.hbm [resolvable:$true] %s13916_s28 }
  0x3b   : > { %s13918_s16 = scalar_lea.hbm %s13917_s28, 64  ;;  %p13924_p10 = scmp.lt.s32.totalorder %s13917_s28, %s16595_s4 }
  0x3c   : > { %p13919_p1 = scmp.ne.s32.totalorder %s13917_s28, %s13918_s16  ;;  %p13925_p12 = scmp.lt.s32.totalorder %s13923_s3, %s13918_s16 }
  0x3e   : > { %p13921_p2 = pnand %p13919_p1, %p13830_p9  ;;  %p13926_p13 = por %p13925_p12, %p13924_p10 }
  0x40   : > { %p13922_p11 = pneg %p13921_p2 }
  0x42   : > { %p13927_p0 = pnand %p13926_p13, %p13922_p11 }
  0x44   : > { %13930 = shalt.err (!%p13927_p0)
}
  0x45   : > { %13745 = dma.hbm_to_vmem [thread:$0]  (!%p14146_p7), %s253_s27, 1024, %s255_s10, %s14153_s1  }
  0x46   : > { %263 = sbr.rel (%p14101_p8) target bundleno = 1349 (0x545), region = 40  ;;  %p16615_p9 = scmp.eq.s32.totalorder (!%p14101_p8), %s14079_s22, 0 }
  0x4b   : > { %13991 = dma.done.wait (%p16615_p9), [#allocation3], 128   ;;  %p16616_p3 = pmov %p16615_p9 }
  0x4d   : > { %13993 = vsyncadd (%p16616_p3), [#allocation3], 4294967168  ;;  %p16617_p1 = pmov %p16616_p3 }
  0x4f   : > { %13995 = dma.done.wait (%p16617_p1), [#allocation6], 4128   ;;  %p16618_p2 = pmov %p16617_p1 }
  0x50   : > { %s280_s13 = sand.u32 1, %s14079_s22   ;;  %s14207_s1 = sand.u32 1, %s14012_s19  }
  0x51   : > { %13997 = vsyncadd (%p16618_p2), [#allocation6], 4294963168  ;;  %s8581_s29 = sshll.u32 %s14207_s1, 13  ;;  %s281_s11 = scalar_lea.sflag [#allocation9], %s280_s13 }
  0x52   : > { %s14210_s9 = scalar_lea.vmem [#allocation8], %s8581_s29 }
  0x53   : > { %13999 = dma.done.wait (%p14088_p4), %s281_s11, 132096  }
  0x54   : > { %14001 = vsyncadd (%p14088_p4), %s281_s11, 4294835200  ;;  %v360_v0 = vld [vmem:[#allocation5 + $0xf0] sm:$0xff]  ;;  %v361_v1 = vld [vmem:[#allocation5 + $0xf8] sm:$0xff]  ;;  %s8582_s24 = sshll.u32 %s14207_s1, 6  ;;  %s8583_s6 = sshll.u32 %s14207_s1, 9 }
  0x55   : > { %v358_v2 = vld [vmem:[#allocation5 + $0xe0] sm:$0xff]  ;;  %368 = vmatpush.msra.mxu0 %v360_v0  ;;  %388 = vmatpush.msra.mxu1 %v361_v1  ;;  %v359_v3 = vld [vmem:[#allocation5 + $0xe8] sm:$0xff]  ;;  %v356_v4 = vld [vmem:[#allocation5 + $0xd0] sm:$0xff]  ;;  %s14643_s30 = scalar_lea.vmem [#allocation10], %s8582_s24  ;;  %s14676_s10 = scalar_lea.vmem [#allocation11], %s8583_s6 }
  0x56   : > { %v357_v5 = vld [vmem:[#allocation5 + $0xd8] sm:$0xff]  ;;  %v354_v6 = vld [vmem:[#allocation5 + $0xc0] sm:$0xff]  ;;  %v355_v7 = vld [vmem:[#allocation5 + $0xc8] sm:$0xff]  ;;  %s13710_s15 = sshll.u32 %s14079_s22, 9  ;;  %s8442_s28 = sshll.u32 %s14676_s10, 4  ;;  %s8443_s28 = int_to_ptr.vmem [resolvable:$true] %s8442_s28 }
  0x57   : > { %369 = vmatpush.msra.mxu0 %v358_v2  ;;  %389 = vmatpush.msra.mxu1 %v359_v3  ;;  %v352_v8 = vld [vmem:[#allocation5 + $0xb0] sm:$0xff]  ;;  %v353_v9 = vld [vmem:[#allocation5 + $0xb8] sm:$0xff]  ;;  %v350_v10 = vld [vmem:[#allocation5 + $0xa0] sm:$0xff]  ;;  %s8440_s27 = scalar_lea.hbm %s16596_s5, %s13710_s15  ;;  %s8429_s22 = scalar_lea.sflag [#allocation4], %s14207_s1 }
  0x58   : > { %v351_v11 = vld [vmem:[#allocation5 + $0xa8] sm:$0xff]  ;;  %v348_v12 = vld [vmem:[#allocation5 + $0x90] sm:$0xff]  ;;  %v349_v13 = vld [vmem:[#allocation5 + $0x98] sm:$0xff]  ;;  %s8444_s16 = sshll.u32 %s8440_s27, 4  ;;  %s13966_s17 = scalar_lea.hbm %s16596_s5, 2048  ;;  %s8445_s16 = int_to_ptr.hbm [resolvable:$true] %s8444_s16 }
  0x59   : > { %370 = vmatpush.msra.mxu0 %v356_v4  ;;  %390 = vmatpush.msra.mxu1 %v357_v5  ;;  %v10378_v14 = vld [vmem:[%s14210_s9 + $0xe00] sm:$0xf]  ;;  %v347_v18 = vld [vmem:[#allocation5 + $0x88] sm:$0xff]  ;;  %v344_v21 = vld [vmem:[#allocation5 + $0x70] sm:$0xff]  ;;  %s13960_s7 = sshra.s32 %s8445_s16, 4  ;;  %s13961_s7 = int_to_ptr.hbm [resolvable:$true] %s13960_s7 }
  0x5a   : > { %v13166_v15 = vld [vmem:[%s14210_s9 + $0xefc] sm:$0xf0]  ;;  %v345_v22 = vld [vmem:[#allocation5 + $0x78] sm:$0xff]  ;;  %v343_v30 = vld [vmem:[#allocation5 + $0x68] sm:$0xff]  ;;  %s13962_s0 = scalar_lea.hbm %s13961_s7, 512  ;;  %p13967_p11 = scmp.lt.s32.totalorder %s13961_s7, %s16596_s5 }
  0x5b   : > { %371 = vmatpush.msra.mxu0 %v354_v6  ;;  %391 = vmatpush.msra.mxu1 %v355_v7  ;;  %v12426_v16 = vld [vmem:[%s14210_s9 + $0x1e00] sm:$0xf]  ;;  %v10379_v19 = vor.u32 %v13166_v15, %v10378_v14  ;;  %v340_v36 = vld [vmem:[#allocation5 + $0x50] sm:$0xff]  ;;  %v341_v37 = vld [vmem:[#allocation5 + $0x58] sm:$0xff]  ;;  %p13963_p4 = scmp.ne.s32.totalorder %s13961_s7, %s13962_s0  ;;  %p13968_p10 = scmp.lt.s32.totalorder %s13966_s17, %s13962_s0 }
  0x5c   : > { %v346_v17 = vld [vmem:[#allocation5 + $0x80] sm:$0xff]  ;;  %v339_v42 = vld [vmem:[#allocation5 + $0x48] sm:$0xff]  ;;  %v336_v46 = vld [vmem:[#allocation5 + $0x30] sm:$0xff] }
  0x5d   : > { %372 = vmatpush.msra.mxu0 %v352_v8  ;;  %392 = vmatpush.msra.mxu1 %v353_v9  ;;  %v13678_v20 = vld [vmem:[%s14210_s9 + $0x1efc] sm:$0xf0]  ;;  %v337_v47 = vld [vmem:[#allocation5 + $0x38] sm:$0xff]  ;;  %v335_v52 = vld [vmem:[#allocation5 + $0x28] sm:$0xff]  ;;  %p13964_p8 = pnand %p13963_p4, %p14132_p5  ;;  %p13969_p12 = por %p13968_p10, %p13967_p11 }
  0x5e   : > { %v12427_v23 = vor.u32 %v13678_v20, %v12426_v16  ;;  %v10122_v24 = vld [vmem:[%s14210_s9 + $0xc00] sm:$0xf]  ;;  %6700 = vmatpush.bf16.msra.mxu2 %v10379_v19  ;;  %v332_v53 = vld [vmem:[#allocation5 + $0x10] sm:$0xff]  ;;  %v333_v55 = vld [vmem:[#allocation5 + $0x18] sm:$0xff] }
  0x5f   : > { %373 = vmatpush.msra.mxu0 %v350_v10  ;;  %393 = vmatpush.msra.mxu1 %v351_v11  ;;  %v13102_v25 = vld [vmem:[%s14210_s9 + $0xcfc] sm:$0xf0]  ;;  %v13134_v56 = vld [vmem:[%s14210_s9 + $0xe04] sm:$0xf]  ;;  %v329_v3 = vld [vmem:[#allocation2] sm:$0xff]  ;;  %p13965_p7 = pneg %p13964_p8 }
  0x60   : > { %v12170_v26 = vld [vmem:[%s14210_s9 + $0x1c00] sm:$0xf]  ;;  %v10123_v29 = vor.u32 %v13102_v25, %v10122_v24  ;;  %6713 = vmatpush.bf16.msra.mxu3 %v12427_v23  ;;  %v10380_v57 = vld [vmem:[%s14210_s9 + $0xf00] sm:$0xf0] }
  0x61   : > { %374 = vmatpush.msra.mxu0 %v348_v12  ;;  %394 = vmatpush.msra.mxu1 %v349_v13  ;;  %v13614_v27 = vld [vmem:[%s14210_s9 + $0x1cfc] sm:$0xf0]  ;;  %v13646_v58 = vld [vmem:[%s14210_s9 + $0x1e04] sm:$0xf]  ;;  %v10383_v4 = vor.u32 %v13134_v56, %v10380_v57  ;;  %v9874_v56 = vld [vmem:[%s14210_s9 + $0xa08] sm:$0xf]  ;;  %p13970_p13 = pnand %p13969_p12, %p13965_p7 }
  0x62   : > { %v342_v28 = vld [vmem:[#allocation5 + $0x60] sm:$0xff]  ;;  %v12171_v31 = vor.u32 %v13614_v27, %v12170_v26  ;;  %6701 = vmatpush.bf16.msra.mxu2 %v10123_v29  ;;  %v331_v2 = vld [vmem:[#allocation5 + $0x8] sm:$0xff] }
  0x63   : > { %375 = vmatpush.msra.mxu0 %v346_v17  ;;  %395 = vmatpush.msra.mxu1 %v347_v18  ;;  %v9866_v32 = vld [vmem:[%s14210_s9 + $0xa00] sm:$0xf]  ;;  %v12428_v59 = vld [vmem:[%s14210_s9 + $0x1f00] sm:$0xf0]  ;;  %v13167_v29 = vld [vmem:[%s14210_s9 + $0xf04] sm:$0xf0] }
  0x64   : > { %v13038_v33 = vld [vmem:[%s14210_s9 + $0xafc] sm:$0xf0]  ;;  %6714 = vmatpush.bf16.msra.mxu3 %v12171_v31  ;;  %v12431_v5 = vor.u32 %v13646_v58, %v12428_v59  ;;  %v13070_v6 = vld [vmem:[%s14210_s9 + $0xc04] sm:$0xf]  ;;  %v13039_v57 = vld [vmem:[%s14210_s9 + $0xb04] sm:$0xf0] }
  0x65   : > { %376 = vmatpush.msra.mxu0 %v344_v21  ;;  %396 = vmatpush.msra.mxu1 %v345_v22  ;;  %v11914_v34 = vld [vmem:[%s14210_s9 + $0x1a00] sm:$0xf]  ;;  %v9867_v38 = vor.u32 %v13038_v33, %v9866_v32  ;;  %v10124_v7 = vld [vmem:[%s14210_s9 + $0xd00] sm:$0xf0] }
  0x66   : > { %v13550_v35 = vld [vmem:[%s14210_s9 + $0x1afc] sm:$0xf0]  ;;  %v13582_v8 = vld [vmem:[%s14210_s9 + $0x1c04] sm:$0xf]  ;;  %v10127_v16 = vor.u32 %v13070_v6, %v10124_v7 }
  0x67   : > { %377 = vmatpush.msra.mxu0 %v342_v28  ;;  %397 = vmatpush.msra.mxu1 %v343_v30  ;;  %v9610_v39 = vld [vmem:[%s14210_s9 + $0x800] sm:$0xf]  ;;  %v11915_v43 = vor.u32 %v13550_v35, %v11914_v34  ;;  %v12172_v9 = vld [vmem:[%s14210_s9 + $0x1d00] sm:$0xf0]  ;;  %v10386_v28 = vld [vmem:[%s14210_s9 + $0xe08] sm:$0xf] }
  0x68   : > { %v12974_v40 = vld [vmem:[%s14210_s9 + $0x8fc] sm:$0xf0]  ;;  %6702 = vmatpush.bf16.msra.mxu2 %v9867_v38  ;;  %v12175_v17 = vor.u32 %v13582_v8, %v12172_v9  ;;  %v13006_v18 = vld [vmem:[%s14210_s9 + $0xa04] sm:$0xf] }
  0x69   : > { %v338_v41 = vld [vmem:[#allocation5 + $0x40] sm:$0xff]  ;;  %378 = vmatpush.msra.mxu0 %v340_v36  ;;  %398 = vmatpush.msra.mxu1 %v341_v37  ;;  %v9611_v48 = vor.u32 %v12974_v40, %v9610_v39  ;;  %v10387_v40 = vor.u32 %v13167_v29, %v10386_v28 }
  0x6a   : > { %v11658_v44 = vld [vmem:[%s14210_s9 + $0x1800] sm:$0xf]  ;;  %6715 = vmatpush.bf16.msra.mxu3 %v11915_v43  ;;  %v9868_v19 = vld [vmem:[%s14210_s9 + $0xb00] sm:$0xf0]  ;;  %v10130_v43 = vld [vmem:[%s14210_s9 + $0xc08] sm:$0xf] }
  0x6b   : > { %v13486_v45 = vld [vmem:[%s14210_s9 + $0x18fc] sm:$0xf0]  ;;  %379 = vmatpush.msra.mxu0 %v338_v41  ;;  %399 = vmatpush.msra.mxu1 %v339_v42  ;;  %v13518_v20 = vld [vmem:[%s14210_s9 + $0x1a04] sm:$0xf]  ;;  %v9871_v30 = vor.u32 %v13006_v18, %v9868_v19  ;;  %v12434_v41 = vld [vmem:[%s14210_s9 + $0x1e08] sm:$0xf] }
  0x6c   : > { %v9354_v49 = vld [vmem:[%s14210_s9 + $0x600] sm:$0xf]  ;;  %v11659_v54 = vor.u32 %v13486_v45, %v11658_v44  ;;  %6703 = vmatpush.bf16.msra.mxu2 %v9611_v48  ;;  %v11916_v21 = vld [vmem:[%s14210_s9 + $0x1b00] sm:$0xf0]  ;;  %v13679_v42 = vld [vmem:[%s14210_s9 + $0x1f04] sm:$0xf0] }
  0x6d   : > { %v12910_v50 = vld [vmem:[%s14210_s9 + $0x6fc] sm:$0xf0]  ;;  %380 = vmatpush.msra.mxu0 %v336_v46  ;;  %400 = vmatpush.msra.mxu1 %v337_v47  ;;  %v11919_v31 = vor.u32 %v13518_v20, %v11916_v21  ;;  %v12942_v32 = vld [vmem:[%s14210_s9 + $0x804] sm:$0xf]  ;;  %v13103_v44 = vld [vmem:[%s14210_s9 + $0xd04] sm:$0xf0] }
  0x6e   : > { %v334_v51 = vld [vmem:[#allocation5 + $0x20] sm:$0xff]  ;;  %v9355_v60 = vor.u32 %v12910_v50, %v9354_v49  ;;  %6716 = vmatpush.bf16.msra.mxu3 %v11659_v54  ;;  %v12178_v54 = vld [vmem:[%s14210_s9 + $0x1c08] sm:$0xf] }
  0x6f   : > { %v11402_v61 = vld [vmem:[%s14210_s9 + $0x1600] sm:$0xf]  ;;  %381 = vmatpush.msra.mxu0 %v334_v51  ;;  %401 = vmatpush.msra.mxu1 %v335_v52  ;;  %v9612_v33 = vld [vmem:[%s14210_s9 + $0x900] sm:$0xf0]  ;;  %v12435_v52 = vor.u32 %v13679_v42, %v12434_v41  ;;  %v12180_v41 = vld [vmem:[%s14210_s9 + $0x1d08] sm:$0xf0] }
  0x70   : > { %v13422_v62 = vld [vmem:[%s14210_s9 + $0x16fc] sm:$0xf0]  ;;  %6704 = vmatpush.bf16.msra.mxu2 %v9355_v60  ;;  %v13454_v34 = vld [vmem:[%s14210_s9 + $0x1804] sm:$0xf]  ;;  %v9615_v45 = vor.u32 %v12942_v32, %v9612_v33  ;;  %v9106_v32 = vld [vmem:[%s14210_s9 + $0x408] sm:$0xf] }
  0x71   : > { %v9098_v63 = vld [vmem:[%s14210_s9 + $0x400] sm:$0xf]  ;;  %382 = vmatpush.msra.mxu0 %v332_v53  ;;  %402 = vmatpush.msra.mxu1 %v333_v55  ;;  %v11403_v10 = vor.u32 %v13422_v62, %v11402_v61  ;;  %v11660_v35 = vld [vmem:[%s14210_s9 + $0x1900] sm:$0xf0]  ;;  %v10131_v53 = vor.u32 %v13103_v44, %v10130_v43  ;;  %v13615_v55 = vld [vmem:[%s14210_s9 + $0x1d04] sm:$0xf0] }
  0x72   : > { %v12846_v0 = vld [vmem:[%s14210_s9 + $0x4fc] sm:$0xf0]  ;;  %v11663_v46 = vor.u32 %v13454_v34, %v11660_v35  ;;  %v12878_v47 = vld [vmem:[%s14210_s9 + $0x604] sm:$0xf]  ;;  %v12847_v33 = vld [vmem:[%s14210_s9 + $0x504] sm:$0xf0] }
  0x73   : > { %v330_v1 = vld [vmem:[#allocation5] sm:$0xff]  ;;  %v9099_v11 = vor.u32 %v12846_v0, %v9098_v63  ;;  %403 = vmatpush.msra.mxu1 %v331_v2  ;;  %6717 = vmatpush.bf16.msra.mxu3 %v11403_v10  ;;  %v12179_v0 = vor.u32 %v13615_v55, %v12178_v54  ;;  %v11922_v2 = vld [vmem:[%s14210_s9 + $0x1a08] sm:$0xf]  ;;  %v9107_v43 = vor.u32 %v12847_v33, %v9106_v32  ;;  %v12943_v55 = vld [vmem:[%s14210_s9 + $0x80c] sm:$0xf] }
  0x74   : > { %v11146_v12 = vld [vmem:[%s14210_s9 + $0x1400] sm:$0xf]  ;;  %383 = vmatpush.msra.mxu0 %v330_v1  ;;  %404 = vmatmul.f32.vlgmr.msra.gmra.mxu1 %v329_v3  ;;  %v9356_v48 = vld [vmem:[%s14210_s9 + $0x700] sm:$0xf0]  ;;  %v9875_v1 = vor.u32 %v13039_v57, %v9874_v56  ;;  %v11154_v44 = vld [vmem:[%s14210_s9 + $0x1408] sm:$0xf] }
  0x75   : > { %v13358_v13 = vld [vmem:[%s14210_s9 + $0x14fc] sm:$0xf0]  ;;  %384 = vmatmul.f32.vlgmr.msra.gmra.mxu0 %v329_v3  ;;  %6739 = vmatpush.bf16.msrb.mxu1 %v12431_v5  ;;  %v13390_v49 = vld [vmem:[%s14210_s9 + $0x1604] sm:$0xf]  ;;  %v9359_v58 = vor.u32 %v12878_v47, %v9356_v48  ;;  %v13551_v3 = vld [vmem:[%s14210_s9 + $0x1b04] sm:$0xf0] }
  0x76   : > { %v8842_v14 = vld [vmem:[%s14210_s9 + $0x200] sm:$0xf]  ;;  %6726 = vmatpush.bf16.msrb.mxu0 %v10383_v4  ;;  %6705 = vmatpush.bf16.msra.mxu2 %v9099_v11  ;;  %v11147_v22 = vor.u32 %v13358_v13, %v11146_v12  ;;  %v11404_v50 = vld [vmem:[%s14210_s9 + $0x1700] sm:$0xf0]  ;;  %v9618_v4 = vld [vmem:[%s14210_s9 + $0x808] sm:$0xf]  ;;  %v11923_v12 = vor.u32 %v13551_v3, %v11922_v2 }
  0x77   : > { %v12782_v15 = vld [vmem:[%s14210_s9 + $0x2fc] sm:$0xf0]  ;;  %v11407_v59 = vor.u32 %v13390_v49, %v11404_v50  ;;  %v12814_v60 = vld [vmem:[%s14210_s9 + $0x404] sm:$0xf]  ;;  %v12975_v5 = vld [vmem:[%s14210_s9 + $0x904] sm:$0xf0] }
  0x78   : > { %v8843_v23 = vor.u32 %v12782_v15, %v8842_v14  ;;  %v10890_v24 = vld [vmem:[%s14210_s9 + $0x1200] sm:$0xf]  ;;  %6718 = vmatpush.bf16.msra.mxu3 %v11147_v22  ;;  %v9100_v61 = vld [vmem:[%s14210_s9 + $0x500] sm:$0xf0]  ;;  %v9619_v13 = vor.u32 %v12975_v5, %v9618_v4  ;;  %v11666_v14 = vld [vmem:[%s14210_s9 + $0x1808] sm:$0xf] }
  0x79   : > { %v13294_v25 = vld [vmem:[%s14210_s9 + $0x12fc] sm:$0xf0]  ;;  %6740 = vmatpush.bf16.msrb.mxu1 %v12175_v17  ;;  %v13326_v62 = vld [vmem:[%s14210_s9 + $0x1404] sm:$0xf]  ;;  %v9103_v6 = vor.u32 %v12814_v60, %v9100_v61  ;;  %v13487_v15 = vld [vmem:[%s14210_s9 + $0x1904] sm:$0xf0] }
  0x7a   : > { %v8586_v26 = vld [vmem:[%s14210_s9] sm:$0xf]  ;;  %6727 = vmatpush.bf16.msrb.mxu0 %v10127_v16  ;;  %6706 = vmatpush.bf16.msra.mxu2 %v8843_v23  ;;  %v10891_v36 = vor.u32 %v13294_v25, %v10890_v24  ;;  %v11148_v63 = vld [vmem:[%s14210_s9 + $0x1500] sm:$0xf0]  ;;  %v9362_v16 = vld [vmem:[%s14210_s9 + $0x608] sm:$0xf]  ;;  %v11667_v28 = vor.u32 %v13487_v15, %v11666_v14 }
  0x7b   : > { %v12718_v27 = vld [vmem:[%s14210_s9 + $0xfc] sm:$0xf0]  ;;  %v11151_v7 = vor.u32 %v13326_v62, %v11148_v63  ;;  %v12750_v8 = vld [vmem:[%s14210_s9 + $0x204] sm:$0xf]  ;;  %v12911_v17 = vld [vmem:[%s14210_s9 + $0x704] sm:$0xf0] }
  0x7c   : > { %v8587_v37 = vor.u32 %v12718_v27, %v8586_v26  ;;  %v10634_v38 = vld [vmem:[%s14210_s9 + $0x1000] sm:$0xf]  ;;  %6719 = vmatpush.bf16.msra.mxu3 %v10891_v36  ;;  %v8844_v9 = vld [vmem:[%s14210_s9 + $0x300] sm:$0xf0]  ;;  %v13135_v24 = vld [vmem:[%s14210_s9 + $0xe0c] sm:$0xf]  ;;  %v9363_v29 = vor.u32 %v12911_v17, %v9362_v16 }
  0x7d   : > { %v13230_v39 = vld [vmem:[%s14210_s9 + $0x10fc] sm:$0xf0]  ;;  %6741 = vmatpush.bf16.msrb.mxu1 %v11919_v31  ;;  %v13262_v10 = vld [vmem:[%s14210_s9 + $0x1204] sm:$0xf]  ;;  %v8847_v18 = vor.u32 %v12750_v8, %v8844_v9  ;;  %v10388_v25 = vld [vmem:[%s14210_s9 + $0xf08] sm:$0xf0] }
  0x7e   : > { %6728 = vmatpush.bf16.msrb.mxu0 %v9871_v30  ;;  %6707 = vmatpush.bf16.msra.mxu2 %v8587_v37  ;;  %v10635_v51 = vor.u32 %v13230_v39, %v10634_v38  ;;  %v10892_v11 = vld [vmem:[%s14210_s9 + $0x1300] sm:$0xf0]  ;;  %v13647_v26 = vld [vmem:[%s14210_s9 + $0x1e0c] sm:$0xf]  ;;  %v11410_v30 = vld [vmem:[%s14210_s9 + $0x1608] sm:$0xf]  ;;  %v10391_v36 = vor.u32 %v13135_v24, %v10388_v25 }
  0x7f   : > { %v10895_v19 = vor.u32 %v13262_v10, %v10892_v11  ;;  %v12686_v20 = vld [vmem:[%s14210_s9 + $0x4] sm:$0xf]  ;;  %v12436_v27 = vld [vmem:[%s14210_s9 + $0x1f08] sm:$0xf0]  ;;  %v13423_v31 = vld [vmem:[%s14210_s9 + $0x1704] sm:$0xf0] }
  0x80   : > { %6720 = vmatpush.bf16.msra.mxu3 %v10635_v51  ;;  %v8588_v21 = vld [vmem:[%s14210_s9 + $0x100] sm:$0xf0]  ;;  %v12439_v37 = vor.u32 %v13647_v26, %v12436_v27  ;;  %v13071_v38 = vld [vmem:[%s14210_s9 + $0xc0c] sm:$0xf]  ;;  %v11411_v42 = vor.u32 %v13423_v31, %v11410_v30  ;;  %v8850_v9 = vld [vmem:[%s14210_s9 + $0x208] sm:$0xf] }
  0x81   : > { %6742 = vmatpush.bf16.msrb.mxu1 %v11663_v46  ;;  %v13198_v22 = vld [vmem:[%s14210_s9 + $0x1004] sm:$0xf]  ;;  %v8591_v34 = vor.u32 %v12686_v20, %v8588_v21  ;;  %v10132_v39 = vld [vmem:[%s14210_s9 + $0xd08] sm:$0xf0]  ;;  %v12783_v10 = vld [vmem:[%s14210_s9 + $0x304] sm:$0xf0] }
  0x82   : > { %6752 = vmatpush.bf16.msrb.mxu2 %v10387_v40  ;;  %6729 = vmatpush.bf16.msrb.mxu0 %v9615_v45  ;;  %v10636_v23 = vld [vmem:[%s14210_s9 + $0x1100] sm:$0xf0]  ;;  %v13583_v40 = vld [vmem:[%s14210_s9 + $0x1c0c] sm:$0xf]  ;;  %v13359_v45 = vld [vmem:[%s14210_s9 + $0x1504] sm:$0xf0]  ;;  %v10135_v46 = vor.u32 %v13071_v38, %v10132_v39  ;;  %v8851_v11 = vor.u32 %v12783_v10, %v8850_v9 }
  0x83   : > { %v10639_v35 = vor.u32 %v13198_v22, %v10636_v23  ;;  %v12183_v47 = vor.u32 %v13583_v40, %v12180_v41  ;;  %v13007_v48 = vld [vmem:[%s14210_s9 + $0xa0c] sm:$0xf]  ;;  %v8594_v21 = vld [vmem:[%s14210_s9 + $0x8] sm:$0xf]  ;;  %v362_v33 = vld [vmem:[#allocation7] sm:$0x3] }
  0x84   : > { %6765 = vmatpush.bf16.msrb.mxu3 %v12435_v52  ;;  %v9876_v49 = vld [vmem:[%s14210_s9 + $0xb08] sm:$0xf0]  ;;  %v11155_v52 = vor.u32 %v13359_v45, %v11154_v44  ;;  %v12719_v22 = vld [vmem:[%s14210_s9 + $0x104] sm:$0xf0]  ;;  %v10394_v40 = vld [vmem:[%s14210_s9 + $0xe10] sm:$0xf] }
  0x85   : > { %6743 = vmatpush.bf16.msrb.mxu1 %v11407_v59  ;;  %v13519_v50 = vld [vmem:[%s14210_s9 + $0x1a0c] sm:$0xf]  ;;  %v10642_v23 = vld [vmem:[%s14210_s9 + $0x1008] sm:$0xf]  ;;  %v8595_v24 = vor.u32 %v12719_v22, %v8594_v21  ;;  %v13168_v41 = vld [vmem:[%s14210_s9 + $0xf0c] sm:$0xf0] }
  0x86   : > { %6753 = vmatpush.bf16.msrb.mxu2 %v10131_v53  ;;  %6730 = vmatpush.bf16.msrb.mxu0 %v9359_v58  ;;  %v11924_v51 = vld [vmem:[%s14210_s9 + $0x1b08] sm:$0xf0]  ;;  %v9879_v53 = vor.u32 %v13007_v48, %v9876_v49  ;;  %v13231_v25 = vld [vmem:[%s14210_s9 + $0x1104] sm:$0xf0]  ;;  %v13136_v44 = vld [vmem:[%s14210_s9 + $0xe14] sm:$0xf] }
  0x87   : > { %v11927_v54 = vor.u32 %v13519_v50, %v11924_v51  ;;  %v9620_v56 = vld [vmem:[%s14210_s9 + $0x908] sm:$0xf0]  ;;  %v10396_v45 = vld [vmem:[%s14210_s9 + $0xf10] sm:$0xf0] }
  0x88   : > { %6766 = vmatpush.bf16.msrb.mxu3 %v12179_v0  ;;  %v13455_v57 = vld [vmem:[%s14210_s9 + $0x180c] sm:$0xf]  ;;  %v9623_v59 = vor.u32 %v12943_v55, %v9620_v56  ;;  %v13648_v48 = vld [vmem:[%s14210_s9 + $0x1e14] sm:$0xf]  ;;  %v13104_v55 = vld [vmem:[%s14210_s9 + $0xd0c] sm:$0xf0]  ;;  %v10399_v56 = vor.u32 %v13136_v44, %v10396_v45 }
  0x89   : > { %6744 = vmatpush.bf16.msrb.mxu1 %v11151_v7  ;;  %v11668_v58 = vld [vmem:[%s14210_s9 + $0x1908] sm:$0xf0]  ;;  %v12444_v49 = vld [vmem:[%s14210_s9 + $0x1f10] sm:$0xf0] }
  0x8a   : > { %6754 = vmatpush.bf16.msrb.mxu2 %v9875_v1  ;;  %6731 = vmatpush.bf16.msrb.mxu0 %v9103_v6  ;;  %v11671_v60 = vor.u32 %v13455_v57, %v11668_v58  ;;  %v12879_v61 = vld [vmem:[%s14210_s9 + $0x60c] sm:$0xf]  ;;  %v12447_v57 = vor.u32 %v13648_v48, %v12444_v49  ;;  %v12186_v58 = vld [vmem:[%s14210_s9 + $0x1c10] sm:$0xf]  ;;  %v9884_v9 = vld [vmem:[%s14210_s9 + $0xb10] sm:$0xf0] }
  0x8b   : > { %v9364_v62 = vld [vmem:[%s14210_s9 + $0x708] sm:$0xf0]  ;;  %v13520_v10 = vld [vmem:[%s14210_s9 + $0x1a14] sm:$0xf] }
  0x8c   : > { %6767 = vmatpush.bf16.msrb.mxu3 %v11923_v12  ;;  %v13391_v63 = vld [vmem:[%s14210_s9 + $0x160c] sm:$0xf]  ;;  %v9367_v1 = vor.u32 %v12879_v61, %v9364_v62  ;;  %v10898_v12 = vld [vmem:[%s14210_s9 + $0x1208] sm:$0xf]  ;;  %v10140_v61 = vld [vmem:[%s14210_s9 + $0xd10] sm:$0xf0] }
  0x8d   : > { %6745 = vmatpush.bf16.msrb.mxu1 %v10895_v19  ;;  %v11412_v0 = vld [vmem:[%s14210_s9 + $0x1708] sm:$0xf0]  ;;  %v13584_v62 = vld [vmem:[%s14210_s9 + $0x1c14] sm:$0xf] }
  0x8e   : > { %6755 = vmatpush.bf16.msrb.mxu2 %v9619_v13  ;;  %6732 = vmatpush.bf16.msrb.mxu0 %v8847_v18  ;;  %v11415_v2 = vor.u32 %v13391_v63, %v11412_v0  ;;  %v12815_v3 = vld [vmem:[%s14210_s9 + $0x40c] sm:$0xf]  ;;  %v13295_v13 = vld [vmem:[%s14210_s9 + $0x1304] sm:$0xf0]  ;;  %v12188_v63 = vld [vmem:[%s14210_s9 + $0x1d10] sm:$0xf0] }
  0x8f   : > { %v9108_v4 = vld [vmem:[%s14210_s9 + $0x508] sm:$0xf0]  ;;  %v10899_v15 = vor.u32 %v13295_v13, %v10898_v12  ;;  %v9628_v21 = vld [vmem:[%s14210_s9 + $0x910] sm:$0xf0] }
  0x90   : > { %6768 = vmatpush.bf16.msrb.mxu3 %v11667_v28  ;;  %v13327_v5 = vld [vmem:[%s14210_s9 + $0x140c] sm:$0xf]  ;;  %v9111_v7 = vor.u32 %v12815_v3, %v9108_v4  ;;  %v10643_v28 = vor.u32 %v13231_v25, %v10642_v23  ;;  %v13040_v3 = vld [vmem:[%s14210_s9 + $0xb0c] sm:$0xf0]  ;;  %v13456_v22 = vld [vmem:[%s14210_s9 + $0x1814] sm:$0xf] }
  0x91   : > { %6746 = vmatpush.bf16.msrb.mxu1 %v10639_v35  ;;  %v11156_v6 = vld [vmem:[%s14210_s9 + $0x1508] sm:$0xf0]  ;;  %v365_v35 = vperm.slane %v362_v33, 1  ;;  %v11676_v23 = vld [vmem:[%s14210_s9 + $0x1910] sm:$0xf0] }
  0x92   : > { %6756 = vmatpush.bf16.msrb.mxu2 %v9363_v29  ;;  %6733 = vmatpush.bf16.msrb.mxu0 %v8591_v34  ;;  %v11159_v8 = vor.u32 %v13327_v5, %v11156_v6  ;;  %v12751_v14 = vld [vmem:[%s14210_s9 + $0x20c] sm:$0xf]  ;;  %v364_v34 = vperm.slane %v362_v33, 0  ;;  %v12191_v5 = vor.u32 %v13584_v62, %v12188_v63  ;;  %v11930_v6 = vld [vmem:[%s14210_s9 + $0x1a10] sm:$0xf] }
  0x93   : > { %v8852_v16 = vld [vmem:[%s14210_s9 + $0x308] sm:$0xf0]  ;;  %v9372_v33 = vld [vmem:[%s14210_s9 + $0x710] sm:$0xf0]  ;;  %v8602_v62 = vld [vmem:[%s14210_s9 + $0x10] sm:$0xf] }
  0x94   : > { %6769 = vmatpush.bf16.msrb.mxu3 %v11411_v42  ;;  %v13263_v17 = vld [vmem:[%s14210_s9 + $0x120c] sm:$0xf]  ;;  %v8855_v19 = vor.u32 %v12751_v14, %v8852_v16  ;;  %v12442_v42 = vld [vmem:[%s14210_s9 + $0x1e10] sm:$0xf]  ;;  %v12816_v44 = vld [vmem:[%s14210_s9 + $0x414] sm:$0xf] }
  0x95   : > { %6791 = vmatpush.bf16.msra.mxu1 %v12439_v37  ;;  %v10900_v18 = vld [vmem:[%s14210_s9 + $0x1308] sm:$0xf0]  ;;  %v9626_v14 = vld [vmem:[%s14210_s9 + $0x810] sm:$0xf]  ;;  %v9116_v45 = vld [vmem:[%s14210_s9 + $0x510] sm:$0xf0] }
  0x96   : > { %6778 = vmatpush.bf16.msra.mxu0 %v10391_v36  ;;  %6757 = vmatpush.bf16.msrb.mxu2 %v9107_v43  ;;  %v10903_v20 = vor.u32 %v13263_v17, %v10900_v18  ;;  %v12687_v26 = vld [vmem:[%s14210_s9 + $0xc] sm:$0xf]  ;;  %v13680_v43 = vld [vmem:[%s14210_s9 + $0x1f0c] sm:$0xf0] }
  0x97   : > { %v8596_v27 = vld [vmem:[%s14210_s9 + $0x108] sm:$0xf0]  ;;  %v11674_v18 = vld [vmem:[%s14210_s9 + $0x1810] sm:$0xf] }
  0x98   : > { %6770 = vmatpush.bf16.msrb.mxu3 %v11155_v52  ;;  %v8599_v29 = vor.u32 %v12687_v26, %v8596_v27  ;;  %v13199_v30 = vld [vmem:[%s14210_s9 + $0x100c] sm:$0xf]  ;;  %v10395_v52 = vor.u32 %v13168_v41, %v10394_v40  ;;  %v9370_v26 = vld [vmem:[%s14210_s9 + $0x610] sm:$0xf] }
  0x99   : > { %6792 = vmatpush.bf16.msra.mxu1 %v12183_v47  ;;  %v10644_v31 = vld [vmem:[%s14210_s9 + $0x1108] sm:$0xf0]  ;;  %v12912_v27 = vld [vmem:[%s14210_s9 + $0x70c] sm:$0xf0] }
  0x9a   : > { %6779 = vmatpush.bf16.msra.mxu0 %v10135_v46  ;;  %6758 = vmatpush.bf16.msrb.mxu2 %v8851_v11  ;;  %v10647_v32 = vor.u32 %v13199_v30, %v10644_v31  ;;  %v11932_v11 = vld [vmem:[%s14210_s9 + $0x1b10] sm:$0xf0]  ;;  %v11418_v30 = vld [vmem:[%s14210_s9 + $0x1610] sm:$0xf] }
  0x9b   : > { %v11935_v17 = vor.u32 %v13520_v10, %v11932_v11  ;;  %v13424_v31 = vld [vmem:[%s14210_s9 + $0x170c] sm:$0xf0]  ;;  %v10402_v10 = vld [vmem:[%s14210_s9 + $0xe18] sm:$0xf] }
  0x9c   : > { %6771 = vmatpush.bf16.msrb.mxu3 %v10899_v15  ;;  %v12976_v15 = vld [vmem:[%s14210_s9 + $0x90c] sm:$0xf0]  ;;  %v13169_v11 = vld [vmem:[%s14210_s9 + $0xf14] sm:$0xf0] }
  0x9d   : > { %6793 = vmatpush.bf16.msra.mxu1 %v11927_v54  ;;  %v10138_v54 = vld [vmem:[%s14210_s9 + $0xc10] sm:$0xf] }
  0x9e   : > { %6780 = vmatpush.bf16.msra.mxu0 %v9879_v53  ;;  %6759 = vmatpush.bf16.msrb.mxu2 %v8595_v24  ;;  %v12443_v53 = vor.u32 %v13680_v43, %v12442_v42  ;;  %v10139_v0 = vor.u32 %v13104_v55, %v10138_v54  ;;  %v9627_v24 = vor.u32 %v12976_v15, %v9626_v14  ;;  %v11162_v42 = vld [vmem:[%s14210_s9 + $0x1410] sm:$0xf]  ;;  %v13137_v14 = vld [vmem:[%s14210_s9 + $0xe1c] sm:$0xf] }
  0x9f   : > { %v13360_v43 = vld [vmem:[%s14210_s9 + $0x150c] sm:$0xf0]  ;;  %v9119_v54 = vor.u32 %v12816_v44, %v9116_v45  ;;  %v13521_v44 = vld [vmem:[%s14210_s9 + $0x1a1c] sm:$0xf] }
  0xa0   : > { %6772 = vmatpush.bf16.msrb.mxu3 %v10643_v28  ;;  %v11163_v49 = vor.u32 %v13360_v43, %v11162_v42  ;;  %v13009_v42 = vld [vmem:[%s14210_s9 + $0xa1c] sm:$0xf] }
  0xa1   : > { %6794 = vmatpush.bf16.msra.mxu1 %v11671_v60  ;;  %v13072_v60 = vld [vmem:[%s14210_s9 + $0xc14] sm:$0xf]  ;;  %v9892_v43 = vld [vmem:[%s14210_s9 + $0xb18] sm:$0xf0] }
  0xa2   : > { %6781 = vmatpush.bf16.msra.mxu0 %v9623_v59  ;;  %v13616_v59 = vld [vmem:[%s14210_s9 + $0x1d0c] sm:$0xf0]  ;;  %v10143_v4 = vor.u32 %v13072_v60, %v10140_v61  ;;  %v13264_v60 = vld [vmem:[%s14210_s9 + $0x1214] sm:$0xf]  ;;  %v11940_v45 = vld [vmem:[%s14210_s9 + $0x1b18] sm:$0xf0] }
  0xa3   : > { %v10908_v61 = vld [vmem:[%s14210_s9 + $0x1310] sm:$0xf0] }
  0xa5   : > { %6795 = vmatpush.bf16.msra.mxu1 %v11415_v2  ;;  %v9882_v2 = vld [vmem:[%s14210_s9 + $0xa10] sm:$0xf] }
  0xa6   : > { %6782 = vmatpush.bf16.msra.mxu0 %v9367_v1  ;;  %v12187_v1 = vor.u32 %v13616_v59, %v12186_v58  ;;  %v9883_v12 = vor.u32 %v13040_v3, %v9882_v2  ;;  %v12752_v58 = vld [vmem:[%s14210_s9 + $0x214] sm:$0xf]  ;;  %v10650_v2 = vld [vmem:[%s14210_s9 + $0x1010] sm:$0xf] }
  0xa7   : > { %v8860_v59 = vld [vmem:[%s14210_s9 + $0x310] sm:$0xf0]  ;;  %v13232_v3 = vld [vmem:[%s14210_s9 + $0x110c] sm:$0xf0] }
  0xa9   : > { %6796 = vmatpush.bf16.msra.mxu1 %v11159_v8  ;;  %v13008_v8 = vld [vmem:[%s14210_s9 + $0xa14] sm:$0xf] }
  0xaa   : > { %6783 = vmatpush.bf16.msra.mxu0 %v9111_v7  ;;  %v13552_v7 = vld [vmem:[%s14210_s9 + $0x1b0c] sm:$0xf0]  ;;  %v9887_v16 = vor.u32 %v13008_v8, %v9884_v9  ;;  %v13200_v8 = vld [vmem:[%s14210_s9 + $0x1014] sm:$0xf] }
  0xab   : > { %v11931_v13 = vor.u32 %v13552_v7, %v11930_v6  ;;  %v12688_v6 = vld [vmem:[%s14210_s9 + $0x14] sm:$0xf] }
  0xac   : > { %v8604_v7 = vld [vmem:[%s14210_s9 + $0x110] sm:$0xf0] }
  0xad   : > { %6797 = vmatpush.bf16.msra.mxu1 %v10903_v20  ;;  %v12944_v20 = vld [vmem:[%s14210_s9 + $0x814] sm:$0xf] }
  0xae   : > { %6784 = vmatpush.bf16.msra.mxu0 %v8855_v19  ;;  %v13488_v19 = vld [vmem:[%s14210_s9 + $0x190c] sm:$0xf0]  ;;  %v9631_v28 = vor.u32 %v12944_v20, %v9628_v21  ;;  %v10652_v9 = vld [vmem:[%s14210_s9 + $0x1110] sm:$0xf0]  ;;  %v8607_v20 = vor.u32 %v12688_v6, %v8604_v7  ;;  %v13393_v6 = vld [vmem:[%s14210_s9 + $0x161c] sm:$0xf] }
  0xaf   : > { %v11675_v25 = vor.u32 %v13488_v19, %v11674_v18  ;;  %v13649_v18 = vld [vmem:[%s14210_s9 + $0x1e1c] sm:$0xf]  ;;  %v10655_v21 = vor.u32 %v13200_v8, %v10652_v9 }
  0xb0   : > { %v12452_v19 = vld [vmem:[%s14210_s9 + $0x1f18] sm:$0xf0] }
  0xb1   : > { %6798 = vmatpush.bf16.msra.mxu1 %v10647_v32  ;;  %v12880_v32 = vld [vmem:[%s14210_s9 + $0x614] sm:$0xf]  ;;  %v11428_v7 = vld [vmem:[%s14210_s9 + $0x1718] sm:$0xf0] }
  0xb2   : > { %6785 = vmatpush.bf16.msra.mxu0 %v8599_v29  ;;  %v11679_v29 = vor.u32 %v13456_v22, %v11676_v23  ;;  %v9375_v40 = vor.u32 %v12880_v32, %v9372_v33  ;;  %v10403_v22 = vor.u32 %v13169_v11, %v10402_v10  ;;  %v13585_v32 = vld [vmem:[%s14210_s9 + $0x1c1c] sm:$0xf]  ;;  %v9122_v10 = vld [vmem:[%s14210_s9 + $0x418] sm:$0xf] }
  0xb3   : > { %v12196_v33 = vld [vmem:[%s14210_s9 + $0x1d18] sm:$0xf0]  ;;  %v12849_v11 = vld [vmem:[%s14210_s9 + $0x514] sm:$0xf0] }
  0xf1   : > { %v405_v37 = vpop.f32.mrf.mxu1 }
  0xf2   : > { %v385_v36 = vpop.f32.mrf.mxu0  ;;  %v406_v39 = vadd.f32 %v405_v37, %v365_v35  ;;  %v11420_v35 = vld [vmem:[%s14210_s9 + $0x1710] sm:$0xf0]  ;;  %v11419_v37 = vor.u32 %v13424_v31, %v11418_v30  ;;  %v13073_v30 = vld [vmem:[%s14210_s9 + $0xc1c] sm:$0xf] }
  0xf3   : > { %v386_v38 = vadd.f32 %v385_v36, %v364_v34  ;;  %v13392_v34 = vld [vmem:[%s14210_s9 + $0x1614] sm:$0xf]  ;;  %v9371_v36 = vor.u32 %v12912_v27, %v9370_v26  ;;  %v12455_v27 = vor.u32 %v13649_v18, %v12452_v19  ;;  %v10148_v31 = vld [vmem:[%s14210_s9 + $0xd18] sm:$0xf0] }
  0xf4   : > { %v409_v47 = vmax.f32 %v406_v39, 0.0  ;;  %v12848_v39 = vld [vmem:[%s14210_s9 + $0x50c] sm:$0xf0]  ;;  %v11423_v41 = vor.u32 %v13392_v34, %v11420_v35  ;;  %v13329_v18 = vld [vmem:[%s14210_s9 + $0x141c] sm:$0xf] }
  0xf5   : > { %v408_v46 = vmax.f32 %v386_v38, 0.0  ;;  %v9114_v38 = vld [vmem:[%s14210_s9 + $0x410] sm:$0xf]  ;;  %v11172_v19 = vld [vmem:[%s14210_s9 + $0x1518] sm:$0xf0] }
  0xf6   : > { %v14354_v51 = vpack.c.bf16 %v409_v47, %v409_v47  ;;  %v11164_v47 = vld [vmem:[%s14210_s9 + $0x1510] sm:$0xf0]  ;;  %v9115_v48 = vor.u32 %v12848_v39, %v9114_v38  ;;  %v10151_v38 = vor.u32 %v13073_v30, %v10148_v31  ;;  %v12199_v39 = vor.u32 %v13585_v32, %v12196_v33  ;;  %v13265_v30 = vld [vmem:[%s14210_s9 + $0x121c] sm:$0xf]  ;;  %v8610_v32 = vld [vmem:[%s14210_s9 + $0x18] sm:$0xf] }
  0xf7   : > { %v14352_v50 = vpack.c.bf16 %v408_v46, %v408_v46  ;;  %v13328_v46 = vld [vmem:[%s14210_s9 + $0x1414] sm:$0xf]  ;;  %v10916_v31 = vld [vmem:[%s14210_s9 + $0x1318] sm:$0xf0] }
  0xf8   : > { %6721 = vmatmul.bf16.vlgmr.msra.gmra.mxu3 %v14354_v51  ;;  %6747 = vmatmul.bf16.vlgmr.msrb.gmra.mxu1 %v14354_v51  ;;  %v11167_v55 = vor.u32 %v13328_v46, %v11164_v47 }
  0xf9   : > { %6708 = vmatmul.bf16.vlgmr.msra.gmra.mxu2 %v14352_v50  ;;  %6734 = vmatmul.bf16.vlgmr.msrb.gmra.mxu0 %v14352_v50 }
  0xfa   : > { %6804 = vmatpush.bf16.msra.mxu2 %v10395_v52  ;;  %6817 = vmatpush.bf16.msra.mxu3 %v12443_v53  ;;  %v8858_v52 = vld [vmem:[%s14210_s9 + $0x210] sm:$0xf] }
  0xfb   : > { %6830 = vmatpush.bf16.msrb.mxu0 %v10399_v56  ;;  %6843 = vmatpush.bf16.msrb.mxu1 %v12447_v57  ;;  %v12784_v53 = vld [vmem:[%s14210_s9 + $0x30c] sm:$0xf0] }
  0xfc   : > { %v10906_v56 = vld [vmem:[%s14210_s9 + $0x1210] sm:$0xf]  ;;  %v8859_v63 = vor.u32 %v12784_v53, %v8858_v52  ;;  %v9895_v52 = vor.u32 %v13009_v42, %v9892_v43  ;;  %v11943_v53 = vor.u32 %v13521_v44, %v11940_v45  ;;  %v13201_v42 = vld [vmem:[%s14210_s9 + $0x101c] sm:$0xf]  ;;  %v10410_v44 = vld [vmem:[%s14210_s9 + $0xe20] sm:$0xf] }
  0xfd   : > { %v13296_v57 = vld [vmem:[%s14210_s9 + $0x130c] sm:$0xf0]  ;;  %v10660_v43 = vld [vmem:[%s14210_s9 + $0x1118] sm:$0xf0]  ;;  %v13170_v45 = vld [vmem:[%s14210_s9 + $0xf1c] sm:$0xf0] }
  0xfe   : > { %6805 = vmatpush.bf16.msra.mxu2 %v10139_v0  ;;  %6818 = vmatpush.bf16.msra.mxu3 %v12187_v1  ;;  %v10907_v0 = vor.u32 %v13296_v57, %v10906_v56  ;;  %v12720_v1 = vld [vmem:[%s14210_s9 + $0x10c] sm:$0xf0]  ;;  %v12945_v56 = vld [vmem:[%s14210_s9 + $0x81c] sm:$0xf] }
  0xff   : > { %6831 = vmatpush.bf16.msrb.mxu0 %v10143_v4  ;;  %6844 = vmatpush.bf16.msrb.mxu1 %v12191_v5  ;;  %v8863_v4 = vor.u32 %v12752_v58, %v8860_v59  ;;  %v10911_v5 = vor.u32 %v13264_v60, %v10908_v61  ;;  %v8603_v15 = vor.u32 %v12720_v1, %v8602_v62  ;;  %v9636_v57 = vld [vmem:[%s14210_s9 + $0x918] sm:$0xf0]  ;;  %v9378_v62 = vld [vmem:[%s14210_s9 + $0x618] sm:$0xf] }
 0x100   : > { %v13457_v58 = vld [vmem:[%s14210_s9 + $0x181c] sm:$0xf] }
 0x101   : > { %v11684_v59 = vld [vmem:[%s14210_s9 + $0x1918] sm:$0xf0] }
 0x102   : > { %6806 = vmatpush.bf16.msra.mxu2 %v9883_v12  ;;  %6819 = vmatpush.bf16.msra.mxu3 %v11931_v13  ;;  %v12450_v12 = vld [vmem:[%s14210_s9 + $0x1e18] sm:$0xf]  ;;  %v11687_v1 = vor.u32 %v13457_v58, %v11684_v59  ;;  %v10411_v58 = vor.u32 %v13170_v45, %v10410_v44  ;;  %v9130_v44 = vld [vmem:[%s14210_s9 + $0x420] sm:$0xf] }
 0x103   : > { %6832 = vmatpush.bf16.msrb.mxu0 %v9887_v16  ;;  %6845 = vmatpush.bf16.msrb.mxu1 %v11935_v17  ;;  %v13681_v13 = vld [vmem:[%s14210_s9 + $0x1f14] sm:$0xf0]  ;;  %v10651_v16 = vor.u32 %v13232_v3, %v10650_v2  ;;  %v10404_v17 = vld [vmem:[%s14210_s9 + $0xf18] sm:$0xf0]  ;;  %v12850_v45 = vld [vmem:[%s14210_s9 + $0x51c] sm:$0xf0] }
 0x104   : > { %v12451_v23 = vor.u32 %v13681_v13, %v12450_v12  ;;  %v10407_v26 = vor.u32 %v13137_v14, %v10404_v17  ;;  %v11426_v2 = vld [vmem:[%s14210_s9 + $0x1618] sm:$0xf]  ;;  %v11431_v13 = vor.u32 %v13393_v6, %v11428_v7  ;;  %v9124_v17 = vld [vmem:[%s14210_s9 + $0x518] sm:$0xf0] }
 0x105   : > { %v13425_v3 = vld [vmem:[%s14210_s9 + $0x1714] sm:$0xf0] }
 0x106   : > { %6807 = vmatpush.bf16.msra.mxu2 %v9627_v24  ;;  %6820 = vmatpush.bf16.msra.mxu3 %v11675_v25  ;;  %v10146_v24 = vld [vmem:[%s14210_s9 + $0xc18] sm:$0xf]  ;;  %v11427_v9 = vor.u32 %v13425_v3, %v11426_v2  ;;  %v13074_v2 = vld [vmem:[%s14210_s9 + $0xc24] sm:$0xf] }
 0x107   : > { %6833 = vmatpush.bf16.msrb.mxu0 %v9631_v28  ;;  %6846 = vmatpush.bf16.msrb.mxu1 %v11679_v29  ;;  %v13105_v25 = vld [vmem:[%s14210_s9 + $0xd14] sm:$0xf0]  ;;  %v10156_v3 = vld [vmem:[%s14210_s9 + $0xd20] sm:$0xf0] }
 0x108   : > { %6773 = vmatmul.bf16.vlgmr.msrb.gmra.mxu3 %v14354_v51  ;;  %6799 = vmatmul.bf16.vlgmr.msra.gmra.mxu1 %v14354_v51  ;;  %v12194_v28 = vld [vmem:[%s14210_s9 + $0x1c18] sm:$0xf]  ;;  %v10147_v34 = vor.u32 %v13105_v25, %v10146_v24  ;;  %v11175_v25 = vor.u32 %v13329_v18, %v11172_v19 }
 0x109   : > { %6760 = vmatmul.bf16.vlgmr.msrb.gmra.mxu2 %v14352_v50  ;;  %6786 = vmatmul.bf16.vlgmr.msra.gmra.mxu0 %v14352_v50  ;;  %v13617_v29 = vld [vmem:[%s14210_s9 + $0x1d14] sm:$0xf0] }
 0x10a   : > { %6808 = vmatpush.bf16.msra.mxu2 %v9371_v36  ;;  %6821 = vmatpush.bf16.msra.mxu3 %v11419_v37  ;;  %v12195_v35 = vor.u32 %v13617_v29, %v12194_v28  ;;  %v9890_v36 = vld [vmem:[%s14210_s9 + $0xa18] sm:$0xf]  ;;  %v12753_v28 = vld [vmem:[%s14210_s9 + $0x21c] sm:$0xf] }
 0x10b   : > { %6834 = vmatpush.bf16.msrb.mxu0 %v9375_v40  ;;  %6847 = vmatpush.bf16.msrb.mxu1 %v11423_v41  ;;  %v13041_v37 = vld [vmem:[%s14210_s9 + $0xb14] sm:$0xf0]  ;;  %v8868_v29 = vld [vmem:[%s14210_s9 + $0x318] sm:$0xf0] }
 0x10c   : > { %v11938_v40 = vld [vmem:[%s14210_s9 + $0x1a18] sm:$0xf]  ;;  %v9891_v46 = vor.u32 %v13041_v37, %v9890_v36 }
 0x10d   : > { %v13553_v41 = vld [vmem:[%s14210_s9 + $0x1b14] sm:$0xf0] }
 0x10e   : > { %6809 = vmatpush.bf16.msra.mxu2 %v9115_v48  ;;  %6822 = vmatpush.bf16.msra.mxu3 %v11163_v49  ;;  %v11939_v47 = vor.u32 %v13553_v41, %v11938_v40  ;;  %v9634_v48 = vld [vmem:[%s14210_s9 + $0x818] sm:$0xf]  ;;  %v12689_v40 = vld [vmem:[%s14210_s9 + $0x1c] sm:$0xf] }
 0x10f   : > { %6835 = vmatpush.bf16.msrb.mxu0 %v9119_v54  ;;  %6848 = vmatpush.bf16.msrb.mxu1 %v11167_v55  ;;  %v12977_v49 = vld [vmem:[%s14210_s9 + $0x914] sm:$0xf0]  ;;  %v8612_v41 = vld [vmem:[%s14210_s9 + $0x118] sm:$0xf0] }
 0x110   : > { %v11682_v54 = vld [vmem:[%s14210_s9 + $0x1818] sm:$0xf]  ;;  %v9635_v60 = vor.u32 %v12977_v49, %v9634_v48  ;;  %v13138_v48 = vld [vmem:[%s14210_s9 + $0xe24] sm:$0xf] }
 0x111   : > { %v13489_v55 = vld [vmem:[%s14210_s9 + $0x1914] sm:$0xf0] }
 0x112   : > { %6810 = vmatpush.bf16.msra.mxu2 %v8859_v63  ;;  %6823 = vmatpush.bf16.msra.mxu3 %v10907_v0  ;;  %v11683_v61 = vor.u32 %v13489_v55, %v11682_v54  ;;  %v12913_v63 = vld [vmem:[%s14210_s9 + $0x714] sm:$0xf0]  ;;  %v9639_v0 = vor.u32 %v12945_v56, %v9636_v57  ;;  %v13650_v54 = vld [vmem:[%s14210_s9 + $0x1e24] sm:$0xf]  ;;  %v8615_v56 = vor.u32 %v12689_v40, %v8612_v41 }
 0x113   : > { %6836 = vmatpush.bf16.msrb.mxu0 %v8863_v4  ;;  %6849 = vmatpush.bf16.msrb.mxu1 %v10911_v5  ;;  %v12881_v4 = vld [vmem:[%s14210_s9 + $0x61c] sm:$0xf]  ;;  %v9379_v8 = vor.u32 %v12913_v63, %v9378_v62  ;;  %v11170_v14 = vld [vmem:[%s14210_s9 + $0x1418] sm:$0xf]  ;;  %v12460_v55 = vld [vmem:[%s14210_s9 + $0x1f20] sm:$0xf0]  ;;  %v10663_v57 = vor.u32 %v13201_v42, %v10660_v43 }
 0x114   : > { %v9380_v5 = vld [vmem:[%s14210_s9 + $0x718] sm:$0xf0]  ;;  %v10658_v36 = vld [vmem:[%s14210_s9 + $0x1018] sm:$0xf]  ;;  %v12463_v63 = vor.u32 %v13650_v54, %v12460_v55  ;;  %v13394_v40 = vld [vmem:[%s14210_s9 + $0x1624] sm:$0xf] }
 0x115   : > { %v9383_v12 = vor.u32 %v12881_v4, %v9380_v5  ;;  %v13233_v37 = vld [vmem:[%s14210_s9 + $0x1114] sm:$0xf0]  ;;  %v13586_v4 = vld [vmem:[%s14210_s9 + $0x1c24] sm:$0xf] }
 0x116   : > { %6811 = vmatpush.bf16.msra.mxu2 %v8603_v15  ;;  %6824 = vmatpush.bf16.msra.mxu3 %v10651_v16  ;;  %v13361_v15 = vld [vmem:[%s14210_s9 + $0x1514] sm:$0xf0]  ;;  %v12817_v16 = vld [vmem:[%s14210_s9 + $0x41c] sm:$0xf]  ;;  %v12204_v5 = vld [vmem:[%s14210_s9 + $0x1d20] sm:$0xf0] }
 0x117   : > { %6837 = vmatpush.bf16.msrb.mxu0 %v8607_v20  ;;  %6850 = vmatpush.bf16.msrb.mxu1 %v10655_v21  ;;  %v9123_v20 = vor.u32 %v12849_v11, %v9122_v10  ;;  %v11171_v21 = vor.u32 %v13361_v15, %v11170_v14  ;;  %v9127_v24 = vor.u32 %v12817_v16, %v9124_v17  ;;  %v13010_v14 = vld [vmem:[%s14210_s9 + $0xa24] sm:$0xf] }
 0x118   : > { %v10159_v10 = vor.u32 %v13074_v2, %v10156_v3  ;;  %v12207_v11 = vor.u32 %v13586_v4, %v12204_v5  ;;  %v9900_v15 = vld [vmem:[%s14210_s9 + $0xb20] sm:$0xf0]  ;;  %v8618_v4 = vld [vmem:[%s14210_s9 + $0x20] sm:$0xf] }
 0x119   : > { %6812 = vmatmul.bf16.vlgmr.msra.gmra.mxu2 %v14352_v50  ;;  %6825 = vmatmul.bf16.vlgmr.msra.gmra.mxu3 %v14354_v51  ;;  %v13522_v16 = vld [vmem:[%s14210_s9 + $0x1a24] sm:$0xf] }
 0x11a   : > { %6856 = vmatpush.bf16.msrb.mxu2 %v10403_v22  ;;  %6869 = vmatpush.bf16.msrb.mxu3 %v12451_v23  ;;  %v8866_v22 = vld [vmem:[%s14210_s9 + $0x218] sm:$0xf]  ;;  %v11948_v17 = vld [vmem:[%s14210_s9 + $0x1b20] sm:$0xf0] }
 0x11b   : > { %6882 = vmatpush.bf16.msra.mxu0 %v10407_v26  ;;  %6895 = vmatpush.bf16.msra.mxu1 %v12455_v27  ;;  %v12785_v23 = vld [vmem:[%s14210_s9 + $0x314] sm:$0xf0]  ;;  %v11436_v41 = vld [vmem:[%s14210_s9 + $0x1720] sm:$0xf0] }
 0x11c   : > { %6838 = vmatmul.bf16.vlgmr.msrb.gmra.mxu0 %v14352_v50  ;;  %6851 = vmatmul.bf16.vlgmr.msrb.gmra.mxu1 %v14354_v51  ;;  %v10914_v26 = vld [vmem:[%s14210_s9 + $0x1218] sm:$0xf]  ;;  %v8867_v33 = vor.u32 %v12785_v23, %v8866_v22  ;;  %v9903_v22 = vor.u32 %v13010_v14, %v9900_v15  ;;  %v11951_v23 = vor.u32 %v13522_v16, %v11948_v17  ;;  %v13330_v54 = vld [vmem:[%s14210_s9 + $0x1424] sm:$0xf]  ;;  %v10418_v16 = vld [vmem:[%s14210_s9 + $0xe28] sm:$0xf] }
 0x11d   : > { %v13297_v27 = vld [vmem:[%s14210_s9 + $0x1314] sm:$0xf0]  ;;  %v11180_v55 = vld [vmem:[%s14210_s9 + $0x1520] sm:$0xf0]  ;;  %v13171_v17 = vld [vmem:[%s14210_s9 + $0xf24] sm:$0xf0] }
 0x11e   : > { %6857 = vmatpush.bf16.msrb.mxu2 %v10147_v34  ;;  %6870 = vmatpush.bf16.msrb.mxu3 %v12195_v35  ;;  %v10915_v34 = vor.u32 %v13297_v27, %v10914_v26  ;;  %v12721_v35 = vld [vmem:[%s14210_s9 + $0x114] sm:$0xf0]  ;;  %v12946_v26 = vld [vmem:[%s14210_s9 + $0x824] sm:$0xf] }
 0x11f   : > { %6883 = vmatpush.bf16.msra.mxu0 %v10151_v38  ;;  %6896 = vmatpush.bf16.msra.mxu1 %v12199_v39  ;;  %v8871_v38 = vor.u32 %v12753_v28, %v8868_v29  ;;  %v10919_v39 = vor.u32 %v13265_v30, %v10916_v31  ;;  %v8611_v49 = vor.u32 %v12721_v35, %v8610_v32  ;;  %v9644_v27 = vld [vmem:[%s14210_s9 + $0x920] sm:$0xf0]  ;;  %v9386_v32 = vld [vmem:[%s14210_s9 + $0x620] sm:$0xf] }
 0x120   : > { %v13458_v28 = vld [vmem:[%s14210_s9 + $0x1824] sm:$0xf] }
 0x121   : > { %v11692_v29 = vld [vmem:[%s14210_s9 + $0x1920] sm:$0xf0] }
 0x122   : > { %6858 = vmatpush.bf16.msrb.mxu2 %v9891_v46  ;;  %6871 = vmatpush.bf16.msrb.mxu3 %v11939_v47  ;;  %v12458_v46 = vld [vmem:[%s14210_s9 + $0x1e20] sm:$0xf]  ;;  %v11695_v35 = vor.u32 %v13458_v28, %v11692_v29  ;;  %v13266_v2 = vld [vmem:[%s14210_s9 + $0x1224] sm:$0xf]  ;;  %v10419_v28 = vor.u32 %v13171_v17, %v10418_v16  ;;  %v9138_v16 = vld [vmem:[%s14210_s9 + $0x428] sm:$0xf] }
 0x123   : > { %6884 = vmatpush.bf16.msra.mxu0 %v9895_v52  ;;  %6897 = vmatpush.bf16.msra.mxu1 %v11943_v53  ;;  %v13682_v47 = vld [vmem:[%s14210_s9 + $0x1f1c] sm:$0xf0]  ;;  %v10659_v52 = vor.u32 %v13233_v37, %v10658_v36  ;;  %v10412_v53 = vld [vmem:[%s14210_s9 + $0xf20] sm:$0xf0]  ;;  %v12851_v17 = vld [vmem:[%s14210_s9 + $0x524] sm:$0xf0] }
 0x124   : > { %v12459_v59 = vor.u32 %v13682_v47, %v12458_v46  ;;  %v10415_v62 = vor.u32 %v13138_v48, %v10412_v53  ;;  %v11434_v36 = vld [vmem:[%s14210_s9 + $0x1620] sm:$0xf]  ;;  %v11439_v47 = vor.u32 %v13394_v40, %v11436_v41  ;;  %v9132_v53 = vld [vmem:[%s14210_s9 + $0x520] sm:$0xf0] }
 0x125   : > { %v13426_v37 = vld [vmem:[%s14210_s9 + $0x171c] sm:$0xf0]  ;;  %v10924_v3 = vld [vmem:[%s14210_s9 + $0x1320] sm:$0xf0] }
 0x126   : > { %6859 = vmatpush.bf16.msrb.mxu2 %v9635_v60  ;;  %6872 = vmatpush.bf16.msrb.mxu3 %v11683_v61  ;;  %v10154_v60 = vld [vmem:[%s14210_s9 + $0xc20] sm:$0xf]  ;;  %v11435_v43 = vor.u32 %v13426_v37, %v11434_v36  ;;  %v13202_v14 = vld [vmem:[%s14210_s9 + $0x1024] sm:$0xf]  ;;  %v13075_v36 = vld [vmem:[%s14210_s9 + $0xc2c] sm:$0xf] }
 0x127   : > { %6885 = vmatpush.bf16.msra.mxu0 %v9639_v0  ;;  %6898 = vmatpush.bf16.msra.mxu1 %v11687_v1  ;;  %v13106_v61 = vld [vmem:[%s14210_s9 + $0xd1c] sm:$0xf0]  ;;  %v10668_v15 = vld [vmem:[%s14210_s9 + $0x1120] sm:$0xf0]  ;;  %v10164_v37 = vld [vmem:[%s14210_s9 + $0xd28] sm:$0xf0] }
 0x128   : > { %v12202_v0 = vld [vmem:[%s14210_s9 + $0x1c20] sm:$0xf]  ;;  %v10155_v6 = vor.u32 %v13106_v61, %v10154_v60  ;;  %v11183_v61 = vor.u32 %v13330_v54, %v11180_v55 }
 0x129   : > { %v13618_v1 = vld [vmem:[%s14210_s9 + $0x1d1c] sm:$0xf0] }
 0x12a   : > { %6860 = vmatpush.bf16.msrb.mxu2 %v9379_v8  ;;  %6873 = vmatpush.bf16.msrb.mxu3 %v11427_v9  ;;  %v12203_v7 = vor.u32 %v13618_v1, %v12202_v0  ;;  %v9898_v8 = vld [vmem:[%s14210_s9 + $0xa20] sm:$0xf]  ;;  %v12754_v0 = vld [vmem:[%s14210_s9 + $0x224] sm:$0xf] }
 0x12b   : > { %6886 = vmatpush.bf16.msra.mxu0 %v9383_v12  ;;  %6899 = vmatpush.bf16.msra.mxu1 %v11431_v13  ;;  %v13042_v9 = vld [vmem:[%s14210_s9 + $0xb1c] sm:$0xf0]  ;;  %v8876_v1 = vld [vmem:[%s14210_s9 + $0x320] sm:$0xf0] }
 0x12c   : > { %v11946_v12 = vld [vmem:[%s14210_s9 + $0x1a20] sm:$0xf]  ;;  %v9899_v18 = vor.u32 %v13042_v9, %v9898_v8 }
 0x12d   : > { %v13554_v13 = vld [vmem:[%s14210_s9 + $0x1b1c] sm:$0xf0] }
 0x12e   : > { %6861 = vmatpush.bf16.msrb.mxu2 %v9123_v20  ;;  %6874 = vmatpush.bf16.msrb.mxu3 %v11171_v21  ;;  %v11947_v19 = vor.u32 %v13554_v13, %v11946_v12  ;;  %v9642_v20 = vld [vmem:[%s14210_s9 + $0x820] sm:$0xf]  ;;  %v12690_v12 = vld [vmem:[%s14210_s9 + $0x24] sm:$0xf] }
 0x12f   : > { %6887 = vmatpush.bf16.msra.mxu0 %v9127_v24  ;;  %6900 = vmatpush.bf16.msra.mxu1 %v11175_v25  ;;  %v12978_v21 = vld [vmem:[%s14210_s9 + $0x91c] sm:$0xf0]  ;;  %v8620_v13 = vld [vmem:[%s14210_s9 + $0x120] sm:$0xf0] }
 0x130   : > { %v11690_v24 = vld [vmem:[%s14210_s9 + $0x1820] sm:$0xf]  ;;  %v9643_v30 = vor.u32 %v12978_v21, %v9642_v20  ;;  %v13139_v20 = vld [vmem:[%s14210_s9 + $0xe2c] sm:$0xf] }
 0x131   : > { %v13490_v25 = vld [vmem:[%s14210_s9 + $0x191c] sm:$0xf0] }
 0x132   : > { %6862 = vmatpush.bf16.msrb.mxu2 %v8867_v33  ;;  %6875 = vmatpush.bf16.msrb.mxu3 %v10915_v34  ;;  %v11691_v31 = vor.u32 %v13490_v25, %v11690_v24  ;;  %v12914_v33 = vld [vmem:[%s14210_s9 + $0x71c] sm:$0xf0]  ;;  %v9647_v34 = vor.u32 %v12946_v26, %v9644_v27  ;;  %v13651_v24 = vld [vmem:[%s14210_s9 + $0x1e2c] sm:$0xf]  ;;  %v8623_v26 = vor.u32 %v12690_v12, %v8620_v13 }
 0x133   : > { %6888 = vmatpush.bf16.msra.mxu0 %v8871_v38  ;;  %6901 = vmatpush.bf16.msra.mxu1 %v10919_v39  ;;  %v12882_v38 = vld [vmem:[%s14210_s9 + $0x624] sm:$0xf]  ;;  %v9387_v42 = vor.u32 %v12914_v33, %v9386_v32  ;;  %v11178_v48 = vld [vmem:[%s14210_s9 + $0x1420] sm:$0xf]  ;;  %v12468_v25 = vld [vmem:[%s14210_s9 + $0x1f28] sm:$0xf0]  ;;  %v10671_v27 = vor.u32 %v13202_v14, %v10668_v15 }
 0x134   : > { %v9388_v39 = vld [vmem:[%s14210_s9 + $0x720] sm:$0xf0]  ;;  %v10666_v8 = vld [vmem:[%s14210_s9 + $0x1020] sm:$0xf]  ;;  %v12471_v33 = vor.u32 %v13651_v24, %v12468_v25  ;;  %v13395_v12 = vld [vmem:[%s14210_s9 + $0x162c] sm:$0xf] }
 0x135   : > { %v9391_v46 = vor.u32 %v12882_v38, %v9388_v39  ;;  %v13234_v9 = vld [vmem:[%s14210_s9 + $0x111c] sm:$0xf0]  ;;  %v13587_v38 = vld [vmem:[%s14210_s9 + $0x1c2c] sm:$0xf] }
 0x136   : > { %6863 = vmatpush.bf16.msrb.mxu2 %v8611_v49  ;;  %6876 = vmatpush.bf16.msrb.mxu3 %v10659_v52  ;;  %v13362_v49 = vld [vmem:[%s14210_s9 + $0x151c] sm:$0xf0]  ;;  %v12818_v52 = vld [vmem:[%s14210_s9 + $0x424] sm:$0xf]  ;;  %v12212_v39 = vld [vmem:[%s14210_s9 + $0x1d28] sm:$0xf0] }
 0x137   : > { %6889 = vmatpush.bf16.msra.mxu0 %v8615_v56  ;;  %6902 = vmatpush.bf16.msra.mxu1 %v10663_v57  ;;  %v9131_v56 = vor.u32 %v12850_v45, %v9130_v44  ;;  %v11179_v57 = vor.u32 %v13362_v49, %v11178_v48  ;;  %v9135_v60 = vor.u32 %v12818_v52, %v9132_v53  ;;  %v13011_v48 = vld [vmem:[%s14210_s9 + $0xa2c] sm:$0xf] }
 0x138   : > { %v10167_v44 = vor.u32 %v13075_v36, %v10164_v37  ;;  %v12215_v45 = vor.u32 %v13587_v38, %v12212_v39  ;;  %v9908_v49 = vld [vmem:[%s14210_s9 + $0xb28] sm:$0xf0]  ;;  %v8626_v38 = vld [vmem:[%s14210_s9 + $0x28] sm:$0xf] }
 0x139   : > { %6864 = vmatmul.bf16.vlgmr.msrb.gmra.mxu2 %v14352_v50  ;;  %6877 = vmatmul.bf16.vlgmr.msrb.gmra.mxu3 %v14354_v51  ;;  %v13523_v52 = vld [vmem:[%s14210_s9 + $0x1a2c] sm:$0xf] }
 0x13a   : > { %6908 = vmatpush.bf16.msra.mxu2 %v10411_v58  ;;  %6921 = vmatpush.bf16.msra.mxu3 %v12459_v59  ;;  %v8874_v58 = vld [vmem:[%s14210_s9 + $0x220] sm:$0xf]  ;;  %v11956_v53 = vld [vmem:[%s14210_s9 + $0x1b28] sm:$0xf0] }
 0x13b   : > { %6934 = vmatpush.bf16.msrb.mxu0 %v10415_v62  ;;  %6947 = vmatpush.bf16.msrb.mxu1 %v12463_v63  ;;  %v12786_v59 = vld [vmem:[%s14210_s9 + $0x31c] sm:$0xf0]  ;;  %v11444_v13 = vld [vmem:[%s14210_s9 + $0x1728] sm:$0xf0] }
 0x13c   : > { %6890 = vmatmul.bf16.vlgmr.msra.gmra.mxu0 %v14352_v50  ;;  %6903 = vmatmul.bf16.vlgmr.msra.gmra.mxu1 %v14354_v51  ;;  %v10922_v62 = vld [vmem:[%s14210_s9 + $0x1220] sm:$0xf]  ;;  %v8875_v5 = vor.u32 %v12786_v59, %v8874_v58  ;;  %v9911_v58 = vor.u32 %v13011_v48, %v9908_v49  ;;  %v11959_v59 = vor.u32 %v13523_v52, %v11956_v53  ;;  %v13331_v24 = vld [vmem:[%s14210_s9 + $0x142c] sm:$0xf]  ;;  %v10426_v52 = vld [vmem:[%s14210_s9 + $0xe30] sm:$0xf] }
 0x13d   : > { %v13298_v63 = vld [vmem:[%s14210_s9 + $0x131c] sm:$0xf0]  ;;  %v11188_v25 = vld [vmem:[%s14210_s9 + $0x1528] sm:$0xf0]  ;;  %v13172_v53 = vld [vmem:[%s14210_s9 + $0xf2c] sm:$0xf0] }
 0x13e   : > { %6909 = vmatpush.bf16.msra.mxu2 %v10155_v6  ;;  %6922 = vmatpush.bf16.msra.mxu3 %v12203_v7  ;;  %v10923_v6 = vor.u32 %v13298_v63, %v10922_v62  ;;  %v12722_v7 = vld [vmem:[%s14210_s9 + $0x11c] sm:$0xf0]  ;;  %v12947_v62 = vld [vmem:[%s14210_s9 + $0x82c] sm:$0xf] }
 0x13f   : > { %6935 = vmatpush.bf16.msrb.mxu0 %v10159_v10  ;;  %6948 = vmatpush.bf16.msrb.mxu1 %v12207_v11  ;;  %v8879_v10 = vor.u32 %v12754_v0, %v8876_v1  ;;  %v10927_v11 = vor.u32 %v13266_v2, %v10924_v3  ;;  %v8619_v21 = vor.u32 %v12722_v7, %v8618_v4  ;;  %v9652_v63 = vld [vmem:[%s14210_s9 + $0x928] sm:$0xf0]  ;;  %v9394_v4 = vld [vmem:[%s14210_s9 + $0x628] sm:$0xf] }
 0x140   : > { %v13459_v0 = vld [vmem:[%s14210_s9 + $0x182c] sm:$0xf] }
 0x141   : > { %v11700_v1 = vld [vmem:[%s14210_s9 + $0x1928] sm:$0xf0] }
 0x142   : > { %6910 = vmatpush.bf16.msra.mxu2 %v9899_v18  ;;  %6923 = vmatpush.bf16.msra.mxu3 %v11947_v19  ;;  %v12466_v18 = vld [vmem:[%s14210_s9 + $0x1e28] sm:$0xf]  ;;  %v11703_v7 = vor.u32 %v13459_v0, %v11700_v1  ;;  %v13267_v36 = vld [vmem:[%s14210_s9 + $0x122c] sm:$0xf]  ;;  %v10427_v0 = vor.u32 %v13172_v53, %v10426_v52 }
 0x143   : > { %6936 = vmatpush.bf16.msrb.mxu0 %v9903_v22  ;;  %6949 = vmatpush.bf16.msrb.mxu1 %v11951_v23  ;;  %v13683_v19 = vld [vmem:[%s14210_s9 + $0x1f24] sm:$0xf0]  ;;  %v10667_v22 = vor.u32 %v13234_v9, %v10666_v8  ;;  %v10420_v23 = vld [vmem:[%s14210_s9 + $0xf28] sm:$0xf0] }
 0x144   : > { %v12467_v29 = vor.u32 %v13683_v19, %v12466_v18  ;;  %v10423_v32 = vor.u32 %v13139_v20, %v10420_v23  ;;  %v11442_v8 = vld [vmem:[%s14210_s9 + $0x1628] sm:$0xf]  ;;  %v11447_v19 = vor.u32 %v13395_v12, %v11444_v13  ;;  %v9140_v23 = vld [vmem:[%s14210_s9 + $0x528] sm:$0xf0]  ;;  %v14646_v12 = vld [vmem:[%s14643_s30] sm:$0xff] }
 0x145   : > { %v13427_v9 = vld [vmem:[%s14210_s9 + $0x1724] sm:$0xf0]  ;;  %v10932_v37 = vld [vmem:[%s14210_s9 + $0x1328] sm:$0xf0] }
 0x146   : > { %6911 = vmatpush.bf16.msra.mxu2 %v9643_v30  ;;  %6924 = vmatpush.bf16.msra.mxu3 %v11691_v31  ;;  %v10162_v30 = vld [vmem:[%s14210_s9 + $0xc28] sm:$0xf]  ;;  %v11443_v15 = vor.u32 %v13427_v9, %v11442_v8  ;;  %v13203_v48 = vld [vmem:[%s14210_s9 + $0x102c] sm:$0xf]  ;;  %v13076_v8 = vld [vmem:[%s14210_s9 + $0xc34] sm:$0xf] }
 0x147   : > { %6937 = vmatpush.bf16.msrb.mxu0 %v9647_v34  ;;  %6950 = vmatpush.bf16.msrb.mxu1 %v11695_v35  ;;  %v13107_v31 = vld [vmem:[%s14210_s9 + $0xd24] sm:$0xf0]  ;;  %v10676_v49 = vld [vmem:[%s14210_s9 + $0x1128] sm:$0xf0]  ;;  %v10172_v9 = vld [vmem:[%s14210_s9 + $0xd30] sm:$0xf0] }
 0x148   : > { %v12210_v34 = vld [vmem:[%s14210_s9 + $0x1c28] sm:$0xf]  ;;  %v10163_v40 = vor.u32 %v13107_v31, %v10162_v30  ;;  %v11191_v31 = vor.u32 %v13331_v24, %v11188_v25  ;;  %v13524_v24 = vld [vmem:[%s14210_s9 + $0x1a34] sm:$0xf] }
 0x149   : > { %v13619_v35 = vld [vmem:[%s14210_s9 + $0x1d24] sm:$0xf0]  ;;  %v11964_v25 = vld [vmem:[%s14210_s9 + $0x1b30] sm:$0xf0] }
 0x14a   : > { %6912 = vmatpush.bf16.msra.mxu2 %v9387_v42  ;;  %6925 = vmatpush.bf16.msra.mxu3 %v11435_v43  ;;  %v12211_v41 = vor.u32 %v13619_v35, %v12210_v34  ;;  %v9906_v42 = vld [vmem:[%s14210_s9 + $0xa28] sm:$0xf]  ;;  %v12755_v34 = vld [vmem:[%s14210_s9 + $0x22c] sm:$0xf] }
 0x14b   : > { %6938 = vmatpush.bf16.msrb.mxu0 %v9391_v46  ;;  %6951 = vmatpush.bf16.msrb.mxu1 %v11439_v47  ;;  %v13043_v43 = vld [vmem:[%s14210_s9 + $0xb24] sm:$0xf0]  ;;  %v8884_v35 = vld [vmem:[%s14210_s9 + $0x328] sm:$0xf0] }
 0x14c   : > { %v11954_v46 = vld [vmem:[%s14210_s9 + $0x1a28] sm:$0xf]  ;;  %v9907_v54 = vor.u32 %v13043_v43, %v9906_v42 }
 0x14d   : > { %v13555_v47 = vld [vmem:[%s14210_s9 + $0x1b24] sm:$0xf0] }
 0x14e   : > { %6913 = vmatpush.bf16.msra.mxu2 %v9131_v56  ;;  %6926 = vmatpush.bf16.msra.mxu3 %v11179_v57  ;;  %v11955_v55 = vor.u32 %v13555_v47, %v11954_v46  ;;  %v9650_v56 = vld [vmem:[%s14210_s9 + $0x828] sm:$0xf]  ;;  %v12691_v46 = vld [vmem:[%s14210_s9 + $0x2c] sm:$0xf] }
 0x14f   : > { %6939 = vmatpush.bf16.msrb.mxu0 %v9135_v60  ;;  %6952 = vmatpush.bf16.msrb.mxu1 %v11183_v61  ;;  %v12979_v57 = vld [vmem:[%s14210_s9 + $0x924] sm:$0xf0]  ;;  %v8628_v47 = vld [vmem:[%s14210_s9 + $0x128] sm:$0xf0] }
 0x150   : > { %v11698_v60 = vld [vmem:[%s14210_s9 + $0x1828] sm:$0xf]  ;;  %v9651_v2 = vor.u32 %v12979_v57, %v9650_v56  ;;  %v13140_v56 = vld [vmem:[%s14210_s9 + $0xe34] sm:$0xf] }
 0x151   : > { %v13491_v61 = vld [vmem:[%s14210_s9 + $0x1924] sm:$0xf0] }
 0x152   : > { %6914 = vmatpush.bf16.msra.mxu2 %v8875_v5  ;;  %6927 = vmatpush.bf16.msra.mxu3 %v10923_v6  ;;  %v11699_v3 = vor.u32 %v13491_v61, %v11698_v60  ;;  %v12915_v5 = vld [vmem:[%s14210_s9 + $0x724] sm:$0xf0]  ;;  %v9655_v6 = vor.u32 %v12947_v62, %v9652_v63  ;;  %v13652_v60 = vld [vmem:[%s14210_s9 + $0x1e34] sm:$0xf]  ;;  %v8631_v62 = vor.u32 %v12691_v46, %v8628_v47  ;;  %v12916_v46 = vld [vmem:[%s14210_s9 + $0x72c] sm:$0xf0] }
 0x153   : > { %6940 = vmatpush.bf16.msrb.mxu0 %v8879_v10  ;;  %6953 = vmatpush.bf16.msrb.mxu1 %v10927_v11  ;;  %v12883_v10 = vld [vmem:[%s14210_s9 + $0x62c] sm:$0xf]  ;;  %v9395_v14 = vor.u32 %v12915_v5, %v9394_v4  ;;  %v11186_v20 = vld [vmem:[%s14210_s9 + $0x1428] sm:$0xf]  ;;  %v12476_v61 = vld [vmem:[%s14210_s9 + $0x1f30] sm:$0xf0]  ;;  %v10679_v63 = vor.u32 %v13203_v48, %v10676_v49 }
 0x154   : > { %v9396_v11 = vld [vmem:[%s14210_s9 + $0x728] sm:$0xf0]  ;;  %v10674_v42 = vld [vmem:[%s14210_s9 + $0x1028] sm:$0xf]  ;;  %v12218_v4 = vld [vmem:[%s14210_s9 + $0x1c30] sm:$0xf] }
 0x155   : > { %v9399_v18 = vor.u32 %v12883_v10, %v9396_v11  ;;  %v13235_v43 = vld [vmem:[%s14210_s9 + $0x1124] sm:$0xf0]  ;;  %v13588_v10 = vld [vmem:[%s14210_s9 + $0x1c34] sm:$0xf]  ;;  %v11450_v47 = vld [vmem:[%s14210_s9 + $0x1630] sm:$0xf] }
 0x156   : > { %6915 = vmatpush.bf16.msra.mxu2 %v8619_v21  ;;  %6928 = vmatpush.bf16.msra.mxu3 %v10667_v22  ;;  %v13363_v21 = vld [vmem:[%s14210_s9 + $0x1524] sm:$0xf0]  ;;  %v12819_v22 = vld [vmem:[%s14210_s9 + $0x42c] sm:$0xf]  ;;  %v12220_v11 = vld [vmem:[%s14210_s9 + $0x1d30] sm:$0xf0] }
 0x157   : > { %6941 = vmatpush.bf16.msrb.mxu0 %v8623_v26  ;;  %6954 = vmatpush.bf16.msrb.mxu1 %v10671_v27  ;;  %v9139_v26 = vor.u32 %v12851_v17, %v9138_v16  ;;  %v11187_v27 = vor.u32 %v13363_v21, %v11186_v20  ;;  %v9143_v30 = vor.u32 %v12819_v22, %v9140_v23  ;;  %v13044_v16 = vld [vmem:[%s14210_s9 + $0xb2c] sm:$0xf0]  ;;  %v13012_v21 = vld [vmem:[%s14210_s9 + $0xa34] sm:$0xf]  ;;  %v1453_v22 = vperm.slane %v14646_v12, 1 }
 0x158   : > { %v11962_v17 = vld [vmem:[%s14210_s9 + $0x1a30] sm:$0xf]  ;;  %v9916_v23 = vld [vmem:[%s14210_s9 + $0xb30] sm:$0xf0] }
 0x159   : > { %6916 = vmatmul.bf16.vlgmr.msra.gmra.mxu2 %v14352_v50  ;;  %6929 = vmatmul.bf16.vlgmr.msra.gmra.mxu3 %v14354_v51  ;;  %v13556_v20 = vld [vmem:[%s14210_s9 + $0x1b2c] sm:$0xf0] }
 0x15a   : > { %6960 = vmatpush.bf16.msrb.mxu2 %v10419_v28  ;;  %6973 = vmatpush.bf16.msrb.mxu3 %v12467_v29  ;;  %v8882_v28 = vld [vmem:[%s14210_s9 + $0x228] sm:$0xf] }
 0x15b   : > { %6986 = vmatpush.bf16.msra.mxu0 %v10423_v32  ;;  %6999 = vmatpush.bf16.msra.mxu1 %v12471_v33  ;;  %v12787_v29 = vld [vmem:[%s14210_s9 + $0x324] sm:$0xf0] }
 0x15c   : > { %6942 = vmatmul.bf16.vlgmr.msrb.gmra.mxu0 %v14352_v50  ;;  %6955 = vmatmul.bf16.vlgmr.msrb.gmra.mxu1 %v14354_v51  ;;  %v10930_v32 = vld [vmem:[%s14210_s9 + $0x1228] sm:$0xf]  ;;  %v8883_v39 = vor.u32 %v12787_v29, %v8882_v28 }
 0x15d   : > { %v13299_v33 = vld [vmem:[%s14210_s9 + $0x1324] sm:$0xf0] }
 0x15e   : > { %6961 = vmatpush.bf16.msrb.mxu2 %v10163_v40  ;;  %6974 = vmatpush.bf16.msrb.mxu3 %v12211_v41  ;;  %v10931_v40 = vor.u32 %v13299_v33, %v10930_v32  ;;  %v12723_v41 = vld [vmem:[%s14210_s9 + $0x124] sm:$0xf0]  ;;  %v11706_v32 = vld [vmem:[%s14210_s9 + $0x1830] sm:$0xf]  ;;  %v9919_v33 = vor.u32 %v13012_v21, %v9916_v23  ;;  %v1455_v23 = vperm.slane %v14646_v12, 3 }
 0x15f   : > { %6987 = vmatpush.bf16.msra.mxu0 %v10167_v44  ;;  %7000 = vmatpush.bf16.msra.mxu1 %v12215_v45  ;;  %v8887_v44 = vor.u32 %v12755_v34, %v8884_v35  ;;  %v10935_v45 = vor.u32 %v13267_v36, %v10932_v37  ;;  %v8627_v57 = vor.u32 %v12723_v41, %v8626_v38  ;;  %v13492_v36 = vld [vmem:[%s14210_s9 + $0x192c] sm:$0xf0]  ;;  %v12948_v37 = vld [vmem:[%s14210_s9 + $0x834] sm:$0xf]  ;;  %v1452_v41 = vperm.slane %v14646_v12, 0 }
 0x160   : > { %v11967_v34 = vor.u32 %v13524_v24, %v11964_v25  ;;  %v9660_v38 = vld [vmem:[%s14210_s9 + $0x930] sm:$0xf0]  ;;  %v13300_v21 = vld [vmem:[%s14210_s9 + $0x132c] sm:$0xf0] }
 0x161   : > { %v9663_v48 = vor.u32 %v12948_v37, %v9660_v38  ;;  %v8892_v24 = vld [vmem:[%s14210_s9 + $0x330] sm:$0xf0] }
 0x162   : > { %6962 = vmatpush.bf16.msrb.mxu2 %v9907_v54  ;;  %6975 = vmatpush.bf16.msrb.mxu3 %v11955_v55  ;;  %v12474_v54 = vld [vmem:[%s14210_s9 + $0x1e30] sm:$0xf]  ;;  %v13268_v25 = vld [vmem:[%s14210_s9 + $0x1234] sm:$0xf] }
 0x163   : > { %6988 = vmatpush.bf16.msra.mxu0 %v9911_v58  ;;  %7001 = vmatpush.bf16.msra.mxu1 %v11959_v59  ;;  %v13684_v55 = vld [vmem:[%s14210_s9 + $0x1f2c] sm:$0xf0]  ;;  %v10675_v58 = vor.u32 %v13235_v43, %v10674_v42  ;;  %v10428_v59 = vld [vmem:[%s14210_s9 + $0xf30] sm:$0xf0] }
 0x164   : > { %v12475_v1 = vor.u32 %v13684_v55, %v12474_v54  ;;  %v10431_v5 = vor.u32 %v13140_v56, %v10428_v59  ;;  %v13428_v54 = vld [vmem:[%s14210_s9 + $0x172c] sm:$0xf0]  ;;  %v12884_v55 = vld [vmem:[%s14210_s9 + $0x634] sm:$0xf] }
 0x165   : > { %v11452_v59 = vld [vmem:[%s14210_s9 + $0x1730] sm:$0xf0] }
 0x166   : > { %6963 = vmatpush.bf16.msrb.mxu2 %v9651_v2  ;;  %6976 = vmatpush.bf16.msrb.mxu3 %v11699_v3  ;;  %v10170_v2 = vld [vmem:[%s14210_s9 + $0xc30] sm:$0xf] }
 0x167   : > { %6989 = vmatpush.bf16.msra.mxu0 %v9655_v6  ;;  %7002 = vmatpush.bf16.msra.mxu1 %v11703_v7  ;;  %v13108_v3 = vld [vmem:[%s14210_s9 + $0xd2c] sm:$0xf0]  ;;  %v12479_v6 = vor.u32 %v13652_v60, %v12476_v61 }
 0x168   : > { %v13620_v7 = vld [vmem:[%s14210_s9 + $0x1d2c] sm:$0xf0]  ;;  %v10171_v13 = vor.u32 %v13108_v3, %v10170_v2 }
 0x169   : > { %v12852_v2 = vld [vmem:[%s14210_s9 + $0x52c] sm:$0xf0] }
 0x16a   : > { %6964 = vmatpush.bf16.msrb.mxu2 %v9395_v14  ;;  %6977 = vmatpush.bf16.msrb.mxu3 %v11443_v15  ;;  %v12219_v14 = vor.u32 %v13620_v7, %v12218_v4  ;;  %v9914_v15 = vld [vmem:[%s14210_s9 + $0xa30] sm:$0xf]  ;;  %v12820_v7 = vld [vmem:[%s14210_s9 + $0x434] sm:$0xf] }
 0x16b   : > { %6990 = vmatpush.bf16.msra.mxu0 %v9399_v18  ;;  %7003 = vmatpush.bf16.msra.mxu1 %v11447_v19  ;;  %v10175_v18 = vor.u32 %v13076_v8, %v10172_v9  ;;  %v12223_v19 = vor.u32 %v13588_v10, %v12220_v11  ;;  %v9148_v8 = vld [vmem:[%s14210_s9 + $0x530] sm:$0xf0] }
 0x16c   : > { %v13332_v9 = vld [vmem:[%s14210_s9 + $0x1434] sm:$0xf] }
 0x16d   : > { %v11196_v10 = vld [vmem:[%s14210_s9 + $0x1530] sm:$0xf0] }
 0x16e   : > { %6965 = vmatpush.bf16.msrb.mxu2 %v9139_v26  ;;  %6978 = vmatpush.bf16.msrb.mxu3 %v11187_v27  ;;  %v9915_v26 = vor.u32 %v13044_v16, %v9914_v15  ;;  %v11963_v27 = vor.u32 %v13556_v20, %v11962_v17  ;;  %v12788_v15 = vld [vmem:[%s14210_s9 + $0x32c] sm:$0xf0]  ;;  %v9151_v17 = vor.u32 %v12820_v7, %v9148_v8 }
 0x16f   : > { %6991 = vmatpush.bf16.msra.mxu0 %v9143_v30  ;;  %7004 = vmatpush.bf16.msra.mxu1 %v11191_v31  ;;  %v9658_v30 = vld [vmem:[%s14210_s9 + $0x830] sm:$0xf] }
 0x170   : > { %v12980_v31 = vld [vmem:[%s14210_s9 + $0x92c] sm:$0xf0] }
 0x171   : > { %v9659_v43 = vor.u32 %v12980_v31, %v9658_v30  ;;  %v10938_v16 = vld [vmem:[%s14210_s9 + $0x1230] sm:$0xf] }
 0x172   : > { %6966 = vmatpush.bf16.msrb.mxu2 %v8883_v39  ;;  %6979 = vmatpush.bf16.msrb.mxu3 %v10931_v40  ;;  %v13460_v39 = vld [vmem:[%s14210_s9 + $0x1834] sm:$0xf]  ;;  %v10939_v30 = vor.u32 %v13300_v21, %v10938_v16  ;;  %v13045_v16 = vld [vmem:[%s14210_s9 + $0xb34] sm:$0xf0]  ;;  %v13013_v21 = vld [vmem:[%s14210_s9 + $0xa3c] sm:$0xf] }
 0x173   : > { %6992 = vmatpush.bf16.msra.mxu0 %v8887_v44  ;;  %7005 = vmatpush.bf16.msra.mxu1 %v10935_v45  ;;  %v11708_v40 = vld [vmem:[%s14210_s9 + $0x1930] sm:$0xf0]  ;;  %v11707_v44 = vor.u32 %v13492_v36, %v11706_v32  ;;  %v9402_v45 = vld [vmem:[%s14210_s9 + $0x630] sm:$0xf] }
 0x174   : > { %v11711_v49 = vor.u32 %v13460_v39, %v11708_v40  ;;  %v9403_v61 = vor.u32 %v12916_v46, %v9402_v45  ;;  %v8636_v39 = vld [vmem:[%s14210_s9 + $0x130] sm:$0xf0]  ;;  %v12482_v46 = vld [vmem:[%s14210_s9 + $0x1e38] sm:$0xf] }
 0x175   : > { %v6748_v29 = vpop.f32.mrf.mxu1  ;;  %v13204_v40 = vld [vmem:[%s14210_s9 + $0x1034] sm:$0xf] }
 0x176   : > { %6967 = vmatpush.bf16.msrb.mxu2 %v8627_v57  ;;  %6980 = vmatpush.bf16.msrb.mxu3 %v10675_v58  ;;  %v6735_v28 = vpop.f32.mrf.mxu0  ;;  %v9404_v57 = vld [vmem:[%s14210_s9 + $0x730] sm:$0xf0] }
 0x177   : > { %6993 = vmatpush.bf16.msra.mxu0 %v8631_v62  ;;  %7006 = vmatpush.bf16.msra.mxu1 %v10679_v63  ;;  %v6736_v35 = vadd.f32 %v6735_v28, %v1453_v22  ;;  %v13396_v58 = vld [vmem:[%s14210_s9 + $0x1634] sm:$0xf]  ;;  %v11451_v62 = vor.u32 %v13428_v54, %v11450_v47  ;;  %v9407_v3 = vor.u32 %v12884_v55, %v9404_v57  ;;  %v12724_v28 = vld [vmem:[%s14210_s9 + $0x12c] sm:$0xf0]  ;;  %v13685_v47 = vld [vmem:[%s14210_s9 + $0x1f34] sm:$0xf0] }
 0x178   : > { %v11455_v4 = vor.u32 %v13396_v58, %v11452_v59  ;;  %v12756_v22 = vld [vmem:[%s14210_s9 + $0x234] sm:$0xf]  ;;  %v13653_v54 = vld [vmem:[%s14210_s9 + $0x1e3c] sm:$0xf] }
 0x179   : > { %6968 = vmatmul.bf16.vlgmr.msrb.gmra.mxu2 %v14352_v50  ;;  %6981 = vmatmul.bf16.vlgmr.msrb.gmra.mxu3 %v14354_v51  ;;  %v6749_v42 = vadd.f32 %v6748_v29, %v6736_v35  ;;  %v12692_v35 = vld [vmem:[%s14210_s9 + $0x34] sm:$0xf]  ;;  %v8895_v36 = vor.u32 %v12756_v22, %v8892_v24  ;;  %v12484_v55 = vld [vmem:[%s14210_s9 + $0x1f38] sm:$0xf0] }
 0x17a   : > { %7012 = vmatpush.bf16.msra.mxu2 %v10427_v0  ;;  %7025 = vmatpush.bf16.msra.mxu3 %v12475_v1  ;;  %v9146_v1 = vld [vmem:[%s14210_s9 + $0x430] sm:$0xf]  ;;  %v9924_v22 = vld [vmem:[%s14210_s9 + $0xb38] sm:$0xf0] }
 0x17b   : > { %7038 = vmatpush.bf16.msrb.mxu0 %v10431_v5  ;;  %7051 = vmatpush.bf16.msrb.mxu1 %v12479_v6  ;;  %8365 = vst [vmem:[%s14676_s10 + $0x8] sm:$0xff] %v6749_v42  ;;  %v6722_v53 = vpop.f32.mrf.mxu3  ;;  %v11194_v5 = vld [vmem:[%s14210_s9 + $0x1430] sm:$0xf]  ;;  %v9147_v11 = vor.u32 %v12852_v2, %v9146_v1  ;;  %v10434_v42 = vld [vmem:[%s14210_s9 + $0xe38] sm:$0xf]  ;;  %v12487_v2 = vor.u32 %v13653_v54, %v12484_v55 }
 0x17c   : > { %6994 = vmatmul.bf16.vlgmr.msra.gmra.mxu0 %v14352_v50  ;;  %7007 = vmatmul.bf16.vlgmr.msra.gmra.mxu1 %v14354_v51  ;;  %v6709_v52 = vpop.f32.mrf.mxu2  ;;  %v13364_v6 = vld [vmem:[%s14210_s9 + $0x152c] sm:$0xf0]  ;;  %v11972_v24 = vld [vmem:[%s14210_s9 + $0x1b38] sm:$0xf0] }
 0x17d   : > { %v6710_v56 = vadd.f32 %v6709_v52, %v1452_v41  ;;  %v6750_v0 = vpop.f32.mrf.mxu1  ;;  %v10684_v41 = vld [vmem:[%s14210_s9 + $0x1130] sm:$0xf0]  ;;  %v9412_v54 = vld [vmem:[%s14210_s9 + $0x738] sm:$0xf0] }
 0x17e   : > { %7013 = vmatpush.bf16.msra.mxu2 %v10171_v13  ;;  %7026 = vmatpush.bf16.msra.mxu3 %v12219_v14  ;;  %v6737_v63 = vpop.f32.mrf.mxu0  ;;  %v11195_v13 = vor.u32 %v13364_v6, %v11194_v5  ;;  %v8890_v14 = vld [vmem:[%s14210_s9 + $0x230] sm:$0xf]  ;;  %v10687_v57 = vor.u32 %v13204_v40, %v10684_v41  ;;  %v13109_v0 = vld [vmem:[%s14210_s9 + $0xd34] sm:$0xf0]  ;;  %v13077_v5 = vld [vmem:[%s14210_s9 + $0xc3c] sm:$0xf] }
 0x17f   : > { %7039 = vmatpush.bf16.msrb.mxu0 %v10175_v18  ;;  %7052 = vmatpush.bf16.msrb.mxu1 %v12223_v19  ;;  %v6723_v60 = vadd.f32 %v6722_v53, %v6710_v56  ;;  %v11199_v18 = vor.u32 %v13332_v9, %v11196_v10  ;;  %v8891_v29 = vor.u32 %v12788_v15, %v8890_v14  ;;  %v10436_v53 = vld [vmem:[%s14210_s9 + $0xf38] sm:$0xf0]  ;;  %v10178_v63 = vld [vmem:[%s14210_s9 + $0xc38] sm:$0xf] }
 0x180   : > { %v8639_v56 = vor.u32 %v12692_v35, %v8636_v39  ;;  %v10180_v9 = vld [vmem:[%s14210_s9 + $0xd38] sm:$0xf0]  ;;  %v9922_v15 = vld [vmem:[%s14210_s9 + $0xa38] sm:$0xf] }
 0x181   : > { %8364 = vst [vmem:[%s14676_s10] sm:$0xff] %v6723_v60  ;;  %v13589_v10 = vld [vmem:[%s14210_s9 + $0x1c3c] sm:$0xf]  ;;  %v13493_v35 = vld [vmem:[%s14210_s9 + $0x1934] sm:$0xf0] }
 0x182   : > { %7014 = vmatpush.bf16.msra.mxu2 %v9915_v26  ;;  %7027 = vmatpush.bf16.msra.mxu3 %v11963_v27  ;;  %v10940_v26 = vld [vmem:[%s14210_s9 + $0x1330] sm:$0xf0]  ;;  %v8634_v27 = vld [vmem:[%s14210_s9 + $0x30] sm:$0xf]  ;;  %v11716_v39 = vld [vmem:[%s14210_s9 + $0x1938] sm:$0xf0] }
 0x183   : > { %7040 = vmatpush.bf16.msrb.mxu0 %v9919_v33  ;;  %7053 = vmatpush.bf16.msrb.mxu1 %v11967_v34  ;;  %v6724_v20 = vpop.f32.mrf.mxu3  ;;  %v10682_v33 = vld [vmem:[%s14210_s9 + $0x1030] sm:$0xf]  ;;  %v10943_v37 = vor.u32 %v13268_v25, %v10940_v26  ;;  %v13397_v55 = vld [vmem:[%s14210_s9 + $0x163c] sm:$0xf] }
 0x184   : > { %v6711_v19 = vpop.f32.mrf.mxu2  ;;  %v13236_v34 = vld [vmem:[%s14210_s9 + $0x112c] sm:$0xf0]  ;;  %v13557_v20 = vld [vmem:[%s14210_s9 + $0x1b34] sm:$0xf0] }
 0x185   : > { %v6800_v32 = vpop.f32.mrf.mxu1  ;;  %v10683_v52 = vor.u32 %v13236_v34, %v10682_v33  ;;  %v11970_v19 = vld [vmem:[%s14210_s9 + $0x1a38] sm:$0xf] }
 0x186   : > { %7015 = vmatpush.bf16.msra.mxu2 %v9659_v43  ;;  %7028 = vmatpush.bf16.msra.mxu3 %v11707_v44  ;;  %v6787_v31 = vpop.f32.mrf.mxu0  ;;  %v13173_v43 = vld [vmem:[%s14210_s9 + $0xf34] sm:$0xf0]  ;;  %v1454_v44 = vperm.slane %v14646_v12, 2 }
 0x187   : > { %7041 = vmatpush.bf16.msrb.mxu0 %v9663_v48  ;;  %7054 = vmatpush.bf16.msrb.mxu1 %v11711_v49  ;;  %v6788_v38 = vadd.f32 %v6787_v31, %v1455_v23  ;;  %v13141_v48 = vld [vmem:[%s14210_s9 + $0xe3c] sm:$0xf]  ;;  %v8635_v49 = vor.u32 %v12724_v28, %v8634_v27  ;;  %v10435_v60 = vor.u32 %v13173_v43, %v10434_v42  ;;  %v12981_v31 = vld [vmem:[%s14210_s9 + $0x934] sm:$0xf0] }
 0x188   : > { %v10439_v1 = vor.u32 %v13141_v48, %v10436_v53  ;;  %v13525_v23 = vld [vmem:[%s14210_s9 + $0x1a3c] sm:$0xf]  ;;  %v9923_v27 = vor.u32 %v13045_v16, %v9922_v15  ;;  %v11971_v28 = vor.u32 %v13557_v20, %v11970_v19  ;;  %v11714_v34 = vld [vmem:[%s14210_s9 + $0x1838] sm:$0xf] }
 0x189   : > { %v6801_v45 = vadd.f32 %v6800_v32, %v6788_v38  ;;  %v9927_v32 = vor.u32 %v13013_v21, %v9924_v22  ;;  %v11975_v33 = vor.u32 %v13525_v23, %v11972_v24  ;;  %v13461_v38 = vld [vmem:[%s14210_s9 + $0x183c] sm:$0xf]  ;;  %v11715_v43 = vor.u32 %v13493_v35, %v11714_v34  ;;  %v8898_v16 = vld [vmem:[%s14210_s9 + $0x238] sm:$0xf] }
 0x18a   : > { %7016 = vmatpush.bf16.msra.mxu2 %v9403_v61  ;;  %7029 = vmatpush.bf16.msra.mxu3 %v11451_v62  ;;  %v12483_v61 = vor.u32 %v13685_v47, %v12482_v46  ;;  %v11458_v46 = vld [vmem:[%s14210_s9 + $0x1638] sm:$0xf]  ;;  %v12885_v53 = vld [vmem:[%s14210_s9 + $0x63c] sm:$0xf] }
 0x18b   : > { %7042 = vmatpush.bf16.msrb.mxu0 %v9407_v3  ;;  %7055 = vmatpush.bf16.msrb.mxu1 %v11455_v4  ;;  %8367 = vst [vmem:[%s14676_s10 + $0x18] sm:$0xff] %v6801_v45  ;;  %v6774_v59 = vpop.f32.mrf.mxu3  ;;  %v12226_v3 = vld [vmem:[%s14210_s9 + $0x1c38] sm:$0xf]  ;;  %v12757_v22 = vld [vmem:[%s14210_s9 + $0x23c] sm:$0xf] }
 0x18c   : > { %v6761_v58 = vpop.f32.mrf.mxu2  ;;  %v13621_v4 = vld [vmem:[%s14210_s9 + $0x1d34] sm:$0xf0]  ;;  %v8900_v23 = vld [vmem:[%s14210_s9 + $0x338] sm:$0xf0] }
 0x18d   : > { %v6762_v62 = vadd.f32 %v6761_v58, %v1454_v44  ;;  %v6802_v8 = vpop.f32.mrf.mxu1  ;;  %v12227_v14 = vor.u32 %v13621_v4, %v12226_v3  ;;  %v9410_v44 = vld [vmem:[%s14210_s9 + $0x638] sm:$0xf]  ;;  %v13269_v24 = vld [vmem:[%s14210_s9 + $0x123c] sm:$0xf] }
 0x18e   : > { %7017 = vmatpush.bf16.msra.mxu2 %v9147_v11  ;;  %7030 = vmatpush.bf16.msra.mxu3 %v11195_v13  ;;  %v6789_v7 = vpop.f32.mrf.mxu0  ;;  %v12228_v11 = vld [vmem:[%s14210_s9 + $0x1d38] sm:$0xf0]  ;;  %v10179_v13 = vor.u32 %v13109_v0, %v10178_v63  ;;  %v12917_v45 = vld [vmem:[%s14210_s9 + $0x734] sm:$0xf0]  ;;  %v9415_v0 = vor.u32 %v12885_v53, %v9412_v54 }
 0x18f   : > { %7043 = vmatpush.bf16.msrb.mxu0 %v9151_v17  ;;  %7056 = vmatpush.bf16.msrb.mxu1 %v11199_v18  ;;  %v6775_v6 = vadd.f32 %v6774_v59, %v6762_v62  ;;  %v10183_v17 = vor.u32 %v13077_v5, %v10180_v9  ;;  %v12231_v18 = vor.u32 %v13589_v10, %v12228_v11  ;;  %v12853_v62 = vld [vmem:[%s14210_s9 + $0x534] sm:$0xf0]  ;;  %v12821_v5 = vld [vmem:[%s14210_s9 + $0x43c] sm:$0xf] }
 0x190   : > { %v9411_v59 = vor.u32 %v12917_v45, %v9410_v44  ;;  %v11202_v63 = vld [vmem:[%s14210_s9 + $0x1438] sm:$0xf]  ;;  %v9156_v7 = vld [vmem:[%s14210_s9 + $0x538] sm:$0xf0]  ;;  %v13142_v44 = vld [vmem:[%s14210_s9 + $0xe44] sm:$0xf] }
 0x191   : > { %8366 = vst [vmem:[%s14676_s10 + $0x10] sm:$0xff] %v6775_v6  ;;  %v13365_v4 = vld [vmem:[%s14210_s9 + $0x1534] sm:$0xf0]  ;;  %v13333_v8 = vld [vmem:[%s14210_s9 + $0x143c] sm:$0xf]  ;;  %v9159_v19 = vor.u32 %v12821_v5, %v9156_v7 }
 0x192   : > { %7018 = vmatpush.bf16.msra.mxu2 %v8891_v29  ;;  %7031 = vmatpush.bf16.msra.mxu3 %v10939_v30  ;;  %v1457_v29 = vperm.slane %v14646_v12, 5  ;;  %v9666_v30 = vld [vmem:[%s14210_s9 + $0x838] sm:$0xf]  ;;  %v11204_v9 = vld [vmem:[%s14210_s9 + $0x1538] sm:$0xf0]  ;;  %v11203_v15 = vor.u32 %v13365_v4, %v11202_v63 }
 0x193   : > { %7044 = vmatpush.bf16.msrb.mxu0 %v8895_v36  ;;  %7057 = vmatpush.bf16.msrb.mxu1 %v10943_v37  ;;  %v6776_v26 = vpop.f32.mrf.mxu3  ;;  %v12949_v36 = vld [vmem:[%s14210_s9 + $0x83c] sm:$0xf]  ;;  %v9667_v42 = vor.u32 %v12981_v31, %v9666_v30  ;;  %v11207_v20 = vor.u32 %v13333_v8, %v11204_v9  ;;  %v13301_v21 = vld [vmem:[%s14210_s9 + $0x1334] sm:$0xf0]  ;;  %v10188_v63 = vld [vmem:[%s14210_s9 + $0xd40] sm:$0xf0] }
 0x194   : > { %v6763_v25 = vpop.f32.mrf.mxu2  ;;  %v9668_v37 = vld [vmem:[%s14210_s9 + $0x938] sm:$0xf0]  ;;  %v8642_v26 = vld [vmem:[%s14210_s9 + $0x38] sm:$0xf]  ;;  %v9930_v4 = vld [vmem:[%s14210_s9 + $0xa40] sm:$0xf] }
 0x195   : > { %v9671_v48 = vor.u32 %v12949_v36, %v9668_v37  ;;  %v10948_v25 = vld [vmem:[%s14210_s9 + $0x1338] sm:$0xf0]  ;;  %v10690_v30 = vld [vmem:[%s14210_s9 + $0x1038] sm:$0xf]  ;;  %v13046_v5 = vld [vmem:[%s14210_s9 + $0xb3c] sm:$0xf0] }
 0x196   : > { %7019 = vmatpush.bf16.msra.mxu2 %v8635_v49  ;;  %7032 = vmatpush.bf16.msra.mxu3 %v10683_v52  ;;  %v11719_v49 = vor.u32 %v13461_v38, %v11716_v39  ;;  %v13429_v52 = vld [vmem:[%s14210_s9 + $0x1734] sm:$0xf0]  ;;  %v12693_v36 = vld [vmem:[%s14210_s9 + $0x3c] sm:$0xf]  ;;  %v11978_v8 = vld [vmem:[%s14210_s9 + $0x1a40] sm:$0xf] }
 0x197   : > { %7045 = vmatpush.bf16.msrb.mxu0 %v8639_v56  ;;  %7058 = vmatpush.bf16.msrb.mxu1 %v10687_v57  ;;  %v11460_v56 = vld [vmem:[%s14210_s9 + $0x1738] sm:$0xf0]  ;;  %v1456_v57 = vperm.slane %v14646_v12, 4  ;;  %v13237_v31 = vld [vmem:[%s14210_s9 + $0x1134] sm:$0xf0] }
 0x198   : > { %v8644_v37 = vld [vmem:[%s14210_s9 + $0x138] sm:$0xf0]  ;;  %v13558_v9 = vld [vmem:[%s14210_s9 + $0x1b3c] sm:$0xf0] }
 0x199   : > { %7020 = vmatmul.bf16.vlgmr.msra.gmra.mxu2 %v14352_v50  ;;  %7033 = vmatmul.bf16.vlgmr.msra.gmra.mxu3 %v14354_v51  ;;  %v6839_v40 = vpop.f32.mrf.mxu0  ;;  %v6852_v41 = vpop.f32.mrf.mxu1  ;;  %v13205_v38 = vld [vmem:[%s14210_s9 + $0x103c] sm:$0xf] }
 0x19a   : > { %7064 = vmatpush.bf16.msrb.mxu2 %v10435_v60  ;;  %7077 = vmatpush.bf16.msrb.mxu3 %v12483_v61  ;;  %v6840_v47 = vadd.f32 %v6839_v40, %v1457_v29  ;;  %v11459_v60 = vor.u32 %v13429_v52, %v11458_v46  ;;  %v9154_v61 = vld [vmem:[%s14210_s9 + $0x438] sm:$0xf]  ;;  %v10692_v39 = vld [vmem:[%s14210_s9 + $0x1138] sm:$0xf0]  ;;  %v10442_v40 = vld [vmem:[%s14210_s9 + $0xe40] sm:$0xf]  ;;  %v10691_v46 = vor.u32 %v13237_v31, %v10690_v30 }
 0x19b   : > { %7090 = vmatpush.bf16.msra.mxu0 %v10439_v1  ;;  %7103 = vmatpush.bf16.msra.mxu1 %v12487_v2  ;;  %v11463_v1 = vor.u32 %v13397_v55, %v11460_v56  ;;  %v12725_v29 = vld [vmem:[%s14210_s9 + $0x134] sm:$0xf0]  ;;  %v8647_v52 = vor.u32 %v12693_v36, %v8644_v37  ;;  %v10695_v53 = vor.u32 %v13205_v38, %v10692_v39  ;;  %v10186_v56 = vld [vmem:[%s14210_s9 + $0xc40] sm:$0xf]  ;;  %v12886_v39 = vld [vmem:[%s14210_s9 + $0x644] sm:$0xf] }
 0x19c   : > { %7046 = vmatmul.bf16.vlgmr.msrb.gmra.mxu0 %v14352_v50  ;;  %7059 = vmatmul.bf16.vlgmr.msrb.gmra.mxu1 %v14354_v51  ;;  %v6853_v58 = vadd.f32 %v6852_v41, %v6840_v47  ;;  %v6813_v2 = vpop.f32.mrf.mxu2  ;;  %v6826_v3 = vpop.f32.mrf.mxu3  ;;  %v13174_v41 = vld [vmem:[%s14210_s9 + $0xf3c] sm:$0xf0]  ;;  %v8643_v45 = vor.u32 %v12725_v29, %v8642_v26  ;;  %v10444_v47 = vld [vmem:[%s14210_s9 + $0xf40] sm:$0xf0] }
 0x19d   : > { %v6814_v6 = vadd.f32 %v6813_v2, %v1456_v57  ;;  %v10443_v54 = vor.u32 %v13174_v41, %v10442_v40  ;;  %v13110_v57 = vld [vmem:[%s14210_s9 + $0xd3c] sm:$0xf0]  ;;  %v13462_v26 = vld [vmem:[%s14210_s9 + $0x1844] sm:$0xf] }
 0x19e   : > { %7065 = vmatpush.bf16.msrb.mxu2 %v10179_v13  ;;  %7078 = vmatpush.bf16.msrb.mxu3 %v12227_v14  ;;  %8369 = vst [vmem:[%s14676_s10 + $0x28] sm:$0xff] %v6853_v58  ;;  %v9155_v14 = vor.u32 %v12853_v62, %v9154_v61  ;;  %v10447_v58 = vor.u32 %v13142_v44, %v10444_v47  ;;  %v13622_v61 = vld [vmem:[%s14210_s9 + $0x1d3c] sm:$0xf0]  ;;  %v13078_v62 = vld [vmem:[%s14210_s9 + $0xc44] sm:$0xf] }
 0x19f   : > { %7091 = vmatpush.bf16.msra.mxu0 %v10183_v17  ;;  %7104 = vmatpush.bf16.msra.mxu1 %v12231_v18  ;;  %v6827_v10 = vadd.f32 %v6826_v3, %v6814_v6  ;;  %v12789_v17 = vld [vmem:[%s14210_s9 + $0x334] sm:$0xf0]  ;;  %v10187_v2 = vor.u32 %v13110_v57, %v10186_v56  ;;  %v10191_v6 = vor.u32 %v13078_v62, %v10188_v63  ;;  %v13430_v38 = vld [vmem:[%s14210_s9 + $0x173c] sm:$0xf0]  ;;  %v9420_v40 = vld [vmem:[%s14210_s9 + $0x740] sm:$0xf0] }
 0x1a0   : > { %v10946_v18 = vld [vmem:[%s14210_s9 + $0x1238] sm:$0xf]  ;;  %v13398_v41 = vld [vmem:[%s14210_s9 + $0x1644] sm:$0xf]  ;;  %v9162_v47 = vld [vmem:[%s14210_s9 + $0x440] sm:$0xf] }
 0x1a1   : > { %v6841_v11 = vpop.f32.mrf.mxu0  ;;  %v6854_v13 = vpop.f32.mrf.mxu1  ;;  %8368 = vst [vmem:[%s14676_s10 + $0x20] sm:$0xff] %v6827_v10  ;;  %v13014_v10 = vld [vmem:[%s14210_s9 + $0xa44] sm:$0xf] }
 0x1a2   : > { %7066 = vmatpush.bf16.msrb.mxu2 %v9923_v27  ;;  %7079 = vmatpush.bf16.msrb.mxu3 %v11971_v28  ;;  %v8899_v27 = vor.u32 %v12789_v17, %v8898_v16  ;;  %v10947_v28 = vor.u32 %v13301_v21, %v10946_v18  ;;  %v9932_v11 = vld [vmem:[%s14210_s9 + $0xb40] sm:$0xf0]  ;;  %v11979_v16 = vor.u32 %v13558_v9, %v11978_v8  ;;  %v1459_v17 = vperm.slane %v14646_v12, 7  ;;  %v9674_v18 = vld [vmem:[%s14210_s9 + $0x840] sm:$0xf] }
 0x1a3   : > { %7092 = vmatpush.bf16.msra.mxu0 %v9927_v32  ;;  %7105 = vmatpush.bf16.msra.mxu1 %v11975_v33  ;;  %v8903_v32 = vor.u32 %v12757_v22, %v8900_v23  ;;  %v10951_v33 = vor.u32 %v13269_v24, %v10948_v25  ;;  %v13526_v13 = vld [vmem:[%s14210_s9 + $0x1a44] sm:$0xf]  ;;  %v11722_v22 = vld [vmem:[%s14210_s9 + $0x1840] sm:$0xf] }
 0x1a4   : > { %v6815_v34 = vpop.f32.mrf.mxu2  ;;  %v6828_v35 = vpop.f32.mrf.mxu3  ;;  %v13494_v23 = vld [vmem:[%s14210_s9 + $0x193c] sm:$0xf0]  ;;  %v12950_v24 = vld [vmem:[%s14210_s9 + $0x844] sm:$0xf] }
 0x1a5   : > { %v9676_v25 = vld [vmem:[%s14210_s9 + $0x940] sm:$0xf0]  ;;  %v11723_v31 = vor.u32 %v13494_v23, %v11722_v22  ;;  %v11466_v34 = vld [vmem:[%s14210_s9 + $0x1640] sm:$0xf] }
 0x1a6   : > { %7067 = vmatpush.bf16.msrb.mxu2 %v9667_v42  ;;  %7080 = vmatpush.bf16.msrb.mxu3 %v11715_v43  ;;  %v12490_v42 = vld [vmem:[%s14210_s9 + $0x1e40] sm:$0xf]  ;;  %v9679_v36 = vor.u32 %v12950_v24, %v9676_v25  ;;  %v12822_v56 = vld [vmem:[%s14210_s9 + $0x444] sm:$0xf] }
 0x1a7   : > { %7093 = vmatpush.bf16.msra.mxu0 %v9671_v48  ;;  %7106 = vmatpush.bf16.msra.mxu1 %v11719_v49  ;;  %v13686_v43 = vld [vmem:[%s14210_s9 + $0x1f3c] sm:$0xf0]  ;;  %v13654_v48 = vld [vmem:[%s14210_s9 + $0x1e44] sm:$0xf] }
 0x1a8   : > { %v12492_v49 = vld [vmem:[%s14210_s9 + $0x1f40] sm:$0xf0]  ;;  %v12491_v55 = vor.u32 %v13686_v43, %v12490_v42  ;;  %v1458_v43 = vperm.slane %v14646_v12, 6 }
 0x1a9   : > { %v11468_v42 = vld [vmem:[%s14210_s9 + $0x1740] sm:$0xf0] }
 0x1aa   : > { %7068 = vmatpush.bf16.msrb.mxu2 %v9411_v59  ;;  %7081 = vmatpush.bf16.msrb.mxu3 %v11459_v60  ;;  %v12495_v59 = vor.u32 %v13654_v48, %v12492_v49  ;;  %v12234_v60 = vld [vmem:[%s14210_s9 + $0x1c40] sm:$0xf]  ;;  %v12758_v8 = vld [vmem:[%s14210_s9 + $0x244] sm:$0xf] }
 0x1ab   : > { %7094 = vmatpush.bf16.msra.mxu0 %v9415_v0  ;;  %7107 = vmatpush.bf16.msra.mxu1 %v11463_v1  ;;  %v13590_v0 = vld [vmem:[%s14210_s9 + $0x1c44] sm:$0xf]  ;;  %v12235_v3 = vor.u32 %v13622_v61, %v12234_v60  ;;  %v12854_v48 = vld [vmem:[%s14210_s9 + $0x53c] sm:$0xf0] }
 0x1ac   : > { %v12236_v1 = vld [vmem:[%s14210_s9 + $0x1d40] sm:$0xf0]  ;;  %v11210_v49 = vld [vmem:[%s14210_s9 + $0x1440] sm:$0xf] }
 0x1ad   : > { %v12239_v7 = vor.u32 %v13590_v0, %v12236_v1  ;;  %v11212_v60 = vld [vmem:[%s14210_s9 + $0x1540] sm:$0xf0]  ;;  %v9163_v0 = vor.u32 %v12854_v48, %v9162_v47  ;;  %v13079_v47 = vld [vmem:[%s14210_s9 + $0xc4c] sm:$0xf] }
 0x1ae   : > { %7069 = vmatpush.bf16.msrb.mxu2 %v9155_v14  ;;  %7082 = vmatpush.bf16.msrb.mxu3 %v11203_v15  ;;  %v11980_v14 = vld [vmem:[%s14210_s9 + $0x1b40] sm:$0xf0]  ;;  %v9931_v15 = vor.u32 %v13046_v5, %v9930_v4  ;;  %v10954_v4 = vld [vmem:[%s14210_s9 + $0x1240] sm:$0xf]  ;;  %v10196_v48 = vld [vmem:[%s14210_s9 + $0xd48] sm:$0xf0] }
 0x1af   : > { %7095 = vmatpush.bf16.msra.mxu0 %v9159_v19  ;;  %7108 = vmatpush.bf16.msra.mxu1 %v11207_v20  ;;  %v12982_v19 = vld [vmem:[%s14210_s9 + $0x93c] sm:$0xf0]  ;;  %v9935_v20 = vor.u32 %v13014_v10, %v9932_v11  ;;  %v11983_v21 = vor.u32 %v13526_v13, %v11980_v14  ;;  %v8908_v9 = vld [vmem:[%s14210_s9 + $0x340] sm:$0xf0] }
 0x1b0   : > { %v9675_v30 = vor.u32 %v12982_v19, %v9674_v18  ;;  %v13270_v10 = vld [vmem:[%s14210_s9 + $0x1244] sm:$0xf]  ;;  %v8650_v13 = vld [vmem:[%s14210_s9 + $0x40] sm:$0xf]  ;;  %v8911_v19 = vor.u32 %v12758_v8, %v8908_v9  ;;  %v11730_v8 = vld [vmem:[%s14210_s9 + $0x1848] sm:$0xf] }
 0x1b1   : > { %v10956_v11 = vld [vmem:[%s14210_s9 + $0x1340] sm:$0xf0]  ;;  %v13238_v18 = vld [vmem:[%s14210_s9 + $0x113c] sm:$0xf0]  ;;  %v13495_v9 = vld [vmem:[%s14210_s9 + $0x1944] sm:$0xf0] }
 0x1b2   : > { %7070 = vmatpush.bf16.msrb.mxu2 %v8899_v27  ;;  %7083 = vmatpush.bf16.msrb.mxu3 %v10947_v28  ;;  %v11724_v27 = vld [vmem:[%s14210_s9 + $0x1940] sm:$0xf0] }
 0x1b3   : > { %7096 = vmatpush.bf16.msra.mxu0 %v8903_v32  ;;  %7109 = vmatpush.bf16.msra.mxu1 %v10951_v33  ;;  %v9418_v32 = vld [vmem:[%s14210_s9 + $0x640] sm:$0xf]  ;;  %v11727_v37 = vor.u32 %v13462_v26, %v11724_v27  ;;  %v12694_v23 = vld [vmem:[%s14210_s9 + $0x44] sm:$0xf]  ;;  %v10450_v27 = vld [vmem:[%s14210_s9 + $0xe48] sm:$0xf] }
 0x1b4   : > { %v12918_v33 = vld [vmem:[%s14210_s9 + $0x73c] sm:$0xf0]  ;;  %v8652_v24 = vld [vmem:[%s14210_s9 + $0x140] sm:$0xf0] }
 0x1b5   : > { %v13206_v25 = vld [vmem:[%s14210_s9 + $0x1044] sm:$0xf] }
 0x1b6   : > { %7071 = vmatpush.bf16.msrb.mxu2 %v8643_v45  ;;  %7084 = vmatpush.bf16.msrb.mxu3 %v10691_v46  ;;  %v9419_v45 = vor.u32 %v12918_v33, %v9418_v32  ;;  %v11467_v46 = vor.u32 %v13430_v38, %v11466_v34  ;;  %v10700_v26 = vld [vmem:[%s14210_s9 + $0x1140] sm:$0xf0]  ;;  %v10452_v34 = vld [vmem:[%s14210_s9 + $0xf48] sm:$0xf0] }
 0x1b7   : > { %7097 = vmatpush.bf16.msra.mxu0 %v8647_v52  ;;  %7110 = vmatpush.bf16.msra.mxu1 %v10695_v53  ;;  %v9423_v52 = vor.u32 %v12886_v39, %v9420_v40  ;;  %v11471_v53 = vor.u32 %v13398_v41, %v11468_v42  ;;  %v10703_v38 = vor.u32 %v13206_v25, %v10700_v26  ;;  %v10194_v41 = vld [vmem:[%s14210_s9 + $0xc48] sm:$0xf]  ;;  %v12887_v26 = vld [vmem:[%s14210_s9 + $0x64c] sm:$0xf] }
 0x1b8   : > { %v13111_v42 = vld [vmem:[%s14210_s9 + $0xd44] sm:$0xf0] }
 0x1b9   : > { %7072 = vmatmul.bf16.vlgmr.msrb.gmra.mxu2 %v14352_v50  ;;  %7085 = vmatmul.bf16.vlgmr.msrb.gmra.mxu3 %v14354_v51  ;;  %v6891_v28 = vpop.f32.mrf.mxu0  ;;  %v6904_v29 = vpop.f32.mrf.mxu1  ;;  %v13431_v25 = vld [vmem:[%s14210_s9 + $0x1744] sm:$0xf0] }
 0x1ba   : > { %7116 = vmatpush.bf16.msra.mxu2 %v10443_v54  ;;  %7129 = vmatpush.bf16.msra.mxu3 %v12491_v55  ;;  %v6892_v35 = vadd.f32 %v6891_v28, %v1459_v17  ;;  %v13366_v55 = vld [vmem:[%s14210_s9 + $0x153c] sm:$0xf0]  ;;  %v13175_v28 = vld [vmem:[%s14210_s9 + $0xf44] sm:$0xf0] }
 0x1bb   : > { %7142 = vmatpush.bf16.msrb.mxu0 %v10447_v58  ;;  %7155 = vmatpush.bf16.msrb.mxu1 %v12495_v59  ;;  %v9164_v58 = vld [vmem:[%s14210_s9 + $0x540] sm:$0xf0]  ;;  %v11211_v1 = vor.u32 %v13366_v55, %v11210_v49  ;;  %v10698_v17 = vld [vmem:[%s14210_s9 + $0x1040] sm:$0xf]  ;;  %v10451_v39 = vor.u32 %v13175_v28, %v10450_v27  ;;  %v13591_v49 = vld [vmem:[%s14210_s9 + $0x1c4c] sm:$0xf] }
 0x1bc   : > { %7098 = vmatmul.bf16.vlgmr.msra.gmra.mxu0 %v14352_v50  ;;  %7111 = vmatmul.bf16.vlgmr.msra.gmra.mxu1 %v14354_v51  ;;  %v6905_v44 = vadd.f32 %v6904_v29, %v6892_v35  ;;  %v6865_v12 = vpop.f32.mrf.mxu2  ;;  %v6878_v54 = vpop.f32.mrf.mxu3  ;;  %v13334_v59 = vld [vmem:[%s14210_s9 + $0x1444] sm:$0xf]  ;;  %v9167_v5 = vor.u32 %v12822_v56, %v9164_v58  ;;  %v12498_v29 = vld [vmem:[%s14210_s9 + $0x1e48] sm:$0xf]  ;;  %v10699_v33 = vor.u32 %v13238_v18, %v10698_v17  ;;  %v13655_v35 = vld [vmem:[%s14210_s9 + $0x1e4c] sm:$0xf] }
 0x1bd   : > { %v6866_v57 = vadd.f32 %v6865_v12, %v1458_v43  ;;  %v13047_v55 = vld [vmem:[%s14210_s9 + $0xb44] sm:$0xf0]  ;;  %v11731_v18 = vor.u32 %v13495_v9, %v11730_v8  ;;  %v9428_v27 = vld [vmem:[%s14210_s9 + $0x748] sm:$0xf0] }
 0x1be   : > { %7117 = vmatpush.bf16.msra.mxu2 %v10187_v2  ;;  %7130 = vmatpush.bf16.msra.mxu3 %v12235_v3  ;;  %8371 = vst [vmem:[%s14676_s10 + $0x38] sm:$0xff] %v6905_v44  ;;  %v8906_v2 = vld [vmem:[%s14210_s9 + $0x240] sm:$0xf]  ;;  %v11986_v56 = vld [vmem:[%s14210_s9 + $0x1a48] sm:$0xf] }
 0x1bf   : > { %7143 = vmatpush.bf16.msrb.mxu0 %v10191_v6  ;;  %7156 = vmatpush.bf16.msrb.mxu1 %v12239_v7  ;;  %v6879_v61 = vadd.f32 %v6878_v54, %v6866_v57  ;;  %v12790_v3 = vld [vmem:[%s14210_s9 + $0x33c] sm:$0xf0]  ;;  %v11215_v6 = vor.u32 %v13334_v59, %v11212_v60  ;;  %v9938_v54 = vld [vmem:[%s14210_s9 + $0xa48] sm:$0xf]  ;;  %v10199_v57 = vor.u32 %v13079_v47, %v10196_v48  ;;  %v13015_v60 = vld [vmem:[%s14210_s9 + $0xa4c] sm:$0xf] }
 0x1c0   : > { %v13302_v7 = vld [vmem:[%s14210_s9 + $0x133c] sm:$0xf0]  ;;  %v8907_v14 = vor.u32 %v12790_v3, %v8906_v2  ;;  %v13559_v59 = vld [vmem:[%s14210_s9 + $0x1b44] sm:$0xf0]  ;;  %v13399_v28 = vld [vmem:[%s14210_s9 + $0x164c] sm:$0xf] }
 0x1c1   : > { %v6893_v62 = vpop.f32.mrf.mxu0  ;;  %v6906_v63 = vpop.f32.mrf.mxu1  ;;  %8370 = vst [vmem:[%s14676_s10 + $0x30] sm:$0xff] %v6879_v61  ;;  %v14879_v61 = vld [vmem:[%s14643_s30 + $0x8] sm:$0xff]  ;;  %v11987_v2 = vor.u32 %v13559_v59, %v11986_v56 }
 0x1c2   : > { %7118 = vmatpush.bf16.msra.mxu2 %v9931_v15  ;;  %7131 = vmatpush.bf16.msra.mxu3 %v11979_v16  ;;  %v10955_v15 = vor.u32 %v13302_v7, %v10954_v4  ;;  %v12726_v16 = vld [vmem:[%s14210_s9 + $0x13c] sm:$0xf0]  ;;  %v9940_v62 = vld [vmem:[%s14210_s9 + $0xb48] sm:$0xf0]  ;;  %v1461_v3 = vperm.slane %v14879_v61, 1 }
 0x1c3   : > { %7144 = vmatpush.bf16.msrb.mxu0 %v9935_v20  ;;  %7157 = vmatpush.bf16.msrb.mxu1 %v11983_v21  ;;  %v10959_v20 = vor.u32 %v13270_v10, %v10956_v11  ;;  %v8651_v32 = vor.u32 %v12726_v16, %v8650_v13  ;;  %v13527_v63 = vld [vmem:[%s14210_s9 + $0x1a4c] sm:$0xf]  ;;  %v9682_v4 = vld [vmem:[%s14210_s9 + $0x848] sm:$0xf] }
 0x1c4   : > { %v6867_v21 = vpop.f32.mrf.mxu2  ;;  %v6880_v22 = vpop.f32.mrf.mxu3  ;;  %v12951_v10 = vld [vmem:[%s14210_s9 + $0x84c] sm:$0xf] }
 0x1c5   : > { %v9684_v11 = vld [vmem:[%s14210_s9 + $0x948] sm:$0xf0]  ;;  %v11474_v21 = vld [vmem:[%s14210_s9 + $0x1648] sm:$0xf] }
 0x1c6   : > { %7119 = vmatpush.bf16.msra.mxu2 %v9675_v30  ;;  %7132 = vmatpush.bf16.msra.mxu3 %v11723_v31  ;;  %v13687_v30 = vld [vmem:[%s14210_s9 + $0x1f44] sm:$0xf0]  ;;  %v13143_v31 = vld [vmem:[%s14210_s9 + $0xe4c] sm:$0xf] }
 0x1c7   : > { %7145 = vmatpush.bf16.msrb.mxu0 %v9679_v36  ;;  %7158 = vmatpush.bf16.msrb.mxu1 %v11727_v37  ;;  %v12500_v36 = vld [vmem:[%s14210_s9 + $0x1f48] sm:$0xf0]  ;;  %v8655_v37 = vor.u32 %v12694_v23, %v8652_v24  ;;  %v12499_v40 = vor.u32 %v13687_v30, %v12498_v29  ;;  %v10455_v43 = vor.u32 %v13143_v31, %v10452_v34  ;;  %v1460_v30 = vperm.slane %v14879_v61, 0  ;;  %v9170_v34 = vld [vmem:[%s14210_s9 + $0x448] sm:$0xf] }
 0x1c8   : > { %v12503_v44 = vor.u32 %v13655_v35, %v12500_v36  ;;  %v13463_v13 = vld [vmem:[%s14210_s9 + $0x184c] sm:$0xf]  ;;  %v9687_v23 = vor.u32 %v12951_v10, %v9684_v11  ;;  %v12855_v35 = vld [vmem:[%s14210_s9 + $0x544] sm:$0xf0] }
 0x1c9   : > { %v11476_v29 = vld [vmem:[%s14210_s9 + $0x1748] sm:$0xf0]  ;;  %v11218_v36 = vld [vmem:[%s14210_s9 + $0x1448] sm:$0xf] }
 0x1ca   : > { %7120 = vmatpush.bf16.msra.mxu2 %v9419_v45  ;;  %7133 = vmatpush.bf16.msra.mxu3 %v11467_v46  ;;  %v12242_v45 = vld [vmem:[%s14210_s9 + $0x1c48] sm:$0xf]  ;;  %v12759_v59 = vld [vmem:[%s14210_s9 + $0x24c] sm:$0xf] }
 0x1cb   : > { %7146 = vmatpush.bf16.msrb.mxu0 %v9423_v52  ;;  %7159 = vmatpush.bf16.msrb.mxu1 %v11471_v53  ;;  %v13623_v46 = vld [vmem:[%s14210_s9 + $0x1d44] sm:$0xf0]  ;;  %v12244_v52 = vld [vmem:[%s14210_s9 + $0x1d48] sm:$0xf0]  ;;  %v10195_v53 = vor.u32 %v13111_v42, %v10194_v41 }
 0x1cc   : > { %v12243_v12 = vor.u32 %v13623_v46, %v12242_v45  ;;  %v12247_v58 = vor.u32 %v13591_v49, %v12244_v52  ;;  %v13367_v41 = vld [vmem:[%s14210_s9 + $0x1544] sm:$0xf0]  ;;  %v12823_v42 = vld [vmem:[%s14210_s9 + $0x44c] sm:$0xf]  ;;  %v9171_v52 = vor.u32 %v12855_v35, %v9170_v34  ;;  %v13624_v34 = vld [vmem:[%s14210_s9 + $0x1d4c] sm:$0xf0] }
 0x1cd   : > { %v13335_v45 = vld [vmem:[%s14210_s9 + $0x144c] sm:$0xf]  ;;  %v13080_v35 = vld [vmem:[%s14210_s9 + $0xc54] sm:$0xf] }
 0x1ce   : > { %7121 = vmatpush.bf16.msra.mxu2 %v9163_v0  ;;  %7134 = vmatpush.bf16.msra.mxu3 %v11211_v1  ;;  %v11988_v0 = vld [vmem:[%s14210_s9 + $0x1b48] sm:$0xf0]  ;;  %v9939_v1 = vor.u32 %v13047_v55, %v9938_v54  ;;  %v12791_v54 = vld [vmem:[%s14210_s9 + $0x344] sm:$0xf0] }
 0x1cf   : > { %7147 = vmatpush.bf16.msrb.mxu0 %v9167_v5  ;;  %7160 = vmatpush.bf16.msrb.mxu1 %v11215_v6  ;;  %v12983_v5 = vld [vmem:[%s14210_s9 + $0x944] sm:$0xf0]  ;;  %v9943_v6 = vor.u32 %v13015_v60, %v9940_v62  ;;  %v11991_v7 = vor.u32 %v13527_v63, %v11988_v0  ;;  %v11220_v46 = vld [vmem:[%s14210_s9 + $0x1548] sm:$0xf0] }
 0x1d0   : > { %v9683_v17 = vor.u32 %v12983_v5, %v9682_v4  ;;  %v10962_v55 = vld [vmem:[%s14210_s9 + $0x1248] sm:$0xf]  ;;  %v8916_v60 = vld [vmem:[%s14210_s9 + $0x348] sm:$0xf0] }
 0x1d1   : > { %v13271_v62 = vld [vmem:[%s14210_s9 + $0x124c] sm:$0xf]  ;;  %v8658_v0 = vld [vmem:[%s14210_s9 + $0x48] sm:$0xf] }
 0x1d2   : > { %7122 = vmatpush.bf16.msra.mxu2 %v8907_v14  ;;  %7135 = vmatpush.bf16.msra.mxu3 %v10955_v15  ;;  %v11732_v14 = vld [vmem:[%s14210_s9 + $0x1948] sm:$0xf0]  ;;  %v10706_v4 = vld [vmem:[%s14210_s9 + $0x1048] sm:$0xf] }
 0x1d3   : > { %7148 = vmatpush.bf16.msrb.mxu0 %v8911_v19  ;;  %7161 = vmatpush.bf16.msrb.mxu1 %v10959_v20  ;;  %v9426_v19 = vld [vmem:[%s14210_s9 + $0x648] sm:$0xf]  ;;  %v11735_v24 = vor.u32 %v13463_v13, %v11732_v14  ;;  %v10964_v63 = vld [vmem:[%s14210_s9 + $0x1348] sm:$0xf0] }
 0x1d4   : > { %v12919_v20 = vld [vmem:[%s14210_s9 + $0x744] sm:$0xf0]  ;;  %v12695_v10 = vld [vmem:[%s14210_s9 + $0x4c] sm:$0xf] }
 0x1d5   : > { %v13239_v5 = vld [vmem:[%s14210_s9 + $0x1144] sm:$0xf0]  ;;  %v8660_v11 = vld [vmem:[%s14210_s9 + $0x148] sm:$0xf0] }
 0x1d6   : > { %7123 = vmatpush.bf16.msra.mxu2 %v8651_v32  ;;  %7136 = vmatpush.bf16.msra.mxu3 %v10699_v33  ;;  %v9427_v32 = vor.u32 %v12919_v20, %v9426_v19  ;;  %v11475_v33 = vor.u32 %v13431_v25, %v11474_v21  ;;  %v13207_v13 = vld [vmem:[%s14210_s9 + $0x104c] sm:$0xf]  ;;  %v13144_v19 = vld [vmem:[%s14210_s9 + $0xe54] sm:$0xf]  ;;  %v10707_v21 = vor.u32 %v13239_v5, %v10706_v4 }
 0x1d7   : > { %7149 = vmatpush.bf16.msrb.mxu0 %v8655_v37  ;;  %7162 = vmatpush.bf16.msrb.mxu1 %v10703_v38  ;;  %v9431_v37 = vor.u32 %v12887_v26, %v9428_v27  ;;  %v11479_v38 = vor.u32 %v13399_v28, %v11476_v29  ;;  %v10708_v14 = vld [vmem:[%s14210_s9 + $0x1148] sm:$0xf0]  ;;  %v8663_v25 = vor.u32 %v12695_v10, %v8660_v11  ;;  %v10202_v29 = vld [vmem:[%s14210_s9 + $0xc50] sm:$0xf] }
 0x1d8   : > { %v10711_v26 = vor.u32 %v13207_v13, %v10708_v14  ;;  %v13432_v13 = vld [vmem:[%s14210_s9 + $0x174c] sm:$0xf0]  ;;  %v12888_v14 = vld [vmem:[%s14210_s9 + $0x654] sm:$0xf] }
 0x1d9   : > { %7124 = vmatmul.bf16.vlgmr.msra.gmra.mxu2 %v14352_v50  ;;  %7137 = vmatmul.bf16.vlgmr.msra.gmra.mxu3 %v14354_v51  ;;  %v6943_v15 = vpop.f32.mrf.mxu0  ;;  %v6956_v16 = vpop.f32.mrf.mxu1 }
 0x1da   : > { %7168 = vmatpush.bf16.msrb.mxu2 %v10451_v39  ;;  %7181 = vmatpush.bf16.msrb.mxu3 %v12499_v40  ;;  %v6944_v22 = vadd.f32 %v6943_v15, %v1461_v3  ;;  %v12727_v3 = vld [vmem:[%s14210_s9 + $0x144] sm:$0xf0]  ;;  %v10458_v15 = vld [vmem:[%s14210_s9 + $0xe50] sm:$0xf] }
 0x1db   : > { %7194 = vmatpush.bf16.msra.mxu0 %v10455_v43  ;;  %7207 = vmatpush.bf16.msra.mxu1 %v12503_v44  ;;  %v9172_v44 = vld [vmem:[%s14210_s9 + $0x548] sm:$0xf0]  ;;  %v8659_v20 = vor.u32 %v12727_v3, %v8658_v0  ;;  %v13464_v0 = vld [vmem:[%s14210_s9 + $0x1854] sm:$0xf] }
 0x1dc   : > { %7150 = vmatmul.bf16.vlgmr.msrb.gmra.mxu0 %v14352_v50  ;;  %7163 = vmatmul.bf16.vlgmr.msrb.gmra.mxu1 %v14354_v51  ;;  %v6957_v31 = vadd.f32 %v6956_v16, %v6944_v22  ;;  %v6917_v39 = vpop.f32.mrf.mxu2  ;;  %v6930_v40 = vpop.f32.mrf.mxu3  ;;  %v9175_v56 = vor.u32 %v12823_v42, %v9172_v44  ;;  %v13176_v16 = vld [vmem:[%s14210_s9 + $0xf4c] sm:$0xf0]  ;;  %v10460_v22 = vld [vmem:[%s14210_s9 + $0xf50] sm:$0xf0] }
 0x1dd   : > { %v6918_v43 = vadd.f32 %v6917_v39, %v1460_v30  ;;  %v10459_v27 = vor.u32 %v13176_v16, %v10458_v15  ;;  %v13112_v30 = vld [vmem:[%s14210_s9 + $0xd4c] sm:$0xf0]  ;;  %v9436_v15 = vld [vmem:[%s14210_s9 + $0x750] sm:$0xf0] }
 0x1de   : > { %7169 = vmatpush.bf16.msrb.mxu2 %v10195_v53  ;;  %7182 = vmatpush.bf16.msrb.mxu3 %v12243_v12  ;;  %8373 = vst [vmem:[%s14676_s10 + $0x48] sm:$0xff] %v6957_v31  ;;  %v11219_v53 = vor.u32 %v13367_v41, %v11218_v36  ;;  %v8914_v12 = vld [vmem:[%s14210_s9 + $0x248] sm:$0xf]  ;;  %v10463_v31 = vor.u32 %v13144_v19, %v10460_v22  ;;  %v10204_v36 = vld [vmem:[%s14210_s9 + $0xd50] sm:$0xf0] }
 0x1df   : > { %7195 = vmatpush.bf16.msra.mxu0 %v10199_v57  ;;  %7208 = vmatpush.bf16.msra.mxu1 %v12247_v58  ;;  %v6931_v47 = vadd.f32 %v6930_v40, %v6918_v43  ;;  %v11223_v57 = vor.u32 %v13335_v45, %v11220_v46  ;;  %v13303_v58 = vld [vmem:[%s14210_s9 + $0x1344] sm:$0xf0]  ;;  %v10203_v39 = vor.u32 %v13112_v30, %v10202_v29  ;;  %v9946_v41 = vld [vmem:[%s14210_s9 + $0xa50] sm:$0xf]  ;;  %v13400_v16 = vld [vmem:[%s14210_s9 + $0x1654] sm:$0xf] }
 0x1e0   : > { %v13048_v42 = vld [vmem:[%s14210_s9 + $0xb4c] sm:$0xf0]  ;;  %v10207_v43 = vor.u32 %v13080_v35, %v10204_v36  ;;  %v12824_v30 = vld [vmem:[%s14210_s9 + $0x454] sm:$0xf] }
 0x1e1   : > { %v6945_v48 = vpop.f32.mrf.mxu0  ;;  %v6958_v49 = vpop.f32.mrf.mxu1  ;;  %8372 = vst [vmem:[%s14676_s10 + $0x40] sm:$0xff] %v6931_v47  ;;  %v11994_v45 = vld [vmem:[%s14210_s9 + $0x1a50] sm:$0xf]  ;;  %v13016_v47 = vld [vmem:[%s14210_s9 + $0xa54] sm:$0xf] }
 0x1e2   : > { %7170 = vmatpush.bf16.msrb.mxu2 %v9939_v1  ;;  %7183 = vmatpush.bf16.msrb.mxu3 %v11987_v2  ;;  %v8915_v1 = vor.u32 %v12791_v54, %v8914_v12  ;;  %v10963_v2 = vor.u32 %v13303_v58, %v10962_v55  ;;  %v13560_v46 = vld [vmem:[%s14210_s9 + $0x1b4c] sm:$0xf0]  ;;  %v9948_v48 = vld [vmem:[%s14210_s9 + $0xb50] sm:$0xf0]  ;;  %v1463_v54 = vperm.slane %v14879_v61, 3 }
 0x1e3   : > { %7196 = vmatpush.bf16.msra.mxu0 %v9943_v6  ;;  %7209 = vmatpush.bf16.msra.mxu1 %v11991_v7  ;;  %v8919_v6 = vor.u32 %v12759_v59, %v8916_v60  ;;  %v10967_v7 = vor.u32 %v13271_v62, %v10964_v63  ;;  %v13528_v49 = vld [vmem:[%s14210_s9 + $0x1a54] sm:$0xf]  ;;  %v11995_v12 = vor.u32 %v13560_v46, %v11994_v45  ;;  %v9690_v55 = vld [vmem:[%s14210_s9 + $0x850] sm:$0xf] }
 0x1e4   : > { %v6919_v8 = vpop.f32.mrf.mxu2  ;;  %v6932_v9 = vpop.f32.mrf.mxu3  ;;  %v11738_v59 = vld [vmem:[%s14210_s9 + $0x1850] sm:$0xf]  ;;  %v12952_v62 = vld [vmem:[%s14210_s9 + $0x854] sm:$0xf] }
 0x1e5   : > { %v13496_v60 = vld [vmem:[%s14210_s9 + $0x194c] sm:$0xf0]  ;;  %v9692_v63 = vld [vmem:[%s14210_s9 + $0x950] sm:$0xf0] }
 0x1e6   : > { %7171 = vmatpush.bf16.msrb.mxu2 %v9683_v17  ;;  %7184 = vmatpush.bf16.msrb.mxu3 %v11731_v18  ;;  %v12506_v17 = vld [vmem:[%s14210_s9 + $0x1e50] sm:$0xf]  ;;  %v11739_v5 = vor.u32 %v13496_v60, %v11738_v59  ;;  %v9695_v10 = vor.u32 %v12952_v62, %v9692_v63  ;;  %v12760_v46 = vld [vmem:[%s14210_s9 + $0x254] sm:$0xf] }
 0x1e7   : > { %7197 = vmatpush.bf16.msra.mxu0 %v9687_v23  ;;  %7210 = vmatpush.bf16.msra.mxu1 %v11735_v24  ;;  %v13688_v18 = vld [vmem:[%s14210_s9 + $0x1f4c] sm:$0xf0]  ;;  %v13656_v23 = vld [vmem:[%s14210_s9 + $0x1e54] sm:$0xf] }
 0x1e8   : > { %v12508_v24 = vld [vmem:[%s14210_s9 + $0x1f50] sm:$0xf0]  ;;  %v12507_v28 = vor.u32 %v13688_v18, %v12506_v17  ;;  %v11482_v8 = vld [vmem:[%s14210_s9 + $0x1650] sm:$0xf]  ;;  %v1462_v18 = vperm.slane %v14879_v61, 2 }
 0x1e9   : > { %v11484_v17 = vld [vmem:[%s14210_s9 + $0x1750] sm:$0xf0]  ;;  %v9178_v22 = vld [vmem:[%s14210_s9 + $0x450] sm:$0xf] }
 0x1ea   : > { %7172 = vmatpush.bf16.msrb.mxu2 %v9427_v32  ;;  %7185 = vmatpush.bf16.msrb.mxu3 %v11475_v33  ;;  %v12511_v32 = vor.u32 %v13656_v23, %v12508_v24  ;;  %v12250_v33 = vld [vmem:[%s14210_s9 + $0x1c50] sm:$0xf]  ;;  %v12696_v62 = vld [vmem:[%s14210_s9 + $0x54] sm:$0xf] }
 0x1eb   : > { %7198 = vmatpush.bf16.msra.mxu0 %v9431_v37  ;;  %7211 = vmatpush.bf16.msra.mxu1 %v11479_v38  ;;  %v13592_v37 = vld [vmem:[%s14210_s9 + $0x1c54] sm:$0xf]  ;;  %v12251_v40 = vor.u32 %v13624_v34, %v12250_v33  ;;  %v12856_v23 = vld [vmem:[%s14210_s9 + $0x54c] sm:$0xf0] }
 0x1ec   : > { %v12252_v38 = vld [vmem:[%s14210_s9 + $0x1d50] sm:$0xf0]  ;;  %v11226_v24 = vld [vmem:[%s14210_s9 + $0x1450] sm:$0xf] }
 0x1ed   : > { %v12255_v44 = vor.u32 %v13592_v37, %v12252_v38  ;;  %v13368_v29 = vld [vmem:[%s14210_s9 + $0x154c] sm:$0xf0]  ;;  %v13336_v33 = vld [vmem:[%s14210_s9 + $0x1454] sm:$0xf]  ;;  %v9179_v38 = vor.u32 %v12856_v23, %v9178_v22  ;;  %v13625_v22 = vld [vmem:[%s14210_s9 + $0x1d54] sm:$0xf0] }
 0x1ee   : > { %7173 = vmatpush.bf16.msrb.mxu2 %v9171_v52  ;;  %7186 = vmatpush.bf16.msrb.mxu3 %v11219_v53  ;;  %v11996_v52 = vld [vmem:[%s14210_s9 + $0x1b50] sm:$0xf0]  ;;  %v9947_v53 = vor.u32 %v13048_v42, %v9946_v41  ;;  %v12792_v41 = vld [vmem:[%s14210_s9 + $0x34c] sm:$0xf0]  ;;  %v13081_v23 = vld [vmem:[%s14210_s9 + $0xc5c] sm:$0xf] }
 0x1ef   : > { %7199 = vmatpush.bf16.msra.mxu0 %v9175_v56  ;;  %7212 = vmatpush.bf16.msra.mxu1 %v11223_v57  ;;  %v12984_v56 = vld [vmem:[%s14210_s9 + $0x94c] sm:$0xf0]  ;;  %v9951_v57 = vor.u32 %v13016_v47, %v9948_v48  ;;  %v11999_v58 = vor.u32 %v13528_v49, %v11996_v52  ;;  %v11228_v34 = vld [vmem:[%s14210_s9 + $0x1550] sm:$0xf0] }
 0x1f0   : > { %v9691_v4 = vor.u32 %v12984_v56, %v9690_v55  ;;  %v10970_v42 = vld [vmem:[%s14210_s9 + $0x1250] sm:$0xf]  ;;  %v8924_v47 = vld [vmem:[%s14210_s9 + $0x350] sm:$0xf0] }
 0x1f1   : > { %v13304_v45 = vld [vmem:[%s14210_s9 + $0x134c] sm:$0xf0]  ;;  %v13272_v48 = vld [vmem:[%s14210_s9 + $0x1254] sm:$0xf] }
 0x1f2   : > { %7174 = vmatpush.bf16.msrb.mxu2 %v8915_v1  ;;  %7187 = vmatpush.bf16.msrb.mxu3 %v10963_v2  ;;  %v11740_v1 = vld [vmem:[%s14210_s9 + $0x1950] sm:$0xf0]  ;;  %v8666_v52 = vld [vmem:[%s14210_s9 + $0x50] sm:$0xf] }
 0x1f3   : > { %7200 = vmatpush.bf16.msra.mxu0 %v8919_v6  ;;  %7213 = vmatpush.bf16.msra.mxu1 %v10967_v7  ;;  %v9434_v6 = vld [vmem:[%s14210_s9 + $0x650] sm:$0xf]  ;;  %v11743_v11 = vor.u32 %v13464_v0, %v11740_v1  ;;  %v10972_v49 = vld [vmem:[%s14210_s9 + $0x1350] sm:$0xf0] }
 0x1f4   : > { %v12920_v7 = vld [vmem:[%s14210_s9 + $0x74c] sm:$0xf0]  ;;  %v8668_v63 = vld [vmem:[%s14210_s9 + $0x150] sm:$0xf0] }
 0x1f5   : > { %v10714_v55 = vld [vmem:[%s14210_s9 + $0x1050] sm:$0xf]  ;;  %v13208_v0 = vld [vmem:[%s14210_s9 + $0x1054] sm:$0xf] }
 0x1f6   : > { %7175 = vmatpush.bf16.msrb.mxu2 %v8659_v20  ;;  %7188 = vmatpush.bf16.msrb.mxu3 %v10707_v21  ;;  %v9435_v20 = vor.u32 %v12920_v7, %v9434_v6  ;;  %v11483_v21 = vor.u32 %v13432_v13, %v11482_v8  ;;  %v13240_v56 = vld [vmem:[%s14210_s9 + $0x114c] sm:$0xf0]  ;;  %v10716_v1 = vld [vmem:[%s14210_s9 + $0x1150] sm:$0xf0]  ;;  %v13145_v6 = vld [vmem:[%s14210_s9 + $0xe5c] sm:$0xf]  ;;  %v8671_v13 = vor.u32 %v12696_v62, %v8668_v63 }
 0x1f7   : > { %7201 = vmatpush.bf16.msra.mxu0 %v8663_v25  ;;  %7214 = vmatpush.bf16.msra.mxu1 %v10711_v26  ;;  %v9439_v25 = vor.u32 %v12888_v14, %v9436_v15  ;;  %v11487_v26 = vor.u32 %v13400_v16, %v11484_v17  ;;  %v10715_v8 = vor.u32 %v13240_v56, %v10714_v55  ;;  %v10210_v17 = vld [vmem:[%s14210_s9 + $0xc58] sm:$0xf] }
 0x1f8   : > { %v10719_v14 = vor.u32 %v13208_v0, %v10716_v1  ;;  %v13433_v0 = vld [vmem:[%s14210_s9 + $0x1754] sm:$0xf0]  ;;  %v12889_v1 = vld [vmem:[%s14210_s9 + $0x65c] sm:$0xf] }
 0x1f9   : > { %7176 = vmatmul.bf16.vlgmr.msrb.gmra.mxu2 %v14352_v50  ;;  %7189 = vmatmul.bf16.vlgmr.msrb.gmra.mxu3 %v14354_v51  ;;  %v6995_v2 = vpop.f32.mrf.mxu0  ;;  %v7008_v3 = vpop.f32.mrf.mxu1 }
 0x1fa   : > { %7220 = vmatpush.bf16.msra.mxu2 %v10459_v27  ;;  %7233 = vmatpush.bf16.msra.mxu3 %v12507_v28  ;;  %v6996_v9 = vadd.f32 %v6995_v2, %v1463_v54  ;;  %v12728_v54 = vld [vmem:[%s14210_s9 + $0x14c] sm:$0xf0]  ;;  %v10466_v2 = vld [vmem:[%s14210_s9 + $0xe58] sm:$0xf] }
 0x1fb   : > { %7246 = vmatpush.bf16.msrb.mxu0 %v10463_v31  ;;  %7259 = vmatpush.bf16.msrb.mxu1 %v12511_v32  ;;  %v9180_v32 = vld [vmem:[%s14210_s9 + $0x550] sm:$0xf0]  ;;  %v8667_v7 = vor.u32 %v12728_v54, %v8666_v52  ;;  %v13465_v52 = vld [vmem:[%s14210_s9 + $0x185c] sm:$0xf] }
 0x1fc   : > { %7202 = vmatmul.bf16.vlgmr.msra.gmra.mxu0 %v14352_v50  ;;  %7215 = vmatmul.bf16.vlgmr.msra.gmra.mxu1 %v14354_v51  ;;  %v7009_v19 = vadd.f32 %v7008_v3, %v6996_v9  ;;  %v6969_v27 = vpop.f32.mrf.mxu2  ;;  %v6982_v28 = vpop.f32.mrf.mxu3  ;;  %v13177_v3 = vld [vmem:[%s14210_s9 + $0xf54] sm:$0xf0]  ;;  %v10468_v9 = vld [vmem:[%s14210_s9 + $0xf58] sm:$0xf0] }
 0x1fd   : > { %v6970_v31 = vadd.f32 %v6969_v27, %v1462_v18  ;;  %v10467_v15 = vor.u32 %v13177_v3, %v10466_v2  ;;  %v13113_v18 = vld [vmem:[%s14210_s9 + $0xd54] sm:$0xf0]  ;;  %v9444_v2 = vld [vmem:[%s14210_s9 + $0x758] sm:$0xf0] }
 0x1fe   : > { %7221 = vmatpush.bf16.msra.mxu2 %v10203_v39  ;;  %7234 = vmatpush.bf16.msra.mxu3 %v12251_v40  ;;  %8375 = vst [vmem:[%s14676_s10 + $0x58] sm:$0xff] %v7009_v19  ;;  %v11227_v39 = vor.u32 %v13368_v29, %v11226_v24  ;;  %v8922_v40 = vld [vmem:[%s14210_s9 + $0x250] sm:$0xf]  ;;  %v10471_v19 = vor.u32 %v13145_v6, %v10468_v9  ;;  %v10212_v24 = vld [vmem:[%s14210_s9 + $0xd58] sm:$0xf0] }
 0x1ff   : > { %7247 = vmatpush.bf16.msrb.mxu0 %v10207_v43  ;;  %7260 = vmatpush.bf16.msrb.mxu1 %v12255_v44  ;;  %v6983_v35 = vadd.f32 %v6982_v28, %v6970_v31  ;;  %v9183_v43 = vor.u32 %v12824_v30, %v9180_v32  ;;  %v11231_v44 = vor.u32 %v13336_v33, %v11228_v34  ;;  %v9954_v29 = vld [vmem:[%s14210_s9 + $0xa58] sm:$0xf]  ;;  %v13401_v3 = vld [vmem:[%s14210_s9 + $0x165c] sm:$0xf] }
 0x200   : > { %v10211_v27 = vor.u32 %v13113_v18, %v10210_v17  ;;  %v13049_v30 = vld [vmem:[%s14210_s9 + $0xb54] sm:$0xf0]  ;;  %v10215_v31 = vor.u32 %v13081_v23, %v10212_v24  ;;  %v12825_v18 = vld [vmem:[%s14210_s9 + $0x45c] sm:$0xf] }
 0x201   : > { %v6997_v36 = vpop.f32.mrf.mxu0  ;;  %v7010_v37 = vpop.f32.mrf.mxu1  ;;  %8374 = vst [vmem:[%s14676_s10 + $0x50] sm:$0xff] %v6983_v35  ;;  %v12002_v33 = vld [vmem:[%s14210_s9 + $0x1a58] sm:$0xf]  ;;  %v13017_v35 = vld [vmem:[%s14210_s9 + $0xa5c] sm:$0xf] }
 0x202   : > { %7222 = vmatpush.bf16.msra.mxu2 %v9947_v53  ;;  %7235 = vmatpush.bf16.msra.mxu3 %v11995_v12  ;;  %v8923_v53 = vor.u32 %v12792_v41, %v8922_v40  ;;  %v10971_v12 = vor.u32 %v13304_v45, %v10970_v42  ;;  %v13561_v34 = vld [vmem:[%s14210_s9 + $0x1b54] sm:$0xf0]  ;;  %v9956_v36 = vld [vmem:[%s14210_s9 + $0xb58] sm:$0xf0]  ;;  %v1465_v41 = vperm.slane %v14879_v61, 5 }
 0x203   : > { %7248 = vmatpush.bf16.msrb.mxu0 %v9951_v57  ;;  %7261 = vmatpush.bf16.msrb.mxu1 %v11999_v58  ;;  %v8927_v57 = vor.u32 %v12760_v46, %v8924_v47  ;;  %v10975_v58 = vor.u32 %v13272_v48, %v10972_v49  ;;  %v13529_v37 = vld [vmem:[%s14210_s9 + $0x1a5c] sm:$0xf]  ;;  %v12003_v40 = vor.u32 %v13561_v34, %v12002_v33  ;;  %v9698_v42 = vld [vmem:[%s14210_s9 + $0x858] sm:$0xf] }
 0x204   : > { %v6971_v59 = vpop.f32.mrf.mxu2  ;;  %v6984_v60 = vpop.f32.mrf.mxu3  ;;  %v11746_v46 = vld [vmem:[%s14210_s9 + $0x1858] sm:$0xf]  ;;  %v12953_v48 = vld [vmem:[%s14210_s9 + $0x85c] sm:$0xf] }
 0x205   : > { %v13497_v47 = vld [vmem:[%s14210_s9 + $0x1954] sm:$0xf0]  ;;  %v9700_v49 = vld [vmem:[%s14210_s9 + $0x958] sm:$0xf0] }
 0x206   : > { %7223 = vmatpush.bf16.msra.mxu2 %v9691_v4  ;;  %7236 = vmatpush.bf16.msra.mxu3 %v11739_v5  ;;  %v12514_v4 = vld [vmem:[%s14210_s9 + $0x1e58] sm:$0xf]  ;;  %v11747_v56 = vor.u32 %v13497_v47, %v11746_v46  ;;  %v9703_v62 = vor.u32 %v12953_v48, %v9700_v49  ;;  %v12761_v34 = vld [vmem:[%s14210_s9 + $0x25c] sm:$0xf] }
 0x207   : > { %7249 = vmatpush.bf16.msrb.mxu0 %v9695_v10  ;;  %7262 = vmatpush.bf16.msrb.mxu1 %v11743_v11  ;;  %v13689_v5 = vld [vmem:[%s14210_s9 + $0x1f54] sm:$0xf0]  ;;  %v13657_v10 = vld [vmem:[%s14210_s9 + $0x1e5c] sm:$0xf] }
 0x208   : > { %v12516_v11 = vld [vmem:[%s14210_s9 + $0x1f58] sm:$0xf0]  ;;  %v12515_v16 = vor.u32 %v13689_v5, %v12514_v4  ;;  %v11490_v59 = vld [vmem:[%s14210_s9 + $0x1658] sm:$0xf]  ;;  %v1464_v5 = vperm.slane %v14879_v61, 4 }
 0x209   : > { %v11492_v4 = vld [vmem:[%s14210_s9 + $0x1758] sm:$0xf0]  ;;  %v9186_v9 = vld [vmem:[%s14210_s9 + $0x458] sm:$0xf] }
 0x20a   : > { %7224 = vmatpush.bf16.msra.mxu2 %v9435_v20  ;;  %7237 = vmatpush.bf16.msra.mxu3 %v11483_v21  ;;  %v12519_v20 = vor.u32 %v13657_v10, %v12516_v11  ;;  %v12258_v21 = vld [vmem:[%s14210_s9 + $0x1c58] sm:$0xf]  ;;  %v12697_v48 = vld [vmem:[%s14210_s9 + $0x5c] sm:$0xf] }
 0x20b   : > { %7250 = vmatpush.bf16.msrb.mxu0 %v9439_v25  ;;  %7263 = vmatpush.bf16.msrb.mxu1 %v11487_v26  ;;  %v13593_v25 = vld [vmem:[%s14210_s9 + $0x1c5c] sm:$0xf]  ;;  %v12259_v28 = vor.u32 %v13625_v22, %v12258_v21  ;;  %v12857_v10 = vld [vmem:[%s14210_s9 + $0x554] sm:$0xf0] }
 0x20c   : > { %v12260_v26 = vld [vmem:[%s14210_s9 + $0x1d58] sm:$0xf0]  ;;  %v11234_v11 = vld [vmem:[%s14210_s9 + $0x1458] sm:$0xf] }
 0x20d   : > { %v12263_v32 = vor.u32 %v13593_v25, %v12260_v26  ;;  %v13369_v17 = vld [vmem:[%s14210_s9 + $0x1554] sm:$0xf0]  ;;  %v13337_v21 = vld [vmem:[%s14210_s9 + $0x145c] sm:$0xf]  ;;  %v9187_v26 = vor.u32 %v12857_v10, %v9186_v9  ;;  %v13626_v9 = vld [vmem:[%s14210_s9 + $0x1d5c] sm:$0xf0] }
 0x20e   : > { %7225 = vmatpush.bf16.msra.mxu2 %v9179_v38  ;;  %7238 = vmatpush.bf16.msra.mxu3 %v11227_v39  ;;  %v12004_v38 = vld [vmem:[%s14210_s9 + $0x1b58] sm:$0xf0]  ;;  %v9955_v39 = vor.u32 %v13049_v30, %v9954_v29  ;;  %v12793_v29 = vld [vmem:[%s14210_s9 + $0x354] sm:$0xf0]  ;;  %v13082_v10 = vld [vmem:[%s14210_s9 + $0xc64] sm:$0xf] }
 0x20f   : > { %7251 = vmatpush.bf16.msrb.mxu0 %v9183_v43  ;;  %7264 = vmatpush.bf16.msrb.mxu1 %v11231_v44  ;;  %v12985_v43 = vld [vmem:[%s14210_s9 + $0x954] sm:$0xf0]  ;;  %v9959_v44 = vor.u32 %v13017_v35, %v9956_v36  ;;  %v12007_v45 = vor.u32 %v13529_v37, %v12004_v38  ;;  %v11236_v22 = vld [vmem:[%s14210_s9 + $0x1558] sm:$0xf0] }
 0x210   : > { %v9699_v55 = vor.u32 %v12985_v43, %v9698_v42  ;;  %v10978_v30 = vld [vmem:[%s14210_s9 + $0x1258] sm:$0xf]  ;;  %v8932_v35 = vld [vmem:[%s14210_s9 + $0x358] sm:$0xf0] }
 0x211   : > { %v13305_v33 = vld [vmem:[%s14210_s9 + $0x1354] sm:$0xf0]  ;;  %v13273_v36 = vld [vmem:[%s14210_s9 + $0x125c] sm:$0xf] }
 0x212   : > { %7226 = vmatpush.bf16.msra.mxu2 %v8923_v53  ;;  %7239 = vmatpush.bf16.msra.mxu3 %v10971_v12  ;;  %v11748_v53 = vld [vmem:[%s14210_s9 + $0x1958] sm:$0xf0]  ;;  %v8674_v38 = vld [vmem:[%s14210_s9 + $0x58] sm:$0xf] }
 0x213   : > { %7252 = vmatpush.bf16.msrb.mxu0 %v8927_v57  ;;  %7265 = vmatpush.bf16.msrb.mxu1 %v10975_v58  ;;  %v9442_v57 = vld [vmem:[%s14210_s9 + $0x658] sm:$0xf]  ;;  %v11751_v63 = vor.u32 %v13465_v52, %v11748_v53  ;;  %v10980_v37 = vld [vmem:[%s14210_s9 + $0x1358] sm:$0xf0] }
 0x214   : > { %v12921_v58 = vld [vmem:[%s14210_s9 + $0x754] sm:$0xf0]  ;;  %v8676_v49 = vld [vmem:[%s14210_s9 + $0x158] sm:$0xf0] }
 0x215   : > { %v10722_v42 = vld [vmem:[%s14210_s9 + $0x1058] sm:$0xf]  ;;  %v13209_v52 = vld [vmem:[%s14210_s9 + $0x105c] sm:$0xf] }
 0x216   : > { %7227 = vmatpush.bf16.msra.mxu2 %v8667_v7  ;;  %7240 = vmatpush.bf16.msra.mxu3 %v10715_v8  ;;  %v9443_v7 = vor.u32 %v12921_v58, %v9442_v57  ;;  %v11491_v8 = vor.u32 %v13433_v0, %v11490_v59  ;;  %v13241_v43 = vld [vmem:[%s14210_s9 + $0x1154] sm:$0xf0]  ;;  %v10724_v53 = vld [vmem:[%s14210_s9 + $0x1158] sm:$0xf0]  ;;  %v13146_v57 = vld [vmem:[%s14210_s9 + $0xe64] sm:$0xf]  ;;  %v8679_v0 = vor.u32 %v12697_v48, %v8676_v49 }
 0x217   : > { %7253 = vmatpush.bf16.msrb.mxu0 %v8671_v13  ;;  %7266 = vmatpush.bf16.msrb.mxu1 %v10719_v14  ;;  %v9447_v13 = vor.u32 %v12889_v1, %v9444_v2  ;;  %v11495_v14 = vor.u32 %v13401_v3, %v11492_v4  ;;  %v10723_v59 = vor.u32 %v13241_v43, %v10722_v42  ;;  %v10218_v4 = vld [vmem:[%s14210_s9 + $0xc60] sm:$0xf] }
 0x218   : > { %v10727_v1 = vor.u32 %v13209_v52, %v10724_v53  ;;  %v13434_v52 = vld [vmem:[%s14210_s9 + $0x175c] sm:$0xf0]  ;;  %v12890_v53 = vld [vmem:[%s14210_s9 + $0x664] sm:$0xf] }
 0x219   : > { %7228 = vmatmul.bf16.vlgmr.msra.gmra.mxu2 %v14352_v50  ;;  %7241 = vmatmul.bf16.vlgmr.msra.gmra.mxu3 %v14354_v51  ;;  %v7047_v12 = vpop.f32.mrf.mxu0  ;;  %v7060_v54 = vpop.f32.mrf.mxu1 }
 0x21a   : > { %7272 = vmatpush.bf16.msrb.mxu2 %v10467_v15  ;;  %7285 = vmatpush.bf16.msrb.mxu3 %v12515_v16  ;;  %v7048_v60 = vadd.f32 %v7047_v12, %v1465_v41  ;;  %v12729_v41 = vld [vmem:[%s14210_s9 + $0x154] sm:$0xf0]  ;;  %v10474_v12 = vld [vmem:[%s14210_s9 + $0xe60] sm:$0xf] }
 0x21b   : > { %7298 = vmatpush.bf16.msra.mxu0 %v10471_v19  ;;  %7311 = vmatpush.bf16.msra.mxu1 %v12519_v20  ;;  %v9188_v20 = vld [vmem:[%s14210_s9 + $0x558] sm:$0xf0]  ;;  %v8675_v58 = vor.u32 %v12729_v41, %v8674_v38  ;;  %v13466_v38 = vld [vmem:[%s14210_s9 + $0x1864] sm:$0xf] }
 0x21c   : > { %7254 = vmatmul.bf16.vlgmr.msrb.gmra.mxu0 %v14352_v50  ;;  %7267 = vmatmul.bf16.vlgmr.msrb.gmra.mxu1 %v14354_v51  ;;  %v7061_v6 = vadd.f32 %v7060_v54, %v7048_v60  ;;  %v7021_v15 = vpop.f32.mrf.mxu2  ;;  %v7034_v16 = vpop.f32.mrf.mxu3  ;;  %v13178_v54 = vld [vmem:[%s14210_s9 + $0xf5c] sm:$0xf0]  ;;  %v10476_v60 = vld [vmem:[%s14210_s9 + $0xf60] sm:$0xf0] }
 0x21d   : > { %v7022_v19 = vadd.f32 %v7021_v15, %v1464_v5  ;;  %v10475_v2 = vor.u32 %v13178_v54, %v10474_v12  ;;  %v13114_v5 = vld [vmem:[%s14210_s9 + $0xd5c] sm:$0xf0]  ;;  %v9452_v12 = vld [vmem:[%s14210_s9 + $0x760] sm:$0xf0] }
 0x21e   : > { %7273 = vmatpush.bf16.msrb.mxu2 %v10211_v27  ;;  %7286 = vmatpush.bf16.msrb.mxu3 %v12259_v28  ;;  %8377 = vst [vmem:[%s14676_s10 + $0x68] sm:$0xff] %v7061_v6  ;;  %v11235_v27 = vor.u32 %v13369_v17, %v11234_v11  ;;  %v8930_v28 = vld [vmem:[%s14210_s9 + $0x258] sm:$0xf]  ;;  %v10479_v6 = vor.u32 %v13146_v57, %v10476_v60  ;;  %v10220_v11 = vld [vmem:[%s14210_s9 + $0xd60] sm:$0xf0] }
 0x21f   : > { %7299 = vmatpush.bf16.msra.mxu0 %v10215_v31  ;;  %7312 = vmatpush.bf16.msra.mxu1 %v12263_v32  ;;  %v7035_v23 = vadd.f32 %v7034_v16, %v7022_v19  ;;  %v9191_v31 = vor.u32 %v12825_v18, %v9188_v20  ;;  %v11239_v32 = vor.u32 %v13337_v21, %v11236_v22  ;;  %v9962_v17 = vld [vmem:[%s14210_s9 + $0xa60] sm:$0xf]  ;;  %v13402_v54 = vld [vmem:[%s14210_s9 + $0x1664] sm:$0xf] }
 0x220   : > { %v10219_v15 = vor.u32 %v13114_v5, %v10218_v4  ;;  %v13050_v18 = vld [vmem:[%s14210_s9 + $0xb5c] sm:$0xf0]  ;;  %v10223_v19 = vor.u32 %v13082_v10, %v10220_v11  ;;  %v12826_v4 = vld [vmem:[%s14210_s9 + $0x464] sm:$0xf] }
 0x221   : > { %v7049_v24 = vpop.f32.mrf.mxu0  ;;  %v7062_v25 = vpop.f32.mrf.mxu1  ;;  %8376 = vst [vmem:[%s14676_s10 + $0x60] sm:$0xff] %v7035_v23  ;;  %v12010_v21 = vld [vmem:[%s14210_s9 + $0x1a60] sm:$0xf]  ;;  %v13018_v23 = vld [vmem:[%s14210_s9 + $0xa64] sm:$0xf] }
 0x222   : > { %7274 = vmatpush.bf16.msrb.mxu2 %v9955_v39  ;;  %7287 = vmatpush.bf16.msrb.mxu3 %v12003_v40  ;;  %v8931_v39 = vor.u32 %v12793_v29, %v8930_v28  ;;  %v10979_v40 = vor.u32 %v13305_v33, %v10978_v30  ;;  %v13562_v22 = vld [vmem:[%s14210_s9 + $0x1b5c] sm:$0xf0]  ;;  %v9964_v24 = vld [vmem:[%s14210_s9 + $0xb60] sm:$0xf0]  ;;  %v1467_v29 = vperm.slane %v14879_v61, 7 }
 0x223   : > { %7300 = vmatpush.bf16.msra.mxu0 %v9959_v44  ;;  %7313 = vmatpush.bf16.msra.mxu1 %v12007_v45  ;;  %v8935_v44 = vor.u32 %v12761_v34, %v8932_v35  ;;  %v10983_v45 = vor.u32 %v13273_v36, %v10980_v37  ;;  %v13530_v25 = vld [vmem:[%s14210_s9 + $0x1a64] sm:$0xf]  ;;  %v12011_v28 = vor.u32 %v13562_v22, %v12010_v21  ;;  %v9706_v30 = vld [vmem:[%s14210_s9 + $0x860] sm:$0xf] }
 0x224   : > { %v7023_v46 = vpop.f32.mrf.mxu2  ;;  %v7036_v47 = vpop.f32.mrf.mxu3  ;;  %v11754_v34 = vld [vmem:[%s14210_s9 + $0x1860] sm:$0xf]  ;;  %v12954_v36 = vld [vmem:[%s14210_s9 + $0x864] sm:$0xf] }
 0x225   : > { %v13498_v35 = vld [vmem:[%s14210_s9 + $0x195c] sm:$0xf0]  ;;  %v9708_v37 = vld [vmem:[%s14210_s9 + $0x960] sm:$0xf0] }
 0x226   : > { %7275 = vmatpush.bf16.msrb.mxu2 %v9699_v55  ;;  %7288 = vmatpush.bf16.msrb.mxu3 %v11747_v56  ;;  %v12522_v55 = vld [vmem:[%s14210_s9 + $0x1e60] sm:$0xf]  ;;  %v11755_v43 = vor.u32 %v13498_v35, %v11754_v34  ;;  %v9711_v48 = vor.u32 %v12954_v36, %v9708_v37  ;;  %v12762_v21 = vld [vmem:[%s14210_s9 + $0x264] sm:$0xf] }
 0x227   : > { %7301 = vmatpush.bf16.msra.mxu0 %v9703_v62  ;;  %7314 = vmatpush.bf16.msra.mxu1 %v11751_v63  ;;  %v13690_v56 = vld [vmem:[%s14210_s9 + $0x1f5c] sm:$0xf0]  ;;  %v13658_v62 = vld [vmem:[%s14210_s9 + $0x1e64] sm:$0xf] }
 0x228   : > { %v12524_v63 = vld [vmem:[%s14210_s9 + $0x1f60] sm:$0xf0]  ;;  %v12523_v3 = vor.u32 %v13690_v56, %v12522_v55  ;;  %v11498_v46 = vld [vmem:[%s14210_s9 + $0x1660] sm:$0xf]  ;;  %v1466_v56 = vperm.slane %v14879_v61, 6 }
 0x229   : > { %v11500_v55 = vld [vmem:[%s14210_s9 + $0x1760] sm:$0xf0]  ;;  %v9194_v60 = vld [vmem:[%s14210_s9 + $0x460] sm:$0xf] }
 0x22a   : > { %7276 = vmatpush.bf16.msrb.mxu2 %v9443_v7  ;;  %7289 = vmatpush.bf16.msrb.mxu3 %v11491_v8  ;;  %v12527_v7 = vor.u32 %v13658_v62, %v12524_v63  ;;  %v12266_v8 = vld [vmem:[%s14210_s9 + $0x1c60] sm:$0xf]  ;;  %v8940_v22 = vld [vmem:[%s14210_s9 + $0x360] sm:$0xf0] }
 0x22b   : > { %7302 = vmatpush.bf16.msra.mxu0 %v9447_v13  ;;  %7315 = vmatpush.bf16.msra.mxu1 %v11495_v14  ;;  %v13594_v13 = vld [vmem:[%s14210_s9 + $0x1c64] sm:$0xf]  ;;  %v12267_v16 = vor.u32 %v13626_v9, %v12266_v8  ;;  %v12858_v62 = vld [vmem:[%s14210_s9 + $0x55c] sm:$0xf0] }
 0x22c   : > { %v12268_v14 = vld [vmem:[%s14210_s9 + $0x1d60] sm:$0xf0]  ;;  %v11242_v63 = vld [vmem:[%s14210_s9 + $0x1460] sm:$0xf] }
 0x22d   : > { %v12271_v20 = vor.u32 %v13594_v13, %v12268_v14  ;;  %v11244_v8 = vld [vmem:[%s14210_s9 + $0x1560] sm:$0xf0]  ;;  %v9195_v13 = vor.u32 %v12858_v62, %v9194_v60  ;;  %v13083_v60 = vld [vmem:[%s14210_s9 + $0xc6c] sm:$0xf] }
 0x22e   : > { %7277 = vmatpush.bf16.msrb.mxu2 %v9187_v26  ;;  %7290 = vmatpush.bf16.msrb.mxu3 %v11235_v27  ;;  %v12012_v26 = vld [vmem:[%s14210_s9 + $0x1b60] sm:$0xf0]  ;;  %v9963_v27 = vor.u32 %v13050_v18, %v9962_v17  ;;  %v10986_v17 = vld [vmem:[%s14210_s9 + $0x1260] sm:$0xf]  ;;  %v10228_v62 = vld [vmem:[%s14210_s9 + $0xd68] sm:$0xf0] }
 0x22f   : > { %7303 = vmatpush.bf16.msra.mxu0 %v9191_v31  ;;  %7316 = vmatpush.bf16.msra.mxu1 %v11239_v32  ;;  %v12986_v31 = vld [vmem:[%s14210_s9 + $0x95c] sm:$0xf0]  ;;  %v9967_v32 = vor.u32 %v13018_v23, %v9964_v24  ;;  %v12015_v33 = vor.u32 %v13530_v25, %v12012_v26  ;;  %v13274_v23 = vld [vmem:[%s14210_s9 + $0x1264] sm:$0xf] }
 0x230   : > { %v9707_v42 = vor.u32 %v12986_v31, %v9706_v30  ;;  %v10988_v24 = vld [vmem:[%s14210_s9 + $0x1360] sm:$0xf0]  ;;  %v8682_v25 = vld [vmem:[%s14210_s9 + $0x60] sm:$0xf]  ;;  %v8943_v31 = vor.u32 %v12762_v21, %v8940_v22  ;;  %v11762_v21 = vld [vmem:[%s14210_s9 + $0x1868] sm:$0xf] }
 0x231   : > { %v13242_v30 = vld [vmem:[%s14210_s9 + $0x115c] sm:$0xf0]  ;;  %v12698_v35 = vld [vmem:[%s14210_s9 + $0x64] sm:$0xf]  ;;  %v13499_v22 = vld [vmem:[%s14210_s9 + $0x1964] sm:$0xf0] }
 0x232   : > { %7278 = vmatpush.bf16.msrb.mxu2 %v8931_v39  ;;  %7291 = vmatpush.bf16.msrb.mxu3 %v10979_v40  ;;  %v11756_v39 = vld [vmem:[%s14210_s9 + $0x1960] sm:$0xf0] }
 0x233   : > { %7304 = vmatpush.bf16.msra.mxu0 %v8935_v44  ;;  %7317 = vmatpush.bf16.msra.mxu1 %v10983_v45  ;;  %v9450_v44 = vld [vmem:[%s14210_s9 + $0x660] sm:$0xf]  ;;  %v11759_v49 = vor.u32 %v13466_v38, %v11756_v39  ;;  %v8684_v36 = vld [vmem:[%s14210_s9 + $0x160] sm:$0xf0]  ;;  %v10482_v39 = vld [vmem:[%s14210_s9 + $0xe68] sm:$0xf] }
 0x234   : > { %v12922_v45 = vld [vmem:[%s14210_s9 + $0x75c] sm:$0xf0]  ;;  %v13210_v37 = vld [vmem:[%s14210_s9 + $0x1064] sm:$0xf] }
 0x235   : > { %v10732_v38 = vld [vmem:[%s14210_s9 + $0x1160] sm:$0xf0] }
 0x236   : > { %7279 = vmatpush.bf16.msrb.mxu2 %v8675_v58  ;;  %7292 = vmatpush.bf16.msrb.mxu3 %v10723_v59  ;;  %v9451_v58 = vor.u32 %v12922_v45, %v9450_v44  ;;  %v11499_v59 = vor.u32 %v13434_v52, %v11498_v46  ;;  %v10484_v46 = vld [vmem:[%s14210_s9 + $0xf68] sm:$0xf0]  ;;  %v10735_v52 = vor.u32 %v13210_v37, %v10732_v38  ;;  %v13435_v37 = vld [vmem:[%s14210_s9 + $0x1764] sm:$0xf0] }
 0x237   : > { %7305 = vmatpush.bf16.msra.mxu0 %v8679_v0  ;;  %7318 = vmatpush.bf16.msra.mxu1 %v10727_v1  ;;  %v9455_v0 = vor.u32 %v12890_v53, %v9452_v12  ;;  %v11503_v1 = vor.u32 %v13402_v54, %v11500_v55  ;;  %v10226_v54 = vld [vmem:[%s14210_s9 + $0xc68] sm:$0xf]  ;;  %v12891_v38 = vld [vmem:[%s14210_s9 + $0x66c] sm:$0xf] }
 0x238   : > { %v13115_v55 = vld [vmem:[%s14210_s9 + $0xd64] sm:$0xf0] }
 0x239   : > { %7280 = vmatmul.bf16.vlgmr.msrb.gmra.mxu2 %v14352_v50  ;;  %7293 = vmatmul.bf16.vlgmr.msrb.gmra.mxu3 %v14354_v51  ;;  %v7099_v40 = vpop.f32.mrf.mxu0  ;;  %v7112_v41 = vpop.f32.mrf.mxu1 }
 0x23a   : > { %7324 = vmatpush.bf16.msra.mxu2 %v10475_v2  ;;  %7337 = vmatpush.bf16.msra.mxu3 %v12523_v3  ;;  %v7100_v47 = vadd.f32 %v7099_v40, %v1467_v29  ;;  %v13370_v3 = vld [vmem:[%s14210_s9 + $0x155c] sm:$0xf0]  ;;  %v13179_v40 = vld [vmem:[%s14210_s9 + $0xf64] sm:$0xf0] }
 0x23b   : > { %7350 = vmatpush.bf16.msrb.mxu0 %v10479_v6  ;;  %7363 = vmatpush.bf16.msrb.mxu1 %v12527_v7  ;;  %v9196_v6 = vld [vmem:[%s14210_s9 + $0x560] sm:$0xf0]  ;;  %v11243_v14 = vor.u32 %v13370_v3, %v11242_v63  ;;  %v10730_v29 = vld [vmem:[%s14210_s9 + $0x1060] sm:$0xf]  ;;  %v10483_v53 = vor.u32 %v13179_v40, %v10482_v39  ;;  %v13595_v63 = vld [vmem:[%s14210_s9 + $0x1c6c] sm:$0xf] }
 0x23c   : > { %7306 = vmatmul.bf16.vlgmr.msra.gmra.mxu0 %v14352_v50  ;;  %7319 = vmatmul.bf16.vlgmr.msra.gmra.mxu1 %v14354_v51  ;;  %v7113_v57 = vadd.f32 %v7112_v41, %v7100_v47  ;;  %v7073_v61 = vpop.f32.mrf.mxu2  ;;  %v7086_v2 = vpop.f32.mrf.mxu3  ;;  %v13338_v7 = vld [vmem:[%s14210_s9 + $0x1464] sm:$0xf]  ;;  %v9199_v18 = vor.u32 %v12826_v4, %v9196_v6  ;;  %v12530_v41 = vld [vmem:[%s14210_s9 + $0x1e68] sm:$0xf]  ;;  %v10731_v45 = vor.u32 %v13242_v30, %v10730_v29  ;;  %v13659_v47 = vld [vmem:[%s14210_s9 + $0x1e6c] sm:$0xf] }
 0x23d   : > { %v7074_v5 = vadd.f32 %v7073_v61, %v1466_v56  ;;  %v13051_v3 = vld [vmem:[%s14210_s9 + $0xb64] sm:$0xf0]  ;;  %v11763_v30 = vor.u32 %v13499_v22, %v11762_v21  ;;  %v9460_v39 = vld [vmem:[%s14210_s9 + $0x768] sm:$0xf0] }
 0x23e   : > { %7325 = vmatpush.bf16.msra.mxu2 %v10219_v15  ;;  %7338 = vmatpush.bf16.msra.mxu3 %v12267_v16  ;;  %8379 = vst [vmem:[%s14676_s10 + $0x78] sm:$0xff] %v7113_v57  ;;  %v8938_v15 = vld [vmem:[%s14210_s9 + $0x260] sm:$0xf]  ;;  %v12018_v4 = vld [vmem:[%s14210_s9 + $0x1a68] sm:$0xf] }
 0x23f   : > { %7351 = vmatpush.bf16.msrb.mxu0 %v10223_v19  ;;  %7364 = vmatpush.bf16.msrb.mxu1 %v12271_v20  ;;  %v7087_v9 = vadd.f32 %v7086_v2, %v7074_v5  ;;  %v12794_v16 = vld [vmem:[%s14210_s9 + $0x35c] sm:$0xf0]  ;;  %v11247_v19 = vor.u32 %v13338_v7, %v11244_v8  ;;  %v9970_v2 = vld [vmem:[%s14210_s9 + $0xa68] sm:$0xf]  ;;  %v10231_v5 = vor.u32 %v13083_v60, %v10228_v62  ;;  %v13019_v8 = vld [vmem:[%s14210_s9 + $0xa6c] sm:$0xf] }
 0x240   : > { %v13306_v20 = vld [vmem:[%s14210_s9 + $0x135c] sm:$0xf0]  ;;  %v8939_v26 = vor.u32 %v12794_v16, %v8938_v15  ;;  %v13563_v7 = vld [vmem:[%s14210_s9 + $0x1b64] sm:$0xf0]  ;;  %v13403_v40 = vld [vmem:[%s14210_s9 + $0x166c] sm:$0xf] }
 0x241   : > { %v7101_v10 = vpop.f32.mrf.mxu0  ;;  %v7114_v11 = vpop.f32.mrf.mxu1  ;;  %8378 = vst [vmem:[%s14676_s10 + $0x70] sm:$0xff] %v7087_v9  ;;  %v15170_v9 = vld [vmem:[%s14643_s30 + $0x10] sm:$0xff]  ;;  %v12019_v15 = vor.u32 %v13563_v7, %v12018_v4  ;;  %v12763_v7 = vld [vmem:[%s14210_s9 + $0x26c] sm:$0xf] }
 0x242   : > { %7326 = vmatpush.bf16.msra.mxu2 %v9963_v27  ;;  %7339 = vmatpush.bf16.msra.mxu3 %v12011_v28  ;;  %v10987_v27 = vor.u32 %v13306_v20, %v10986_v17  ;;  %v12730_v28 = vld [vmem:[%s14210_s9 + $0x15c] sm:$0xf0]  ;;  %v9972_v10 = vld [vmem:[%s14210_s9 + $0xb68] sm:$0xf0]  ;;  %v1469_v16 = vperm.slane %v15170_v9, 1 }
 0x243   : > { %7352 = vmatpush.bf16.msrb.mxu0 %v9967_v32  ;;  %7365 = vmatpush.bf16.msrb.mxu1 %v12015_v33  ;;  %v10991_v32 = vor.u32 %v13274_v23, %v10988_v24  ;;  %v8683_v44 = vor.u32 %v12730_v28, %v8682_v25  ;;  %v13531_v11 = vld [vmem:[%s14210_s9 + $0x1a6c] sm:$0xf]  ;;  %v9714_v17 = vld [vmem:[%s14210_s9 + $0x868] sm:$0xf] }
 0x244   : > { %v7075_v33 = vpop.f32.mrf.mxu2  ;;  %v7088_v34 = vpop.f32.mrf.mxu3  ;;  %v12955_v23 = vld [vmem:[%s14210_s9 + $0x86c] sm:$0xf] }
 0x245   : > { %v9716_v24 = vld [vmem:[%s14210_s9 + $0x968] sm:$0xf0]  ;;  %v11506_v33 = vld [vmem:[%s14210_s9 + $0x1668] sm:$0xf] }
 0x246   : > { %7327 = vmatpush.bf16.msra.mxu2 %v9707_v42  ;;  %7340 = vmatpush.bf16.msra.mxu3 %v11755_v43  ;;  %v13691_v42 = vld [vmem:[%s14210_s9 + $0x1f64] sm:$0xf0]  ;;  %v13147_v43 = vld [vmem:[%s14210_s9 + $0xe6c] sm:$0xf] }
 0x247   : > { %7353 = vmatpush.bf16.msrb.mxu0 %v9711_v48  ;;  %7366 = vmatpush.bf16.msrb.mxu1 %v11759_v49  ;;  %v12532_v48 = vld [vmem:[%s14210_s9 + $0x1f68] sm:$0xf0]  ;;  %v8687_v49 = vor.u32 %v12698_v35, %v8684_v36  ;;  %v12531_v12 = vor.u32 %v13691_v42, %v12530_v41  ;;  %v10487_v56 = vor.u32 %v13147_v43, %v10484_v46  ;;  %v1468_v42 = vperm.slane %v15170_v9, 0  ;;  %v9202_v46 = vld [vmem:[%s14210_s9 + $0x468] sm:$0xf] }
 0x248   : > { %v12535_v57 = vor.u32 %v13659_v47, %v12532_v48  ;;  %v13467_v25 = vld [vmem:[%s14210_s9 + $0x186c] sm:$0xf]  ;;  %v9719_v35 = vor.u32 %v12955_v23, %v9716_v24  ;;  %v12859_v47 = vld [vmem:[%s14210_s9 + $0x564] sm:$0xf0] }
 0x249   : > { %v11508_v41 = vld [vmem:[%s14210_s9 + $0x1768] sm:$0xf0]  ;;  %v11250_v48 = vld [vmem:[%s14210_s9 + $0x1468] sm:$0xf] }
 0x24a   : > { %7328 = vmatpush.bf16.msra.mxu2 %v9451_v58  ;;  %7341 = vmatpush.bf16.msra.mxu3 %v11499_v59  ;;  %v12274_v58 = vld [vmem:[%s14210_s9 + $0x1c68] sm:$0xf]  ;;  %v12699_v23 = vld [vmem:[%s14210_s9 + $0x6c] sm:$0xf] }
 0x24b   : > { %7354 = vmatpush.bf16.msrb.mxu0 %v9455_v0  ;;  %7367 = vmatpush.bf16.msrb.mxu1 %v11503_v1  ;;  %v13627_v59 = vld [vmem:[%s14210_s9 + $0x1d64] sm:$0xf0]  ;;  %v12276_v0 = vld [vmem:[%s14210_s9 + $0x1d68] sm:$0xf0]  ;;  %v10227_v1 = vor.u32 %v13115_v55, %v10226_v54 }
 0x24c   : > { %v12275_v61 = vor.u32 %v13627_v59, %v12274_v58  ;;  %v12279_v6 = vor.u32 %v13595_v63, %v12276_v0  ;;  %v13371_v54 = vld [vmem:[%s14210_s9 + $0x1564] sm:$0xf0]  ;;  %v12827_v55 = vld [vmem:[%s14210_s9 + $0x46c] sm:$0xf]  ;;  %v9203_v0 = vor.u32 %v12859_v47, %v9202_v46  ;;  %v13628_v46 = vld [vmem:[%s14210_s9 + $0x1d6c] sm:$0xf0] }
 0x24d   : > { %v13339_v58 = vld [vmem:[%s14210_s9 + $0x146c] sm:$0xf]  ;;  %v13084_v47 = vld [vmem:[%s14210_s9 + $0xc74] sm:$0xf] }
 0x24e   : > { %7329 = vmatpush.bf16.msra.mxu2 %v9195_v13  ;;  %7342 = vmatpush.bf16.msra.mxu3 %v11243_v14  ;;  %v12020_v13 = vld [vmem:[%s14210_s9 + $0x1b68] sm:$0xf0]  ;;  %v9971_v14 = vor.u32 %v13051_v3, %v9970_v2  ;;  %v12795_v2 = vld [vmem:[%s14210_s9 + $0x364] sm:$0xf0] }
 0x24f   : > { %7355 = vmatpush.bf16.msrb.mxu0 %v9199_v18  ;;  %7368 = vmatpush.bf16.msrb.mxu1 %v11247_v19  ;;  %v12987_v18 = vld [vmem:[%s14210_s9 + $0x964] sm:$0xf0]  ;;  %v9975_v19 = vor.u32 %v13019_v8, %v9972_v10  ;;  %v12023_v20 = vor.u32 %v13531_v11, %v12020_v13  ;;  %v11252_v59 = vld [vmem:[%s14210_s9 + $0x1568] sm:$0xf0] }
 0x250   : > { %v9715_v29 = vor.u32 %v12987_v18, %v9714_v17  ;;  %v10994_v3 = vld [vmem:[%s14210_s9 + $0x1268] sm:$0xf]  ;;  %v8948_v8 = vld [vmem:[%s14210_s9 + $0x368] sm:$0xf0] }
 0x251   : > { %v13275_v10 = vld [vmem:[%s14210_s9 + $0x126c] sm:$0xf]  ;;  %v8690_v13 = vld [vmem:[%s14210_s9 + $0x68] sm:$0xf] }
 0x252   : > { %7330 = vmatpush.bf16.msra.mxu2 %v8939_v26  ;;  %7343 = vmatpush.bf16.msra.mxu3 %v10987_v27  ;;  %v11764_v26 = vld [vmem:[%s14210_s9 + $0x1968] sm:$0xf0]  ;;  %v10738_v17 = vld [vmem:[%s14210_s9 + $0x1068] sm:$0xf] }
 0x253   : > { %7356 = vmatpush.bf16.msrb.mxu0 %v8943_v31  ;;  %7369 = vmatpush.bf16.msrb.mxu1 %v10991_v32  ;;  %v9458_v31 = vld [vmem:[%s14210_s9 + $0x668] sm:$0xf]  ;;  %v11767_v36 = vor.u32 %v13467_v25, %v11764_v26  ;;  %v10996_v11 = vld [vmem:[%s14210_s9 + $0x1368] sm:$0xf0] }
 0x254   : > { %v12923_v32 = vld [vmem:[%s14210_s9 + $0x764] sm:$0xf0]  ;;  %v8692_v24 = vld [vmem:[%s14210_s9 + $0x168] sm:$0xf0] }
 0x255   : > { %v13243_v18 = vld [vmem:[%s14210_s9 + $0x1164] sm:$0xf0]  ;;  %v13211_v25 = vld [vmem:[%s14210_s9 + $0x106c] sm:$0xf] }
 0x256   : > { %7331 = vmatpush.bf16.msra.mxu2 %v8683_v44  ;;  %7344 = vmatpush.bf16.msra.mxu3 %v10731_v45  ;;  %v9459_v44 = vor.u32 %v12923_v32, %v9458_v31  ;;  %v11507_v45 = vor.u32 %v13435_v37, %v11506_v33  ;;  %v10740_v26 = vld [vmem:[%s14210_s9 + $0x1168] sm:$0xf0]  ;;  %v13148_v31 = vld [vmem:[%s14210_s9 + $0xe74] sm:$0xf]  ;;  %v10739_v33 = vor.u32 %v13243_v18, %v10738_v17 }
 0x257   : > { %7357 = vmatpush.bf16.msrb.mxu0 %v8687_v49  ;;  %7370 = vmatpush.bf16.msrb.mxu1 %v10735_v52  ;;  %v9463_v49 = vor.u32 %v12891_v38, %v9460_v39  ;;  %v11511_v52 = vor.u32 %v13403_v40, %v11508_v41  ;;  %v8695_v37 = vor.u32 %v12699_v23, %v8692_v24  ;;  %v10234_v41 = vld [vmem:[%s14210_s9 + $0xc70] sm:$0xf] }
 0x258   : > { %v10743_v38 = vor.u32 %v13211_v25, %v10740_v26  ;;  %v13436_v25 = vld [vmem:[%s14210_s9 + $0x176c] sm:$0xf0]  ;;  %v12892_v26 = vld [vmem:[%s14210_s9 + $0x674] sm:$0xf] }
 0x259   : > { %7332 = vmatmul.bf16.vlgmr.msra.gmra.mxu2 %v14352_v50  ;;  %7345 = vmatmul.bf16.vlgmr.msra.gmra.mxu3 %v14354_v51  ;;  %v7151_v27 = vpop.f32.mrf.mxu0  ;;  %v7164_v28 = vpop.f32.mrf.mxu1 }
 0x25a   : > { %7376 = vmatpush.bf16.msrb.mxu2 %v10483_v53  ;;  %7389 = vmatpush.bf16.msrb.mxu3 %v12531_v12  ;;  %v7152_v34 = vadd.f32 %v7151_v27, %v1469_v16  ;;  %v12731_v16 = vld [vmem:[%s14210_s9 + $0x164] sm:$0xf0]  ;;  %v10490_v27 = vld [vmem:[%s14210_s9 + $0xe70] sm:$0xf] }
 0x25b   : > { %7402 = vmatpush.bf16.msra.mxu0 %v10487_v56  ;;  %7415 = vmatpush.bf16.msra.mxu1 %v12535_v57  ;;  %v9204_v57 = vld [vmem:[%s14210_s9 + $0x568] sm:$0xf0]  ;;  %v8691_v32 = vor.u32 %v12731_v16, %v8690_v13  ;;  %v13468_v13 = vld [vmem:[%s14210_s9 + $0x1874] sm:$0xf] }
 0x25c   : > { %7358 = vmatmul.bf16.vlgmr.msrb.gmra.mxu0 %v14352_v50  ;;  %7371 = vmatmul.bf16.vlgmr.msrb.gmra.mxu1 %v14354_v51  ;;  %v7165_v43 = vadd.f32 %v7164_v28, %v7152_v34  ;;  %v7125_v53 = vpop.f32.mrf.mxu2  ;;  %v7138_v12 = vpop.f32.mrf.mxu3  ;;  %v9207_v4 = vor.u32 %v12827_v55, %v9204_v57  ;;  %v13180_v28 = vld [vmem:[%s14210_s9 + $0xf6c] sm:$0xf0]  ;;  %v10492_v34 = vld [vmem:[%s14210_s9 + $0xf70] sm:$0xf0] }
 0x25d   : > { %v7126_v56 = vadd.f32 %v7125_v53, %v1468_v42  ;;  %v10491_v39 = vor.u32 %v13180_v28, %v10490_v27  ;;  %v13116_v42 = vld [vmem:[%s14210_s9 + $0xd6c] sm:$0xf0]  ;;  %v9468_v27 = vld [vmem:[%s14210_s9 + $0x770] sm:$0xf0] }
 0x25e   : > { %7377 = vmatpush.bf16.msrb.mxu2 %v10227_v1  ;;  %7390 = vmatpush.bf16.msrb.mxu3 %v12275_v61  ;;  %8381 = vst [vmem:[%s14676_s10 + $0x88] sm:$0xff] %v7165_v43  ;;  %v11251_v1 = vor.u32 %v13371_v54, %v11250_v48  ;;  %v8946_v61 = vld [vmem:[%s14210_s9 + $0x268] sm:$0xf]  ;;  %v10495_v43 = vor.u32 %v13148_v31, %v10492_v34  ;;  %v10236_v48 = vld [vmem:[%s14210_s9 + $0xd70] sm:$0xf0] }
 0x25f   : > { %7403 = vmatpush.bf16.msra.mxu0 %v10231_v5  ;;  %7416 = vmatpush.bf16.msra.mxu1 %v12279_v6  ;;  %v7139_v60 = vadd.f32 %v7138_v12, %v7126_v56  ;;  %v11255_v5 = vor.u32 %v13339_v58, %v11252_v59  ;;  %v13307_v6 = vld [vmem:[%s14210_s9 + $0x1364] sm:$0xf0]  ;;  %v10235_v53 = vor.u32 %v13116_v42, %v10234_v41  ;;  %v9978_v54 = vld [vmem:[%s14210_s9 + $0xa70] sm:$0xf]  ;;  %v13404_v28 = vld [vmem:[%s14210_s9 + $0x1674] sm:$0xf] }
 0x260   : > { %v13052_v55 = vld [vmem:[%s14210_s9 + $0xb6c] sm:$0xf0]  ;;  %v10239_v56 = vor.u32 %v13084_v47, %v10236_v48  ;;  %v12828_v42 = vld [vmem:[%s14210_s9 + $0x474] sm:$0xf] }
 0x261   : > { %v7153_v62 = vpop.f32.mrf.mxu0  ;;  %v7166_v63 = vpop.f32.mrf.mxu1  ;;  %8380 = vst [vmem:[%s14676_s10 + $0x80] sm:$0xff] %v7139_v60  ;;  %v12026_v58 = vld [vmem:[%s14210_s9 + $0x1a70] sm:$0xf]  ;;  %v13020_v60 = vld [vmem:[%s14210_s9 + $0xa74] sm:$0xf] }
 0x262   : > { %7378 = vmatpush.bf16.msrb.mxu2 %v9971_v14  ;;  %7391 = vmatpush.bf16.msrb.mxu3 %v12019_v15  ;;  %v8947_v14 = vor.u32 %v12795_v2, %v8946_v61  ;;  %v10995_v15 = vor.u32 %v13307_v6, %v10994_v3  ;;  %v13564_v59 = vld [vmem:[%s14210_s9 + $0x1b6c] sm:$0xf0]  ;;  %v9980_v62 = vld [vmem:[%s14210_s9 + $0xb70] sm:$0xf0]  ;;  %v1471_v2 = vperm.slane %v15170_v9, 3 }
 0x263   : > { %7404 = vmatpush.bf16.msra.mxu0 %v9975_v19  ;;  %7417 = vmatpush.bf16.msra.mxu1 %v12023_v20  ;;  %v8951_v19 = vor.u32 %v12763_v7, %v8948_v8  ;;  %v10999_v20 = vor.u32 %v13275_v10, %v10996_v11  ;;  %v13532_v63 = vld [vmem:[%s14210_s9 + $0x1a74] sm:$0xf]  ;;  %v12027_v61 = vor.u32 %v13564_v59, %v12026_v58  ;;  %v9722_v3 = vld [vmem:[%s14210_s9 + $0x870] sm:$0xf] }
 0x264   : > { %v7127_v21 = vpop.f32.mrf.mxu2  ;;  %v7140_v22 = vpop.f32.mrf.mxu3  ;;  %v11770_v7 = vld [vmem:[%s14210_s9 + $0x1870] sm:$0xf]  ;;  %v12956_v10 = vld [vmem:[%s14210_s9 + $0x874] sm:$0xf] }
 0x265   : > { %v13500_v8 = vld [vmem:[%s14210_s9 + $0x196c] sm:$0xf0]  ;;  %v9724_v11 = vld [vmem:[%s14210_s9 + $0x970] sm:$0xf0] }
 0x266   : > { %7379 = vmatpush.bf16.msrb.mxu2 %v9715_v29  ;;  %7392 = vmatpush.bf16.msrb.mxu3 %v11763_v30  ;;  %v12538_v29 = vld [vmem:[%s14210_s9 + $0x1e70] sm:$0xf]  ;;  %v11771_v18 = vor.u32 %v13500_v8, %v11770_v7  ;;  %v9727_v23 = vor.u32 %v12956_v10, %v9724_v11  ;;  %v12764_v59 = vld [vmem:[%s14210_s9 + $0x274] sm:$0xf] }
 0x267   : > { %7405 = vmatpush.bf16.msra.mxu0 %v9719_v35  ;;  %7418 = vmatpush.bf16.msra.mxu1 %v11767_v36  ;;  %v13692_v30 = vld [vmem:[%s14210_s9 + $0x1f6c] sm:$0xf0]  ;;  %v13660_v35 = vld [vmem:[%s14210_s9 + $0x1e74] sm:$0xf] }
 0x268   : > { %v12540_v36 = vld [vmem:[%s14210_s9 + $0x1f70] sm:$0xf0]  ;;  %v12539_v40 = vor.u32 %v13692_v30, %v12538_v29  ;;  %v11514_v21 = vld [vmem:[%s14210_s9 + $0x1670] sm:$0xf]  ;;  %v1470_v30 = vperm.slane %v15170_v9, 2 }
 0x269   : > { %v11516_v29 = vld [vmem:[%s14210_s9 + $0x1770] sm:$0xf0]  ;;  %v9210_v34 = vld [vmem:[%s14210_s9 + $0x470] sm:$0xf] }
 0x26a   : > { %7380 = vmatpush.bf16.msrb.mxu2 %v9459_v44  ;;  %7393 = vmatpush.bf16.msrb.mxu3 %v11507_v45  ;;  %v12543_v44 = vor.u32 %v13660_v35, %v12540_v36  ;;  %v12282_v45 = vld [vmem:[%s14210_s9 + $0x1c70] sm:$0xf]  ;;  %v12700_v10 = vld [vmem:[%s14210_s9 + $0x74] sm:$0xf] }
 0x26b   : > { %7406 = vmatpush.bf16.msra.mxu0 %v9463_v49  ;;  %7419 = vmatpush.bf16.msra.mxu1 %v11511_v52  ;;  %v13596_v49 = vld [vmem:[%s14210_s9 + $0x1c74] sm:$0xf]  ;;  %v12283_v12 = vor.u32 %v13628_v46, %v12282_v45  ;;  %v12860_v35 = vld [vmem:[%s14210_s9 + $0x56c] sm:$0xf0] }
 0x26c   : > { %v12284_v52 = vld [vmem:[%s14210_s9 + $0x1d70] sm:$0xf0]  ;;  %v11258_v36 = vld [vmem:[%s14210_s9 + $0x1470] sm:$0xf] }
 0x26d   : > { %v12287_v57 = vor.u32 %v13596_v49, %v12284_v52  ;;  %v13372_v41 = vld [vmem:[%s14210_s9 + $0x156c] sm:$0xf0]  ;;  %v13340_v45 = vld [vmem:[%s14210_s9 + $0x1474] sm:$0xf]  ;;  %v9211_v52 = vor.u32 %v12860_v35, %v9210_v34  ;;  %v13629_v34 = vld [vmem:[%s14210_s9 + $0x1d74] sm:$0xf0] }
 0x26e   : > { %7381 = vmatpush.bf16.msrb.mxu2 %v9203_v0  ;;  %7394 = vmatpush.bf16.msrb.mxu3 %v11251_v1  ;;  %v12028_v0 = vld [vmem:[%s14210_s9 + $0x1b70] sm:$0xf0]  ;;  %v9979_v1 = vor.u32 %v13052_v55, %v9978_v54  ;;  %v12796_v54 = vld [vmem:[%s14210_s9 + $0x36c] sm:$0xf0]  ;;  %v13085_v35 = vld [vmem:[%s14210_s9 + $0xc7c] sm:$0xf] }
 0x26f   : > { %7407 = vmatpush.bf16.msra.mxu0 %v9207_v4  ;;  %7420 = vmatpush.bf16.msra.mxu1 %v11255_v5  ;;  %v12988_v4 = vld [vmem:[%s14210_s9 + $0x96c] sm:$0xf0]  ;;  %v9983_v5 = vor.u32 %v13020_v60, %v9980_v62  ;;  %v12031_v6 = vor.u32 %v13532_v63, %v12028_v0  ;;  %v11260_v46 = vld [vmem:[%s14210_s9 + $0x1570] sm:$0xf0] }
 0x270   : > { %v9723_v17 = vor.u32 %v12988_v4, %v9722_v3  ;;  %v11002_v55 = vld [vmem:[%s14210_s9 + $0x1270] sm:$0xf]  ;;  %v8956_v60 = vld [vmem:[%s14210_s9 + $0x370] sm:$0xf0] }
 0x271   : > { %v13308_v58 = vld [vmem:[%s14210_s9 + $0x136c] sm:$0xf0]  ;;  %v13276_v62 = vld [vmem:[%s14210_s9 + $0x1274] sm:$0xf] }
 0x272   : > { %7382 = vmatpush.bf16.msrb.mxu2 %v8947_v14  ;;  %7395 = vmatpush.bf16.msrb.mxu3 %v10995_v15  ;;  %v11772_v14 = vld [vmem:[%s14210_s9 + $0x1970] sm:$0xf0]  ;;  %v8698_v0 = vld [vmem:[%s14210_s9 + $0x70] sm:$0xf] }
 0x273   : > { %7408 = vmatpush.bf16.msra.mxu0 %v8951_v19  ;;  %7421 = vmatpush.bf16.msra.mxu1 %v10999_v20  ;;  %v9466_v19 = vld [vmem:[%s14210_s9 + $0x670] sm:$0xf]  ;;  %v11775_v24 = vor.u32 %v13468_v13, %v11772_v14  ;;  %v11004_v63 = vld [vmem:[%s14210_s9 + $0x1370] sm:$0xf0] }
 0x274   : > { %v12924_v20 = vld [vmem:[%s14210_s9 + $0x76c] sm:$0xf0]  ;;  %v8700_v11 = vld [vmem:[%s14210_s9 + $0x170] sm:$0xf0] }
 0x275   : > { %v10746_v3 = vld [vmem:[%s14210_s9 + $0x1070] sm:$0xf]  ;;  %v13212_v13 = vld [vmem:[%s14210_s9 + $0x1074] sm:$0xf] }
 0x276   : > { %7383 = vmatpush.bf16.msrb.mxu2 %v8691_v32  ;;  %7396 = vmatpush.bf16.msrb.mxu3 %v10739_v33  ;;  %v9467_v32 = vor.u32 %v12924_v20, %v9466_v19  ;;  %v11515_v33 = vor.u32 %v13436_v25, %v11514_v21  ;;  %v13244_v4 = vld [vmem:[%s14210_s9 + $0x116c] sm:$0xf0]  ;;  %v10748_v14 = vld [vmem:[%s14210_s9 + $0x1170] sm:$0xf0]  ;;  %v13149_v19 = vld [vmem:[%s14210_s9 + $0xe7c] sm:$0xf]  ;;  %v8703_v25 = vor.u32 %v12700_v10, %v8700_v11 }
 0x277   : > { %7409 = vmatpush.bf16.msra.mxu0 %v8695_v37  ;;  %7422 = vmatpush.bf16.msra.mxu1 %v10743_v38  ;;  %v9471_v37 = vor.u32 %v12892_v26, %v9468_v27  ;;  %v11519_v38 = vor.u32 %v13404_v28, %v11516_v29  ;;  %v10747_v21 = vor.u32 %v13244_v4, %v10746_v3  ;;  %v10242_v29 = vld [vmem:[%s14210_s9 + $0xc78] sm:$0xf] }
 0x278   : > { %v10751_v26 = vor.u32 %v13212_v13, %v10748_v14  ;;  %v13437_v13 = vld [vmem:[%s14210_s9 + $0x1774] sm:$0xf0]  ;;  %v12893_v14 = vld [vmem:[%s14210_s9 + $0x67c] sm:$0xf] }
 0x279   : > { %7384 = vmatmul.bf16.vlgmr.msrb.gmra.mxu2 %v14352_v50  ;;  %7397 = vmatmul.bf16.vlgmr.msrb.gmra.mxu3 %v14354_v51  ;;  %v7203_v15 = vpop.f32.mrf.mxu0  ;;  %v7216_v16 = vpop.f32.mrf.mxu1 }
 0x27a   : > { %7428 = vmatpush.bf16.msra.mxu2 %v10491_v39  ;;  %7441 = vmatpush.bf16.msra.mxu3 %v12539_v40  ;;  %v7204_v22 = vadd.f32 %v7203_v15, %v1471_v2  ;;  %v12732_v2 = vld [vmem:[%s14210_s9 + $0x16c] sm:$0xf0]  ;;  %v10498_v15 = vld [vmem:[%s14210_s9 + $0xe78] sm:$0xf] }
 0x27b   : > { %7454 = vmatpush.bf16.msrb.mxu0 %v10495_v43  ;;  %7467 = vmatpush.bf16.msrb.mxu1 %v12543_v44  ;;  %v9212_v44 = vld [vmem:[%s14210_s9 + $0x570] sm:$0xf0]  ;;  %v8699_v20 = vor.u32 %v12732_v2, %v8698_v0  ;;  %v13469_v0 = vld [vmem:[%s14210_s9 + $0x187c] sm:$0xf] }
 0x27c   : > { %7410 = vmatmul.bf16.vlgmr.msra.gmra.mxu0 %v14352_v50  ;;  %7423 = vmatmul.bf16.vlgmr.msra.gmra.mxu1 %v14354_v51  ;;  %v7217_v31 = vadd.f32 %v7216_v16, %v7204_v22  ;;  %v7177_v39 = vpop.f32.mrf.mxu2  ;;  %v7190_v40 = vpop.f32.mrf.mxu3  ;;  %v13181_v16 = vld [vmem:[%s14210_s9 + $0xf74] sm:$0xf0]  ;;  %v10500_v22 = vld [vmem:[%s14210_s9 + $0xf78] sm:$0xf0] }
 0x27d   : > { %v7178_v43 = vadd.f32 %v7177_v39, %v1470_v30  ;;  %v10499_v27 = vor.u32 %v13181_v16, %v10498_v15  ;;  %v13117_v30 = vld [vmem:[%s14210_s9 + $0xd74] sm:$0xf0]  ;;  %v9476_v15 = vld [vmem:[%s14210_s9 + $0x778] sm:$0xf0] }
 0x27e   : > { %7429 = vmatpush.bf16.msra.mxu2 %v10235_v53  ;;  %7442 = vmatpush.bf16.msra.mxu3 %v12283_v12  ;;  %8383 = vst [vmem:[%s14676_s10 + $0x98] sm:$0xff] %v7217_v31  ;;  %v11259_v53 = vor.u32 %v13372_v41, %v11258_v36  ;;  %v8954_v12 = vld [vmem:[%s14210_s9 + $0x270] sm:$0xf]  ;;  %v10503_v31 = vor.u32 %v13149_v19, %v10500_v22  ;;  %v10244_v36 = vld [vmem:[%s14210_s9 + $0xd78] sm:$0xf0] }
 0x27f   : > { %7455 = vmatpush.bf16.msrb.mxu0 %v10239_v56  ;;  %7468 = vmatpush.bf16.msrb.mxu1 %v12287_v57  ;;  %v7191_v47 = vadd.f32 %v7190_v40, %v7178_v43  ;;  %v9215_v56 = vor.u32 %v12828_v42, %v9212_v44  ;;  %v11263_v57 = vor.u32 %v13340_v45, %v11260_v46  ;;  %v9986_v41 = vld [vmem:[%s14210_s9 + $0xa78] sm:$0xf]  ;;  %v13405_v16 = vld [vmem:[%s14210_s9 + $0x167c] sm:$0xf] }
 0x280   : > { %v10243_v39 = vor.u32 %v13117_v30, %v10242_v29  ;;  %v13053_v42 = vld [vmem:[%s14210_s9 + $0xb74] sm:$0xf0]  ;;  %v10247_v43 = vor.u32 %v13085_v35, %v10244_v36  ;;  %v12829_v30 = vld [vmem:[%s14210_s9 + $0x47c] sm:$0xf] }
 0x281   : > { %v7205_v48 = vpop.f32.mrf.mxu0  ;;  %v7218_v49 = vpop.f32.mrf.mxu1  ;;  %8382 = vst [vmem:[%s14676_s10 + $0x90] sm:$0xff] %v7191_v47  ;;  %v12034_v45 = vld [vmem:[%s14210_s9 + $0x1a78] sm:$0xf]  ;;  %v13021_v47 = vld [vmem:[%s14210_s9 + $0xa7c] sm:$0xf] }
 0x282   : > { %7430 = vmatpush.bf16.msra.mxu2 %v9979_v1  ;;  %7443 = vmatpush.bf16.msra.mxu3 %v12027_v61  ;;  %v8955_v1 = vor.u32 %v12796_v54, %v8954_v12  ;;  %v11003_v61 = vor.u32 %v13308_v58, %v11002_v55  ;;  %v13565_v46 = vld [vmem:[%s14210_s9 + $0x1b74] sm:$0xf0]  ;;  %v9988_v48 = vld [vmem:[%s14210_s9 + $0xb78] sm:$0xf0]  ;;  %v1473_v54 = vperm.slane %v15170_v9, 5 }
 0x283   : > { %7456 = vmatpush.bf16.msrb.mxu0 %v9983_v5  ;;  %7469 = vmatpush.bf16.msrb.mxu1 %v12031_v6  ;;  %v8959_v5 = vor.u32 %v12764_v59, %v8956_v60  ;;  %v11007_v6 = vor.u32 %v13276_v62, %v11004_v63  ;;  %v13533_v49 = vld [vmem:[%s14210_s9 + $0x1a7c] sm:$0xf]  ;;  %v12035_v12 = vor.u32 %v13565_v46, %v12034_v45  ;;  %v9730_v55 = vld [vmem:[%s14210_s9 + $0x878] sm:$0xf] }
 0x284   : > { %v7179_v7 = vpop.f32.mrf.mxu2  ;;  %v7192_v8 = vpop.f32.mrf.mxu3  ;;  %v11778_v59 = vld [vmem:[%s14210_s9 + $0x1878] sm:$0xf]  ;;  %v12957_v62 = vld [vmem:[%s14210_s9 + $0x87c] sm:$0xf] }
 0x285   : > { %v13501_v60 = vld [vmem:[%s14210_s9 + $0x1974] sm:$0xf0]  ;;  %v9732_v63 = vld [vmem:[%s14210_s9 + $0x978] sm:$0xf0] }
 0x286   : > { %7431 = vmatpush.bf16.msra.mxu2 %v9723_v17  ;;  %7444 = vmatpush.bf16.msra.mxu3 %v11771_v18  ;;  %v12546_v17 = vld [vmem:[%s14210_s9 + $0x1e78] sm:$0xf]  ;;  %v11779_v4 = vor.u32 %v13501_v60, %v11778_v59  ;;  %v9735_v10 = vor.u32 %v12957_v62, %v9732_v63  ;;  %v12765_v46 = vld [vmem:[%s14210_s9 + $0x27c] sm:$0xf] }
 0x287   : > { %7457 = vmatpush.bf16.msrb.mxu0 %v9727_v23  ;;  %7470 = vmatpush.bf16.msrb.mxu1 %v11775_v24  ;;  %v13693_v18 = vld [vmem:[%s14210_s9 + $0x1f74] sm:$0xf0]  ;;  %v13661_v23 = vld [vmem:[%s14210_s9 + $0x1e7c] sm:$0xf] }
 0x288   : > { %v12548_v24 = vld [vmem:[%s14210_s9 + $0x1f78] sm:$0xf0]  ;;  %v12547_v28 = vor.u32 %v13693_v18, %v12546_v17  ;;  %v11522_v7 = vld [vmem:[%s14210_s9 + $0x1678] sm:$0xf]  ;;  %v1472_v18 = vperm.slane %v15170_v9, 4 }
 0x289   : > { %v11524_v17 = vld [vmem:[%s14210_s9 + $0x1778] sm:$0xf0]  ;;  %v9218_v22 = vld [vmem:[%s14210_s9 + $0x478] sm:$0xf] }
 0x28a   : > { %7432 = vmatpush.bf16.msra.mxu2 %v9467_v32  ;;  %7445 = vmatpush.bf16.msra.mxu3 %v11515_v33  ;;  %v12551_v32 = vor.u32 %v13661_v23, %v12548_v24  ;;  %v12290_v33 = vld [vmem:[%s14210_s9 + $0x1c78] sm:$0xf]  ;;  %v12701_v62 = vld [vmem:[%s14210_s9 + $0x7c] sm:$0xf] }
 0x28b   : > { %7458 = vmatpush.bf16.msrb.mxu0 %v9471_v37  ;;  %7471 = vmatpush.bf16.msrb.mxu1 %v11519_v38  ;;  %v13597_v37 = vld [vmem:[%s14210_s9 + $0x1c7c] sm:$0xf]  ;;  %v12291_v40 = vor.u32 %v13629_v34, %v12290_v33  ;;  %v12861_v23 = vld [vmem:[%s14210_s9 + $0x574] sm:$0xf0] }
 0x28c   : > { %v12292_v38 = vld [vmem:[%s14210_s9 + $0x1d78] sm:$0xf0]  ;;  %v11266_v24 = vld [vmem:[%s14210_s9 + $0x1478] sm:$0xf] }
 0x28d   : > { %v12295_v44 = vor.u32 %v13597_v37, %v12292_v38  ;;  %v13373_v29 = vld [vmem:[%s14210_s9 + $0x1574] sm:$0xf0]  ;;  %v13341_v33 = vld [vmem:[%s14210_s9 + $0x147c] sm:$0xf]  ;;  %v9219_v38 = vor.u32 %v12861_v23, %v9218_v22  ;;  %v13630_v22 = vld [vmem:[%s14210_s9 + $0x1d7c] sm:$0xf0] }
 0x28e   : > { %7433 = vmatpush.bf16.msra.mxu2 %v9211_v52  ;;  %7446 = vmatpush.bf16.msra.mxu3 %v11259_v53  ;;  %v12036_v52 = vld [vmem:[%s14210_s9 + $0x1b78] sm:$0xf0]  ;;  %v9987_v53 = vor.u32 %v13053_v42, %v9986_v41  ;;  %v12797_v41 = vld [vmem:[%s14210_s9 + $0x374] sm:$0xf0]  ;;  %v13086_v23 = vld [vmem:[%s14210_s9 + $0xc84] sm:$0xf] }
 0x28f   : > { %7459 = vmatpush.bf16.msrb.mxu0 %v9215_v56  ;;  %7472 = vmatpush.bf16.msrb.mxu1 %v11263_v57  ;;  %v12989_v56 = vld [vmem:[%s14210_s9 + $0x974] sm:$0xf0]  ;;  %v9991_v57 = vor.u32 %v13021_v47, %v9988_v48  ;;  %v12039_v58 = vor.u32 %v13533_v49, %v12036_v52  ;;  %v11268_v34 = vld [vmem:[%s14210_s9 + $0x1578] sm:$0xf0] }
 0x290   : > { %v9731_v3 = vor.u32 %v12989_v56, %v9730_v55  ;;  %v11010_v42 = vld [vmem:[%s14210_s9 + $0x1278] sm:$0xf]  ;;  %v8964_v47 = vld [vmem:[%s14210_s9 + $0x378] sm:$0xf0] }
 0x291   : > { %v13309_v45 = vld [vmem:[%s14210_s9 + $0x1374] sm:$0xf0]  ;;  %v13277_v48 = vld [vmem:[%s14210_s9 + $0x127c] sm:$0xf] }
 0x292   : > { %7434 = vmatpush.bf16.msra.mxu2 %v8955_v1  ;;  %7447 = vmatpush.bf16.msra.mxu3 %v11003_v61  ;;  %v11780_v1 = vld [vmem:[%s14210_s9 + $0x1978] sm:$0xf0]  ;;  %v8706_v52 = vld [vmem:[%s14210_s9 + $0x78] sm:$0xf] }
 0x293   : > { %7460 = vmatpush.bf16.msrb.mxu0 %v8959_v5  ;;  %7473 = vmatpush.bf16.msrb.mxu1 %v11007_v6  ;;  %v9474_v5 = vld [vmem:[%s14210_s9 + $0x678] sm:$0xf]  ;;  %v11783_v11 = vor.u32 %v13469_v0, %v11780_v1  ;;  %v11012_v49 = vld [vmem:[%s14210_s9 + $0x1378] sm:$0xf0] }
 0x294   : > { %v12925_v6 = vld [vmem:[%s14210_s9 + $0x774] sm:$0xf0]  ;;  %v8708_v63 = vld [vmem:[%s14210_s9 + $0x178] sm:$0xf0] }
 0x295   : > { %v10754_v55 = vld [vmem:[%s14210_s9 + $0x1078] sm:$0xf]  ;;  %v13213_v0 = vld [vmem:[%s14210_s9 + $0x107c] sm:$0xf] }
 0x296   : > { %7435 = vmatpush.bf16.msra.mxu2 %v8699_v20  ;;  %7448 = vmatpush.bf16.msra.mxu3 %v10747_v21  ;;  %v9475_v20 = vor.u32 %v12925_v6, %v9474_v5  ;;  %v11523_v21 = vor.u32 %v13437_v13, %v11522_v7  ;;  %v13245_v56 = vld [vmem:[%s14210_s9 + $0x1174] sm:$0xf0]  ;;  %v10756_v1 = vld [vmem:[%s14210_s9 + $0x1178] sm:$0xf0]  ;;  %v13150_v5 = vld [vmem:[%s14210_s9 + $0xe84] sm:$0xf]  ;;  %v8711_v13 = vor.u32 %v12701_v62, %v8708_v63 }
 0x297   : > { %7461 = vmatpush.bf16.msrb.mxu0 %v8703_v25  ;;  %7474 = vmatpush.bf16.msrb.mxu1 %v10751_v26  ;;  %v9479_v25 = vor.u32 %v12893_v14, %v9476_v15  ;;  %v11527_v26 = vor.u32 %v13405_v16, %v11524_v17  ;;  %v10755_v7 = vor.u32 %v13245_v56, %v10754_v55  ;;  %v10250_v17 = vld [vmem:[%s14210_s9 + $0xc80] sm:$0xf] }
 0x298   : > { %v10759_v14 = vor.u32 %v13213_v0, %v10756_v1  ;;  %v13438_v0 = vld [vmem:[%s14210_s9 + $0x177c] sm:$0xf0]  ;;  %v12894_v1 = vld [vmem:[%s14210_s9 + $0x684] sm:$0xf] }
 0x299   : > { %7436 = vmatmul.bf16.vlgmr.msra.gmra.mxu2 %v14352_v50  ;;  %7449 = vmatmul.bf16.vlgmr.msra.gmra.mxu3 %v14354_v51  ;;  %v7255_v61 = vpop.f32.mrf.mxu0  ;;  %v7268_v2 = vpop.f32.mrf.mxu1 }
 0x29a   : > { %7480 = vmatpush.bf16.msrb.mxu2 %v10499_v27  ;;  %7493 = vmatpush.bf16.msrb.mxu3 %v12547_v28  ;;  %v7256_v8 = vadd.f32 %v7255_v61, %v1473_v54  ;;  %v12733_v54 = vld [vmem:[%s14210_s9 + $0x174] sm:$0xf0]  ;;  %v10506_v61 = vld [vmem:[%s14210_s9 + $0xe80] sm:$0xf] }
 0x29b   : > { %7506 = vmatpush.bf16.msra.mxu0 %v10503_v31  ;;  %7519 = vmatpush.bf16.msra.mxu1 %v12551_v32  ;;  %v9220_v32 = vld [vmem:[%s14210_s9 + $0x578] sm:$0xf0]  ;;  %v8707_v6 = vor.u32 %v12733_v54, %v8706_v52  ;;  %v13470_v52 = vld [vmem:[%s14210_s9 + $0x1884] sm:$0xf] }
 0x29c   : > { %7462 = vmatmul.bf16.vlgmr.msrb.gmra.mxu0 %v14352_v50  ;;  %7475 = vmatmul.bf16.vlgmr.msrb.gmra.mxu1 %v14354_v51  ;;  %v7269_v19 = vadd.f32 %v7268_v2, %v7256_v8  ;;  %v7229_v27 = vpop.f32.mrf.mxu2  ;;  %v7242_v28 = vpop.f32.mrf.mxu3  ;;  %v13182_v2 = vld [vmem:[%s14210_s9 + $0xf7c] sm:$0xf0]  ;;  %v10508_v8 = vld [vmem:[%s14210_s9 + $0xf80] sm:$0xf0] }
 0x29d   : > { %v7230_v31 = vadd.f32 %v7229_v27, %v1472_v18  ;;  %v10507_v15 = vor.u32 %v13182_v2, %v10506_v61  ;;  %v13118_v18 = vld [vmem:[%s14210_s9 + $0xd7c] sm:$0xf0]  ;;  %v9484_v61 = vld [vmem:[%s14210_s9 + $0x780] sm:$0xf0] }
 0x29e   : > { %7481 = vmatpush.bf16.msrb.mxu2 %v10243_v39  ;;  %7494 = vmatpush.bf16.msrb.mxu3 %v12291_v40  ;;  %8385 = vst [vmem:[%s14676_s10 + $0xa8] sm:$0xff] %v7269_v19  ;;  %v11267_v39 = vor.u32 %v13373_v29, %v11266_v24  ;;  %v8962_v40 = vld [vmem:[%s14210_s9 + $0x278] sm:$0xf]  ;;  %v10511_v19 = vor.u32 %v13150_v5, %v10508_v8  ;;  %v10252_v24 = vld [vmem:[%s14210_s9 + $0xd80] sm:$0xf0] }
 0x29f   : > { %7507 = vmatpush.bf16.msra.mxu0 %v10247_v43  ;;  %7520 = vmatpush.bf16.msra.mxu1 %v12295_v44  ;;  %v7243_v35 = vadd.f32 %v7242_v28, %v7230_v31  ;;  %v9223_v43 = vor.u32 %v12829_v30, %v9220_v32  ;;  %v11271_v44 = vor.u32 %v13341_v33, %v11268_v34  ;;  %v9994_v29 = vld [vmem:[%s14210_s9 + $0xa80] sm:$0xf]  ;;  %v13406_v2 = vld [vmem:[%s14210_s9 + $0x1684] sm:$0xf] }
 0x2a0   : > { %v10251_v27 = vor.u32 %v13118_v18, %v10250_v17  ;;  %v13054_v30 = vld [vmem:[%s14210_s9 + $0xb7c] sm:$0xf0]  ;;  %v10255_v31 = vor.u32 %v13086_v23, %v10252_v24  ;;  %v12830_v17 = vld [vmem:[%s14210_s9 + $0x484] sm:$0xf] }
 0x2a1   : > { %v7257_v36 = vpop.f32.mrf.mxu0  ;;  %v7270_v37 = vpop.f32.mrf.mxu1  ;;  %8384 = vst [vmem:[%s14676_s10 + $0xa0] sm:$0xff] %v7243_v35  ;;  %v12042_v33 = vld [vmem:[%s14210_s9 + $0x1a80] sm:$0xf]  ;;  %v13022_v35 = vld [vmem:[%s14210_s9 + $0xa84] sm:$0xf] }
 0x2a2   : > { %7482 = vmatpush.bf16.msrb.mxu2 %v9987_v53  ;;  %7495 = vmatpush.bf16.msrb.mxu3 %v12035_v12  ;;  %v8963_v53 = vor.u32 %v12797_v41, %v8962_v40  ;;  %v11011_v12 = vor.u32 %v13309_v45, %v11010_v42  ;;  %v13566_v34 = vld [vmem:[%s14210_s9 + $0x1b7c] sm:$0xf0]  ;;  %v9996_v36 = vld [vmem:[%s14210_s9 + $0xb80] sm:$0xf0]  ;;  %v1475_v41 = vperm.slane %v15170_v9, 7 }
 0x2a3   : > { %7508 = vmatpush.bf16.msra.mxu0 %v9991_v57  ;;  %7521 = vmatpush.bf16.msra.mxu1 %v12039_v58  ;;  %v8967_v57 = vor.u32 %v12765_v46, %v8964_v47  ;;  %v11015_v58 = vor.u32 %v13277_v48, %v11012_v49  ;;  %v13534_v37 = vld [vmem:[%s14210_s9 + $0x1a84] sm:$0xf]  ;;  %v12043_v40 = vor.u32 %v13566_v34, %v12042_v33  ;;  %v9738_v42 = vld [vmem:[%s14210_s9 + $0x880] sm:$0xf] }
 0x2a4   : > { %v7231_v59 = vpop.f32.mrf.mxu2  ;;  %v7244_v60 = vpop.f32.mrf.mxu3  ;;  %v11786_v46 = vld [vmem:[%s14210_s9 + $0x1880] sm:$0xf]  ;;  %v12958_v48 = vld [vmem:[%s14210_s9 + $0x884] sm:$0xf] }
 0x2a5   : > { %v13502_v47 = vld [vmem:[%s14210_s9 + $0x197c] sm:$0xf0]  ;;  %v9740_v49 = vld [vmem:[%s14210_s9 + $0x980] sm:$0xf0] }
 0x2a6   : > { %7483 = vmatpush.bf16.msrb.mxu2 %v9731_v3  ;;  %7496 = vmatpush.bf16.msrb.mxu3 %v11779_v4  ;;  %v12554_v3 = vld [vmem:[%s14210_s9 + $0x1e80] sm:$0xf]  ;;  %v11787_v56 = vor.u32 %v13502_v47, %v11786_v46  ;;  %v9743_v62 = vor.u32 %v12958_v48, %v9740_v49  ;;  %v12766_v33 = vld [vmem:[%s14210_s9 + $0x284] sm:$0xf] }
 0x2a7   : > { %7509 = vmatpush.bf16.msra.mxu0 %v9735_v10  ;;  %7522 = vmatpush.bf16.msra.mxu1 %v11783_v11  ;;  %v13694_v4 = vld [vmem:[%s14210_s9 + $0x1f7c] sm:$0xf0]  ;;  %v13662_v10 = vld [vmem:[%s14210_s9 + $0x1e84] sm:$0xf] }
 0x2a8   : > { %v12556_v11 = vld [vmem:[%s14210_s9 + $0x1f80] sm:$0xf0]  ;;  %v12555_v16 = vor.u32 %v13694_v4, %v12554_v3  ;;  %v11530_v59 = vld [vmem:[%s14210_s9 + $0x1680] sm:$0xf]  ;;  %v1474_v4 = vperm.slane %v15170_v9, 6 }
 0x2a9   : > { %v11532_v3 = vld [vmem:[%s14210_s9 + $0x1780] sm:$0xf0]  ;;  %v9226_v8 = vld [vmem:[%s14210_s9 + $0x480] sm:$0xf] }
 0x2aa   : > { %7484 = vmatpush.bf16.msrb.mxu2 %v9475_v20  ;;  %7497 = vmatpush.bf16.msrb.mxu3 %v11523_v21  ;;  %v12559_v20 = vor.u32 %v13662_v10, %v12556_v11  ;;  %v12298_v21 = vld [vmem:[%s14210_s9 + $0x1c80] sm:$0xf]  ;;  %v8972_v34 = vld [vmem:[%s14210_s9 + $0x380] sm:$0xf0] }
 0x2ab   : > { %7510 = vmatpush.bf16.msra.mxu0 %v9479_v25  ;;  %7523 = vmatpush.bf16.msra.mxu1 %v11527_v26  ;;  %v13598_v25 = vld [vmem:[%s14210_s9 + $0x1c84] sm:$0xf]  ;;  %v12299_v28 = vor.u32 %v13630_v22, %v12298_v21  ;;  %v12862_v10 = vld [vmem:[%s14210_s9 + $0x57c] sm:$0xf0] }
 0x2ac   : > { %v12300_v26 = vld [vmem:[%s14210_s9 + $0x1d80] sm:$0xf0]  ;;  %v11274_v11 = vld [vmem:[%s14210_s9 + $0x1480] sm:$0xf] }
 0x2ad   : > { %v12303_v32 = vor.u32 %v13598_v25, %v12300_v26  ;;  %v11276_v21 = vld [vmem:[%s14210_s9 + $0x1580] sm:$0xf0]  ;;  %v9227_v25 = vor.u32 %v12862_v10, %v9226_v8  ;;  %v13087_v8 = vld [vmem:[%s14210_s9 + $0xc8c] sm:$0xf] }
 0x2ae   : > { %7485 = vmatpush.bf16.msrb.mxu2 %v9219_v38  ;;  %7498 = vmatpush.bf16.msrb.mxu3 %v11267_v39  ;;  %v12044_v38 = vld [vmem:[%s14210_s9 + $0x1b80] sm:$0xf0]  ;;  %v9995_v39 = vor.u32 %v13054_v30, %v9994_v29  ;;  %v11018_v29 = vld [vmem:[%s14210_s9 + $0x1280] sm:$0xf]  ;;  %v10260_v10 = vld [vmem:[%s14210_s9 + $0xd88] sm:$0xf0] }
 0x2af   : > { %7511 = vmatpush.bf16.msra.mxu0 %v9223_v43  ;;  %7524 = vmatpush.bf16.msra.mxu1 %v11271_v44  ;;  %v12990_v43 = vld [vmem:[%s14210_s9 + $0x97c] sm:$0xf0]  ;;  %v9999_v44 = vor.u32 %v13022_v35, %v9996_v36  ;;  %v12047_v45 = vor.u32 %v13534_v37, %v12044_v38  ;;  %v13278_v35 = vld [vmem:[%s14210_s9 + $0x1284] sm:$0xf] }
 0x2b0   : > { %v9739_v55 = vor.u32 %v12990_v43, %v9738_v42  ;;  %v11020_v36 = vld [vmem:[%s14210_s9 + $0x1380] sm:$0xf0]  ;;  %v8714_v37 = vld [vmem:[%s14210_s9 + $0x80] sm:$0xf]  ;;  %v8975_v43 = vor.u32 %v12766_v33, %v8972_v34  ;;  %v11794_v33 = vld [vmem:[%s14210_s9 + $0x1888] sm:$0xf] }
 0x2b1   : > { %v13246_v42 = vld [vmem:[%s14210_s9 + $0x117c] sm:$0xf0]  ;;  %v12702_v47 = vld [vmem:[%s14210_s9 + $0x84] sm:$0xf]  ;;  %v13503_v34 = vld [vmem:[%s14210_s9 + $0x1984] sm:$0xf0] }
 0x2b2   : > { %7486 = vmatpush.bf16.msrb.mxu2 %v8963_v53  ;;  %7499 = vmatpush.bf16.msrb.mxu3 %v11011_v12  ;;  %v11788_v53 = vld [vmem:[%s14210_s9 + $0x1980] sm:$0xf0] }
 0x2b3   : > { %7512 = vmatpush.bf16.msra.mxu0 %v8967_v57  ;;  %7525 = vmatpush.bf16.msra.mxu1 %v11015_v58  ;;  %v9482_v57 = vld [vmem:[%s14210_s9 + $0x680] sm:$0xf]  ;;  %v11791_v63 = vor.u32 %v13470_v52, %v11788_v53  ;;  %v8716_v48 = vld [vmem:[%s14210_s9 + $0x180] sm:$0xf0]  ;;  %v10514_v53 = vld [vmem:[%s14210_s9 + $0xe88] sm:$0xf] }
 0x2b4   : > { %v12926_v58 = vld [vmem:[%s14210_s9 + $0x77c] sm:$0xf0]  ;;  %v13214_v49 = vld [vmem:[%s14210_s9 + $0x1084] sm:$0xf] }
 0x2b5   : > { %v10764_v52 = vld [vmem:[%s14210_s9 + $0x1180] sm:$0xf0] }
 0x2b6   : > { %7487 = vmatpush.bf16.msrb.mxu2 %v8707_v6  ;;  %7500 = vmatpush.bf16.msrb.mxu3 %v10755_v7  ;;  %v9483_v6 = vor.u32 %v12926_v58, %v9482_v57  ;;  %v11531_v7 = vor.u32 %v13438_v0, %v11530_v59  ;;  %v10516_v59 = vld [vmem:[%s14210_s9 + $0xf88] sm:$0xf0]  ;;  %v10767_v0 = vor.u32 %v13214_v49, %v10764_v52  ;;  %v13439_v49 = vld [vmem:[%s14210_s9 + $0x1784] sm:$0xf0] }
 0x2b7   : > { %7513 = vmatpush.bf16.msra.mxu0 %v8711_v13  ;;  %7526 = vmatpush.bf16.msra.mxu1 %v10759_v14  ;;  %v9487_v13 = vor.u32 %v12894_v1, %v9484_v61  ;;  %v11535_v14 = vor.u32 %v13406_v2, %v11532_v3  ;;  %v10258_v2 = vld [vmem:[%s14210_s9 + $0xc88] sm:$0xf]  ;;  %v12895_v52 = vld [vmem:[%s14210_s9 + $0x68c] sm:$0xf] }
 0x2b8   : > { %v13119_v3 = vld [vmem:[%s14210_s9 + $0xd84] sm:$0xf0] }
 0x2b9   : > { %7488 = vmatmul.bf16.vlgmr.msrb.gmra.mxu2 %v14352_v50  ;;  %7501 = vmatmul.bf16.vlgmr.msrb.gmra.mxu3 %v14354_v51  ;;  %v7307_v12 = vpop.f32.mrf.mxu0  ;;  %v7320_v54 = vpop.f32.mrf.mxu1 }
 0x2ba   : > { %7532 = vmatpush.bf16.msra.mxu2 %v10507_v15  ;;  %7545 = vmatpush.bf16.msra.mxu3 %v12555_v16  ;;  %v7308_v60 = vadd.f32 %v7307_v12, %v1475_v41  ;;  %v13374_v16 = vld [vmem:[%s14210_s9 + $0x157c] sm:$0xf0]  ;;  %v13183_v12 = vld [vmem:[%s14210_s9 + $0xf84] sm:$0xf0] }
 0x2bb   : > { %7558 = vmatpush.bf16.msrb.mxu0 %v10511_v19  ;;  %7571 = vmatpush.bf16.msrb.mxu1 %v12559_v20  ;;  %v9228_v19 = vld [vmem:[%s14210_s9 + $0x580] sm:$0xf0]  ;;  %v11275_v26 = vor.u32 %v13374_v16, %v11274_v11  ;;  %v10762_v41 = vld [vmem:[%s14210_s9 + $0x1080] sm:$0xf]  ;;  %v10515_v1 = vor.u32 %v13183_v12, %v10514_v53  ;;  %v13599_v11 = vld [vmem:[%s14210_s9 + $0x1c8c] sm:$0xf] }
 0x2bc   : > { %7514 = vmatmul.bf16.vlgmr.msra.gmra.mxu0 %v14352_v50  ;;  %7527 = vmatmul.bf16.vlgmr.msra.gmra.mxu1 %v14354_v51  ;;  %v7321_v5 = vadd.f32 %v7320_v54, %v7308_v60  ;;  %v7281_v9 = vpop.f32.mrf.mxu2  ;;  %v7294_v15 = vpop.f32.mrf.mxu3  ;;  %v13342_v20 = vld [vmem:[%s14210_s9 + $0x1484] sm:$0xf]  ;;  %v9231_v30 = vor.u32 %v12830_v17, %v9228_v19  ;;  %v12562_v54 = vld [vmem:[%s14210_s9 + $0x1e88] sm:$0xf]  ;;  %v10763_v58 = vor.u32 %v13246_v42, %v10762_v41  ;;  %v13663_v60 = vld [vmem:[%s14210_s9 + $0x1e8c] sm:$0xf] }
 0x2bd   : > { %v7282_v18 = vadd.f32 %v7281_v9, %v1474_v4  ;;  %v13055_v16 = vld [vmem:[%s14210_s9 + $0xb84] sm:$0xf0]  ;;  %v11795_v42 = vor.u32 %v13503_v34, %v11794_v33  ;;  %v9492_v53 = vld [vmem:[%s14210_s9 + $0x788] sm:$0xf0] }
 0x2be   : > { %7533 = vmatpush.bf16.msra.mxu2 %v10251_v27  ;;  %7546 = vmatpush.bf16.msra.mxu3 %v12299_v28  ;;  %8387 = vst [vmem:[%s14676_s10 + $0xb8] sm:$0xff] %v7321_v5  ;;  %v8970_v27 = vld [vmem:[%s14210_s9 + $0x280] sm:$0xf]  ;;  %v12050_v17 = vld [vmem:[%s14210_s9 + $0x1a88] sm:$0xf] }
 0x2bf   : > { %7559 = vmatpush.bf16.msrb.mxu0 %v10255_v31  ;;  %7572 = vmatpush.bf16.msrb.mxu1 %v12303_v32  ;;  %v7295_v22 = vadd.f32 %v7294_v15, %v7282_v18  ;;  %v12798_v28 = vld [vmem:[%s14210_s9 + $0x37c] sm:$0xf0]  ;;  %v11279_v31 = vor.u32 %v13342_v20, %v11276_v21  ;;  %v10002_v15 = vld [vmem:[%s14210_s9 + $0xa88] sm:$0xf]  ;;  %v10263_v18 = vor.u32 %v13087_v8, %v10260_v10  ;;  %v13023_v21 = vld [vmem:[%s14210_s9 + $0xa8c] sm:$0xf] }
 0x2c0   : > { %v13310_v32 = vld [vmem:[%s14210_s9 + $0x137c] sm:$0xf0]  ;;  %v8971_v38 = vor.u32 %v12798_v28, %v8970_v27  ;;  %v13567_v20 = vld [vmem:[%s14210_s9 + $0x1b84] sm:$0xf0]  ;;  %v13407_v12 = vld [vmem:[%s14210_s9 + $0x168c] sm:$0xf] }
 0x2c1   : > { %v7309_v23 = vpop.f32.mrf.mxu0  ;;  %v7322_v24 = vpop.f32.mrf.mxu1  ;;  %8386 = vst [vmem:[%s14676_s10 + $0xb0] sm:$0xff] %v7295_v22  ;;  %v15461_v22 = vld [vmem:[%s14643_s30 + $0x18] sm:$0xff]  ;;  %v12051_v27 = vor.u32 %v13567_v20, %v12050_v17  ;;  %v12767_v20 = vld [vmem:[%s14210_s9 + $0x28c] sm:$0xf] }
 0x2c2   : > { %7534 = vmatpush.bf16.msra.mxu2 %v9995_v39  ;;  %7547 = vmatpush.bf16.msra.mxu3 %v12043_v40  ;;  %v11019_v39 = vor.u32 %v13310_v32, %v11018_v29  ;;  %v12734_v40 = vld [vmem:[%s14210_s9 + $0x17c] sm:$0xf0]  ;;  %v10004_v23 = vld [vmem:[%s14210_s9 + $0xb88] sm:$0xf0]  ;;  %v1477_v28 = vperm.slane %v15461_v22, 1 }
 0x2c3   : > { %7560 = vmatpush.bf16.msrb.mxu0 %v9999_v44  ;;  %7573 = vmatpush.bf16.msrb.mxu1 %v12047_v45  ;;  %v11023_v44 = vor.u32 %v13278_v35, %v11020_v36  ;;  %v8715_v57 = vor.u32 %v12734_v40, %v8714_v37  ;;  %v13535_v24 = vld [vmem:[%s14210_s9 + $0x1a8c] sm:$0xf]  ;;  %v9746_v29 = vld [vmem:[%s14210_s9 + $0x888] sm:$0xf] }
 0x2c4   : > { %v7283_v45 = vpop.f32.mrf.mxu2  ;;  %v7296_v46 = vpop.f32.mrf.mxu3  ;;  %v12959_v35 = vld [vmem:[%s14210_s9 + $0x88c] sm:$0xf] }
 0x2c5   : > { %v9748_v36 = vld [vmem:[%s14210_s9 + $0x988] sm:$0xf0]  ;;  %v11538_v45 = vld [vmem:[%s14210_s9 + $0x1688] sm:$0xf] }
 0x2c6   : > { %7535 = vmatpush.bf16.msra.mxu2 %v9739_v55  ;;  %7548 = vmatpush.bf16.msra.mxu3 %v11787_v56  ;;  %v13695_v55 = vld [vmem:[%s14210_s9 + $0x1f84] sm:$0xf0]  ;;  %v13151_v56 = vld [vmem:[%s14210_s9 + $0xe8c] sm:$0xf] }
 0x2c7   : > { %7561 = vmatpush.bf16.msrb.mxu0 %v9743_v62  ;;  %7574 = vmatpush.bf16.msrb.mxu1 %v11791_v63  ;;  %v12564_v62 = vld [vmem:[%s14210_s9 + $0x1f88] sm:$0xf0]  ;;  %v8719_v63 = vor.u32 %v12702_v47, %v8716_v48  ;;  %v12563_v61 = vor.u32 %v13695_v55, %v12562_v54  ;;  %v10519_v4 = vor.u32 %v13151_v56, %v10516_v59  ;;  %v1476_v55 = vperm.slane %v15461_v22, 0  ;;  %v9234_v59 = vld [vmem:[%s14210_s9 + $0x488] sm:$0xf] }
 0x2c8   : > { %v12567_v5 = vor.u32 %v13663_v60, %v12564_v62  ;;  %v13471_v37 = vld [vmem:[%s14210_s9 + $0x188c] sm:$0xf]  ;;  %v9751_v47 = vor.u32 %v12959_v35, %v9748_v36  ;;  %v12863_v60 = vld [vmem:[%s14210_s9 + $0x584] sm:$0xf0] }
 0x2c9   : > { %v11540_v54 = vld [vmem:[%s14210_s9 + $0x1788] sm:$0xf0]  ;;  %v11282_v62 = vld [vmem:[%s14210_s9 + $0x1488] sm:$0xf] }
 0x2ca   : > { %7536 = vmatpush.bf16.msra.mxu2 %v9483_v6  ;;  %7549 = vmatpush.bf16.msra.mxu3 %v11531_v7  ;;  %v12306_v6 = vld [vmem:[%s14210_s9 + $0x1c88] sm:$0xf]  ;;  %v12703_v35 = vld [vmem:[%s14210_s9 + $0x8c] sm:$0xf] }
 0x2cb   : > { %7562 = vmatpush.bf16.msrb.mxu0 %v9487_v13  ;;  %7575 = vmatpush.bf16.msrb.mxu1 %v11535_v14  ;;  %v13631_v7 = vld [vmem:[%s14210_s9 + $0x1d84] sm:$0xf0]  ;;  %v12308_v13 = vld [vmem:[%s14210_s9 + $0x1d88] sm:$0xf0]  ;;  %v10259_v14 = vor.u32 %v13119_v3, %v10258_v2 }
 0x2cc   : > { %v12307_v9 = vor.u32 %v13631_v7, %v12306_v6  ;;  %v12311_v19 = vor.u32 %v13599_v11, %v12308_v13  ;;  %v13375_v2 = vld [vmem:[%s14210_s9 + $0x1584] sm:$0xf0]  ;;  %v12831_v3 = vld [vmem:[%s14210_s9 + $0x48c] sm:$0xf]  ;;  %v9235_v13 = vor.u32 %v12863_v60, %v9234_v59  ;;  %v13632_v59 = vld [vmem:[%s14210_s9 + $0x1d8c] sm:$0xf0] }
 0x2cd   : > { %v13343_v6 = vld [vmem:[%s14210_s9 + $0x148c] sm:$0xf]  ;;  %v13088_v60 = vld [vmem:[%s14210_s9 + $0xc94] sm:$0xf] }
 0x2ce   : > { %7537 = vmatpush.bf16.msra.mxu2 %v9227_v25  ;;  %7550 = vmatpush.bf16.msra.mxu3 %v11275_v26  ;;  %v12052_v25 = vld [vmem:[%s14210_s9 + $0x1b88] sm:$0xf0]  ;;  %v10003_v26 = vor.u32 %v13055_v16, %v10002_v15  ;;  %v12799_v15 = vld [vmem:[%s14210_s9 + $0x384] sm:$0xf0] }
 0x2cf   : > { %7563 = vmatpush.bf16.msrb.mxu0 %v9231_v30  ;;  %7576 = vmatpush.bf16.msrb.mxu1 %v11279_v31  ;;  %v12991_v30 = vld [vmem:[%s14210_s9 + $0x984] sm:$0xf0]  ;;  %v10007_v31 = vor.u32 %v13023_v21, %v10004_v23  ;;  %v12055_v32 = vor.u32 %v13535_v24, %v12052_v25  ;;  %v11284_v7 = vld [vmem:[%s14210_s9 + $0x1588] sm:$0xf0] }
 0x2d0   : > { %v9747_v41 = vor.u32 %v12991_v30, %v9746_v29  ;;  %v11026_v16 = vld [vmem:[%s14210_s9 + $0x1288] sm:$0xf]  ;;  %v8980_v21 = vld [vmem:[%s14210_s9 + $0x388] sm:$0xf0] }
 0x2d1   : > { %v13279_v23 = vld [vmem:[%s14210_s9 + $0x128c] sm:$0xf]  ;;  %v8722_v25 = vld [vmem:[%s14210_s9 + $0x88] sm:$0xf] }
 0x2d2   : > { %7538 = vmatpush.bf16.msra.mxu2 %v8971_v38  ;;  %7551 = vmatpush.bf16.msra.mxu3 %v11019_v39  ;;  %v11796_v38 = vld [vmem:[%s14210_s9 + $0x1988] sm:$0xf0]  ;;  %v10770_v29 = vld [vmem:[%s14210_s9 + $0x1088] sm:$0xf] }
 0x2d3   : > { %7564 = vmatpush.bf16.msrb.mxu0 %v8975_v43  ;;  %7577 = vmatpush.bf16.msrb.mxu1 %v11023_v44  ;;  %v9490_v43 = vld [vmem:[%s14210_s9 + $0x688] sm:$0xf]  ;;  %v11799_v48 = vor.u32 %v13471_v37, %v11796_v38  ;;  %v11028_v24 = vld [vmem:[%s14210_s9 + $0x1388] sm:$0xf0] }
 0x2d4   : > { %v12927_v44 = vld [vmem:[%s14210_s9 + $0x784] sm:$0xf0]  ;;  %v8724_v36 = vld [vmem:[%s14210_s9 + $0x188] sm:$0xf0] }
 0x2d5   : > { %v13247_v30 = vld [vmem:[%s14210_s9 + $0x1184] sm:$0xf0]  ;;  %v13215_v37 = vld [vmem:[%s14210_s9 + $0x108c] sm:$0xf] }
 0x2d6   : > { %7539 = vmatpush.bf16.msra.mxu2 %v8715_v57  ;;  %7552 = vmatpush.bf16.msra.mxu3 %v10763_v58  ;;  %v9491_v57 = vor.u32 %v12927_v44, %v9490_v43  ;;  %v11539_v58 = vor.u32 %v13439_v49, %v11538_v45  ;;  %v10772_v38 = vld [vmem:[%s14210_s9 + $0x1188] sm:$0xf0]  ;;  %v13152_v43 = vld [vmem:[%s14210_s9 + $0xe94] sm:$0xf]  ;;  %v10771_v45 = vor.u32 %v13247_v30, %v10770_v29 }
 0x2d7   : > { %7565 = vmatpush.bf16.msrb.mxu0 %v8719_v63  ;;  %7578 = vmatpush.bf16.msrb.mxu1 %v10767_v0  ;;  %v9495_v63 = vor.u32 %v12895_v52, %v9492_v53  ;;  %v11543_v0 = vor.u32 %v13407_v12, %v11540_v54  ;;  %v8727_v49 = vor.u32 %v12703_v35, %v8724_v36  ;;  %v10266_v54 = vld [vmem:[%s14210_s9 + $0xc90] sm:$0xf] }
 0x2d8   : > { %v10775_v52 = vor.u32 %v13215_v37, %v10772_v38  ;;  %v13440_v37 = vld [vmem:[%s14210_s9 + $0x178c] sm:$0xf0]  ;;  %v12896_v38 = vld [vmem:[%s14210_s9 + $0x694] sm:$0xf] }
 0x2d9   : > { %7540 = vmatmul.bf16.vlgmr.msra.gmra.mxu2 %v14352_v50  ;;  %7553 = vmatmul.bf16.vlgmr.msra.gmra.mxu3 %v14354_v51  ;;  %v7359_v39 = vpop.f32.mrf.mxu0  ;;  %v7372_v40 = vpop.f32.mrf.mxu1 }
 0x2da   : > { %7584 = vmatpush.bf16.msrb.mxu2 %v10515_v1  ;;  %7597 = vmatpush.bf16.msrb.mxu3 %v12563_v61  ;;  %v7360_v46 = vadd.f32 %v7359_v39, %v1477_v28  ;;  %v12735_v28 = vld [vmem:[%s14210_s9 + $0x184] sm:$0xf0]  ;;  %v10522_v39 = vld [vmem:[%s14210_s9 + $0xe90] sm:$0xf] }
 0x2db   : > { %7610 = vmatpush.bf16.msra.mxu0 %v10519_v4  ;;  %7623 = vmatpush.bf16.msra.mxu1 %v12567_v5  ;;  %v9236_v5 = vld [vmem:[%s14210_s9 + $0x588] sm:$0xf0]  ;;  %v8723_v44 = vor.u32 %v12735_v28, %v8722_v25  ;;  %v13472_v25 = vld [vmem:[%s14210_s9 + $0x1894] sm:$0xf] }
 0x2dc   : > { %7566 = vmatmul.bf16.vlgmr.msrb.gmra.mxu0 %v14352_v50  ;;  %7579 = vmatmul.bf16.vlgmr.msrb.gmra.mxu1 %v14354_v51  ;;  %v7373_v56 = vadd.f32 %v7372_v40, %v7360_v46  ;;  %v7333_v1 = vpop.f32.mrf.mxu2  ;;  %v7346_v61 = vpop.f32.mrf.mxu3  ;;  %v9239_v17 = vor.u32 %v12831_v3, %v9236_v5  ;;  %v13184_v40 = vld [vmem:[%s14210_s9 + $0xf8c] sm:$0xf0]  ;;  %v10524_v46 = vld [vmem:[%s14210_s9 + $0xf90] sm:$0xf0] }
 0x2dd   : > { %v7334_v4 = vadd.f32 %v7333_v1, %v1476_v55  ;;  %v10523_v53 = vor.u32 %v13184_v40, %v10522_v39  ;;  %v13120_v55 = vld [vmem:[%s14210_s9 + $0xd8c] sm:$0xf0]  ;;  %v9500_v39 = vld [vmem:[%s14210_s9 + $0x790] sm:$0xf0] }
 0x2de   : > { %7585 = vmatpush.bf16.msrb.mxu2 %v10259_v14  ;;  %7598 = vmatpush.bf16.msrb.mxu3 %v12307_v9  ;;  %8389 = vst [vmem:[%s14676_s10 + $0xc8] sm:$0xff] %v7373_v56  ;;  %v11283_v14 = vor.u32 %v13375_v2, %v11282_v62  ;;  %v8978_v9 = vld [vmem:[%s14210_s9 + $0x288] sm:$0xf]  ;;  %v10527_v56 = vor.u32 %v13152_v43, %v10524_v46  ;;  %v10268_v62 = vld [vmem:[%s14210_s9 + $0xd90] sm:$0xf0] }
 0x2df   : > { %7611 = vmatpush.bf16.msra.mxu0 %v10263_v18  ;;  %7624 = vmatpush.bf16.msra.mxu1 %v12311_v19  ;;  %v7347_v8 = vadd.f32 %v7346_v61, %v7334_v4  ;;  %v11287_v18 = vor.u32 %v13343_v6, %v11284_v7  ;;  %v13311_v19 = vld [vmem:[%s14210_s9 + $0x1384] sm:$0xf0]  ;;  %v10267_v1 = vor.u32 %v13120_v55, %v10266_v54  ;;  %v10010_v2 = vld [vmem:[%s14210_s9 + $0xa90] sm:$0xf]  ;;  %v13408_v40 = vld [vmem:[%s14210_s9 + $0x1694] sm:$0xf] }
 0x2e0   : > { %v13056_v3 = vld [vmem:[%s14210_s9 + $0xb8c] sm:$0xf0]  ;;  %v10271_v4 = vor.u32 %v13088_v60, %v10268_v62  ;;  %v12832_v55 = vld [vmem:[%s14210_s9 + $0x494] sm:$0xf] }
 0x2e1   : > { %v7361_v10 = vpop.f32.mrf.mxu0  ;;  %v7374_v11 = vpop.f32.mrf.mxu1  ;;  %8388 = vst [vmem:[%s14676_s10 + $0xc0] sm:$0xff] %v7347_v8  ;;  %v12058_v6 = vld [vmem:[%s14210_s9 + $0x1a90] sm:$0xf]  ;;  %v13024_v8 = vld [vmem:[%s14210_s9 + $0xa94] sm:$0xf] }
 0x2e2   : > { %7586 = vmatpush.bf16.msrb.mxu2 %v10003_v26  ;;  %7599 = vmatpush.bf16.msrb.mxu3 %v12051_v27  ;;  %v8979_v26 = vor.u32 %v12799_v15, %v8978_v9  ;;  %v11027_v27 = vor.u32 %v13311_v19, %v11026_v16  ;;  %v13568_v7 = vld [vmem:[%s14210_s9 + $0x1b8c] sm:$0xf0]  ;;  %v10012_v10 = vld [vmem:[%s14210_s9 + $0xb90] sm:$0xf0]  ;;  %v1479_v15 = vperm.slane %v15461_v22, 3 }
 0x2e3   : > { %7612 = vmatpush.bf16.msra.mxu0 %v10007_v31  ;;  %7625 = vmatpush.bf16.msra.mxu1 %v12055_v32  ;;  %v8983_v31 = vor.u32 %v12767_v20, %v8980_v21  ;;  %v11031_v32 = vor.u32 %v13279_v23, %v11028_v24  ;;  %v13536_v11 = vld [vmem:[%s14210_s9 + $0x1a94] sm:$0xf]  ;;  %v12059_v9 = vor.u32 %v13568_v7, %v12058_v6  ;;  %v9754_v16 = vld [vmem:[%s14210_s9 + $0x890] sm:$0xf] }
 0x2e4   : > { %v7335_v33 = vpop.f32.mrf.mxu2  ;;  %v7348_v34 = vpop.f32.mrf.mxu3  ;;  %v11802_v20 = vld [vmem:[%s14210_s9 + $0x1890] sm:$0xf]  ;;  %v12960_v23 = vld [vmem:[%s14210_s9 + $0x894] sm:$0xf] }
 0x2e5   : > { %v13504_v21 = vld [vmem:[%s14210_s9 + $0x198c] sm:$0xf0]  ;;  %v9756_v24 = vld [vmem:[%s14210_s9 + $0x990] sm:$0xf0] }
 0x2e6   : > { %7587 = vmatpush.bf16.msrb.mxu2 %v9747_v41  ;;  %7600 = vmatpush.bf16.msrb.mxu3 %v11795_v42  ;;  %v12570_v41 = vld [vmem:[%s14210_s9 + $0x1e90] sm:$0xf]  ;;  %v11803_v30 = vor.u32 %v13504_v21, %v11802_v20  ;;  %v9759_v35 = vor.u32 %v12960_v23, %v9756_v24  ;;  %v12768_v7 = vld [vmem:[%s14210_s9 + $0x294] sm:$0xf] }
 0x2e7   : > { %7613 = vmatpush.bf16.msra.mxu0 %v9751_v47  ;;  %7626 = vmatpush.bf16.msra.mxu1 %v11799_v48  ;;  %v13696_v42 = vld [vmem:[%s14210_s9 + $0x1f8c] sm:$0xf0]  ;;  %v13664_v47 = vld [vmem:[%s14210_s9 + $0x1e94] sm:$0xf] }
 0x2e8   : > { %v12572_v48 = vld [vmem:[%s14210_s9 + $0x1f90] sm:$0xf0]  ;;  %v12571_v12 = vor.u32 %v13696_v42, %v12570_v41  ;;  %v11546_v33 = vld [vmem:[%s14210_s9 + $0x1690] sm:$0xf]  ;;  %v1478_v42 = vperm.slane %v15461_v22, 2 }
 0x2e9   : > { %v11548_v41 = vld [vmem:[%s14210_s9 + $0x1790] sm:$0xf0]  ;;  %v9242_v46 = vld [vmem:[%s14210_s9 + $0x490] sm:$0xf] }
 0x2ea   : > { %7588 = vmatpush.bf16.msrb.mxu2 %v9491_v57  ;;  %7601 = vmatpush.bf16.msrb.mxu3 %v11539_v58  ;;  %v12575_v57 = vor.u32 %v13664_v47, %v12572_v48  ;;  %v12314_v58 = vld [vmem:[%s14210_s9 + $0x1c90] sm:$0xf]  ;;  %v12704_v23 = vld [vmem:[%s14210_s9 + $0x94] sm:$0xf] }
 0x2eb   : > { %7614 = vmatpush.bf16.msra.mxu0 %v9495_v63  ;;  %7627 = vmatpush.bf16.msra.mxu1 %v11543_v0  ;;  %v13600_v63 = vld [vmem:[%s14210_s9 + $0x1c94] sm:$0xf]  ;;  %v12315_v61 = vor.u32 %v13632_v59, %v12314_v58  ;;  %v12864_v47 = vld [vmem:[%s14210_s9 + $0x58c] sm:$0xf0] }
 0x2ec   : > { %v12316_v0 = vld [vmem:[%s14210_s9 + $0x1d90] sm:$0xf0]  ;;  %v11290_v48 = vld [vmem:[%s14210_s9 + $0x1490] sm:$0xf] }
 0x2ed   : > { %v12319_v5 = vor.u32 %v13600_v63, %v12316_v0  ;;  %v13376_v54 = vld [vmem:[%s14210_s9 + $0x158c] sm:$0xf0]  ;;  %v13344_v58 = vld [vmem:[%s14210_s9 + $0x1494] sm:$0xf]  ;;  %v9243_v0 = vor.u32 %v12864_v47, %v9242_v46  ;;  %v13633_v46 = vld [vmem:[%s14210_s9 + $0x1d94] sm:$0xf0] }
 0x2ee   : > { %7589 = vmatpush.bf16.msrb.mxu2 %v9235_v13  ;;  %7602 = vmatpush.bf16.msrb.mxu3 %v11283_v14  ;;  %v12060_v13 = vld [vmem:[%s14210_s9 + $0x1b90] sm:$0xf0]  ;;  %v10011_v14 = vor.u32 %v13056_v3, %v10010_v2  ;;  %v12800_v2 = vld [vmem:[%s14210_s9 + $0x38c] sm:$0xf0]  ;;  %v13089_v47 = vld [vmem:[%s14210_s9 + $0xc9c] sm:$0xf] }
 0x2ef   : > { %7615 = vmatpush.bf16.msra.mxu0 %v9239_v17  ;;  %7628 = vmatpush.bf16.msra.mxu1 %v11287_v18  ;;  %v12992_v17 = vld [vmem:[%s14210_s9 + $0x98c] sm:$0xf0]  ;;  %v10015_v18 = vor.u32 %v13024_v8, %v10012_v10  ;;  %v12063_v19 = vor.u32 %v13536_v11, %v12060_v13  ;;  %v11292_v59 = vld [vmem:[%s14210_s9 + $0x1590] sm:$0xf0] }
 0x2f0   : > { %v9755_v29 = vor.u32 %v12992_v17, %v9754_v16  ;;  %v11034_v3 = vld [vmem:[%s14210_s9 + $0x1290] sm:$0xf]  ;;  %v8988_v8 = vld [vmem:[%s14210_s9 + $0x390] sm:$0xf0] }
 0x2f1   : > { %v13312_v6 = vld [vmem:[%s14210_s9 + $0x138c] sm:$0xf0]  ;;  %v13280_v10 = vld [vmem:[%s14210_s9 + $0x1294] sm:$0xf] }
 0x2f2   : > { %7590 = vmatpush.bf16.msrb.mxu2 %v8979_v26  ;;  %7603 = vmatpush.bf16.msrb.mxu3 %v11027_v27  ;;  %v11804_v26 = vld [vmem:[%s14210_s9 + $0x1990] sm:$0xf0]  ;;  %v8730_v13 = vld [vmem:[%s14210_s9 + $0x90] sm:$0xf] }
 0x2f3   : > { %7616 = vmatpush.bf16.msra.mxu0 %v8983_v31  ;;  %7629 = vmatpush.bf16.msra.mxu1 %v11031_v32  ;;  %v9498_v31 = vld [vmem:[%s14210_s9 + $0x690] sm:$0xf]  ;;  %v11807_v36 = vor.u32 %v13472_v25, %v11804_v26  ;;  %v11036_v11 = vld [vmem:[%s14210_s9 + $0x1390] sm:$0xf0] }
 0x2f4   : > { %v12928_v32 = vld [vmem:[%s14210_s9 + $0x78c] sm:$0xf0]  ;;  %v8732_v24 = vld [vmem:[%s14210_s9 + $0x190] sm:$0xf0] }
 0x2f5   : > { %v10778_v16 = vld [vmem:[%s14210_s9 + $0x1090] sm:$0xf]  ;;  %v13216_v25 = vld [vmem:[%s14210_s9 + $0x1094] sm:$0xf] }
 0x2f6   : > { %7591 = vmatpush.bf16.msrb.mxu2 %v8723_v44  ;;  %7604 = vmatpush.bf16.msrb.mxu3 %v10771_v45  ;;  %v9499_v44 = vor.u32 %v12928_v32, %v9498_v31  ;;  %v11547_v45 = vor.u32 %v13440_v37, %v11546_v33  ;;  %v13248_v17 = vld [vmem:[%s14210_s9 + $0x118c] sm:$0xf0]  ;;  %v10780_v26 = vld [vmem:[%s14210_s9 + $0x1190] sm:$0xf0]  ;;  %v13153_v31 = vld [vmem:[%s14210_s9 + $0xe9c] sm:$0xf]  ;;  %v8735_v37 = vor.u32 %v12704_v23, %v8732_v24 }
 0x2f7   : > { %7617 = vmatpush.bf16.msra.mxu0 %v8727_v49  ;;  %7630 = vmatpush.bf16.msra.mxu1 %v10775_v52  ;;  %v9503_v49 = vor.u32 %v12896_v38, %v9500_v39  ;;  %v11551_v52 = vor.u32 %v13408_v40, %v11548_v41  ;;  %v10779_v33 = vor.u32 %v13248_v17, %v10778_v16  ;;  %v10274_v41 = vld [vmem:[%s14210_s9 + $0xc98] sm:$0xf] }
 0x2f8   : > { %v10783_v38 = vor.u32 %v13216_v25, %v10780_v26  ;;  %v13441_v25 = vld [vmem:[%s14210_s9 + $0x1794] sm:$0xf0]  ;;  %v12897_v26 = vld [vmem:[%s14210_s9 + $0x69c] sm:$0xf] }
 0x2f9   : > { %7592 = vmatmul.bf16.vlgmr.msrb.gmra.mxu2 %v14352_v50  ;;  %7605 = vmatmul.bf16.vlgmr.msrb.gmra.mxu3 %v14354_v51  ;;  %v7411_v27 = vpop.f32.mrf.mxu0  ;;  %v7424_v28 = vpop.f32.mrf.mxu1 }
 0x2fa   : > { %7636 = vmatpush.bf16.msra.mxu2 %v10523_v53  ;;  %7649 = vmatpush.bf16.msra.mxu3 %v12571_v12  ;;  %v7412_v34 = vadd.f32 %v7411_v27, %v1479_v15  ;;  %v12736_v15 = vld [vmem:[%s14210_s9 + $0x18c] sm:$0xf0]  ;;  %v10530_v27 = vld [vmem:[%s14210_s9 + $0xe98] sm:$0xf] }
 0x2fb   : > { %7662 = vmatpush.bf16.msrb.mxu0 %v10527_v56  ;;  %7675 = vmatpush.bf16.msrb.mxu1 %v12575_v57  ;;  %v9244_v57 = vld [vmem:[%s14210_s9 + $0x590] sm:$0xf0]  ;;  %v8731_v32 = vor.u32 %v12736_v15, %v8730_v13  ;;  %v13473_v13 = vld [vmem:[%s14210_s9 + $0x189c] sm:$0xf] }
 0x2fc   : > { %7618 = vmatmul.bf16.vlgmr.msra.gmra.mxu0 %v14352_v50  ;;  %7631 = vmatmul.bf16.vlgmr.msra.gmra.mxu1 %v14354_v51  ;;  %v7425_v43 = vadd.f32 %v7424_v28, %v7412_v34  ;;  %v7385_v53 = vpop.f32.mrf.mxu2  ;;  %v7398_v12 = vpop.f32.mrf.mxu3  ;;  %v13185_v28 = vld [vmem:[%s14210_s9 + $0xf94] sm:$0xf0]  ;;  %v10532_v34 = vld [vmem:[%s14210_s9 + $0xf98] sm:$0xf0] }
 0x2fd   : > { %v7386_v56 = vadd.f32 %v7385_v53, %v1478_v42  ;;  %v10531_v39 = vor.u32 %v13185_v28, %v10530_v27  ;;  %v13121_v42 = vld [vmem:[%s14210_s9 + $0xd94] sm:$0xf0]  ;;  %v9508_v27 = vld [vmem:[%s14210_s9 + $0x798] sm:$0xf0] }
 0x2fe   : > { %7637 = vmatpush.bf16.msra.mxu2 %v10267_v1  ;;  %7650 = vmatpush.bf16.msra.mxu3 %v12315_v61  ;;  %8391 = vst [vmem:[%s14676_s10 + $0xd8] sm:$0xff] %v7425_v43  ;;  %v11291_v1 = vor.u32 %v13376_v54, %v11290_v48  ;;  %v8986_v61 = vld [vmem:[%s14210_s9 + $0x290] sm:$0xf]  ;;  %v10535_v43 = vor.u32 %v13153_v31, %v10532_v34  ;;  %v10276_v48 = vld [vmem:[%s14210_s9 + $0xd98] sm:$0xf0] }
 0x2ff   : > { %7663 = vmatpush.bf16.msrb.mxu0 %v10271_v4  ;;  %7676 = vmatpush.bf16.msrb.mxu1 %v12319_v5  ;;  %v7399_v60 = vadd.f32 %v7398_v12, %v7386_v56  ;;  %v9247_v4 = vor.u32 %v12832_v55, %v9244_v57  ;;  %v11295_v5 = vor.u32 %v13344_v58, %v11292_v59  ;;  %v10018_v54 = vld [vmem:[%s14210_s9 + $0xa98] sm:$0xf]  ;;  %v13409_v28 = vld [vmem:[%s14210_s9 + $0x169c] sm:$0xf] }
 0x300   : > { %v10275_v53 = vor.u32 %v13121_v42, %v10274_v41  ;;  %v13057_v55 = vld [vmem:[%s14210_s9 + $0xb94] sm:$0xf0]  ;;  %v10279_v56 = vor.u32 %v13089_v47, %v10276_v48  ;;  %v12833_v42 = vld [vmem:[%s14210_s9 + $0x49c] sm:$0xf] }
 0x301   : > { %v7413_v62 = vpop.f32.mrf.mxu0  ;;  %v7426_v63 = vpop.f32.mrf.mxu1  ;;  %8390 = vst [vmem:[%s14676_s10 + $0xd0] sm:$0xff] %v7399_v60  ;;  %v12066_v58 = vld [vmem:[%s14210_s9 + $0x1a98] sm:$0xf]  ;;  %v13025_v60 = vld [vmem:[%s14210_s9 + $0xa9c] sm:$0xf] }
 0x302   : > { %7638 = vmatpush.bf16.msra.mxu2 %v10011_v14  ;;  %7651 = vmatpush.bf16.msra.mxu3 %v12059_v9  ;;  %v8987_v14 = vor.u32 %v12800_v2, %v8986_v61  ;;  %v11035_v9 = vor.u32 %v13312_v6, %v11034_v3  ;;  %v13569_v59 = vld [vmem:[%s14210_s9 + $0x1b94] sm:$0xf0]  ;;  %v10020_v62 = vld [vmem:[%s14210_s9 + $0xb98] sm:$0xf0]  ;;  %v1481_v2 = vperm.slane %v15461_v22, 5 }
 0x303   : > { %7664 = vmatpush.bf16.msrb.mxu0 %v10015_v18  ;;  %7677 = vmatpush.bf16.msrb.mxu1 %v12063_v19  ;;  %v8991_v18 = vor.u32 %v12768_v7, %v8988_v8  ;;  %v11039_v19 = vor.u32 %v13280_v10, %v11036_v11  ;;  %v13537_v63 = vld [vmem:[%s14210_s9 + $0x1a9c] sm:$0xf]  ;;  %v12067_v61 = vor.u32 %v13569_v59, %v12066_v58  ;;  %v9762_v3 = vld [vmem:[%s14210_s9 + $0x898] sm:$0xf] }
 0x304   : > { %v7387_v20 = vpop.f32.mrf.mxu2  ;;  %v7400_v21 = vpop.f32.mrf.mxu3  ;;  %v11810_v7 = vld [vmem:[%s14210_s9 + $0x1898] sm:$0xf]  ;;  %v12961_v10 = vld [vmem:[%s14210_s9 + $0x89c] sm:$0xf] }
 0x305   : > { %v13505_v8 = vld [vmem:[%s14210_s9 + $0x1994] sm:$0xf0]  ;;  %v9764_v11 = vld [vmem:[%s14210_s9 + $0x998] sm:$0xf0] }
 0x306   : > { %7639 = vmatpush.bf16.msra.mxu2 %v9755_v29  ;;  %7652 = vmatpush.bf16.msra.mxu3 %v11803_v30  ;;  %v12578_v29 = vld [vmem:[%s14210_s9 + $0x1e98] sm:$0xf]  ;;  %v11811_v17 = vor.u32 %v13505_v8, %v11810_v7  ;;  %v9767_v23 = vor.u32 %v12961_v10, %v9764_v11  ;;  %v12769_v59 = vld [vmem:[%s14210_s9 + $0x29c] sm:$0xf] }
 0x307   : > { %7665 = vmatpush.bf16.msrb.mxu0 %v9759_v35  ;;  %7678 = vmatpush.bf16.msrb.mxu1 %v11807_v36  ;;  %v13697_v30 = vld [vmem:[%s14210_s9 + $0x1f94] sm:$0xf0]  ;;  %v13665_v35 = vld [vmem:[%s14210_s9 + $0x1e9c] sm:$0xf] }
 0x308   : > { %v12580_v36 = vld [vmem:[%s14210_s9 + $0x1f98] sm:$0xf0]  ;;  %v12579_v40 = vor.u32 %v13697_v30, %v12578_v29  ;;  %v11554_v20 = vld [vmem:[%s14210_s9 + $0x1698] sm:$0xf]  ;;  %v1480_v30 = vperm.slane %v15461_v22, 4 }
 0x309   : > { %v11556_v29 = vld [vmem:[%s14210_s9 + $0x1798] sm:$0xf0]  ;;  %v9250_v34 = vld [vmem:[%s14210_s9 + $0x498] sm:$0xf] }
 0x30a   : > { %7640 = vmatpush.bf16.msra.mxu2 %v9499_v44  ;;  %7653 = vmatpush.bf16.msra.mxu3 %v11547_v45  ;;  %v12583_v44 = vor.u32 %v13665_v35, %v12580_v36  ;;  %v12322_v45 = vld [vmem:[%s14210_s9 + $0x1c98] sm:$0xf]  ;;  %v12705_v10 = vld [vmem:[%s14210_s9 + $0x9c] sm:$0xf] }
 0x30b   : > { %7666 = vmatpush.bf16.msrb.mxu0 %v9503_v49  ;;  %7679 = vmatpush.bf16.msrb.mxu1 %v11551_v52  ;;  %v13601_v49 = vld [vmem:[%s14210_s9 + $0x1c9c] sm:$0xf]  ;;  %v12323_v12 = vor.u32 %v13633_v46, %v12322_v45  ;;  %v12865_v35 = vld [vmem:[%s14210_s9 + $0x594] sm:$0xf0] }
 0x30c   : > { %v12324_v52 = vld [vmem:[%s14210_s9 + $0x1d98] sm:$0xf0]  ;;  %v11298_v36 = vld [vmem:[%s14210_s9 + $0x1498] sm:$0xf] }
 0x30d   : > { %v12327_v57 = vor.u32 %v13601_v49, %v12324_v52  ;;  %v13377_v41 = vld [vmem:[%s14210_s9 + $0x1594] sm:$0xf0]  ;;  %v13345_v45 = vld [vmem:[%s14210_s9 + $0x149c] sm:$0xf]  ;;  %v9251_v52 = vor.u32 %v12865_v35, %v9250_v34  ;;  %v13634_v34 = vld [vmem:[%s14210_s9 + $0x1d9c] sm:$0xf0] }
 0x30e   : > { %7641 = vmatpush.bf16.msra.mxu2 %v9243_v0  ;;  %7654 = vmatpush.bf16.msra.mxu3 %v11291_v1  ;;  %v12068_v0 = vld [vmem:[%s14210_s9 + $0x1b98] sm:$0xf0]  ;;  %v10019_v1 = vor.u32 %v13057_v55, %v10018_v54  ;;  %v12801_v54 = vld [vmem:[%s14210_s9 + $0x394] sm:$0xf0]  ;;  %v13090_v35 = vld [vmem:[%s14210_s9 + $0xca4] sm:$0xf] }
 0x30f   : > { %7667 = vmatpush.bf16.msrb.mxu0 %v9247_v4  ;;  %7680 = vmatpush.bf16.msrb.mxu1 %v11295_v5  ;;  %v12993_v4 = vld [vmem:[%s14210_s9 + $0x994] sm:$0xf0]  ;;  %v10023_v5 = vor.u32 %v13025_v60, %v10020_v62  ;;  %v12071_v6 = vor.u32 %v13537_v63, %v12068_v0  ;;  %v11300_v46 = vld [vmem:[%s14210_s9 + $0x1598] sm:$0xf0] }
 0x310   : > { %v9763_v16 = vor.u32 %v12993_v4, %v9762_v3  ;;  %v11042_v55 = vld [vmem:[%s14210_s9 + $0x1298] sm:$0xf]  ;;  %v8996_v60 = vld [vmem:[%s14210_s9 + $0x398] sm:$0xf0] }
 0x311   : > { %v13313_v58 = vld [vmem:[%s14210_s9 + $0x1394] sm:$0xf0]  ;;  %v13281_v62 = vld [vmem:[%s14210_s9 + $0x129c] sm:$0xf] }
 0x312   : > { %7642 = vmatpush.bf16.msra.mxu2 %v8987_v14  ;;  %7655 = vmatpush.bf16.msra.mxu3 %v11035_v9  ;;  %v11812_v14 = vld [vmem:[%s14210_s9 + $0x1998] sm:$0xf0]  ;;  %v8738_v0 = vld [vmem:[%s14210_s9 + $0x98] sm:$0xf] }
 0x313   : > { %7668 = vmatpush.bf16.msrb.mxu0 %v8991_v18  ;;  %7681 = vmatpush.bf16.msrb.mxu1 %v11039_v19  ;;  %v9506_v18 = vld [vmem:[%s14210_s9 + $0x698] sm:$0xf]  ;;  %v11815_v24 = vor.u32 %v13473_v13, %v11812_v14  ;;  %v11044_v63 = vld [vmem:[%s14210_s9 + $0x1398] sm:$0xf0] }
 0x314   : > { %v12929_v19 = vld [vmem:[%s14210_s9 + $0x794] sm:$0xf0]  ;;  %v8740_v11 = vld [vmem:[%s14210_s9 + $0x198] sm:$0xf0] }
 0x315   : > { %v10786_v3 = vld [vmem:[%s14210_s9 + $0x1098] sm:$0xf]  ;;  %v13217_v13 = vld [vmem:[%s14210_s9 + $0x109c] sm:$0xf] }
 0x316   : > { %7643 = vmatpush.bf16.msra.mxu2 %v8731_v32  ;;  %7656 = vmatpush.bf16.msra.mxu3 %v10779_v33  ;;  %v9507_v32 = vor.u32 %v12929_v19, %v9506_v18  ;;  %v11555_v33 = vor.u32 %v13441_v25, %v11554_v20  ;;  %v13249_v4 = vld [vmem:[%s14210_s9 + $0x1194] sm:$0xf0]  ;;  %v10788_v14 = vld [vmem:[%s14210_s9 + $0x1198] sm:$0xf0]  ;;  %v13154_v18 = vld [vmem:[%s14210_s9 + $0xea4] sm:$0xf]  ;;  %v8743_v25 = vor.u32 %v12705_v10, %v8740_v11 }
 0x317   : > { %7669 = vmatpush.bf16.msrb.mxu0 %v8735_v37  ;;  %7682 = vmatpush.bf16.msrb.mxu1 %v10783_v38  ;;  %v9511_v37 = vor.u32 %v12897_v26, %v9508_v27  ;;  %v11559_v38 = vor.u32 %v13409_v28, %v11556_v29  ;;  %v10787_v20 = vor.u32 %v13249_v4, %v10786_v3  ;;  %v10282_v29 = vld [vmem:[%s14210_s9 + $0xca0] sm:$0xf] }
 0x318   : > { %v10791_v26 = vor.u32 %v13217_v13, %v10788_v14  ;;  %v13442_v13 = vld [vmem:[%s14210_s9 + $0x179c] sm:$0xf0]  ;;  %v12898_v14 = vld [vmem:[%s14210_s9 + $0x6a4] sm:$0xf] }
 0x319   : > { %7644 = vmatmul.bf16.vlgmr.msra.gmra.mxu2 %v14352_v50  ;;  %7657 = vmatmul.bf16.vlgmr.msra.gmra.mxu3 %v14354_v51  ;;  %v7463_v9 = vpop.f32.mrf.mxu0  ;;  %v7476_v15 = vpop.f32.mrf.mxu1 }
 0x31a   : > { %7688 = vmatpush.bf16.msrb.mxu2 %v10531_v39  ;;  %7701 = vmatpush.bf16.msrb.mxu3 %v12579_v40  ;;  %v7464_v21 = vadd.f32 %v7463_v9, %v1481_v2  ;;  %v12737_v2 = vld [vmem:[%s14210_s9 + $0x194] sm:$0xf0]  ;;  %v10538_v9 = vld [vmem:[%s14210_s9 + $0xea0] sm:$0xf] }
 0x31b   : > { %7714 = vmatpush.bf16.msra.mxu0 %v10535_v43  ;;  %7727 = vmatpush.bf16.msra.mxu1 %v12583_v44  ;;  %v9252_v44 = vld [vmem:[%s14210_s9 + $0x598] sm:$0xf0]  ;;  %v8739_v19 = vor.u32 %v12737_v2, %v8738_v0  ;;  %v13474_v0 = vld [vmem:[%s14210_s9 + $0x18a4] sm:$0xf] }
 0x31c   : > { %7670 = vmatmul.bf16.vlgmr.msrb.gmra.mxu0 %v14352_v50  ;;  %7683 = vmatmul.bf16.vlgmr.msrb.gmra.mxu1 %v14354_v51  ;;  %v7477_v31 = vadd.f32 %v7476_v15, %v7464_v21  ;;  %v7437_v39 = vpop.f32.mrf.mxu2  ;;  %v7450_v40 = vpop.f32.mrf.mxu3  ;;  %v13186_v15 = vld [vmem:[%s14210_s9 + $0xf9c] sm:$0xf0]  ;;  %v10540_v21 = vld [vmem:[%s14210_s9 + $0xfa0] sm:$0xf0] }
 0x31d   : > { %v7438_v43 = vadd.f32 %v7437_v39, %v1480_v30  ;;  %v10539_v27 = vor.u32 %v13186_v15, %v10538_v9  ;;  %v13122_v30 = vld [vmem:[%s14210_s9 + $0xd9c] sm:$0xf0]  ;;  %v9516_v9 = vld [vmem:[%s14210_s9 + $0x7a0] sm:$0xf0] }
 0x31e   : > { %7689 = vmatpush.bf16.msrb.mxu2 %v10275_v53  ;;  %7702 = vmatpush.bf16.msrb.mxu3 %v12323_v12  ;;  %8393 = vst [vmem:[%s14676_s10 + $0xe8] sm:$0xff] %v7477_v31  ;;  %v11299_v53 = vor.u32 %v13377_v41, %v11298_v36  ;;  %v8994_v12 = vld [vmem:[%s14210_s9 + $0x298] sm:$0xf]  ;;  %v10543_v31 = vor.u32 %v13154_v18, %v10540_v21  ;;  %v10284_v36 = vld [vmem:[%s14210_s9 + $0xda0] sm:$0xf0] }
 0x31f   : > { %7715 = vmatpush.bf16.msra.mxu0 %v10279_v56  ;;  %7728 = vmatpush.bf16.msra.mxu1 %v12327_v57  ;;  %v7451_v47 = vadd.f32 %v7450_v40, %v7438_v43  ;;  %v9255_v56 = vor.u32 %v12833_v42, %v9252_v44  ;;  %v11303_v57 = vor.u32 %v13345_v45, %v11300_v46  ;;  %v10026_v41 = vld [vmem:[%s14210_s9 + $0xaa0] sm:$0xf]  ;;  %v13410_v15 = vld [vmem:[%s14210_s9 + $0x16a4] sm:$0xf] }
 0x320   : > { %v10283_v39 = vor.u32 %v13122_v30, %v10282_v29  ;;  %v13058_v42 = vld [vmem:[%s14210_s9 + $0xb9c] sm:$0xf0]  ;;  %v10287_v43 = vor.u32 %v13090_v35, %v10284_v36  ;;  %v12834_v29 = vld [vmem:[%s14210_s9 + $0x4a4] sm:$0xf] }
 0x321   : > { %v7465_v48 = vpop.f32.mrf.mxu0  ;;  %v7478_v49 = vpop.f32.mrf.mxu1  ;;  %8392 = vst [vmem:[%s14676_s10 + $0xe0] sm:$0xff] %v7451_v47  ;;  %v12074_v45 = vld [vmem:[%s14210_s9 + $0x1aa0] sm:$0xf]  ;;  %v13026_v47 = vld [vmem:[%s14210_s9 + $0xaa4] sm:$0xf] }
 0x322   : > { %7690 = vmatpush.bf16.msrb.mxu2 %v10019_v1  ;;  %7703 = vmatpush.bf16.msrb.mxu3 %v12067_v61  ;;  %v8995_v1 = vor.u32 %v12801_v54, %v8994_v12  ;;  %v11043_v61 = vor.u32 %v13313_v58, %v11042_v55  ;;  %v13570_v46 = vld [vmem:[%s14210_s9 + $0x1b9c] sm:$0xf0]  ;;  %v10028_v48 = vld [vmem:[%s14210_s9 + $0xba0] sm:$0xf0]  ;;  %v1483_v54 = vperm.slane %v15461_v22, 7 }
 0x323   : > { %7716 = vmatpush.bf16.msra.mxu0 %v10023_v5  ;;  %7729 = vmatpush.bf16.msra.mxu1 %v12071_v6  ;;  %v8999_v5 = vor.u32 %v12769_v59, %v8996_v60  ;;  %v11047_v6 = vor.u32 %v13281_v62, %v11044_v63  ;;  %v13538_v49 = vld [vmem:[%s14210_s9 + $0x1aa4] sm:$0xf]  ;;  %v12075_v12 = vor.u32 %v13570_v46, %v12074_v45  ;;  %v9770_v55 = vld [vmem:[%s14210_s9 + $0x8a0] sm:$0xf] }
 0x324   : > { %v7439_v7 = vpop.f32.mrf.mxu2  ;;  %v7452_v8 = vpop.f32.mrf.mxu3  ;;  %v11818_v59 = vld [vmem:[%s14210_s9 + $0x18a0] sm:$0xf]  ;;  %v12962_v62 = vld [vmem:[%s14210_s9 + $0x8a4] sm:$0xf] }
 0x325   : > { %v13506_v60 = vld [vmem:[%s14210_s9 + $0x199c] sm:$0xf0]  ;;  %v9772_v63 = vld [vmem:[%s14210_s9 + $0x9a0] sm:$0xf0] }
 0x326   : > { %7691 = vmatpush.bf16.msrb.mxu2 %v9763_v16  ;;  %7704 = vmatpush.bf16.msrb.mxu3 %v11811_v17  ;;  %v12586_v16 = vld [vmem:[%s14210_s9 + $0x1ea0] sm:$0xf]  ;;  %v11819_v4 = vor.u32 %v13506_v60, %v11818_v59  ;;  %v9775_v10 = vor.u32 %v12962_v62, %v9772_v63  ;;  %v12770_v45 = vld [vmem:[%s14210_s9 + $0x2a4] sm:$0xf] }
 0x327   : > { %7717 = vmatpush.bf16.msra.mxu0 %v9767_v23  ;;  %7730 = vmatpush.bf16.msra.mxu1 %v11815_v24  ;;  %v13698_v17 = vld [vmem:[%s14210_s9 + $0x1f9c] sm:$0xf0]  ;;  %v13666_v23 = vld [vmem:[%s14210_s9 + $0x1ea4] sm:$0xf] }
 0x328   : > { %v12588_v24 = vld [vmem:[%s14210_s9 + $0x1fa0] sm:$0xf0]  ;;  %v12587_v28 = vor.u32 %v13698_v17, %v12586_v16  ;;  %v11562_v7 = vld [vmem:[%s14210_s9 + $0x16a0] sm:$0xf]  ;;  %v1482_v17 = vperm.slane %v15461_v22, 6 }
 0x329   : > { %v11564_v16 = vld [vmem:[%s14210_s9 + $0x17a0] sm:$0xf0]  ;;  %v9258_v21 = vld [vmem:[%s14210_s9 + $0x4a0] sm:$0xf] }
 0x32a   : > { %7692 = vmatpush.bf16.msrb.mxu2 %v9507_v32  ;;  %7705 = vmatpush.bf16.msrb.mxu3 %v11555_v33  ;;  %v12591_v32 = vor.u32 %v13666_v23, %v12588_v24  ;;  %v12330_v33 = vld [vmem:[%s14210_s9 + $0x1ca0] sm:$0xf]  ;;  %v9004_v46 = vld [vmem:[%s14210_s9 + $0x3a0] sm:$0xf0] }
 0x32b   : > { %7718 = vmatpush.bf16.msra.mxu0 %v9511_v37  ;;  %7731 = vmatpush.bf16.msra.mxu1 %v11559_v38  ;;  %v13602_v37 = vld [vmem:[%s14210_s9 + $0x1ca4] sm:$0xf]  ;;  %v12331_v40 = vor.u32 %v13634_v34, %v12330_v33  ;;  %v12866_v23 = vld [vmem:[%s14210_s9 + $0x59c] sm:$0xf0] }
 0x32c   : > { %v12332_v38 = vld [vmem:[%s14210_s9 + $0x1da0] sm:$0xf0]  ;;  %v11306_v24 = vld [vmem:[%s14210_s9 + $0x14a0] sm:$0xf] }
 0x32d   : > { %v12335_v44 = vor.u32 %v13602_v37, %v12332_v38  ;;  %v11308_v33 = vld [vmem:[%s14210_s9 + $0x15a0] sm:$0xf0]  ;;  %v9259_v37 = vor.u32 %v12866_v23, %v9258_v21  ;;  %v13091_v21 = vld [vmem:[%s14210_s9 + $0xcac] sm:$0xf] }
 0x32e   : > { %7693 = vmatpush.bf16.msrb.mxu2 %v9251_v52  ;;  %7706 = vmatpush.bf16.msrb.mxu3 %v11299_v53  ;;  %v12076_v52 = vld [vmem:[%s14210_s9 + $0x1ba0] sm:$0xf0]  ;;  %v10027_v53 = vor.u32 %v13058_v42, %v10026_v41  ;;  %v11050_v41 = vld [vmem:[%s14210_s9 + $0x12a0] sm:$0xf]  ;;  %v10292_v23 = vld [vmem:[%s14210_s9 + $0xda8] sm:$0xf0] }
 0x32f   : > { %7719 = vmatpush.bf16.msra.mxu0 %v9255_v56  ;;  %7732 = vmatpush.bf16.msra.mxu1 %v11303_v57  ;;  %v12994_v56 = vld [vmem:[%s14210_s9 + $0x99c] sm:$0xf0]  ;;  %v10031_v57 = vor.u32 %v13026_v47, %v10028_v48  ;;  %v12079_v58 = vor.u32 %v13538_v49, %v12076_v52  ;;  %v13282_v47 = vld [vmem:[%s14210_s9 + $0x12a4] sm:$0xf] }
 0x330   : > { %v9771_v3 = vor.u32 %v12994_v56, %v9770_v55  ;;  %v11052_v48 = vld [vmem:[%s14210_s9 + $0x13a0] sm:$0xf0]  ;;  %v8746_v49 = vld [vmem:[%s14210_s9 + $0xa0] sm:$0xf]  ;;  %v9007_v56 = vor.u32 %v12770_v45, %v9004_v46  ;;  %v11826_v45 = vld [vmem:[%s14210_s9 + $0x18a8] sm:$0xf] }
 0x331   : > { %v13250_v55 = vld [vmem:[%s14210_s9 + $0x119c] sm:$0xf0]  ;;  %v12706_v60 = vld [vmem:[%s14210_s9 + $0xa4] sm:$0xf]  ;;  %v13507_v46 = vld [vmem:[%s14210_s9 + $0x19a4] sm:$0xf0] }
 0x332   : > { %7694 = vmatpush.bf16.msrb.mxu2 %v8995_v1  ;;  %7707 = vmatpush.bf16.msrb.mxu3 %v11043_v61  ;;  %v11820_v1 = vld [vmem:[%s14210_s9 + $0x19a0] sm:$0xf0] }
 0x333   : > { %7720 = vmatpush.bf16.msra.mxu0 %v8999_v5  ;;  %7733 = vmatpush.bf16.msra.mxu1 %v11047_v6  ;;  %v9514_v5 = vld [vmem:[%s14210_s9 + $0x6a0] sm:$0xf]  ;;  %v11823_v11 = vor.u32 %v13474_v0, %v11820_v1  ;;  %v8748_v62 = vld [vmem:[%s14210_s9 + $0x1a0] sm:$0xf0]  ;;  %v10546_v1 = vld [vmem:[%s14210_s9 + $0xea8] sm:$0xf] }
 0x334   : > { %v12930_v6 = vld [vmem:[%s14210_s9 + $0x79c] sm:$0xf0]  ;;  %v13218_v63 = vld [vmem:[%s14210_s9 + $0x10a4] sm:$0xf] }
 0x335   : > { %v10796_v0 = vld [vmem:[%s14210_s9 + $0x11a0] sm:$0xf0] }
 0x336   : > { %7695 = vmatpush.bf16.msrb.mxu2 %v8739_v19  ;;  %7708 = vmatpush.bf16.msrb.mxu3 %v10787_v20  ;;  %v9515_v19 = vor.u32 %v12930_v6, %v9514_v5  ;;  %v11563_v20 = vor.u32 %v13442_v13, %v11562_v7  ;;  %v10548_v7 = vld [vmem:[%s14210_s9 + $0xfa8] sm:$0xf0]  ;;  %v10799_v13 = vor.u32 %v13218_v63, %v10796_v0  ;;  %v13443_v63 = vld [vmem:[%s14210_s9 + $0x17a4] sm:$0xf0] }
 0x337   : > { %7721 = vmatpush.bf16.msra.mxu0 %v8743_v25  ;;  %7734 = vmatpush.bf16.msra.mxu1 %v10791_v26  ;;  %v9519_v25 = vor.u32 %v12898_v14, %v9516_v9  ;;  %v11567_v26 = vor.u32 %v13410_v15, %v11564_v16  ;;  %v10290_v15 = vld [vmem:[%s14210_s9 + $0xca8] sm:$0xf]  ;;  %v12899_v0 = vld [vmem:[%s14210_s9 + $0x6ac] sm:$0xf] }
 0x338   : > { %v13123_v16 = vld [vmem:[%s14210_s9 + $0xda4] sm:$0xf0] }
 0x339   : > { %7696 = vmatmul.bf16.vlgmr.msrb.gmra.mxu2 %v14352_v50  ;;  %7709 = vmatmul.bf16.vlgmr.msrb.gmra.mxu3 %v14354_v51  ;;  %v7515_v61 = vpop.f32.mrf.mxu0  ;;  %v7528_v2 = vpop.f32.mrf.mxu1 }
 0x33a   : > { %7740 = vmatpush.bf16.msra.mxu2 %v10539_v27  ;;  %7753 = vmatpush.bf16.msra.mxu3 %v12587_v28  ;;  %v7516_v8 = vadd.f32 %v7515_v61, %v1483_v54  ;;  %v13378_v28 = vld [vmem:[%s14210_s9 + $0x159c] sm:$0xf0]  ;;  %v13187_v61 = vld [vmem:[%s14210_s9 + $0xfa4] sm:$0xf0] }
 0x33b   : > { %7766 = vmatpush.bf16.msrb.mxu0 %v10543_v31  ;;  %7779 = vmatpush.bf16.msrb.mxu1 %v12591_v32  ;;  %v9260_v31 = vld [vmem:[%s14210_s9 + $0x5a0] sm:$0xf0]  ;;  %v11307_v38 = vor.u32 %v13378_v28, %v11306_v24  ;;  %v10794_v54 = vld [vmem:[%s14210_s9 + $0x10a0] sm:$0xf]  ;;  %v10547_v14 = vor.u32 %v13187_v61, %v10546_v1  ;;  %v13603_v24 = vld [vmem:[%s14210_s9 + $0x1cac] sm:$0xf] }
 0x33c   : > { %7722 = vmatmul.bf16.vlgmr.msra.gmra.mxu0 %v14352_v50  ;;  %7735 = vmatmul.bf16.vlgmr.msra.gmra.mxu1 %v14354_v51  ;;  %v7529_v18 = vadd.f32 %v7528_v2, %v7516_v8  ;;  %v7489_v22 = vpop.f32.mrf.mxu2  ;;  %v7502_v27 = vpop.f32.mrf.mxu3  ;;  %v13346_v32 = vld [vmem:[%s14210_s9 + $0x14a4] sm:$0xf]  ;;  %v9263_v42 = vor.u32 %v12834_v29, %v9260_v31  ;;  %v12594_v2 = vld [vmem:[%s14210_s9 + $0x1ea8] sm:$0xf]  ;;  %v10795_v6 = vor.u32 %v13250_v55, %v10794_v54  ;;  %v13667_v8 = vld [vmem:[%s14210_s9 + $0x1eac] sm:$0xf] }
 0x33d   : > { %v7490_v30 = vadd.f32 %v7489_v22, %v1482_v17  ;;  %v13059_v28 = vld [vmem:[%s14210_s9 + $0xba4] sm:$0xf0]  ;;  %v11827_v55 = vor.u32 %v13507_v46, %v11826_v45  ;;  %v9524_v1 = vld [vmem:[%s14210_s9 + $0x7a8] sm:$0xf0] }
 0x33e   : > { %7741 = vmatpush.bf16.msra.mxu2 %v10283_v39  ;;  %7754 = vmatpush.bf16.msra.mxu3 %v12331_v40  ;;  %8395 = vst [vmem:[%s14676_s10 + $0xf8] sm:$0xff] %v7529_v18  ;;  %v9002_v39 = vld [vmem:[%s14210_s9 + $0x2a0] sm:$0xf]  ;;  %v12082_v29 = vld [vmem:[%s14210_s9 + $0x1aa8] sm:$0xf] }
 0x33f   : > { %7767 = vmatpush.bf16.msrb.mxu0 %v10287_v43  ;;  %7780 = vmatpush.bf16.msrb.mxu1 %v12335_v44  ;;  %v7503_v34 = vadd.f32 %v7502_v27, %v7490_v30  ;;  %v12802_v40 = vld [vmem:[%s14210_s9 + $0x39c] sm:$0xf0]  ;;  %v11311_v43 = vor.u32 %v13346_v32, %v11308_v33  ;;  %v10034_v27 = vld [vmem:[%s14210_s9 + $0xaa8] sm:$0xf]  ;;  %v10295_v30 = vor.u32 %v13091_v21, %v10292_v23  ;;  %v13027_v33 = vld [vmem:[%s14210_s9 + $0xaac] sm:$0xf] }
 0x340   : > { %v13314_v44 = vld [vmem:[%s14210_s9 + $0x139c] sm:$0xf0]  ;;  %v9003_v52 = vor.u32 %v12802_v40, %v9002_v39  ;;  %v13571_v32 = vld [vmem:[%s14210_s9 + $0x1ba4] sm:$0xf0]  ;;  %v13411_v61 = vld [vmem:[%s14210_s9 + $0x16ac] sm:$0xf] }
 0x341   : > { %v7517_v35 = vpop.f32.mrf.mxu0  ;;  %v7530_v36 = vpop.f32.mrf.mxu1  ;;  %8394 = vst [vmem:[%s14676_s10 + $0xf0] sm:$0xff] %v7503_v34  ;;  %v15752_v34 = vld [vmem:[%s14643_s30 + $0x20] sm:$0xff]  ;;  %v12083_v39 = vor.u32 %v13571_v32, %v12082_v29  ;;  %v12771_v32 = vld [vmem:[%s14210_s9 + $0x2ac] sm:$0xf] }
 0x342   : > { %7742 = vmatpush.bf16.msra.mxu2 %v10027_v53  ;;  %7755 = vmatpush.bf16.msra.mxu3 %v12075_v12  ;;  %v11051_v53 = vor.u32 %v13314_v44, %v11050_v41  ;;  %v12738_v12 = vld [vmem:[%s14210_s9 + $0x19c] sm:$0xf0]  ;;  %v10036_v35 = vld [vmem:[%s14210_s9 + $0xba8] sm:$0xf0]  ;;  %v1485_v40 = vperm.slane %v15752_v34, 1 }
 0x343   : > { %7768 = vmatpush.bf16.msrb.mxu0 %v10031_v57  ;;  %7781 = vmatpush.bf16.msrb.mxu1 %v12079_v58  ;;  %v11055_v57 = vor.u32 %v13282_v47, %v11052_v48  ;;  %v8747_v5 = vor.u32 %v12738_v12, %v8746_v49  ;;  %v13539_v36 = vld [vmem:[%s14210_s9 + $0x1aac] sm:$0xf]  ;;  %v9778_v41 = vld [vmem:[%s14210_s9 + $0x8a8] sm:$0xf] }
 0x344   : > { %v7491_v58 = vpop.f32.mrf.mxu2  ;;  %v7504_v59 = vpop.f32.mrf.mxu3  ;;  %v12963_v47 = vld [vmem:[%s14210_s9 + $0x8ac] sm:$0xf] }
 0x345   : > { %v9780_v48 = vld [vmem:[%s14210_s9 + $0x9a8] sm:$0xf0]  ;;  %v11570_v58 = vld [vmem:[%s14210_s9 + $0x16a8] sm:$0xf] }
 0x346   : > { %7743 = vmatpush.bf16.msra.mxu2 %v9771_v3  ;;  %7756 = vmatpush.bf16.msra.mxu3 %v11819_v4  ;;  %v13699_v3 = vld [vmem:[%s14210_s9 + $0x1fa4] sm:$0xf0]  ;;  %v13155_v4 = vld [vmem:[%s14210_s9 + $0xeac] sm:$0xf] }
 0x347   : > { %7769 = vmatpush.bf16.msrb.mxu0 %v9775_v10  ;;  %7782 = vmatpush.bf16.msrb.mxu1 %v11823_v11  ;;  %v12596_v10 = vld [vmem:[%s14210_s9 + $0x1fa8] sm:$0xf0]  ;;  %v8751_v11 = vor.u32 %v12706_v60, %v8748_v62  ;;  %v12595_v9 = vor.u32 %v13699_v3, %v12594_v2  ;;  %v10551_v17 = vor.u32 %v13155_v4, %v10548_v7  ;;  %v1484_v3 = vperm.slane %v15752_v34, 0  ;;  %v9266_v7 = vld [vmem:[%s14210_s9 + $0x4a8] sm:$0xf] }
 0x348   : > { %v12599_v18 = vor.u32 %v13667_v8, %v12596_v10  ;;  %v13475_v49 = vld [vmem:[%s14210_s9 + $0x18ac] sm:$0xf]  ;;  %v9783_v60 = vor.u32 %v12963_v47, %v9780_v48  ;;  %v12867_v8 = vld [vmem:[%s14210_s9 + $0x5a4] sm:$0xf0] }
 0x349   : > { %v11572_v2 = vld [vmem:[%s14210_s9 + $0x17a8] sm:$0xf0]  ;;  %v11314_v10 = vld [vmem:[%s14210_s9 + $0x14a8] sm:$0xf] }
 0x34a   : > { %7744 = vmatpush.bf16.msra.mxu2 %v9515_v19  ;;  %7757 = vmatpush.bf16.msra.mxu3 %v11563_v20  ;;  %v12338_v19 = vld [vmem:[%s14210_s9 + $0x1ca8] sm:$0xf]  ;;  %v12707_v47 = vld [vmem:[%s14210_s9 + $0xac] sm:$0xf] }
 0x34b   : > { %7770 = vmatpush.bf16.msrb.mxu0 %v9519_v25  ;;  %7783 = vmatpush.bf16.msrb.mxu1 %v11567_v26  ;;  %v13635_v20 = vld [vmem:[%s14210_s9 + $0x1da4] sm:$0xf0]  ;;  %v12340_v25 = vld [vmem:[%s14210_s9 + $0x1da8] sm:$0xf0]  ;;  %v10291_v26 = vor.u32 %v13123_v16, %v10290_v15 }
 0x34c   : > { %v12339_v22 = vor.u32 %v13635_v20, %v12338_v19  ;;  %v12343_v31 = vor.u32 %v13603_v24, %v12340_v25  ;;  %v13379_v15 = vld [vmem:[%s14210_s9 + $0x15a4] sm:$0xf0]  ;;  %v12835_v16 = vld [vmem:[%s14210_s9 + $0x4ac] sm:$0xf]  ;;  %v9267_v25 = vor.u32 %v12867_v8, %v9266_v7  ;;  %v13636_v7 = vld [vmem:[%s14210_s9 + $0x1dac] sm:$0xf0] }
 0x34d   : > { %v13347_v19 = vld [vmem:[%s14210_s9 + $0x14ac] sm:$0xf]  ;;  %v13092_v8 = vld [vmem:[%s14210_s9 + $0xcb4] sm:$0xf] }
 0x34e   : > { %7745 = vmatpush.bf16.msra.mxu2 %v9259_v37  ;;  %7758 = vmatpush.bf16.msra.mxu3 %v11307_v38  ;;  %v12084_v37 = vld [vmem:[%s14210_s9 + $0x1ba8] sm:$0xf0]  ;;  %v10035_v38 = vor.u32 %v13059_v28, %v10034_v27  ;;  %v12803_v27 = vld [vmem:[%s14210_s9 + $0x3a4] sm:$0xf0] }
 0x34f   : > { %7771 = vmatpush.bf16.msrb.mxu0 %v9263_v42  ;;  %7784 = vmatpush.bf16.msrb.mxu1 %v11311_v43  ;;  %v12995_v42 = vld [vmem:[%s14210_s9 + $0x9a4] sm:$0xf0]  ;;  %v10039_v43 = vor.u32 %v13027_v33, %v10036_v35  ;;  %v12087_v44 = vor.u32 %v13539_v36, %v12084_v37  ;;  %v11316_v20 = vld [vmem:[%s14210_s9 + $0x15a8] sm:$0xf0] }
 0x350   : > { %v9779_v54 = vor.u32 %v12995_v42, %v9778_v41  ;;  %v11058_v28 = vld [vmem:[%s14210_s9 + $0x12a8] sm:$0xf]  ;;  %v9012_v33 = vld [vmem:[%s14210_s9 + $0x3a8] sm:$0xf0] }
 0x351   : > { %v13283_v35 = vld [vmem:[%s14210_s9 + $0x12ac] sm:$0xf]  ;;  %v8754_v37 = vld [vmem:[%s14210_s9 + $0xa8] sm:$0xf] }
 0x352   : > { %7746 = vmatpush.bf16.msra.mxu2 %v9003_v52  ;;  %7759 = vmatpush.bf16.msra.mxu3 %v11051_v53  ;;  %v11828_v52 = vld [vmem:[%s14210_s9 + $0x19a8] sm:$0xf0]  ;;  %v10802_v41 = vld [vmem:[%s14210_s9 + $0x10a8] sm:$0xf] }
 0x353   : > { %7772 = vmatpush.bf16.msrb.mxu0 %v9007_v56  ;;  %7785 = vmatpush.bf16.msrb.mxu1 %v11055_v57  ;;  %v9522_v56 = vld [vmem:[%s14210_s9 + $0x6a8] sm:$0xf]  ;;  %v11831_v62 = vor.u32 %v13475_v49, %v11828_v52  ;;  %v11060_v36 = vld [vmem:[%s14210_s9 + $0x13a8] sm:$0xf0] }
 0x354   : > { %v12931_v57 = vld [vmem:[%s14210_s9 + $0x7a4] sm:$0xf0]  ;;  %v8756_v48 = vld [vmem:[%s14210_s9 + $0x1a8] sm:$0xf0] }
 0x355   : > { %v13251_v42 = vld [vmem:[%s14210_s9 + $0x11a4] sm:$0xf0]  ;;  %v13219_v49 = vld [vmem:[%s14210_s9 + $0x10ac] sm:$0xf] }
 0x356   : > { %7747 = vmatpush.bf16.msra.mxu2 %v8747_v5  ;;  %7760 = vmatpush.bf16.msra.mxu3 %v10795_v6  ;;  %v9523_v5 = vor.u32 %v12931_v57, %v9522_v56  ;;  %v11571_v6 = vor.u32 %v13443_v63, %v11570_v58  ;;  %v10804_v52 = vld [vmem:[%s14210_s9 + $0x11a8] sm:$0xf0]  ;;  %v13156_v56 = vld [vmem:[%s14210_s9 + $0xeb4] sm:$0xf]  ;;  %v10803_v58 = vor.u32 %v13251_v42, %v10802_v41 }
 0x357   : > { %7773 = vmatpush.bf16.msrb.mxu0 %v8751_v11  ;;  %7786 = vmatpush.bf16.msrb.mxu1 %v10799_v13  ;;  %v9527_v11 = vor.u32 %v12899_v0, %v9524_v1  ;;  %v11575_v13 = vor.u32 %v13411_v61, %v11572_v2  ;;  %v8759_v63 = vor.u32 %v12707_v47, %v8756_v48  ;;  %v10298_v2 = vld [vmem:[%s14210_s9 + $0xcb0] sm:$0xf] }
 0x358   : > { %v10807_v0 = vor.u32 %v13219_v49, %v10804_v52  ;;  %v13444_v49 = vld [vmem:[%s14210_s9 + $0x17ac] sm:$0xf0]  ;;  %v12900_v52 = vld [vmem:[%s14210_s9 + $0x6b4] sm:$0xf] }
 0x359   : > { %7748 = vmatmul.bf16.vlgmr.msra.gmra.mxu2 %v14352_v50  ;;  %7761 = vmatmul.bf16.vlgmr.msra.gmra.mxu3 %v14354_v51  ;;  %v7567_v53 = vpop.f32.mrf.mxu0  ;;  %v7580_v12 = vpop.f32.mrf.mxu1 }
 0x35a   : > { %7792 = vmatpush.bf16.msrb.mxu2 %v10547_v14  ;;  %7805 = vmatpush.bf16.msrb.mxu3 %v12595_v9  ;;  %v7568_v59 = vadd.f32 %v7567_v53, %v1485_v40  ;;  %v12739_v40 = vld [vmem:[%s14210_s9 + $0x1a4] sm:$0xf0]  ;;  %v10554_v53 = vld [vmem:[%s14210_s9 + $0xeb0] sm:$0xf] }
 0x35b   : > { %7818 = vmatpush.bf16.msra.mxu0 %v10551_v17  ;;  %7831 = vmatpush.bf16.msra.mxu1 %v12599_v18  ;;  %v9268_v18 = vld [vmem:[%s14210_s9 + $0x5a8] sm:$0xf0]  ;;  %v8755_v57 = vor.u32 %v12739_v40, %v8754_v37  ;;  %v13476_v37 = vld [vmem:[%s14210_s9 + $0x18b4] sm:$0xf] }
 0x35c   : > { %7774 = vmatmul.bf16.vlgmr.msrb.gmra.mxu0 %v14352_v50  ;;  %7787 = vmatmul.bf16.vlgmr.msrb.gmra.mxu1 %v14354_v51  ;;  %v7581_v4 = vadd.f32 %v7580_v12, %v7568_v59  ;;  %v7541_v14 = vpop.f32.mrf.mxu2  ;;  %v7554_v9 = vpop.f32.mrf.mxu3  ;;  %v9271_v29 = vor.u32 %v12835_v16, %v9268_v18  ;;  %v13188_v12 = vld [vmem:[%s14210_s9 + $0xfac] sm:$0xf0]  ;;  %v10556_v59 = vld [vmem:[%s14210_s9 + $0xfb0] sm:$0xf0] }
 0x35d   : > { %v7542_v17 = vadd.f32 %v7541_v14, %v1484_v3  ;;  %v10555_v1 = vor.u32 %v13188_v12, %v10554_v53  ;;  %v13124_v3 = vld [vmem:[%s14210_s9 + $0xdac] sm:$0xf0]  ;;  %v9532_v53 = vld [vmem:[%s14210_s9 + $0x7b0] sm:$0xf0] }
 0x35e   : > { %7793 = vmatpush.bf16.msrb.mxu2 %v10291_v26  ;;  %7806 = vmatpush.bf16.msrb.mxu3 %v12339_v22  ;;  %8397 = vst [vmem:[%s14676_s10 + $0x108] sm:$0xff] %v7581_v4  ;;  %v11315_v26 = vor.u32 %v13379_v15, %v11314_v10  ;;  %v9010_v22 = vld [vmem:[%s14210_s9 + $0x2a8] sm:$0xf]  ;;  %v10559_v4 = vor.u32 %v13156_v56, %v10556_v59  ;;  %v10300_v10 = vld [vmem:[%s14210_s9 + $0xdb0] sm:$0xf0] }
 0x35f   : > { %7819 = vmatpush.bf16.msra.mxu0 %v10295_v30  ;;  %7832 = vmatpush.bf16.msra.mxu1 %v12343_v31  ;;  %v7555_v21 = vadd.f32 %v7554_v9, %v7542_v17  ;;  %v11319_v30 = vor.u32 %v13347_v19, %v11316_v20  ;;  %v13315_v31 = vld [vmem:[%s14210_s9 + $0x13a4] sm:$0xf0]  ;;  %v10299_v14 = vor.u32 %v13124_v3, %v10298_v2  ;;  %v10042_v15 = vld [vmem:[%s14210_s9 + $0xab0] sm:$0xf]  ;;  %v13412_v12 = vld [vmem:[%s14210_s9 + $0x16b4] sm:$0xf] }
 0x360   : > { %v13060_v16 = vld [vmem:[%s14210_s9 + $0xbac] sm:$0xf0]  ;;  %v10303_v17 = vor.u32 %v13092_v8, %v10300_v10  ;;  %v12836_v3 = vld [vmem:[%s14210_s9 + $0x4b4] sm:$0xf] }
 0x361   : > { %v7569_v23 = vpop.f32.mrf.mxu0  ;;  %v7582_v24 = vpop.f32.mrf.mxu1  ;;  %8396 = vst [vmem:[%s14676_s10 + $0x100] sm:$0xff] %v7555_v21  ;;  %v12090_v19 = vld [vmem:[%s14210_s9 + $0x1ab0] sm:$0xf]  ;;  %v13028_v21 = vld [vmem:[%s14210_s9 + $0xab4] sm:$0xf] }
 0x362   : > { %7794 = vmatpush.bf16.msrb.mxu2 %v10035_v38  ;;  %7807 = vmatpush.bf16.msrb.mxu3 %v12083_v39  ;;  %v9011_v38 = vor.u32 %v12803_v27, %v9010_v22  ;;  %v11059_v39 = vor.u32 %v13315_v31, %v11058_v28  ;;  %v13572_v20 = vld [vmem:[%s14210_s9 + $0x1bac] sm:$0xf0]  ;;  %v10044_v23 = vld [vmem:[%s14210_s9 + $0xbb0] sm:$0xf0]  ;;  %v1487_v27 = vperm.slane %v15752_v34, 3 }
 0x363   : > { %7820 = vmatpush.bf16.msra.mxu0 %v10039_v43  ;;  %7833 = vmatpush.bf16.msra.mxu1 %v12087_v44  ;;  %v9015_v43 = vor.u32 %v12771_v32, %v9012_v33  ;;  %v11063_v44 = vor.u32 %v13283_v35, %v11060_v36  ;;  %v13540_v24 = vld [vmem:[%s14210_s9 + $0x1ab4] sm:$0xf]  ;;  %v12091_v22 = vor.u32 %v13572_v20, %v12090_v19  ;;  %v9786_v28 = vld [vmem:[%s14210_s9 + $0x8b0] sm:$0xf] }
 0x364   : > { %v7543_v45 = vpop.f32.mrf.mxu2  ;;  %v7556_v46 = vpop.f32.mrf.mxu3  ;;  %v11834_v32 = vld [vmem:[%s14210_s9 + $0x18b0] sm:$0xf]  ;;  %v12964_v35 = vld [vmem:[%s14210_s9 + $0x8b4] sm:$0xf] }
 0x365   : > { %v13508_v33 = vld [vmem:[%s14210_s9 + $0x19ac] sm:$0xf0]  ;;  %v9788_v36 = vld [vmem:[%s14210_s9 + $0x9b0] sm:$0xf0] }
 0x366   : > { %7795 = vmatpush.bf16.msrb.mxu2 %v9779_v54  ;;  %7808 = vmatpush.bf16.msrb.mxu3 %v11827_v55  ;;  %v12602_v54 = vld [vmem:[%s14210_s9 + $0x1eb0] sm:$0xf]  ;;  %v11835_v42 = vor.u32 %v13508_v33, %v11834_v32  ;;  %v9791_v47 = vor.u32 %v12964_v35, %v9788_v36  ;;  %v12772_v20 = vld [vmem:[%s14210_s9 + $0x2b4] sm:$0xf] }
 0x367   : > { %7821 = vmatpush.bf16.msra.mxu0 %v9783_v60  ;;  %7834 = vmatpush.bf16.msra.mxu1 %v11831_v62  ;;  %v13700_v55 = vld [vmem:[%s14210_s9 + $0x1fac] sm:$0xf0]  ;;  %v13668_v60 = vld [vmem:[%s14210_s9 + $0x1eb4] sm:$0xf] }
 0x368   : > { %v12604_v62 = vld [vmem:[%s14210_s9 + $0x1fb0] sm:$0xf0]  ;;  %v12603_v61 = vor.u32 %v13700_v55, %v12602_v54  ;;  %v11578_v45 = vld [vmem:[%s14210_s9 + $0x16b0] sm:$0xf]  ;;  %v1486_v55 = vperm.slane %v15752_v34, 2 }
 0x369   : > { %v11580_v54 = vld [vmem:[%s14210_s9 + $0x17b0] sm:$0xf0]  ;;  %v9274_v59 = vld [vmem:[%s14210_s9 + $0x4b0] sm:$0xf] }
 0x36a   : > { %7796 = vmatpush.bf16.msrb.mxu2 %v9523_v5  ;;  %7809 = vmatpush.bf16.msrb.mxu3 %v11571_v6  ;;  %v12607_v5 = vor.u32 %v13668_v60, %v12604_v62  ;;  %v12346_v6 = vld [vmem:[%s14210_s9 + $0x1cb0] sm:$0xf]  ;;  %v12708_v35 = vld [vmem:[%s14210_s9 + $0xb4] sm:$0xf] }
 0x36b   : > { %7822 = vmatpush.bf16.msra.mxu0 %v9527_v11  ;;  %7835 = vmatpush.bf16.msra.mxu1 %v11575_v13  ;;  %v13604_v11 = vld [vmem:[%s14210_s9 + $0x1cb4] sm:$0xf]  ;;  %v12347_v9 = vor.u32 %v13636_v7, %v12346_v6  ;;  %v12868_v60 = vld [vmem:[%s14210_s9 + $0x5ac] sm:$0xf0] }
 0x36c   : > { %v12348_v13 = vld [vmem:[%s14210_s9 + $0x1db0] sm:$0xf0]  ;;  %v11322_v62 = vld [vmem:[%s14210_s9 + $0x14b0] sm:$0xf] }
 0x36d   : > { %v12351_v18 = vor.u32 %v13604_v11, %v12348_v13  ;;  %v13380_v2 = vld [vmem:[%s14210_s9 + $0x15ac] sm:$0xf0]  ;;  %v13348_v6 = vld [vmem:[%s14210_s9 + $0x14b4] sm:$0xf]  ;;  %v9275_v13 = vor.u32 %v12868_v60, %v9274_v59  ;;  %v13637_v59 = vld [vmem:[%s14210_s9 + $0x1db4] sm:$0xf0] }
 0x36e   : > { %7797 = vmatpush.bf16.msrb.mxu2 %v9267_v25  ;;  %7810 = vmatpush.bf16.msrb.mxu3 %v11315_v26  ;;  %v12092_v25 = vld [vmem:[%s14210_s9 + $0x1bb0] sm:$0xf0]  ;;  %v10043_v26 = vor.u32 %v13060_v16, %v10042_v15  ;;  %v12804_v15 = vld [vmem:[%s14210_s9 + $0x3ac] sm:$0xf0]  ;;  %v13093_v60 = vld [vmem:[%s14210_s9 + $0xcbc] sm:$0xf] }
 0x36f   : > { %7823 = vmatpush.bf16.msra.mxu0 %v9271_v29  ;;  %7836 = vmatpush.bf16.msra.mxu1 %v11319_v30  ;;  %v12996_v29 = vld [vmem:[%s14210_s9 + $0x9ac] sm:$0xf0]  ;;  %v10047_v30 = vor.u32 %v13028_v21, %v10044_v23  ;;  %v12095_v31 = vor.u32 %v13540_v24, %v12092_v25  ;;  %v11324_v7 = vld [vmem:[%s14210_s9 + $0x15b0] sm:$0xf0] }
 0x370   : > { %v9787_v41 = vor.u32 %v12996_v29, %v9786_v28  ;;  %v11066_v16 = vld [vmem:[%s14210_s9 + $0x12b0] sm:$0xf]  ;;  %v9020_v21 = vld [vmem:[%s14210_s9 + $0x3b0] sm:$0xf0] }
 0x371   : > { %v13316_v19 = vld [vmem:[%s14210_s9 + $0x13ac] sm:$0xf0]  ;;  %v13284_v23 = vld [vmem:[%s14210_s9 + $0x12b4] sm:$0xf] }
 0x372   : > { %7798 = vmatpush.bf16.msrb.mxu2 %v9011_v38  ;;  %7811 = vmatpush.bf16.msrb.mxu3 %v11059_v39  ;;  %v11836_v38 = vld [vmem:[%s14210_s9 + $0x19b0] sm:$0xf0]  ;;  %v8762_v25 = vld [vmem:[%s14210_s9 + $0xb0] sm:$0xf] }
 0x373   : > { %7824 = vmatpush.bf16.msra.mxu0 %v9015_v43  ;;  %7837 = vmatpush.bf16.msra.mxu1 %v11063_v44  ;;  %v9530_v43 = vld [vmem:[%s14210_s9 + $0x6b0] sm:$0xf]  ;;  %v11839_v48 = vor.u32 %v13476_v37, %v11836_v38  ;;  %v11068_v24 = vld [vmem:[%s14210_s9 + $0x13b0] sm:$0xf0] }
 0x374   : > { %v12932_v44 = vld [vmem:[%s14210_s9 + $0x7ac] sm:$0xf0]  ;;  %v8764_v36 = vld [vmem:[%s14210_s9 + $0x1b0] sm:$0xf0] }
 0x375   : > { %v10810_v28 = vld [vmem:[%s14210_s9 + $0x10b0] sm:$0xf]  ;;  %v13220_v37 = vld [vmem:[%s14210_s9 + $0x10b4] sm:$0xf] }
 0x376   : > { %7799 = vmatpush.bf16.msrb.mxu2 %v8755_v57  ;;  %7812 = vmatpush.bf16.msrb.mxu3 %v10803_v58  ;;  %v9531_v57 = vor.u32 %v12932_v44, %v9530_v43  ;;  %v11579_v58 = vor.u32 %v13444_v49, %v11578_v45  ;;  %v13252_v29 = vld [vmem:[%s14210_s9 + $0x11ac] sm:$0xf0]  ;;  %v10812_v38 = vld [vmem:[%s14210_s9 + $0x11b0] sm:$0xf0]  ;;  %v13157_v43 = vld [vmem:[%s14210_s9 + $0xebc] sm:$0xf]  ;;  %v8767_v49 = vor.u32 %v12708_v35, %v8764_v36 }
 0x377   : > { %7825 = vmatpush.bf16.msra.mxu0 %v8759_v63  ;;  %7838 = vmatpush.bf16.msra.mxu1 %v10807_v0  ;;  %v9535_v63 = vor.u32 %v12900_v52, %v9532_v53  ;;  %v11583_v0 = vor.u32 %v13412_v12, %v11580_v54  ;;  %v10811_v45 = vor.u32 %v13252_v29, %v10810_v28  ;;  %v10306_v54 = vld [vmem:[%s14210_s9 + $0xcb8] sm:$0xf] }
 0x378   : > { %v10815_v52 = vor.u32 %v13220_v37, %v10812_v38  ;;  %v13445_v37 = vld [vmem:[%s14210_s9 + $0x17b4] sm:$0xf0]  ;;  %v12901_v38 = vld [vmem:[%s14210_s9 + $0x6bc] sm:$0xf] }
 0x379   : > { %7800 = vmatmul.bf16.vlgmr.msrb.gmra.mxu2 %v14352_v50  ;;  %7813 = vmatmul.bf16.vlgmr.msrb.gmra.mxu3 %v14354_v51  ;;  %v7619_v39 = vpop.f32.mrf.mxu0  ;;  %v7632_v40 = vpop.f32.mrf.mxu1 }
 0x37a   : > { %7844 = vmatpush.bf16.msra.mxu2 %v10555_v1  ;;  %7857 = vmatpush.bf16.msra.mxu3 %v12603_v61  ;;  %v7620_v46 = vadd.f32 %v7619_v39, %v1487_v27  ;;  %v12740_v27 = vld [vmem:[%s14210_s9 + $0x1ac] sm:$0xf0]  ;;  %v10562_v39 = vld [vmem:[%s14210_s9 + $0xeb8] sm:$0xf] }
 0x37b   : > { %7870 = vmatpush.bf16.msrb.mxu0 %v10559_v4  ;;  %7883 = vmatpush.bf16.msrb.mxu1 %v12607_v5  ;;  %v9276_v5 = vld [vmem:[%s14210_s9 + $0x5b0] sm:$0xf0]  ;;  %v8763_v44 = vor.u32 %v12740_v27, %v8762_v25  ;;  %v13477_v25 = vld [vmem:[%s14210_s9 + $0x18bc] sm:$0xf] }
 0x37c   : > { %7826 = vmatmul.bf16.vlgmr.msra.gmra.mxu0 %v14352_v50  ;;  %7839 = vmatmul.bf16.vlgmr.msra.gmra.mxu1 %v14354_v51  ;;  %v7633_v56 = vadd.f32 %v7632_v40, %v7620_v46  ;;  %v7593_v1 = vpop.f32.mrf.mxu2  ;;  %v7606_v61 = vpop.f32.mrf.mxu3  ;;  %v13189_v40 = vld [vmem:[%s14210_s9 + $0xfb4] sm:$0xf0]  ;;  %v10564_v46 = vld [vmem:[%s14210_s9 + $0xfb8] sm:$0xf0] }
 0x37d   : > { %v7594_v4 = vadd.f32 %v7593_v1, %v1486_v55  ;;  %v10563_v53 = vor.u32 %v13189_v40, %v10562_v39  ;;  %v13125_v55 = vld [vmem:[%s14210_s9 + $0xdb4] sm:$0xf0]  ;;  %v9540_v39 = vld [vmem:[%s14210_s9 + $0x7b8] sm:$0xf0] }
 0x37e   : > { %7845 = vmatpush.bf16.msra.mxu2 %v10299_v14  ;;  %7858 = vmatpush.bf16.msra.mxu3 %v12347_v9  ;;  %8399 = vst [vmem:[%s14676_s10 + $0x118] sm:$0xff] %v7633_v56  ;;  %v11323_v14 = vor.u32 %v13380_v2, %v11322_v62  ;;  %v9018_v9 = vld [vmem:[%s14210_s9 + $0x2b0] sm:$0xf]  ;;  %v10567_v56 = vor.u32 %v13157_v43, %v10564_v46  ;;  %v10308_v62 = vld [vmem:[%s14210_s9 + $0xdb8] sm:$0xf0] }
 0x37f   : > { %7871 = vmatpush.bf16.msrb.mxu0 %v10303_v17  ;;  %7884 = vmatpush.bf16.msrb.mxu1 %v12351_v18  ;;  %v7607_v8 = vadd.f32 %v7606_v61, %v7594_v4  ;;  %v9279_v17 = vor.u32 %v12836_v3, %v9276_v5  ;;  %v11327_v18 = vor.u32 %v13348_v6, %v11324_v7  ;;  %v10050_v2 = vld [vmem:[%s14210_s9 + $0xab8] sm:$0xf]  ;;  %v13413_v40 = vld [vmem:[%s14210_s9 + $0x16bc] sm:$0xf] }
 0x380   : > { %v10307_v1 = vor.u32 %v13125_v55, %v10306_v54  ;;  %v13061_v3 = vld [vmem:[%s14210_s9 + $0xbb4] sm:$0xf0]  ;;  %v10311_v4 = vor.u32 %v13093_v60, %v10308_v62  ;;  %v12837_v55 = vld [vmem:[%s14210_s9 + $0x4bc] sm:$0xf] }
 0x381   : > { %v7621_v10 = vpop.f32.mrf.mxu0  ;;  %v7634_v11 = vpop.f32.mrf.mxu1  ;;  %8398 = vst [vmem:[%s14676_s10 + $0x110] sm:$0xff] %v7607_v8  ;;  %v12098_v6 = vld [vmem:[%s14210_s9 + $0x1ab8] sm:$0xf]  ;;  %v13029_v8 = vld [vmem:[%s14210_s9 + $0xabc] sm:$0xf] }
 0x382   : > { %7846 = vmatpush.bf16.msra.mxu2 %v10043_v26  ;;  %7859 = vmatpush.bf16.msra.mxu3 %v12091_v22  ;;  %v9019_v26 = vor.u32 %v12804_v15, %v9018_v9  ;;  %v11067_v22 = vor.u32 %v13316_v19, %v11066_v16  ;;  %v13573_v7 = vld [vmem:[%s14210_s9 + $0x1bb4] sm:$0xf0]  ;;  %v10052_v10 = vld [vmem:[%s14210_s9 + $0xbb8] sm:$0xf0]  ;;  %v1489_v15 = vperm.slane %v15752_v34, 5 }
 0x383   : > { %7872 = vmatpush.bf16.msrb.mxu0 %v10047_v30  ;;  %7885 = vmatpush.bf16.msrb.mxu1 %v12095_v31  ;;  %v9023_v30 = vor.u32 %v12772_v20, %v9020_v21  ;;  %v11071_v31 = vor.u32 %v13284_v23, %v11068_v24  ;;  %v13541_v11 = vld [vmem:[%s14210_s9 + $0x1abc] sm:$0xf]  ;;  %v12099_v9 = vor.u32 %v13573_v7, %v12098_v6  ;;  %v9794_v16 = vld [vmem:[%s14210_s9 + $0x8b8] sm:$0xf] }
 0x384   : > { %v7595_v32 = vpop.f32.mrf.mxu2  ;;  %v7608_v33 = vpop.f32.mrf.mxu3  ;;  %v11842_v20 = vld [vmem:[%s14210_s9 + $0x18b8] sm:$0xf]  ;;  %v12965_v23 = vld [vmem:[%s14210_s9 + $0x8bc] sm:$0xf] }
 0x385   : > { %v13509_v21 = vld [vmem:[%s14210_s9 + $0x19b4] sm:$0xf0]  ;;  %v9796_v24 = vld [vmem:[%s14210_s9 + $0x9b8] sm:$0xf0] }
 0x386   : > { %7847 = vmatpush.bf16.msra.mxu2 %v9787_v41  ;;  %7860 = vmatpush.bf16.msra.mxu3 %v11835_v42  ;;  %v12610_v41 = vld [vmem:[%s14210_s9 + $0x1eb8] sm:$0xf]  ;;  %v11843_v29 = vor.u32 %v13509_v21, %v11842_v20  ;;  %v9799_v35 = vor.u32 %v12965_v23, %v9796_v24  ;;  %v12773_v7 = vld [vmem:[%s14210_s9 + $0x2bc] sm:$0xf] }
 0x387   : > { %7873 = vmatpush.bf16.msrb.mxu0 %v9791_v47  ;;  %7886 = vmatpush.bf16.msrb.mxu1 %v11839_v48  ;;  %v13701_v42 = vld [vmem:[%s14210_s9 + $0x1fb4] sm:$0xf0]  ;;  %v13669_v47 = vld [vmem:[%s14210_s9 + $0x1ebc] sm:$0xf] }
 0x388   : > { %v12612_v48 = vld [vmem:[%s14210_s9 + $0x1fb8] sm:$0xf0]  ;;  %v12611_v12 = vor.u32 %v13701_v42, %v12610_v41  ;;  %v11586_v32 = vld [vmem:[%s14210_s9 + $0x16b8] sm:$0xf]  ;;  %v1488_v42 = vperm.slane %v15752_v34, 4 }
 0x389   : > { %v11588_v41 = vld [vmem:[%s14210_s9 + $0x17b8] sm:$0xf0]  ;;  %v9282_v46 = vld [vmem:[%s14210_s9 + $0x4b8] sm:$0xf] }
 0x38a   : > { %7848 = vmatpush.bf16.msra.mxu2 %v9531_v57  ;;  %7861 = vmatpush.bf16.msra.mxu3 %v11579_v58  ;;  %v12615_v57 = vor.u32 %v13669_v47, %v12612_v48  ;;  %v12354_v58 = vld [vmem:[%s14210_s9 + $0x1cb8] sm:$0xf]  ;;  %v12709_v23 = vld [vmem:[%s14210_s9 + $0xbc] sm:$0xf] }
 0x38b   : > { %7874 = vmatpush.bf16.msrb.mxu0 %v9535_v63  ;;  %7887 = vmatpush.bf16.msrb.mxu1 %v11583_v0  ;;  %v13605_v63 = vld [vmem:[%s14210_s9 + $0x1cbc] sm:$0xf]  ;;  %v12355_v61 = vor.u32 %v13637_v59, %v12354_v58  ;;  %v12869_v47 = vld [vmem:[%s14210_s9 + $0x5b4] sm:$0xf0] }
 0x38c   : > { %v12356_v0 = vld [vmem:[%s14210_s9 + $0x1db8] sm:$0xf0]  ;;  %v11330_v48 = vld [vmem:[%s14210_s9 + $0x14b8] sm:$0xf] }
 0x38d   : > { %v12359_v5 = vor.u32 %v13605_v63, %v12356_v0  ;;  %v13381_v54 = vld [vmem:[%s14210_s9 + $0x15b4] sm:$0xf0]  ;;  %v13349_v58 = vld [vmem:[%s14210_s9 + $0x14bc] sm:$0xf]  ;;  %v9283_v0 = vor.u32 %v12869_v47, %v9282_v46  ;;  %v13638_v46 = vld [vmem:[%s14210_s9 + $0x1dbc] sm:$0xf0] }
 0x38e   : > { %7849 = vmatpush.bf16.msra.mxu2 %v9275_v13  ;;  %7862 = vmatpush.bf16.msra.mxu3 %v11323_v14  ;;  %v12100_v13 = vld [vmem:[%s14210_s9 + $0x1bb8] sm:$0xf0]  ;;  %v10051_v14 = vor.u32 %v13061_v3, %v10050_v2  ;;  %v12805_v2 = vld [vmem:[%s14210_s9 + $0x3b4] sm:$0xf0]  ;;  %v13094_v47 = vld [vmem:[%s14210_s9 + $0xcc4] sm:$0xf] }
 0x38f   : > { %7875 = vmatpush.bf16.msrb.mxu0 %v9279_v17  ;;  %7888 = vmatpush.bf16.msrb.mxu1 %v11327_v18  ;;  %v12997_v17 = vld [vmem:[%s14210_s9 + $0x9b4] sm:$0xf0]  ;;  %v10055_v18 = vor.u32 %v13029_v8, %v10052_v10  ;;  %v12103_v19 = vor.u32 %v13541_v11, %v12100_v13  ;;  %v11332_v59 = vld [vmem:[%s14210_s9 + $0x15b8] sm:$0xf0] }
 0x390   : > { %v9795_v28 = vor.u32 %v12997_v17, %v9794_v16  ;;  %v11074_v3 = vld [vmem:[%s14210_s9 + $0x12b8] sm:$0xf]  ;;  %v9028_v8 = vld [vmem:[%s14210_s9 + $0x3b8] sm:$0xf0] }
 0x391   : > { %v13317_v6 = vld [vmem:[%s14210_s9 + $0x13b4] sm:$0xf0]  ;;  %v13285_v10 = vld [vmem:[%s14210_s9 + $0x12bc] sm:$0xf] }
 0x392   : > { %7850 = vmatpush.bf16.msra.mxu2 %v9019_v26  ;;  %7863 = vmatpush.bf16.msra.mxu3 %v11067_v22  ;;  %v11844_v26 = vld [vmem:[%s14210_s9 + $0x19b8] sm:$0xf0]  ;;  %v8770_v13 = vld [vmem:[%s14210_s9 + $0xb8] sm:$0xf] }
 0x393   : > { %7876 = vmatpush.bf16.msrb.mxu0 %v9023_v30  ;;  %7889 = vmatpush.bf16.msrb.mxu1 %v11071_v31  ;;  %v9538_v30 = vld [vmem:[%s14210_s9 + $0x6b8] sm:$0xf]  ;;  %v11847_v36 = vor.u32 %v13477_v25, %v11844_v26  ;;  %v11076_v11 = vld [vmem:[%s14210_s9 + $0x13b8] sm:$0xf0] }
 0x394   : > { %v12933_v31 = vld [vmem:[%s14210_s9 + $0x7b4] sm:$0xf0]  ;;  %v8772_v24 = vld [vmem:[%s14210_s9 + $0x1b8] sm:$0xf0] }
 0x395   : > { %v10818_v16 = vld [vmem:[%s14210_s9 + $0x10b8] sm:$0xf]  ;;  %v13221_v25 = vld [vmem:[%s14210_s9 + $0x10bc] sm:$0xf] }
 0x396   : > { %7851 = vmatpush.bf16.msra.mxu2 %v8763_v44  ;;  %7864 = vmatpush.bf16.msra.mxu3 %v10811_v45  ;;  %v9539_v44 = vor.u32 %v12933_v31, %v9538_v30  ;;  %v11587_v45 = vor.u32 %v13445_v37, %v11586_v32  ;;  %v13253_v17 = vld [vmem:[%s14210_s9 + $0x11b4] sm:$0xf0]  ;;  %v10820_v26 = vld [vmem:[%s14210_s9 + $0x11b8] sm:$0xf0]  ;;  %v13158_v30 = vld [vmem:[%s14210_s9 + $0xec4] sm:$0xf]  ;;  %v8775_v37 = vor.u32 %v12709_v23, %v8772_v24 }
 0x397   : > { %7877 = vmatpush.bf16.msrb.mxu0 %v8767_v49  ;;  %7890 = vmatpush.bf16.msrb.mxu1 %v10815_v52  ;;  %v9543_v49 = vor.u32 %v12901_v38, %v9540_v39  ;;  %v11591_v52 = vor.u32 %v13413_v40, %v11588_v41  ;;  %v10819_v32 = vor.u32 %v13253_v17, %v10818_v16  ;;  %v10314_v41 = vld [vmem:[%s14210_s9 + $0xcc0] sm:$0xf] }
 0x398   : > { %v10823_v38 = vor.u32 %v13221_v25, %v10820_v26  ;;  %v13446_v25 = vld [vmem:[%s14210_s9 + $0x17bc] sm:$0xf0]  ;;  %v12902_v26 = vld [vmem:[%s14210_s9 + $0x6c4] sm:$0xf] }
 0x399   : > { %7852 = vmatmul.bf16.vlgmr.msra.gmra.mxu2 %v14352_v50  ;;  %7865 = vmatmul.bf16.vlgmr.msra.gmra.mxu3 %v14354_v51  ;;  %v7671_v22 = vpop.f32.mrf.mxu0  ;;  %v7684_v27 = vpop.f32.mrf.mxu1 }
 0x39a   : > { %7896 = vmatpush.bf16.msrb.mxu2 %v10563_v53  ;;  %7909 = vmatpush.bf16.msrb.mxu3 %v12611_v12  ;;  %v7672_v33 = vadd.f32 %v7671_v22, %v1489_v15  ;;  %v12741_v15 = vld [vmem:[%s14210_s9 + $0x1b4] sm:$0xf0]  ;;  %v10570_v22 = vld [vmem:[%s14210_s9 + $0xec0] sm:$0xf] }
 0x39b   : > { %7922 = vmatpush.bf16.msra.mxu0 %v10567_v56  ;;  %7935 = vmatpush.bf16.msra.mxu1 %v12615_v57  ;;  %v9284_v57 = vld [vmem:[%s14210_s9 + $0x5b8] sm:$0xf0]  ;;  %v8771_v31 = vor.u32 %v12741_v15, %v8770_v13  ;;  %v13478_v13 = vld [vmem:[%s14210_s9 + $0x18c4] sm:$0xf] }
 0x39c   : > { %7878 = vmatmul.bf16.vlgmr.msrb.gmra.mxu0 %v14352_v50  ;;  %7891 = vmatmul.bf16.vlgmr.msrb.gmra.mxu1 %v14354_v51  ;;  %v7685_v43 = vadd.f32 %v7684_v27, %v7672_v33  ;;  %v7645_v53 = vpop.f32.mrf.mxu2  ;;  %v7658_v12 = vpop.f32.mrf.mxu3  ;;  %v13190_v27 = vld [vmem:[%s14210_s9 + $0xfbc] sm:$0xf0]  ;;  %v10572_v33 = vld [vmem:[%s14210_s9 + $0xfc0] sm:$0xf0] }
 0x39d   : > { %v7646_v56 = vadd.f32 %v7645_v53, %v1488_v42  ;;  %v10571_v39 = vor.u32 %v13190_v27, %v10570_v22  ;;  %v13126_v42 = vld [vmem:[%s14210_s9 + $0xdbc] sm:$0xf0]  ;;  %v9548_v22 = vld [vmem:[%s14210_s9 + $0x7c0] sm:$0xf0] }
 0x39e   : > { %7897 = vmatpush.bf16.msrb.mxu2 %v10307_v1  ;;  %7910 = vmatpush.bf16.msrb.mxu3 %v12355_v61  ;;  %8401 = vst [vmem:[%s14676_s10 + $0x128] sm:$0xff] %v7685_v43  ;;  %v11331_v1 = vor.u32 %v13381_v54, %v11330_v48  ;;  %v9026_v61 = vld [vmem:[%s14210_s9 + $0x2b8] sm:$0xf]  ;;  %v10575_v43 = vor.u32 %v13158_v30, %v10572_v33  ;;  %v10316_v48 = vld [vmem:[%s14210_s9 + $0xdc0] sm:$0xf0] }
 0x39f   : > { %7923 = vmatpush.bf16.msra.mxu0 %v10311_v4  ;;  %7936 = vmatpush.bf16.msra.mxu1 %v12359_v5  ;;  %v7659_v60 = vadd.f32 %v7658_v12, %v7646_v56  ;;  %v9287_v4 = vor.u32 %v12837_v55, %v9284_v57  ;;  %v11335_v5 = vor.u32 %v13349_v58, %v11332_v59  ;;  %v10058_v54 = vld [vmem:[%s14210_s9 + $0xac0] sm:$0xf]  ;;  %v13414_v27 = vld [vmem:[%s14210_s9 + $0x16c4] sm:$0xf] }
 0x3a0   : > { %v10315_v53 = vor.u32 %v13126_v42, %v10314_v41  ;;  %v13062_v55 = vld [vmem:[%s14210_s9 + $0xbbc] sm:$0xf0]  ;;  %v10319_v56 = vor.u32 %v13094_v47, %v10316_v48  ;;  %v12838_v41 = vld [vmem:[%s14210_s9 + $0x4c4] sm:$0xf] }
 0x3a1   : > { %v7673_v62 = vpop.f32.mrf.mxu0  ;;  %v7686_v63 = vpop.f32.mrf.mxu1  ;;  %8400 = vst [vmem:[%s14676_s10 + $0x120] sm:$0xff] %v7659_v60  ;;  %v12106_v58 = vld [vmem:[%s14210_s9 + $0x1ac0] sm:$0xf]  ;;  %v13030_v60 = vld [vmem:[%s14210_s9 + $0xac4] sm:$0xf] }
 0x3a2   : > { %7898 = vmatpush.bf16.msrb.mxu2 %v10051_v14  ;;  %7911 = vmatpush.bf16.msrb.mxu3 %v12099_v9  ;;  %v9027_v14 = vor.u32 %v12805_v2, %v9026_v61  ;;  %v11075_v9 = vor.u32 %v13317_v6, %v11074_v3  ;;  %v13574_v59 = vld [vmem:[%s14210_s9 + $0x1bbc] sm:$0xf0]  ;;  %v10060_v62 = vld [vmem:[%s14210_s9 + $0xbc0] sm:$0xf0]  ;;  %v1491_v2 = vperm.slane %v15752_v34, 7 }
 0x3a3   : > { %7924 = vmatpush.bf16.msra.mxu0 %v10055_v18  ;;  %7937 = vmatpush.bf16.msra.mxu1 %v12103_v19  ;;  %v9031_v18 = vor.u32 %v12773_v7, %v9028_v8  ;;  %v11079_v19 = vor.u32 %v13285_v10, %v11076_v11  ;;  %v13542_v63 = vld [vmem:[%s14210_s9 + $0x1ac4] sm:$0xf]  ;;  %v12107_v61 = vor.u32 %v13574_v59, %v12106_v58  ;;  %v9802_v3 = vld [vmem:[%s14210_s9 + $0x8c0] sm:$0xf] }
 0x3a4   : > { %v7647_v20 = vpop.f32.mrf.mxu2  ;;  %v7660_v21 = vpop.f32.mrf.mxu3  ;;  %v11850_v7 = vld [vmem:[%s14210_s9 + $0x18c0] sm:$0xf]  ;;  %v12966_v10 = vld [vmem:[%s14210_s9 + $0x8c4] sm:$0xf] }
 0x3a5   : > { %v13510_v8 = vld [vmem:[%s14210_s9 + $0x19bc] sm:$0xf0]  ;;  %v9804_v11 = vld [vmem:[%s14210_s9 + $0x9c0] sm:$0xf0] }
 0x3a6   : > { %7899 = vmatpush.bf16.msrb.mxu2 %v9795_v28  ;;  %7912 = vmatpush.bf16.msrb.mxu3 %v11843_v29  ;;  %v12618_v28 = vld [vmem:[%s14210_s9 + $0x1ec0] sm:$0xf]  ;;  %v11851_v17 = vor.u32 %v13510_v8, %v11850_v7  ;;  %v9807_v23 = vor.u32 %v12966_v10, %v9804_v11  ;;  %v12774_v58 = vld [vmem:[%s14210_s9 + $0x2c4] sm:$0xf] }
 0x3a7   : > { %7925 = vmatpush.bf16.msra.mxu0 %v9799_v35  ;;  %7938 = vmatpush.bf16.msra.mxu1 %v11847_v36  ;;  %v13702_v29 = vld [vmem:[%s14210_s9 + $0x1fbc] sm:$0xf0]  ;;  %v13670_v35 = vld [vmem:[%s14210_s9 + $0x1ec4] sm:$0xf] }
 0x3a8   : > { %v12620_v36 = vld [vmem:[%s14210_s9 + $0x1fc0] sm:$0xf0]  ;;  %v12619_v40 = vor.u32 %v13702_v29, %v12618_v28  ;;  %v11594_v20 = vld [vmem:[%s14210_s9 + $0x16c0] sm:$0xf]  ;;  %v1490_v29 = vperm.slane %v15752_v34, 6 }
 0x3a9   : > { %v11596_v28 = vld [vmem:[%s14210_s9 + $0x17c0] sm:$0xf0]  ;;  %v9290_v33 = vld [vmem:[%s14210_s9 + $0x4c0] sm:$0xf] }
 0x3aa   : > { %7900 = vmatpush.bf16.msrb.mxu2 %v9539_v44  ;;  %7913 = vmatpush.bf16.msrb.mxu3 %v11587_v45  ;;  %v12623_v44 = vor.u32 %v13670_v35, %v12620_v36  ;;  %v12362_v45 = vld [vmem:[%s14210_s9 + $0x1cc0] sm:$0xf]  ;;  %v9036_v59 = vld [vmem:[%s14210_s9 + $0x3c0] sm:$0xf0] }
 0x3ab   : > { %7926 = vmatpush.bf16.msra.mxu0 %v9543_v49  ;;  %7939 = vmatpush.bf16.msra.mxu1 %v11591_v52  ;;  %v13606_v49 = vld [vmem:[%s14210_s9 + $0x1cc4] sm:$0xf]  ;;  %v12363_v12 = vor.u32 %v13638_v46, %v12362_v45  ;;  %v12870_v35 = vld [vmem:[%s14210_s9 + $0x5bc] sm:$0xf0] }
 0x3ac   : > { %v12364_v52 = vld [vmem:[%s14210_s9 + $0x1dc0] sm:$0xf0]  ;;  %v11338_v36 = vld [vmem:[%s14210_s9 + $0x14c0] sm:$0xf] }
 0x3ad   : > { %v12367_v57 = vor.u32 %v13606_v49, %v12364_v52  ;;  %v11340_v45 = vld [vmem:[%s14210_s9 + $0x15c0] sm:$0xf0]  ;;  %v9291_v49 = vor.u32 %v12870_v35, %v9290_v33  ;;  %v13095_v33 = vld [vmem:[%s14210_s9 + $0xccc] sm:$0xf] }
 0x3ae   : > { %7901 = vmatpush.bf16.msrb.mxu2 %v9283_v0  ;;  %7914 = vmatpush.bf16.msrb.mxu3 %v11331_v1  ;;  %v12108_v0 = vld [vmem:[%s14210_s9 + $0x1bc0] sm:$0xf0]  ;;  %v10059_v1 = vor.u32 %v13062_v55, %v10058_v54  ;;  %v11082_v54 = vld [vmem:[%s14210_s9 + $0x12c0] sm:$0xf]  ;;  %v10324_v35 = vld [vmem:[%s14210_s9 + $0xdc8] sm:$0xf0] }
 0x3af   : > { %7927 = vmatpush.bf16.msra.mxu0 %v9287_v4  ;;  %7940 = vmatpush.bf16.msra.mxu1 %v11335_v5  ;;  %v12998_v4 = vld [vmem:[%s14210_s9 + $0x9bc] sm:$0xf0]  ;;  %v10063_v5 = vor.u32 %v13030_v60, %v10060_v62  ;;  %v12111_v6 = vor.u32 %v13542_v63, %v12108_v0  ;;  %v13286_v60 = vld [vmem:[%s14210_s9 + $0x12c4] sm:$0xf] }
 0x3b0   : > { %v9803_v16 = vor.u32 %v12998_v4, %v9802_v3  ;;  %v11084_v62 = vld [vmem:[%s14210_s9 + $0x13c0] sm:$0xf0]  ;;  %v8778_v63 = vld [vmem:[%s14210_s9 + $0xc0] sm:$0xf]  ;;  %v9039_v4 = vor.u32 %v12774_v58, %v9036_v59  ;;  %v11858_v58 = vld [vmem:[%s14210_s9 + $0x18c8] sm:$0xf] }
 0x3b1   : > { %v13254_v3 = vld [vmem:[%s14210_s9 + $0x11bc] sm:$0xf0]  ;;  %v12710_v8 = vld [vmem:[%s14210_s9 + $0xc4] sm:$0xf]  ;;  %v13511_v59 = vld [vmem:[%s14210_s9 + $0x19c4] sm:$0xf0] }
 0x3b2   : > { %7902 = vmatpush.bf16.msrb.mxu2 %v9027_v14  ;;  %7915 = vmatpush.bf16.msrb.mxu3 %v11075_v9  ;;  %v11852_v14 = vld [vmem:[%s14210_s9 + $0x19c0] sm:$0xf0] }
 0x3b3   : > { %7928 = vmatpush.bf16.msra.mxu0 %v9031_v18  ;;  %7941 = vmatpush.bf16.msra.mxu1 %v11079_v19  ;;  %v9546_v18 = vld [vmem:[%s14210_s9 + $0x6c0] sm:$0xf]  ;;  %v11855_v24 = vor.u32 %v13478_v13, %v11852_v14  ;;  %v8780_v10 = vld [vmem:[%s14210_s9 + $0x1c0] sm:$0xf0]  ;;  %v10578_v14 = vld [vmem:[%s14210_s9 + $0xec8] sm:$0xf] }
 0x3b4   : > { %v12934_v19 = vld [vmem:[%s14210_s9 + $0x7bc] sm:$0xf0]  ;;  %v13222_v11 = vld [vmem:[%s14210_s9 + $0x10c4] sm:$0xf] }
 0x3b5   : > { %v10828_v13 = vld [vmem:[%s14210_s9 + $0x11c0] sm:$0xf0] }
 0x3b6   : > { %7903 = vmatpush.bf16.msrb.mxu2 %v8771_v31  ;;  %7916 = vmatpush.bf16.msrb.mxu3 %v10819_v32  ;;  %v9547_v31 = vor.u32 %v12934_v19, %v9546_v18  ;;  %v11595_v32 = vor.u32 %v13446_v25, %v11594_v20  ;;  %v10580_v20 = vld [vmem:[%s14210_s9 + $0xfc8] sm:$0xf0]  ;;  %v10831_v25 = vor.u32 %v13222_v11, %v10828_v13  ;;  %v13447_v11 = vld [vmem:[%s14210_s9 + $0x17c4] sm:$0xf0] }
 0x3b7   : > { %7929 = vmatpush.bf16.msra.mxu0 %v8775_v37  ;;  %7942 = vmatpush.bf16.msra.mxu1 %v10823_v38  ;;  %v9551_v37 = vor.u32 %v12902_v26, %v9548_v22  ;;  %v11599_v38 = vor.u32 %v13414_v27, %v11596_v28  ;;  %v10322_v27 = vld [vmem:[%s14210_s9 + $0xcc8] sm:$0xf]  ;;  %v12903_v13 = vld [vmem:[%s14210_s9 + $0x6cc] sm:$0xf] }
 0x3b8   : > { %v13127_v28 = vld [vmem:[%s14210_s9 + $0xdc4] sm:$0xf0] }
 0x3b9   : > { %7904 = vmatmul.bf16.vlgmr.msrb.gmra.mxu2 %v14352_v50  ;;  %7917 = vmatmul.bf16.vlgmr.msrb.gmra.mxu3 %v14354_v51  ;;  %v7723_v9 = vpop.f32.mrf.mxu0  ;;  %v7736_v15 = vpop.f32.mrf.mxu1 }
 0x3ba   : > { %7948 = vmatpush.bf16.msra.mxu2 %v10571_v39  ;;  %7961 = vmatpush.bf16.msra.mxu3 %v12619_v40  ;;  %v7724_v21 = vadd.f32 %v7723_v9, %v1491_v2  ;;  %v13382_v40 = vld [vmem:[%s14210_s9 + $0x15bc] sm:$0xf0]  ;;  %v13191_v9 = vld [vmem:[%s14210_s9 + $0xfc4] sm:$0xf0] }
 0x3bb   : > { %7974 = vmatpush.bf16.msrb.mxu0 %v10575_v43  ;;  %7987 = vmatpush.bf16.msrb.mxu1 %v12623_v44  ;;  %v9292_v43 = vld [vmem:[%s14210_s9 + $0x5c0] sm:$0xf0]  ;;  %v11339_v52 = vor.u32 %v13382_v40, %v11338_v36  ;;  %v10826_v2 = vld [vmem:[%s14210_s9 + $0x10c0] sm:$0xf]  ;;  %v10579_v26 = vor.u32 %v13191_v9, %v10578_v14  ;;  %v13607_v36 = vld [vmem:[%s14210_s9 + $0x1ccc] sm:$0xf] }
 0x3bc   : > { %7930 = vmatmul.bf16.vlgmr.msra.gmra.mxu0 %v14352_v50  ;;  %7943 = vmatmul.bf16.vlgmr.msra.gmra.mxu1 %v14354_v51  ;;  %v7737_v30 = vadd.f32 %v7736_v15, %v7724_v21  ;;  %v7697_v34 = vpop.f32.mrf.mxu2  ;;  %v7710_v39 = vpop.f32.mrf.mxu3  ;;  %v13350_v44 = vld [vmem:[%s14210_s9 + $0x14c4] sm:$0xf]  ;;  %v9295_v55 = vor.u32 %v12838_v41, %v9292_v43  ;;  %v12626_v15 = vld [vmem:[%s14210_s9 + $0x1ec8] sm:$0xf]  ;;  %v10827_v19 = vor.u32 %v13254_v3, %v10826_v2  ;;  %v13671_v21 = vld [vmem:[%s14210_s9 + $0x1ecc] sm:$0xf] }
 0x3bd   : > { %v7698_v42 = vadd.f32 %v7697_v34, %v1490_v29  ;;  %v13063_v40 = vld [vmem:[%s14210_s9 + $0xbc4] sm:$0xf0]  ;;  %v11859_v3 = vor.u32 %v13511_v59, %v11858_v58  ;;  %v9556_v14 = vld [vmem:[%s14210_s9 + $0x7c8] sm:$0xf0] }
 0x3be   : > { %7949 = vmatpush.bf16.msra.mxu2 %v10315_v53  ;;  %7962 = vmatpush.bf16.msra.mxu3 %v12363_v12  ;;  %8403 = vst [vmem:[%s14676_s10 + $0x138] sm:$0xff] %v7737_v30  ;;  %v9034_v53 = vld [vmem:[%s14210_s9 + $0x2c0] sm:$0xf]  ;;  %v12114_v41 = vld [vmem:[%s14210_s9 + $0x1ac8] sm:$0xf] }
 0x3bf   : > { %7975 = vmatpush.bf16.msrb.mxu0 %v10319_v56  ;;  %7988 = vmatpush.bf16.msrb.mxu1 %v12367_v57  ;;  %v7711_v46 = vadd.f32 %v7710_v39, %v7698_v42  ;;  %v12806_v12 = vld [vmem:[%s14210_s9 + $0x3bc] sm:$0xf0]  ;;  %v11343_v56 = vor.u32 %v13350_v44, %v11340_v45  ;;  %v10066_v39 = vld [vmem:[%s14210_s9 + $0xac8] sm:$0xf]  ;;  %v10327_v42 = vor.u32 %v13095_v33, %v10324_v35  ;;  %v13031_v45 = vld [vmem:[%s14210_s9 + $0xacc] sm:$0xf] }
 0x3c0   : > { %v13318_v57 = vld [vmem:[%s14210_s9 + $0x13bc] sm:$0xf0]  ;;  %v9035_v0 = vor.u32 %v12806_v12, %v9034_v53  ;;  %v13575_v44 = vld [vmem:[%s14210_s9 + $0x1bc4] sm:$0xf0]  ;;  %v13415_v9 = vld [vmem:[%s14210_s9 + $0x16cc] sm:$0xf] }
 0x3c1   : > { %v7725_v47 = vpop.f32.mrf.mxu0  ;;  %v7738_v48 = vpop.f32.mrf.mxu1  ;;  %8402 = vst [vmem:[%s14676_s10 + $0x130] sm:$0xff] %v7711_v46  ;;  %v16043_v46 = vld [vmem:[%s14643_s30 + $0x28] sm:$0xff]  ;;  %v12115_v53 = vor.u32 %v13575_v44, %v12114_v41 }
 0x3c2   : > { %7950 = vmatpush.bf16.msra.mxu2 %v10059_v1  ;;  %7963 = vmatpush.bf16.msra.mxu3 %v12107_v61  ;;  %v11083_v1 = vor.u32 %v13318_v57, %v11082_v54  ;;  %v12742_v61 = vld [vmem:[%s14210_s9 + $0x1bc] sm:$0xf0]  ;;  %v10068_v47 = vld [vmem:[%s14210_s9 + $0xbc8] sm:$0xf0]  ;;  %v1493_v12 = vperm.slane %v16043_v46, 1 }
 0x3c3   : > { %7976 = vmatpush.bf16.msrb.mxu0 %v10063_v5  ;;  %7989 = vmatpush.bf16.msrb.mxu1 %v12111_v6  ;;  %v11087_v5 = vor.u32 %v13286_v60, %v11084_v62  ;;  %v8779_v18 = vor.u32 %v12742_v61, %v8778_v63  ;;  %v13543_v48 = vld [vmem:[%s14210_s9 + $0x1acc] sm:$0xf]  ;;  %v9810_v54 = vld [vmem:[%s14210_s9 + $0x8c8] sm:$0xf] }
 0x3c4   : > { %v7699_v6 = vpop.f32.mrf.mxu2  ;;  %v7712_v7 = vpop.f32.mrf.mxu3  ;;  %v12967_v60 = vld [vmem:[%s14210_s9 + $0x8cc] sm:$0xf] }
 0x3c5   : > { %v9812_v62 = vld [vmem:[%s14210_s9 + $0x9c8] sm:$0xf0]  ;;  %v11602_v6 = vld [vmem:[%s14210_s9 + $0x16c8] sm:$0xf] }
 0x3c6   : > { %7951 = vmatpush.bf16.msra.mxu2 %v9803_v16  ;;  %7964 = vmatpush.bf16.msra.mxu3 %v11851_v17  ;;  %v13703_v16 = vld [vmem:[%s14210_s9 + $0x1fc4] sm:$0xf0]  ;;  %v13159_v17 = vld [vmem:[%s14210_s9 + $0xecc] sm:$0xf] }
 0x3c7   : > { %7977 = vmatpush.bf16.msrb.mxu0 %v9807_v23  ;;  %7990 = vmatpush.bf16.msrb.mxu1 %v11855_v24  ;;  %v12628_v23 = vld [vmem:[%s14210_s9 + $0x1fc8] sm:$0xf0]  ;;  %v8783_v24 = vor.u32 %v12710_v8, %v8780_v10  ;;  %v12627_v22 = vor.u32 %v13703_v16, %v12626_v15  ;;  %v10583_v29 = vor.u32 %v13159_v17, %v10580_v20  ;;  %v1492_v16 = vperm.slane %v16043_v46, 0  ;;  %v9298_v20 = vld [vmem:[%s14210_s9 + $0x4c8] sm:$0xf] }
 0x3c8   : > { %v12631_v30 = vor.u32 %v13671_v21, %v12628_v23  ;;  %v13479_v63 = vld [vmem:[%s14210_s9 + $0x18cc] sm:$0xf]  ;;  %v9815_v8 = vor.u32 %v12967_v60, %v9812_v62  ;;  %v12871_v21 = vld [vmem:[%s14210_s9 + $0x5c4] sm:$0xf0] }
 0x3c9   : > { %v11604_v15 = vld [vmem:[%s14210_s9 + $0x17c8] sm:$0xf0]  ;;  %v11346_v23 = vld [vmem:[%s14210_s9 + $0x14c8] sm:$0xf] }
 0x3ca   : > { %7952 = vmatpush.bf16.msra.mxu2 %v9547_v31  ;;  %7965 = vmatpush.bf16.msra.mxu3 %v11595_v32  ;;  %v12370_v31 = vld [vmem:[%s14210_s9 + $0x1cc8] sm:$0xf]  ;;  %v12775_v44 = vld [vmem:[%s14210_s9 + $0x2cc] sm:$0xf] }
 0x3cb   : > { %7978 = vmatpush.bf16.msrb.mxu0 %v9551_v37  ;;  %7991 = vmatpush.bf16.msrb.mxu1 %v11599_v38  ;;  %v13639_v32 = vld [vmem:[%s14210_s9 + $0x1dc4] sm:$0xf0]  ;;  %v12372_v37 = vld [vmem:[%s14210_s9 + $0x1dc8] sm:$0xf0]  ;;  %v10323_v38 = vor.u32 %v13127_v28, %v10322_v27 }
 0x3cc   : > { %v12371_v34 = vor.u32 %v13639_v32, %v12370_v31  ;;  %v12375_v43 = vor.u32 %v13607_v36, %v12372_v37  ;;  %v13383_v27 = vld [vmem:[%s14210_s9 + $0x15c4] sm:$0xf0]  ;;  %v12839_v28 = vld [vmem:[%s14210_s9 + $0x4cc] sm:$0xf]  ;;  %v9299_v37 = vor.u32 %v12871_v21, %v9298_v20  ;;  %v13640_v20 = vld [vmem:[%s14210_s9 + $0x1dcc] sm:$0xf0] }
 0x3cd   : > { %v13351_v31 = vld [vmem:[%s14210_s9 + $0x14cc] sm:$0xf]  ;;  %v13096_v21 = vld [vmem:[%s14210_s9 + $0xcd4] sm:$0xf] }
 0x3ce   : > { %7953 = vmatpush.bf16.msra.mxu2 %v9291_v49  ;;  %7966 = vmatpush.bf16.msra.mxu3 %v11339_v52  ;;  %v12116_v49 = vld [vmem:[%s14210_s9 + $0x1bc8] sm:$0xf0]  ;;  %v10067_v52 = vor.u32 %v13063_v40, %v10066_v39  ;;  %v12807_v39 = vld [vmem:[%s14210_s9 + $0x3c4] sm:$0xf0] }
 0x3cf   : > { %7979 = vmatpush.bf16.msrb.mxu0 %v9295_v55  ;;  %7992 = vmatpush.bf16.msrb.mxu1 %v11343_v56  ;;  %v12999_v55 = vld [vmem:[%s14210_s9 + $0x9c4] sm:$0xf0]  ;;  %v10071_v56 = vor.u32 %v13031_v45, %v10068_v47  ;;  %v12119_v57 = vor.u32 %v13543_v48, %v12116_v49  ;;  %v11348_v32 = vld [vmem:[%s14210_s9 + $0x15c8] sm:$0xf0] }
 0x3d0   : > { %v9811_v2 = vor.u32 %v12999_v55, %v9810_v54  ;;  %v11090_v40 = vld [vmem:[%s14210_s9 + $0x12c8] sm:$0xf]  ;;  %v9044_v45 = vld [vmem:[%s14210_s9 + $0x3c8] sm:$0xf0] }
 0x3d1   : > { %v13287_v47 = vld [vmem:[%s14210_s9 + $0x12cc] sm:$0xf]  ;;  %v8786_v49 = vld [vmem:[%s14210_s9 + $0xc8] sm:$0xf] }
 0x3d2   : > { %7954 = vmatpush.bf16.msra.mxu2 %v9035_v0  ;;  %7967 = vmatpush.bf16.msra.mxu3 %v11083_v1  ;;  %v11860_v0 = vld [vmem:[%s14210_s9 + $0x19c8] sm:$0xf0]  ;;  %v10834_v54 = vld [vmem:[%s14210_s9 + $0x10c8] sm:$0xf] }
 0x3d3   : > { %7980 = vmatpush.bf16.msrb.mxu0 %v9039_v4  ;;  %7993 = vmatpush.bf16.msrb.mxu1 %v11087_v5  ;;  %v9554_v4 = vld [vmem:[%s14210_s9 + $0x6c8] sm:$0xf]  ;;  %v11863_v10 = vor.u32 %v13479_v63, %v11860_v0  ;;  %v11092_v48 = vld [vmem:[%s14210_s9 + $0x13c8] sm:$0xf0] }
 0x3d4   : > { %v12935_v5 = vld [vmem:[%s14210_s9 + $0x7c4] sm:$0xf0]  ;;  %v12711_v60 = vld [vmem:[%s14210_s9 + $0xcc] sm:$0xf] }
 0x3d5   : > { %v13255_v55 = vld [vmem:[%s14210_s9 + $0x11c4] sm:$0xf0]  ;;  %v8788_v62 = vld [vmem:[%s14210_s9 + $0x1c8] sm:$0xf0] }
 0x3d6   : > { %7955 = vmatpush.bf16.msra.mxu2 %v8779_v18  ;;  %7968 = vmatpush.bf16.msra.mxu3 %v10827_v19  ;;  %v9555_v18 = vor.u32 %v12935_v5, %v9554_v4  ;;  %v11603_v19 = vor.u32 %v13447_v11, %v11602_v6  ;;  %v13223_v63 = vld [vmem:[%s14210_s9 + $0x10cc] sm:$0xf]  ;;  %v13160_v4 = vld [vmem:[%s14210_s9 + $0xed4] sm:$0xf]  ;;  %v10835_v6 = vor.u32 %v13255_v55, %v10834_v54 }
 0x3d7   : > { %7981 = vmatpush.bf16.msrb.mxu0 %v8783_v24  ;;  %7994 = vmatpush.bf16.msrb.mxu1 %v10831_v25  ;;  %v9559_v24 = vor.u32 %v12903_v13, %v9556_v14  ;;  %v11607_v25 = vor.u32 %v13415_v9, %v11604_v15  ;;  %v10836_v0 = vld [vmem:[%s14210_s9 + $0x11c8] sm:$0xf0]  ;;  %v8791_v11 = vor.u32 %v12711_v60, %v8788_v62  ;;  %v10330_v15 = vld [vmem:[%s14210_s9 + $0xcd0] sm:$0xf] }
 0x3d8   : > { %v10839_v13 = vor.u32 %v13223_v63, %v10836_v0  ;;  %v13448_v63 = vld [vmem:[%s14210_s9 + $0x17cc] sm:$0xf0]  ;;  %v12904_v0 = vld [vmem:[%s14210_s9 + $0x6d4] sm:$0xf] }
 0x3d9   : > { %7956 = vmatmul.bf16.vlgmr.msra.gmra.mxu2 %v14352_v50  ;;  %7969 = vmatmul.bf16.vlgmr.msra.gmra.mxu3 %v14354_v51  ;;  %v7775_v1 = vpop.f32.mrf.mxu0  ;;  %v7788_v61 = vpop.f32.mrf.mxu1 }
 0x3da   : > { %8000 = vmatpush.bf16.msrb.mxu2 %v10579_v26  ;;  %8013 = vmatpush.bf16.msrb.mxu3 %v12627_v22  ;;  %v7776_v7 = vadd.f32 %v7775_v1, %v1493_v12  ;;  %v12743_v12 = vld [vmem:[%s14210_s9 + $0x1c4] sm:$0xf0]  ;;  %v10586_v1 = vld [vmem:[%s14210_s9 + $0xed0] sm:$0xf] }
 0x3db   : > { %8026 = vmatpush.bf16.msra.mxu0 %v10583_v29  ;;  %8039 = vmatpush.bf16.msra.mxu1 %v12631_v30  ;;  %v9300_v30 = vld [vmem:[%s14210_s9 + $0x5c8] sm:$0xf0]  ;;  %v8787_v5 = vor.u32 %v12743_v12, %v8786_v49  ;;  %v13480_v49 = vld [vmem:[%s14210_s9 + $0x18d4] sm:$0xf] }
 0x3dc   : > { %7982 = vmatmul.bf16.vlgmr.msrb.gmra.mxu0 %v14352_v50  ;;  %7995 = vmatmul.bf16.vlgmr.msrb.gmra.mxu1 %v14354_v51  ;;  %v7789_v17 = vadd.f32 %v7788_v61, %v7776_v7  ;;  %v7749_v26 = vpop.f32.mrf.mxu2  ;;  %v7762_v22 = vpop.f32.mrf.mxu3  ;;  %v9303_v41 = vor.u32 %v12839_v28, %v9300_v30  ;;  %v13192_v61 = vld [vmem:[%s14210_s9 + $0xfcc] sm:$0xf0]  ;;  %v10588_v7 = vld [vmem:[%s14210_s9 + $0xfd0] sm:$0xf0] }
 0x3dd   : > { %v7750_v29 = vadd.f32 %v7749_v26, %v1492_v16  ;;  %v10587_v14 = vor.u32 %v13192_v61, %v10586_v1  ;;  %v13128_v16 = vld [vmem:[%s14210_s9 + $0xdcc] sm:$0xf0]  ;;  %v9564_v1 = vld [vmem:[%s14210_s9 + $0x7d0] sm:$0xf0] }
 0x3de   : > { %8001 = vmatpush.bf16.msrb.mxu2 %v10323_v38  ;;  %8014 = vmatpush.bf16.msrb.mxu3 %v12371_v34  ;;  %8405 = vst [vmem:[%s14676_s10 + $0x148] sm:$0xff] %v7789_v17  ;;  %v11347_v38 = vor.u32 %v13383_v27, %v11346_v23  ;;  %v9042_v34 = vld [vmem:[%s14210_s9 + $0x2c8] sm:$0xf]  ;;  %v10591_v17 = vor.u32 %v13160_v4, %v10588_v7  ;;  %v10332_v23 = vld [vmem:[%s14210_s9 + $0xdd0] sm:$0xf0] }
 0x3df   : > { %8027 = vmatpush.bf16.msra.mxu0 %v10327_v42  ;;  %8040 = vmatpush.bf16.msra.mxu1 %v12375_v43  ;;  %v7763_v33 = vadd.f32 %v7762_v22, %v7750_v29  ;;  %v11351_v42 = vor.u32 %v13351_v31, %v11348_v32  ;;  %v13319_v43 = vld [vmem:[%s14210_s9 + $0x13c4] sm:$0xf0]  ;;  %v10331_v26 = vor.u32 %v13128_v16, %v10330_v15  ;;  %v10074_v27 = vld [vmem:[%s14210_s9 + $0xad0] sm:$0xf]  ;;  %v13416_v61 = vld [vmem:[%s14210_s9 + $0x16d4] sm:$0xf] }
 0x3e0   : > { %v13064_v28 = vld [vmem:[%s14210_s9 + $0xbcc] sm:$0xf0]  ;;  %v10335_v29 = vor.u32 %v13096_v21, %v10332_v23  ;;  %v12840_v16 = vld [vmem:[%s14210_s9 + $0x4d4] sm:$0xf] }
 0x3e1   : > { %v7777_v35 = vpop.f32.mrf.mxu0  ;;  %v7790_v36 = vpop.f32.mrf.mxu1  ;;  %8404 = vst [vmem:[%s14676_s10 + $0x140] sm:$0xff] %v7763_v33  ;;  %v12122_v31 = vld [vmem:[%s14210_s9 + $0x1ad0] sm:$0xf]  ;;  %v13032_v33 = vld [vmem:[%s14210_s9 + $0xad4] sm:$0xf] }
 0x3e2   : > { %8002 = vmatpush.bf16.msrb.mxu2 %v10067_v52  ;;  %8015 = vmatpush.bf16.msrb.mxu3 %v12115_v53  ;;  %v9043_v52 = vor.u32 %v12807_v39, %v9042_v34  ;;  %v11091_v53 = vor.u32 %v13319_v43, %v11090_v40  ;;  %v13576_v32 = vld [vmem:[%s14210_s9 + $0x1bcc] sm:$0xf0]  ;;  %v10076_v35 = vld [vmem:[%s14210_s9 + $0xbd0] sm:$0xf0]  ;;  %v1495_v39 = vperm.slane %v16043_v46, 3 }
 0x3e3   : > { %8028 = vmatpush.bf16.msra.mxu0 %v10071_v56  ;;  %8041 = vmatpush.bf16.msra.mxu1 %v12119_v57  ;;  %v9047_v56 = vor.u32 %v12775_v44, %v9044_v45  ;;  %v11095_v57 = vor.u32 %v13287_v47, %v11092_v48  ;;  %v13544_v36 = vld [vmem:[%s14210_s9 + $0x1ad4] sm:$0xf]  ;;  %v12123_v34 = vor.u32 %v13576_v32, %v12122_v31  ;;  %v9818_v40 = vld [vmem:[%s14210_s9 + $0x8d0] sm:$0xf] }
 0x3e4   : > { %v7751_v58 = vpop.f32.mrf.mxu2  ;;  %v7764_v59 = vpop.f32.mrf.mxu3  ;;  %v11866_v44 = vld [vmem:[%s14210_s9 + $0x18d0] sm:$0xf]  ;;  %v12968_v47 = vld [vmem:[%s14210_s9 + $0x8d4] sm:$0xf] }
 0x3e5   : > { %v13512_v45 = vld [vmem:[%s14210_s9 + $0x19cc] sm:$0xf0]  ;;  %v9820_v48 = vld [vmem:[%s14210_s9 + $0x9d0] sm:$0xf0] }
 0x3e6   : > { %8003 = vmatpush.bf16.msrb.mxu2 %v9811_v2  ;;  %8016 = vmatpush.bf16.msrb.mxu3 %v11859_v3  ;;  %v12634_v2 = vld [vmem:[%s14210_s9 + $0x1ed0] sm:$0xf]  ;;  %v11867_v55 = vor.u32 %v13512_v45, %v11866_v44  ;;  %v9823_v60 = vor.u32 %v12968_v47, %v9820_v48  ;;  %v12776_v32 = vld [vmem:[%s14210_s9 + $0x2d4] sm:$0xf] }
 0x3e7   : > { %8029 = vmatpush.bf16.msra.mxu0 %v9815_v8  ;;  %8042 = vmatpush.bf16.msra.mxu1 %v11863_v10  ;;  %v13704_v3 = vld [vmem:[%s14210_s9 + $0x1fcc] sm:$0xf0]  ;;  %v13672_v8 = vld [vmem:[%s14210_s9 + $0x1ed4] sm:$0xf] }
 0x3e8   : > { %v12636_v10 = vld [vmem:[%s14210_s9 + $0x1fd0] sm:$0xf0]  ;;  %v12635_v9 = vor.u32 %v13704_v3, %v12634_v2  ;;  %v11610_v58 = vld [vmem:[%s14210_s9 + $0x16d0] sm:$0xf]  ;;  %v1494_v3 = vperm.slane %v16043_v46, 2 }
 0x3e9   : > { %v11612_v2 = vld [vmem:[%s14210_s9 + $0x17d0] sm:$0xf0]  ;;  %v9306_v7 = vld [vmem:[%s14210_s9 + $0x4d0] sm:$0xf] }
 0x3ea   : > { %8004 = vmatpush.bf16.msrb.mxu2 %v9555_v18  ;;  %8017 = vmatpush.bf16.msrb.mxu3 %v11603_v19  ;;  %v12639_v18 = vor.u32 %v13672_v8, %v12636_v10  ;;  %v12378_v19 = vld [vmem:[%s14210_s9 + $0x1cd0] sm:$0xf]  ;;  %v12712_v47 = vld [vmem:[%s14210_s9 + $0xd4] sm:$0xf] }
 0x3eb   : > { %8030 = vmatpush.bf16.msra.mxu0 %v9559_v24  ;;  %8043 = vmatpush.bf16.msra.mxu1 %v11607_v25  ;;  %v13608_v24 = vld [vmem:[%s14210_s9 + $0x1cd4] sm:$0xf]  ;;  %v12379_v22 = vor.u32 %v13640_v20, %v12378_v19  ;;  %v12872_v8 = vld [vmem:[%s14210_s9 + $0x5cc] sm:$0xf0] }
 0x3ec   : > { %v12380_v25 = vld [vmem:[%s14210_s9 + $0x1dd0] sm:$0xf0]  ;;  %v11354_v10 = vld [vmem:[%s14210_s9 + $0x14d0] sm:$0xf] }
 0x3ed   : > { %v12383_v30 = vor.u32 %v13608_v24, %v12380_v25  ;;  %v13384_v15 = vld [vmem:[%s14210_s9 + $0x15cc] sm:$0xf0]  ;;  %v13352_v19 = vld [vmem:[%s14210_s9 + $0x14d4] sm:$0xf]  ;;  %v9307_v25 = vor.u32 %v12872_v8, %v9306_v7  ;;  %v13641_v7 = vld [vmem:[%s14210_s9 + $0x1dd4] sm:$0xf0] }
 0x3ee   : > { %8005 = vmatpush.bf16.msrb.mxu2 %v9299_v37  ;;  %8018 = vmatpush.bf16.msrb.mxu3 %v11347_v38  ;;  %v12124_v37 = vld [vmem:[%s14210_s9 + $0x1bd0] sm:$0xf0]  ;;  %v10075_v38 = vor.u32 %v13064_v28, %v10074_v27  ;;  %v12808_v27 = vld [vmem:[%s14210_s9 + $0x3cc] sm:$0xf0]  ;;  %v13097_v8 = vld [vmem:[%s14210_s9 + $0xcdc] sm:$0xf] }
 0x3ef   : > { %8031 = vmatpush.bf16.msra.mxu0 %v9303_v41  ;;  %8044 = vmatpush.bf16.msra.mxu1 %v11351_v42  ;;  %v13000_v41 = vld [vmem:[%s14210_s9 + $0x9cc] sm:$0xf0]  ;;  %v10079_v42 = vor.u32 %v13032_v33, %v10076_v35  ;;  %v12127_v43 = vor.u32 %v13544_v36, %v12124_v37  ;;  %v11356_v20 = vld [vmem:[%s14210_s9 + $0x15d0] sm:$0xf0] }
 0x3f0   : > { %v9819_v54 = vor.u32 %v13000_v41, %v9818_v40  ;;  %v11098_v28 = vld [vmem:[%s14210_s9 + $0x12d0] sm:$0xf]  ;;  %v9052_v33 = vld [vmem:[%s14210_s9 + $0x3d0] sm:$0xf0] }
 0x3f1   : > { %v13320_v31 = vld [vmem:[%s14210_s9 + $0x13cc] sm:$0xf0]  ;;  %v13288_v35 = vld [vmem:[%s14210_s9 + $0x12d4] sm:$0xf] }
 0x3f2   : > { %8006 = vmatpush.bf16.msrb.mxu2 %v9043_v52  ;;  %8019 = vmatpush.bf16.msrb.mxu3 %v11091_v53  ;;  %v11868_v52 = vld [vmem:[%s14210_s9 + $0x19d0] sm:$0xf0]  ;;  %v8794_v37 = vld [vmem:[%s14210_s9 + $0xd0] sm:$0xf] }
 0x3f3   : > { %8032 = vmatpush.bf16.msra.mxu0 %v9047_v56  ;;  %8045 = vmatpush.bf16.msra.mxu1 %v11095_v57  ;;  %v9562_v56 = vld [vmem:[%s14210_s9 + $0x6d0] sm:$0xf]  ;;  %v11871_v62 = vor.u32 %v13480_v49, %v11868_v52  ;;  %v11100_v36 = vld [vmem:[%s14210_s9 + $0x13d0] sm:$0xf0] }
 0x3f4   : > { %v12936_v57 = vld [vmem:[%s14210_s9 + $0x7cc] sm:$0xf0]  ;;  %v8796_v48 = vld [vmem:[%s14210_s9 + $0x1d0] sm:$0xf0] }
 0x3f5   : > { %v10842_v40 = vld [vmem:[%s14210_s9 + $0x10d0] sm:$0xf]  ;;  %v13224_v49 = vld [vmem:[%s14210_s9 + $0x10d4] sm:$0xf] }
 0x3f6   : > { %8007 = vmatpush.bf16.msrb.mxu2 %v8787_v5  ;;  %8020 = vmatpush.bf16.msrb.mxu3 %v10835_v6  ;;  %v9563_v5 = vor.u32 %v12936_v57, %v9562_v56  ;;  %v11611_v6 = vor.u32 %v13448_v63, %v11610_v58  ;;  %v13256_v41 = vld [vmem:[%s14210_s9 + $0x11cc] sm:$0xf0]  ;;  %v10844_v52 = vld [vmem:[%s14210_s9 + $0x11d0] sm:$0xf0]  ;;  %v13161_v56 = vld [vmem:[%s14210_s9 + $0xedc] sm:$0xf]  ;;  %v8799_v63 = vor.u32 %v12712_v47, %v8796_v48 }
 0x3f7   : > { %8033 = vmatpush.bf16.msra.mxu0 %v8791_v11  ;;  %8046 = vmatpush.bf16.msra.mxu1 %v10839_v13  ;;  %v9567_v11 = vor.u32 %v12904_v0, %v9564_v1  ;;  %v11615_v13 = vor.u32 %v13416_v61, %v11612_v2  ;;  %v10843_v58 = vor.u32 %v13256_v41, %v10842_v40  ;;  %v10338_v2 = vld [vmem:[%s14210_s9 + $0xcd8] sm:$0xf] }
 0x3f8   : > { %v10847_v0 = vor.u32 %v13224_v49, %v10844_v52  ;;  %v13449_v49 = vld [vmem:[%s14210_s9 + $0x17d4] sm:$0xf0]  ;;  %v12905_v52 = vld [vmem:[%s14210_s9 + $0x6dc] sm:$0xf] }
 0x3f9   : > { %8008 = vmatmul.bf16.vlgmr.msrb.gmra.mxu2 %v14352_v50  ;;  %8021 = vmatmul.bf16.vlgmr.msrb.gmra.mxu3 %v14354_v51  ;;  %v7827_v53 = vpop.f32.mrf.mxu0  ;;  %v7840_v12 = vpop.f32.mrf.mxu1 }
 0x3fa   : > { %8052 = vmatpush.bf16.msra.mxu2 %v10587_v14  ;;  %8065 = vmatpush.bf16.msra.mxu3 %v12635_v9  ;;  %v7828_v59 = vadd.f32 %v7827_v53, %v1495_v39  ;;  %v12744_v39 = vld [vmem:[%s14210_s9 + $0x1cc] sm:$0xf0]  ;;  %v10594_v53 = vld [vmem:[%s14210_s9 + $0xed8] sm:$0xf] }
 0x3fb   : > { %8078 = vmatpush.bf16.msrb.mxu0 %v10591_v17  ;;  %8091 = vmatpush.bf16.msrb.mxu1 %v12639_v18  ;;  %v9308_v18 = vld [vmem:[%s14210_s9 + $0x5d0] sm:$0xf0]  ;;  %v8795_v57 = vor.u32 %v12744_v39, %v8794_v37  ;;  %v13481_v37 = vld [vmem:[%s14210_s9 + $0x18dc] sm:$0xf] }
 0x3fc   : > { %8034 = vmatmul.bf16.vlgmr.msra.gmra.mxu0 %v14352_v50  ;;  %8047 = vmatmul.bf16.vlgmr.msra.gmra.mxu1 %v14354_v51  ;;  %v7841_v4 = vadd.f32 %v7840_v12, %v7828_v59  ;;  %v7801_v14 = vpop.f32.mrf.mxu2  ;;  %v7814_v9 = vpop.f32.mrf.mxu3  ;;  %v13193_v12 = vld [vmem:[%s14210_s9 + $0xfd4] sm:$0xf0]  ;;  %v10596_v59 = vld [vmem:[%s14210_s9 + $0xfd8] sm:$0xf0] }
 0x3fd   : > { %v7802_v17 = vadd.f32 %v7801_v14, %v1494_v3  ;;  %v10595_v1 = vor.u32 %v13193_v12, %v10594_v53  ;;  %v13129_v3 = vld [vmem:[%s14210_s9 + $0xdd4] sm:$0xf0]  ;;  %v9572_v53 = vld [vmem:[%s14210_s9 + $0x7d8] sm:$0xf0] }
 0x3fe   : > { %8053 = vmatpush.bf16.msra.mxu2 %v10331_v26  ;;  %8066 = vmatpush.bf16.msra.mxu3 %v12379_v22  ;;  %8407 = vst [vmem:[%s14676_s10 + $0x158] sm:$0xff] %v7841_v4  ;;  %v11355_v26 = vor.u32 %v13384_v15, %v11354_v10  ;;  %v9050_v22 = vld [vmem:[%s14210_s9 + $0x2d0] sm:$0xf]  ;;  %v10599_v4 = vor.u32 %v13161_v56, %v10596_v59  ;;  %v10340_v10 = vld [vmem:[%s14210_s9 + $0xdd8] sm:$0xf0] }
 0x3ff   : > { %8079 = vmatpush.bf16.msrb.mxu0 %v10335_v29  ;;  %8092 = vmatpush.bf16.msrb.mxu1 %v12383_v30  ;;  %v7815_v21 = vadd.f32 %v7814_v9, %v7802_v17  ;;  %v9311_v29 = vor.u32 %v12840_v16, %v9308_v18  ;;  %v11359_v30 = vor.u32 %v13352_v19, %v11356_v20  ;;  %v10082_v15 = vld [vmem:[%s14210_s9 + $0xad8] sm:$0xf]  ;;  %v13417_v12 = vld [vmem:[%s14210_s9 + $0x16dc] sm:$0xf] }
 0x400   : > { %v10339_v14 = vor.u32 %v13129_v3, %v10338_v2  ;;  %v13065_v16 = vld [vmem:[%s14210_s9 + $0xbd4] sm:$0xf0]  ;;  %v10343_v17 = vor.u32 %v13097_v8, %v10340_v10  ;;  %v12841_v3 = vld [vmem:[%s14210_s9 + $0x4dc] sm:$0xf] }
 0x401   : > { %v7829_v23 = vpop.f32.mrf.mxu0  ;;  %v7842_v24 = vpop.f32.mrf.mxu1  ;;  %8406 = vst [vmem:[%s14676_s10 + $0x150] sm:$0xff] %v7815_v21  ;;  %v12130_v19 = vld [vmem:[%s14210_s9 + $0x1ad8] sm:$0xf]  ;;  %v13033_v21 = vld [vmem:[%s14210_s9 + $0xadc] sm:$0xf] }
 0x402   : > { %8054 = vmatpush.bf16.msra.mxu2 %v10075_v38  ;;  %8067 = vmatpush.bf16.msra.mxu3 %v12123_v34  ;;  %v9051_v38 = vor.u32 %v12808_v27, %v9050_v22  ;;  %v11099_v34 = vor.u32 %v13320_v31, %v11098_v28  ;;  %v13577_v20 = vld [vmem:[%s14210_s9 + $0x1bd4] sm:$0xf0]  ;;  %v10084_v23 = vld [vmem:[%s14210_s9 + $0xbd8] sm:$0xf0]  ;;  %v1497_v27 = vperm.slane %v16043_v46, 5 }
 0x403   : > { %8080 = vmatpush.bf16.msrb.mxu0 %v10079_v42  ;;  %8093 = vmatpush.bf16.msrb.mxu1 %v12127_v43  ;;  %v9055_v42 = vor.u32 %v12776_v32, %v9052_v33  ;;  %v11103_v43 = vor.u32 %v13288_v35, %v11100_v36  ;;  %v13545_v24 = vld [vmem:[%s14210_s9 + $0x1adc] sm:$0xf]  ;;  %v12131_v22 = vor.u32 %v13577_v20, %v12130_v19  ;;  %v9826_v28 = vld [vmem:[%s14210_s9 + $0x8d8] sm:$0xf] }
 0x404   : > { %v7803_v44 = vpop.f32.mrf.mxu2  ;;  %v7816_v45 = vpop.f32.mrf.mxu3  ;;  %v11874_v32 = vld [vmem:[%s14210_s9 + $0x18d8] sm:$0xf]  ;;  %v12969_v35 = vld [vmem:[%s14210_s9 + $0x8dc] sm:$0xf] }
 0x405   : > { %v13513_v33 = vld [vmem:[%s14210_s9 + $0x19d4] sm:$0xf0]  ;;  %v9828_v36 = vld [vmem:[%s14210_s9 + $0x9d8] sm:$0xf0] }
 0x406   : > { %8055 = vmatpush.bf16.msra.mxu2 %v9819_v54  ;;  %8068 = vmatpush.bf16.msra.mxu3 %v11867_v55  ;;  %v12642_v54 = vld [vmem:[%s14210_s9 + $0x1ed8] sm:$0xf]  ;;  %v11875_v41 = vor.u32 %v13513_v33, %v11874_v32  ;;  %v9831_v47 = vor.u32 %v12969_v35, %v9828_v36  ;;  %v12777_v20 = vld [vmem:[%s14210_s9 + $0x2dc] sm:$0xf] }
 0x407   : > { %8081 = vmatpush.bf16.msrb.mxu0 %v9823_v60  ;;  %8094 = vmatpush.bf16.msrb.mxu1 %v11871_v62  ;;  %v13705_v55 = vld [vmem:[%s14210_s9 + $0x1fd4] sm:$0xf0]  ;;  %v13673_v60 = vld [vmem:[%s14210_s9 + $0x1edc] sm:$0xf] }
 0x408   : > { %v12644_v62 = vld [vmem:[%s14210_s9 + $0x1fd8] sm:$0xf0]  ;;  %v12643_v61 = vor.u32 %v13705_v55, %v12642_v54  ;;  %v11618_v44 = vld [vmem:[%s14210_s9 + $0x16d8] sm:$0xf]  ;;  %v1496_v55 = vperm.slane %v16043_v46, 4 }
 0x409   : > { %v11620_v54 = vld [vmem:[%s14210_s9 + $0x17d8] sm:$0xf0]  ;;  %v9314_v59 = vld [vmem:[%s14210_s9 + $0x4d8] sm:$0xf] }
 0x40a   : > { %8056 = vmatpush.bf16.msra.mxu2 %v9563_v5  ;;  %8069 = vmatpush.bf16.msra.mxu3 %v11611_v6  ;;  %v12647_v5 = vor.u32 %v13673_v60, %v12644_v62  ;;  %v12386_v6 = vld [vmem:[%s14210_s9 + $0x1cd8] sm:$0xf]  ;;  %v12713_v35 = vld [vmem:[%s14210_s9 + $0xdc] sm:$0xf] }
 0x40b   : > { %8082 = vmatpush.bf16.msrb.mxu0 %v9567_v11  ;;  %8095 = vmatpush.bf16.msrb.mxu1 %v11615_v13  ;;  %v13609_v11 = vld [vmem:[%s14210_s9 + $0x1cdc] sm:$0xf]  ;;  %v12387_v9 = vor.u32 %v13641_v7, %v12386_v6  ;;  %v12873_v60 = vld [vmem:[%s14210_s9 + $0x5d4] sm:$0xf0] }
 0x40c   : > { %v12388_v13 = vld [vmem:[%s14210_s9 + $0x1dd8] sm:$0xf0]  ;;  %v11362_v62 = vld [vmem:[%s14210_s9 + $0x14d8] sm:$0xf] }
 0x40d   : > { %v12391_v18 = vor.u32 %v13609_v11, %v12388_v13  ;;  %v13385_v2 = vld [vmem:[%s14210_s9 + $0x15d4] sm:$0xf0]  ;;  %v13353_v6 = vld [vmem:[%s14210_s9 + $0x14dc] sm:$0xf]  ;;  %v9315_v13 = vor.u32 %v12873_v60, %v9314_v59  ;;  %v13642_v59 = vld [vmem:[%s14210_s9 + $0x1ddc] sm:$0xf0] }
 0x40e   : > { %8057 = vmatpush.bf16.msra.mxu2 %v9307_v25  ;;  %8070 = vmatpush.bf16.msra.mxu3 %v11355_v26  ;;  %v12132_v25 = vld [vmem:[%s14210_s9 + $0x1bd8] sm:$0xf0]  ;;  %v10083_v26 = vor.u32 %v13065_v16, %v10082_v15  ;;  %v12809_v15 = vld [vmem:[%s14210_s9 + $0x3d4] sm:$0xf0]  ;;  %v13098_v60 = vld [vmem:[%s14210_s9 + $0xce4] sm:$0xf] }
 0x40f   : > { %8083 = vmatpush.bf16.msrb.mxu0 %v9311_v29  ;;  %8096 = vmatpush.bf16.msrb.mxu1 %v11359_v30  ;;  %v13001_v29 = vld [vmem:[%s14210_s9 + $0x9d4] sm:$0xf0]  ;;  %v10087_v30 = vor.u32 %v13033_v21, %v10084_v23  ;;  %v12135_v31 = vor.u32 %v13545_v24, %v12132_v25  ;;  %v11364_v7 = vld [vmem:[%s14210_s9 + $0x15d8] sm:$0xf0] }
 0x410   : > { %v9827_v40 = vor.u32 %v13001_v29, %v9826_v28  ;;  %v11106_v16 = vld [vmem:[%s14210_s9 + $0x12d8] sm:$0xf]  ;;  %v9060_v21 = vld [vmem:[%s14210_s9 + $0x3d8] sm:$0xf0] }
 0x411   : > { %v13321_v19 = vld [vmem:[%s14210_s9 + $0x13d4] sm:$0xf0]  ;;  %v13289_v23 = vld [vmem:[%s14210_s9 + $0x12dc] sm:$0xf] }
 0x412   : > { %8058 = vmatpush.bf16.msra.mxu2 %v9051_v38  ;;  %8071 = vmatpush.bf16.msra.mxu3 %v11099_v34  ;;  %v11876_v38 = vld [vmem:[%s14210_s9 + $0x19d8] sm:$0xf0]  ;;  %v8802_v25 = vld [vmem:[%s14210_s9 + $0xd8] sm:$0xf] }
 0x413   : > { %8084 = vmatpush.bf16.msrb.mxu0 %v9055_v42  ;;  %8097 = vmatpush.bf16.msrb.mxu1 %v11103_v43  ;;  %v9570_v42 = vld [vmem:[%s14210_s9 + $0x6d8] sm:$0xf]  ;;  %v11879_v48 = vor.u32 %v13481_v37, %v11876_v38  ;;  %v11108_v24 = vld [vmem:[%s14210_s9 + $0x13d8] sm:$0xf0] }
 0x414   : > { %v12937_v43 = vld [vmem:[%s14210_s9 + $0x7d4] sm:$0xf0]  ;;  %v8804_v36 = vld [vmem:[%s14210_s9 + $0x1d8] sm:$0xf0] }
 0x415   : > { %v10850_v28 = vld [vmem:[%s14210_s9 + $0x10d8] sm:$0xf]  ;;  %v13225_v37 = vld [vmem:[%s14210_s9 + $0x10dc] sm:$0xf] }
 0x416   : > { %8059 = vmatpush.bf16.msra.mxu2 %v8795_v57  ;;  %8072 = vmatpush.bf16.msra.mxu3 %v10843_v58  ;;  %v9571_v57 = vor.u32 %v12937_v43, %v9570_v42  ;;  %v11619_v58 = vor.u32 %v13449_v49, %v11618_v44  ;;  %v13257_v29 = vld [vmem:[%s14210_s9 + $0x11d4] sm:$0xf0]  ;;  %v10852_v38 = vld [vmem:[%s14210_s9 + $0x11d8] sm:$0xf0]  ;;  %v13162_v42 = vld [vmem:[%s14210_s9 + $0xee4] sm:$0xf]  ;;  %v8807_v49 = vor.u32 %v12713_v35, %v8804_v36 }
 0x417   : > { %8085 = vmatpush.bf16.msrb.mxu0 %v8799_v63  ;;  %8098 = vmatpush.bf16.msrb.mxu1 %v10847_v0  ;;  %v9575_v63 = vor.u32 %v12905_v52, %v9572_v53  ;;  %v11623_v0 = vor.u32 %v13417_v12, %v11620_v54  ;;  %v10851_v44 = vor.u32 %v13257_v29, %v10850_v28  ;;  %v10346_v54 = vld [vmem:[%s14210_s9 + $0xce0] sm:$0xf] }
 0x418   : > { %v10855_v52 = vor.u32 %v13225_v37, %v10852_v38  ;;  %v13450_v37 = vld [vmem:[%s14210_s9 + $0x17dc] sm:$0xf0]  ;;  %v12906_v38 = vld [vmem:[%s14210_s9 + $0x6e4] sm:$0xf] }
 0x419   : > { %8060 = vmatmul.bf16.vlgmr.msra.gmra.mxu2 %v14352_v50  ;;  %8073 = vmatmul.bf16.vlgmr.msra.gmra.mxu3 %v14354_v51  ;;  %v7879_v34 = vpop.f32.mrf.mxu0  ;;  %v7892_v39 = vpop.f32.mrf.mxu1 }
 0x41a   : > { %8104 = vmatpush.bf16.msrb.mxu2 %v10595_v1  ;;  %8117 = vmatpush.bf16.msrb.mxu3 %v12643_v61  ;;  %v7880_v45 = vadd.f32 %v7879_v34, %v1497_v27  ;;  %v12745_v27 = vld [vmem:[%s14210_s9 + $0x1d4] sm:$0xf0]  ;;  %v10602_v34 = vld [vmem:[%s14210_s9 + $0xee0] sm:$0xf] }
 0x41b   : > { %8130 = vmatpush.bf16.msra.mxu0 %v10599_v4  ;;  %8143 = vmatpush.bf16.msra.mxu1 %v12647_v5  ;;  %v9316_v5 = vld [vmem:[%s14210_s9 + $0x5d8] sm:$0xf0]  ;;  %v8803_v43 = vor.u32 %v12745_v27, %v8802_v25  ;;  %v13482_v25 = vld [vmem:[%s14210_s9 + $0x18e4] sm:$0xf] }
 0x41c   : > { %8086 = vmatmul.bf16.vlgmr.msrb.gmra.mxu0 %v14352_v50  ;;  %8099 = vmatmul.bf16.vlgmr.msrb.gmra.mxu1 %v14354_v51  ;;  %v7893_v56 = vadd.f32 %v7892_v39, %v7880_v45  ;;  %v7853_v1 = vpop.f32.mrf.mxu2  ;;  %v7866_v61 = vpop.f32.mrf.mxu3  ;;  %v13194_v39 = vld [vmem:[%s14210_s9 + $0xfdc] sm:$0xf0]  ;;  %v10604_v45 = vld [vmem:[%s14210_s9 + $0xfe0] sm:$0xf0] }
 0x41d   : > { %v7854_v4 = vadd.f32 %v7853_v1, %v1496_v55  ;;  %v10603_v53 = vor.u32 %v13194_v39, %v10602_v34  ;;  %v13130_v55 = vld [vmem:[%s14210_s9 + $0xddc] sm:$0xf0]  ;;  %v9580_v34 = vld [vmem:[%s14210_s9 + $0x7e0] sm:$0xf0] }
 0x41e   : > { %8105 = vmatpush.bf16.msrb.mxu2 %v10339_v14  ;;  %8118 = vmatpush.bf16.msrb.mxu3 %v12387_v9  ;;  %8409 = vst [vmem:[%s14676_s10 + $0x168] sm:$0xff] %v7893_v56  ;;  %v11363_v14 = vor.u32 %v13385_v2, %v11362_v62  ;;  %v9058_v9 = vld [vmem:[%s14210_s9 + $0x2d8] sm:$0xf]  ;;  %v10607_v56 = vor.u32 %v13162_v42, %v10604_v45  ;;  %v10348_v62 = vld [vmem:[%s14210_s9 + $0xde0] sm:$0xf0] }
 0x41f   : > { %8131 = vmatpush.bf16.msra.mxu0 %v10343_v17  ;;  %8144 = vmatpush.bf16.msra.mxu1 %v12391_v18  ;;  %v7867_v8 = vadd.f32 %v7866_v61, %v7854_v4  ;;  %v9319_v17 = vor.u32 %v12841_v3, %v9316_v5  ;;  %v11367_v18 = vor.u32 %v13353_v6, %v11364_v7  ;;  %v10090_v2 = vld [vmem:[%s14210_s9 + $0xae0] sm:$0xf]  ;;  %v13418_v39 = vld [vmem:[%s14210_s9 + $0x16e4] sm:$0xf] }
 0x420   : > { %v10347_v1 = vor.u32 %v13130_v55, %v10346_v54  ;;  %v13066_v3 = vld [vmem:[%s14210_s9 + $0xbdc] sm:$0xf0]  ;;  %v10351_v4 = vor.u32 %v13098_v60, %v10348_v62  ;;  %v12842_v54 = vld [vmem:[%s14210_s9 + $0x4e4] sm:$0xf] }
 0x421   : > { %v7881_v10 = vpop.f32.mrf.mxu0  ;;  %v7894_v11 = vpop.f32.mrf.mxu1  ;;  %8408 = vst [vmem:[%s14676_s10 + $0x160] sm:$0xff] %v7867_v8  ;;  %v12138_v6 = vld [vmem:[%s14210_s9 + $0x1ae0] sm:$0xf]  ;;  %v13034_v8 = vld [vmem:[%s14210_s9 + $0xae4] sm:$0xf] }
 0x422   : > { %8106 = vmatpush.bf16.msrb.mxu2 %v10083_v26  ;;  %8119 = vmatpush.bf16.msrb.mxu3 %v12131_v22  ;;  %v9059_v26 = vor.u32 %v12809_v15, %v9058_v9  ;;  %v11107_v22 = vor.u32 %v13321_v19, %v11106_v16  ;;  %v13578_v7 = vld [vmem:[%s14210_s9 + $0x1bdc] sm:$0xf0]  ;;  %v10092_v10 = vld [vmem:[%s14210_s9 + $0xbe0] sm:$0xf0]  ;;  %v1499_v15 = vperm.slane %v16043_v46, 7 }
 0x423   : > { %8132 = vmatpush.bf16.msra.mxu0 %v10087_v30  ;;  %8145 = vmatpush.bf16.msra.mxu1 %v12135_v31  ;;  %v9063_v30 = vor.u32 %v12777_v20, %v9060_v21  ;;  %v11111_v31 = vor.u32 %v13289_v23, %v11108_v24  ;;  %v13546_v11 = vld [vmem:[%s14210_s9 + $0x1ae4] sm:$0xf]  ;;  %v12139_v9 = vor.u32 %v13578_v7, %v12138_v6  ;;  %v9834_v16 = vld [vmem:[%s14210_s9 + $0x8e0] sm:$0xf] }
 0x424   : > { %v7855_v32 = vpop.f32.mrf.mxu2  ;;  %v7868_v33 = vpop.f32.mrf.mxu3  ;;  %v11882_v20 = vld [vmem:[%s14210_s9 + $0x18e0] sm:$0xf]  ;;  %v12970_v23 = vld [vmem:[%s14210_s9 + $0x8e4] sm:$0xf] }
 0x425   : > { %v13514_v21 = vld [vmem:[%s14210_s9 + $0x19dc] sm:$0xf0]  ;;  %v9836_v24 = vld [vmem:[%s14210_s9 + $0x9e0] sm:$0xf0] }
 0x426   : > { %8107 = vmatpush.bf16.msrb.mxu2 %v9827_v40  ;;  %8120 = vmatpush.bf16.msrb.mxu3 %v11875_v41  ;;  %v12650_v40 = vld [vmem:[%s14210_s9 + $0x1ee0] sm:$0xf]  ;;  %v11883_v29 = vor.u32 %v13514_v21, %v11882_v20  ;;  %v9839_v35 = vor.u32 %v12970_v23, %v9836_v24  ;;  %v12778_v6 = vld [vmem:[%s14210_s9 + $0x2e4] sm:$0xf] }
 0x427   : > { %8133 = vmatpush.bf16.msra.mxu0 %v9831_v47  ;;  %8146 = vmatpush.bf16.msra.mxu1 %v11879_v48  ;;  %v13706_v41 = vld [vmem:[%s14210_s9 + $0x1fdc] sm:$0xf0]  ;;  %v13674_v47 = vld [vmem:[%s14210_s9 + $0x1ee4] sm:$0xf] }
 0x428   : > { %v12652_v48 = vld [vmem:[%s14210_s9 + $0x1fe0] sm:$0xf0]  ;;  %v12651_v12 = vor.u32 %v13706_v41, %v12650_v40  ;;  %v11626_v32 = vld [vmem:[%s14210_s9 + $0x16e0] sm:$0xf]  ;;  %v1498_v41 = vperm.slane %v16043_v46, 6 }
 0x429   : > { %v11628_v40 = vld [vmem:[%s14210_s9 + $0x17e0] sm:$0xf0]  ;;  %v9322_v45 = vld [vmem:[%s14210_s9 + $0x4e0] sm:$0xf] }
 0x42a   : > { %8108 = vmatpush.bf16.msrb.mxu2 %v9571_v57  ;;  %8121 = vmatpush.bf16.msrb.mxu3 %v11619_v58  ;;  %v12655_v57 = vor.u32 %v13674_v47, %v12652_v48  ;;  %v12394_v58 = vld [vmem:[%s14210_s9 + $0x1ce0] sm:$0xf]  ;;  %v9068_v7 = vld [vmem:[%s14210_s9 + $0x3e0] sm:$0xf0] }
 0x42b   : > { %8134 = vmatpush.bf16.msra.mxu0 %v9575_v63  ;;  %8147 = vmatpush.bf16.msra.mxu1 %v11623_v0  ;;  %v13610_v63 = vld [vmem:[%s14210_s9 + $0x1ce4] sm:$0xf]  ;;  %v12395_v61 = vor.u32 %v13642_v59, %v12394_v58  ;;  %v12874_v47 = vld [vmem:[%s14210_s9 + $0x5dc] sm:$0xf0] }
 0x42c   : > { %v12396_v0 = vld [vmem:[%s14210_s9 + $0x1de0] sm:$0xf0]  ;;  %v11370_v48 = vld [vmem:[%s14210_s9 + $0x14e0] sm:$0xf] }
 0x42d   : > { %v12399_v5 = vor.u32 %v13610_v63, %v12396_v0  ;;  %v11372_v58 = vld [vmem:[%s14210_s9 + $0x15e0] sm:$0xf0]  ;;  %v9323_v63 = vor.u32 %v12874_v47, %v9322_v45  ;;  %v13099_v45 = vld [vmem:[%s14210_s9 + $0xcec] sm:$0xf] }
 0x42e   : > { %8109 = vmatpush.bf16.msrb.mxu2 %v9315_v13  ;;  %8122 = vmatpush.bf16.msrb.mxu3 %v11363_v14  ;;  %v12140_v13 = vld [vmem:[%s14210_s9 + $0x1be0] sm:$0xf0]  ;;  %v10091_v14 = vor.u32 %v13066_v3, %v10090_v2  ;;  %v11114_v2 = vld [vmem:[%s14210_s9 + $0x12e0] sm:$0xf]  ;;  %v10356_v47 = vld [vmem:[%s14210_s9 + $0xde8] sm:$0xf0] }
 0x42f   : > { %8135 = vmatpush.bf16.msra.mxu0 %v9319_v17  ;;  %8148 = vmatpush.bf16.msra.mxu1 %v11367_v18  ;;  %v13002_v17 = vld [vmem:[%s14210_s9 + $0x9dc] sm:$0xf0]  ;;  %v10095_v18 = vor.u32 %v13034_v8, %v10092_v10  ;;  %v12143_v19 = vor.u32 %v13546_v11, %v12140_v13  ;;  %v13290_v8 = vld [vmem:[%s14210_s9 + $0x12e4] sm:$0xf] }
 0x430   : > { %v9835_v28 = vor.u32 %v13002_v17, %v9834_v16  ;;  %v11116_v10 = vld [vmem:[%s14210_s9 + $0x13e0] sm:$0xf0]  ;;  %v8810_v11 = vld [vmem:[%s14210_s9 + $0xe0] sm:$0xf]  ;;  %v9071_v17 = vor.u32 %v12778_v6, %v9068_v7  ;;  %v11890_v6 = vld [vmem:[%s14210_s9 + $0x18e8] sm:$0xf] }
 0x431   : > { %v13258_v16 = vld [vmem:[%s14210_s9 + $0x11dc] sm:$0xf0]  ;;  %v12714_v21 = vld [vmem:[%s14210_s9 + $0xe4] sm:$0xf]  ;;  %v13515_v7 = vld [vmem:[%s14210_s9 + $0x19e4] sm:$0xf0] }
 0x432   : > { %8110 = vmatpush.bf16.msrb.mxu2 %v9059_v26  ;;  %8123 = vmatpush.bf16.msrb.mxu3 %v11107_v22  ;;  %v11884_v26 = vld [vmem:[%s14210_s9 + $0x19e0] sm:$0xf0] }
 0x433   : > { %8136 = vmatpush.bf16.msra.mxu0 %v9063_v30  ;;  %8149 = vmatpush.bf16.msra.mxu1 %v11111_v31  ;;  %v9578_v30 = vld [vmem:[%s14210_s9 + $0x6e0] sm:$0xf]  ;;  %v11887_v36 = vor.u32 %v13482_v25, %v11884_v26  ;;  %v8812_v23 = vld [vmem:[%s14210_s9 + $0x1e0] sm:$0xf0]  ;;  %v10610_v26 = vld [vmem:[%s14210_s9 + $0xee8] sm:$0xf] }
 0x434   : > { %v12938_v31 = vld [vmem:[%s14210_s9 + $0x7dc] sm:$0xf0]  ;;  %v13226_v24 = vld [vmem:[%s14210_s9 + $0x10e4] sm:$0xf] }
 0x435   : > { %v10860_v25 = vld [vmem:[%s14210_s9 + $0x11e0] sm:$0xf0] }
 0x436   : > { %8111 = vmatpush.bf16.msrb.mxu2 %v8803_v43  ;;  %8124 = vmatpush.bf16.msrb.mxu3 %v10851_v44  ;;  %v9579_v43 = vor.u32 %v12938_v31, %v9578_v30  ;;  %v11627_v44 = vor.u32 %v13450_v37, %v11626_v32  ;;  %v10612_v32 = vld [vmem:[%s14210_s9 + $0xfe8] sm:$0xf0]  ;;  %v10863_v37 = vor.u32 %v13226_v24, %v10860_v25  ;;  %v13451_v24 = vld [vmem:[%s14210_s9 + $0x17e4] sm:$0xf0] }
 0x437   : > { %8137 = vmatpush.bf16.msra.mxu0 %v8807_v49  ;;  %8150 = vmatpush.bf16.msra.mxu1 %v10855_v52  ;;  %v9583_v49 = vor.u32 %v12906_v38, %v9580_v34  ;;  %v11631_v52 = vor.u32 %v13418_v39, %v11628_v40  ;;  %v10354_v39 = vld [vmem:[%s14210_s9 + $0xce8] sm:$0xf]  ;;  %v12907_v25 = vld [vmem:[%s14210_s9 + $0x6ec] sm:$0xf] }
 0x438   : > { %v13131_v40 = vld [vmem:[%s14210_s9 + $0xde4] sm:$0xf0] }
 0x439   : > { %8112 = vmatmul.bf16.vlgmr.msrb.gmra.mxu2 %v14352_v50  ;;  %8125 = vmatmul.bf16.vlgmr.msrb.gmra.mxu3 %v14354_v51  ;;  %v7931_v22 = vpop.f32.mrf.mxu0  ;;  %v7944_v27 = vpop.f32.mrf.mxu1 }
 0x43a   : > { %8156 = vmatpush.bf16.msra.mxu2 %v10603_v53  ;;  %8169 = vmatpush.bf16.msra.mxu3 %v12651_v12  ;;  %v7932_v33 = vadd.f32 %v7931_v22, %v1499_v15  ;;  %v13386_v12 = vld [vmem:[%s14210_s9 + $0x15dc] sm:$0xf0]  ;;  %v13195_v22 = vld [vmem:[%s14210_s9 + $0xfe4] sm:$0xf0] }
 0x43b   : > { %8182 = vmatpush.bf16.msrb.mxu0 %v10607_v56  ;;  %8195 = vmatpush.bf16.msrb.mxu1 %v12655_v57  ;;  %v9324_v56 = vld [vmem:[%s14210_s9 + $0x5e0] sm:$0xf0]  ;;  %v11371_v0 = vor.u32 %v13386_v12, %v11370_v48  ;;  %v10858_v15 = vld [vmem:[%s14210_s9 + $0x10e0] sm:$0xf]  ;;  %v10611_v38 = vor.u32 %v13195_v22, %v10610_v26  ;;  %v13611_v48 = vld [vmem:[%s14210_s9 + $0x1cec] sm:$0xf] }
 0x43c   : > { %8138 = vmatmul.bf16.vlgmr.msra.gmra.mxu0 %v14352_v50  ;;  %8151 = vmatmul.bf16.vlgmr.msra.gmra.mxu1 %v14354_v51  ;;  %v7945_v42 = vadd.f32 %v7944_v27, %v7932_v33  ;;  %v7905_v46 = vpop.f32.mrf.mxu2  ;;  %v7918_v53 = vpop.f32.mrf.mxu3  ;;  %v13354_v57 = vld [vmem:[%s14210_s9 + $0x14e4] sm:$0xf]  ;;  %v9327_v3 = vor.u32 %v12842_v54, %v9324_v56  ;;  %v12658_v27 = vld [vmem:[%s14210_s9 + $0x1ee8] sm:$0xf]  ;;  %v10859_v31 = vor.u32 %v13258_v16, %v10858_v15  ;;  %v13675_v33 = vld [vmem:[%s14210_s9 + $0x1eec] sm:$0xf] }
 0x43d   : > { %v7906_v55 = vadd.f32 %v7905_v46, %v1498_v41  ;;  %v13067_v12 = vld [vmem:[%s14210_s9 + $0xbe4] sm:$0xf0]  ;;  %v11891_v16 = vor.u32 %v13515_v7, %v11890_v6  ;;  %v9588_v26 = vld [vmem:[%s14210_s9 + $0x7e8] sm:$0xf0] }
 0x43e   : > { %8157 = vmatpush.bf16.msra.mxu2 %v10347_v1  ;;  %8170 = vmatpush.bf16.msra.mxu3 %v12395_v61  ;;  %8411 = vst [vmem:[%s14676_s10 + $0x178] sm:$0xff] %v7945_v42  ;;  %v9066_v1 = vld [vmem:[%s14210_s9 + $0x2e0] sm:$0xf]  ;;  %v12146_v54 = vld [vmem:[%s14210_s9 + $0x1ae8] sm:$0xf] }
 0x43f   : > { %8183 = vmatpush.bf16.msrb.mxu0 %v10351_v4  ;;  %8196 = vmatpush.bf16.msrb.mxu1 %v12399_v5  ;;  %v7919_v59 = vadd.f32 %v7918_v53, %v7906_v55  ;;  %v12810_v61 = vld [vmem:[%s14210_s9 + $0x3dc] sm:$0xf0]  ;;  %v11375_v4 = vor.u32 %v13354_v57, %v11372_v58  ;;  %v10098_v53 = vld [vmem:[%s14210_s9 + $0xae8] sm:$0xf]  ;;  %v10359_v55 = vor.u32 %v13099_v45, %v10356_v47  ;;  %v13035_v58 = vld [vmem:[%s14210_s9 + $0xaec] sm:$0xf] }
 0x440   : > { %v13322_v5 = vld [vmem:[%s14210_s9 + $0x13dc] sm:$0xf0]  ;;  %v9067_v13 = vor.u32 %v12810_v61, %v9066_v1  ;;  %v13579_v57 = vld [vmem:[%s14210_s9 + $0x1be4] sm:$0xf0]  ;;  %v13419_v22 = vld [vmem:[%s14210_s9 + $0x16ec] sm:$0xf] }
 0x441   : > { %v7933_v60 = vpop.f32.mrf.mxu0  ;;  %v7946_v62 = vpop.f32.mrf.mxu1  ;;  %8410 = vst [vmem:[%s14676_s10 + $0x170] sm:$0xff] %v7919_v59  ;;  %v16334_v59 = vld [vmem:[%s14643_s30 + $0x30] sm:$0xff]  ;;  %v12147_v1 = vor.u32 %v13579_v57, %v12146_v54  ;;  %v12779_v57 = vld [vmem:[%s14210_s9 + $0x2ec] sm:$0xf] }
 0x442   : > { %8158 = vmatpush.bf16.msra.mxu2 %v10091_v14  ;;  %8171 = vmatpush.bf16.msra.mxu3 %v12139_v9  ;;  %v11115_v14 = vor.u32 %v13322_v5, %v11114_v2  ;;  %v12746_v9 = vld [vmem:[%s14210_s9 + $0x1dc] sm:$0xf0]  ;;  %v10100_v60 = vld [vmem:[%s14210_s9 + $0xbe8] sm:$0xf0]  ;;  %v1501_v61 = vperm.slane %v16334_v59, 1 }
 0x443   : > { %8184 = vmatpush.bf16.msrb.mxu0 %v10095_v18  ;;  %8197 = vmatpush.bf16.msrb.mxu1 %v12143_v19  ;;  %v11119_v18 = vor.u32 %v13290_v8, %v11116_v10  ;;  %v8811_v30 = vor.u32 %v12746_v9, %v8810_v11  ;;  %v13547_v62 = vld [vmem:[%s14210_s9 + $0x1aec] sm:$0xf]  ;;  %v9842_v2 = vld [vmem:[%s14210_s9 + $0x8e8] sm:$0xf] }
 0x444   : > { %v7907_v19 = vpop.f32.mrf.mxu2  ;;  %v7920_v20 = vpop.f32.mrf.mxu3  ;;  %v12971_v8 = vld [vmem:[%s14210_s9 + $0x8ec] sm:$0xf] }
 0x445   : > { %v9844_v10 = vld [vmem:[%s14210_s9 + $0x9e8] sm:$0xf0]  ;;  %v11634_v19 = vld [vmem:[%s14210_s9 + $0x16e8] sm:$0xf] }
 0x446   : > { %8159 = vmatpush.bf16.msra.mxu2 %v9835_v28  ;;  %8172 = vmatpush.bf16.msra.mxu3 %v11883_v29  ;;  %v13707_v28 = vld [vmem:[%s14210_s9 + $0x1fe4] sm:$0xf0]  ;;  %v13163_v29 = vld [vmem:[%s14210_s9 + $0xeec] sm:$0xf] }
 0x447   : > { %8185 = vmatpush.bf16.msrb.mxu0 %v9839_v35  ;;  %8198 = vmatpush.bf16.msrb.mxu1 %v11887_v36  ;;  %v12660_v35 = vld [vmem:[%s14210_s9 + $0x1fe8] sm:$0xf0]  ;;  %v8815_v36 = vor.u32 %v12714_v21, %v8812_v23  ;;  %v12659_v34 = vor.u32 %v13707_v28, %v12658_v27  ;;  %v10615_v41 = vor.u32 %v13163_v29, %v10612_v32  ;;  %v1500_v28 = vperm.slane %v16334_v59, 0  ;;  %v9330_v32 = vld [vmem:[%s14210_s9 + $0x4e8] sm:$0xf] }
 0x448   : > { %v12663_v42 = vor.u32 %v13675_v33, %v12660_v35  ;;  %v13483_v11 = vld [vmem:[%s14210_s9 + $0x18ec] sm:$0xf]  ;;  %v9847_v21 = vor.u32 %v12971_v8, %v9844_v10  ;;  %v12875_v33 = vld [vmem:[%s14210_s9 + $0x5e4] sm:$0xf0] }
 0x449   : > { %v11636_v27 = vld [vmem:[%s14210_s9 + $0x17e8] sm:$0xf0]  ;;  %v11378_v35 = vld [vmem:[%s14210_s9 + $0x14e8] sm:$0xf] }
 0x44a   : > { %8160 = vmatpush.bf16.msra.mxu2 %v9579_v43  ;;  %8173 = vmatpush.bf16.msra.mxu3 %v11627_v44  ;;  %v12402_v43 = vld [vmem:[%s14210_s9 + $0x1ce8] sm:$0xf]  ;;  %v12715_v8 = vld [vmem:[%s14210_s9 + $0xec] sm:$0xf] }
 0x44b   : > { %8186 = vmatpush.bf16.msrb.mxu0 %v9583_v49  ;;  %8199 = vmatpush.bf16.msrb.mxu1 %v11631_v52  ;;  %v13643_v44 = vld [vmem:[%s14210_s9 + $0x1de4] sm:$0xf0]  ;;  %v12404_v49 = vld [vmem:[%s14210_s9 + $0x1de8] sm:$0xf0]  ;;  %v10355_v52 = vor.u32 %v13131_v40, %v10354_v39 }
 0x44c   : > { %v12403_v46 = vor.u32 %v13643_v44, %v12402_v43  ;;  %v12407_v56 = vor.u32 %v13611_v48, %v12404_v49  ;;  %v13387_v39 = vld [vmem:[%s14210_s9 + $0x15e4] sm:$0xf0]  ;;  %v12843_v40 = vld [vmem:[%s14210_s9 + $0x4ec] sm:$0xf]  ;;  %v9331_v49 = vor.u32 %v12875_v33, %v9330_v32  ;;  %v13644_v32 = vld [vmem:[%s14210_s9 + $0x1dec] sm:$0xf0] }
 0x44d   : > { %v13355_v43 = vld [vmem:[%s14210_s9 + $0x14ec] sm:$0xf]  ;;  %v13100_v33 = vld [vmem:[%s14210_s9 + $0xcf4] sm:$0xf] }
 0x44e   : > { %8161 = vmatpush.bf16.msra.mxu2 %v9323_v63  ;;  %8174 = vmatpush.bf16.msra.mxu3 %v11371_v0  ;;  %v12148_v63 = vld [vmem:[%s14210_s9 + $0x1be8] sm:$0xf0]  ;;  %v10099_v0 = vor.u32 %v13067_v12, %v10098_v53  ;;  %v12811_v53 = vld [vmem:[%s14210_s9 + $0x3e4] sm:$0xf0] }
 0x44f   : > { %8187 = vmatpush.bf16.msrb.mxu0 %v9327_v3  ;;  %8200 = vmatpush.bf16.msrb.mxu1 %v11375_v4  ;;  %v13003_v3 = vld [vmem:[%s14210_s9 + $0x9e4] sm:$0xf0]  ;;  %v10103_v4 = vor.u32 %v13035_v58, %v10100_v60  ;;  %v12151_v5 = vor.u32 %v13547_v62, %v12148_v63  ;;  %v11380_v44 = vld [vmem:[%s14210_s9 + $0x15e8] sm:$0xf0] }
 0x450   : > { %v9843_v15 = vor.u32 %v13003_v3, %v9842_v2  ;;  %v11122_v12 = vld [vmem:[%s14210_s9 + $0x12e8] sm:$0xf]  ;;  %v9076_v58 = vld [vmem:[%s14210_s9 + $0x3e8] sm:$0xf0] }
 0x451   : > { %v13291_v60 = vld [vmem:[%s14210_s9 + $0x12ec] sm:$0xf]  ;;  %v8818_v63 = vld [vmem:[%s14210_s9 + $0xe8] sm:$0xf] }
 0x452   : > { %8162 = vmatpush.bf16.msra.mxu2 %v9067_v13  ;;  %8175 = vmatpush.bf16.msra.mxu3 %v11115_v14  ;;  %v11892_v13 = vld [vmem:[%s14210_s9 + $0x19e8] sm:$0xf0]  ;;  %v10866_v2 = vld [vmem:[%s14210_s9 + $0x10e8] sm:$0xf] }
 0x453   : > { %8188 = vmatpush.bf16.msrb.mxu0 %v9071_v17  ;;  %8201 = vmatpush.bf16.msrb.mxu1 %v11119_v18  ;;  %v9586_v17 = vld [vmem:[%s14210_s9 + $0x6e8] sm:$0xf]  ;;  %v11895_v23 = vor.u32 %v13483_v11, %v11892_v13  ;;  %v11124_v62 = vld [vmem:[%s14210_s9 + $0x13e8] sm:$0xf0] }
 0x454   : > { %v12939_v18 = vld [vmem:[%s14210_s9 + $0x7e4] sm:$0xf0]  ;;  %v8820_v10 = vld [vmem:[%s14210_s9 + $0x1e8] sm:$0xf0] }
 0x455   : > { %v13259_v3 = vld [vmem:[%s14210_s9 + $0x11e4] sm:$0xf0]  ;;  %v13227_v11 = vld [vmem:[%s14210_s9 + $0x10ec] sm:$0xf] }
 0x456   : > { %8163 = vmatpush.bf16.msra.mxu2 %v8811_v30  ;;  %8176 = vmatpush.bf16.msra.mxu3 %v10859_v31  ;;  %v9587_v30 = vor.u32 %v12939_v18, %v9586_v17  ;;  %v11635_v31 = vor.u32 %v13451_v24, %v11634_v19  ;;  %v10868_v13 = vld [vmem:[%s14210_s9 + $0x11e8] sm:$0xf0]  ;;  %v13164_v17 = vld [vmem:[%s14210_s9 + $0xef4] sm:$0xf]  ;;  %v10867_v19 = vor.u32 %v13259_v3, %v10866_v2 }
 0x457   : > { %8189 = vmatpush.bf16.msrb.mxu0 %v8815_v36  ;;  %8202 = vmatpush.bf16.msrb.mxu1 %v10863_v37  ;;  %v9591_v36 = vor.u32 %v12907_v25, %v9588_v26  ;;  %v11639_v37 = vor.u32 %v13419_v22, %v11636_v27  ;;  %v8823_v24 = vor.u32 %v12715_v8, %v8820_v10  ;;  %v10362_v27 = vld [vmem:[%s14210_s9 + $0xcf0] sm:$0xf] }
 0x458   : > { %v10871_v25 = vor.u32 %v13227_v11, %v10868_v13  ;;  %v13452_v11 = vld [vmem:[%s14210_s9 + $0x17ec] sm:$0xf0]  ;;  %v12908_v13 = vld [vmem:[%s14210_s9 + $0x6f4] sm:$0xf] }
 0x459   : > { %8164 = vmatmul.bf16.vlgmr.msra.gmra.mxu2 %v14352_v50  ;;  %8177 = vmatmul.bf16.vlgmr.msra.gmra.mxu3 %v14354_v51  ;;  %v7983_v14 = vpop.f32.mrf.mxu0  ;;  %v7996_v9 = vpop.f32.mrf.mxu1 }
 0x45a   : > { %8208 = vmatpush.bf16.msrb.mxu2 %v10611_v38  ;;  %8221 = vmatpush.bf16.msrb.mxu3 %v12659_v34  ;;  %v7984_v20 = vadd.f32 %v7983_v14, %v1501_v61  ;;  %v12747_v61 = vld [vmem:[%s14210_s9 + $0x1e4] sm:$0xf0]  ;;  %v10618_v14 = vld [vmem:[%s14210_s9 + $0xef0] sm:$0xf] }
 0x45b   : > { %8234 = vmatpush.bf16.msra.mxu0 %v10615_v41  ;;  %8247 = vmatpush.bf16.msra.mxu1 %v12663_v42  ;;  %v9332_v42 = vld [vmem:[%s14210_s9 + $0x5e8] sm:$0xf0]  ;;  %v8819_v18 = vor.u32 %v12747_v61, %v8818_v63  ;;  %v13484_v63 = vld [vmem:[%s14210_s9 + $0x18f4] sm:$0xf] }
 0x45c   : > { %8190 = vmatmul.bf16.vlgmr.msrb.gmra.mxu0 %v14352_v50  ;;  %8203 = vmatmul.bf16.vlgmr.msrb.gmra.mxu1 %v14354_v51  ;;  %v7997_v29 = vadd.f32 %v7996_v9, %v7984_v20  ;;  %v7957_v38 = vpop.f32.mrf.mxu2  ;;  %v7970_v34 = vpop.f32.mrf.mxu3  ;;  %v9335_v54 = vor.u32 %v12843_v40, %v9332_v42  ;;  %v13196_v9 = vld [vmem:[%s14210_s9 + $0xfec] sm:$0xf0]  ;;  %v10620_v20 = vld [vmem:[%s14210_s9 + $0xff0] sm:$0xf0] }
 0x45d   : > { %v7958_v41 = vadd.f32 %v7957_v38, %v1500_v28  ;;  %v10619_v26 = vor.u32 %v13196_v9, %v10618_v14  ;;  %v13132_v28 = vld [vmem:[%s14210_s9 + $0xdec] sm:$0xf0]  ;;  %v9596_v14 = vld [vmem:[%s14210_s9 + $0x7f0] sm:$0xf0] }
 0x45e   : > { %8209 = vmatpush.bf16.msrb.mxu2 %v10355_v52  ;;  %8222 = vmatpush.bf16.msrb.mxu3 %v12403_v46  ;;  %8413 = vst [vmem:[%s14676_s10 + $0x188] sm:$0xff] %v7997_v29  ;;  %v11379_v52 = vor.u32 %v13387_v39, %v11378_v35  ;;  %v9074_v46 = vld [vmem:[%s14210_s9 + $0x2e8] sm:$0xf]  ;;  %v10623_v29 = vor.u32 %v13164_v17, %v10620_v20  ;;  %v10364_v35 = vld [vmem:[%s14210_s9 + $0xdf0] sm:$0xf0] }
 0x45f   : > { %8235 = vmatpush.bf16.msra.mxu0 %v10359_v55  ;;  %8248 = vmatpush.bf16.msra.mxu1 %v12407_v56  ;;  %v7971_v45 = vadd.f32 %v7970_v34, %v7958_v41  ;;  %v11383_v55 = vor.u32 %v13355_v43, %v11380_v44  ;;  %v13323_v56 = vld [vmem:[%s14210_s9 + $0x13e4] sm:$0xf0]  ;;  %v10363_v38 = vor.u32 %v13132_v28, %v10362_v27  ;;  %v10106_v39 = vld [vmem:[%s14210_s9 + $0xaf0] sm:$0xf]  ;;  %v13420_v9 = vld [vmem:[%s14210_s9 + $0x16f4] sm:$0xf] }
 0x460   : > { %v13068_v40 = vld [vmem:[%s14210_s9 + $0xbec] sm:$0xf0]  ;;  %v10367_v41 = vor.u32 %v13100_v33, %v10364_v35  ;;  %v12844_v28 = vld [vmem:[%s14210_s9 + $0x4f4] sm:$0xf] }
 0x461   : > { %v7985_v47 = vpop.f32.mrf.mxu0  ;;  %v7998_v48 = vpop.f32.mrf.mxu1  ;;  %8412 = vst [vmem:[%s14676_s10 + $0x180] sm:$0xff] %v7971_v45  ;;  %v12154_v43 = vld [vmem:[%s14210_s9 + $0x1af0] sm:$0xf]  ;;  %v13036_v45 = vld [vmem:[%s14210_s9 + $0xaf4] sm:$0xf] }
 0x462   : > { %8210 = vmatpush.bf16.msrb.mxu2 %v10099_v0  ;;  %8223 = vmatpush.bf16.msrb.mxu3 %v12147_v1  ;;  %v9075_v0 = vor.u32 %v12811_v53, %v9074_v46  ;;  %v11123_v1 = vor.u32 %v13323_v56, %v11122_v12  ;;  %v13580_v44 = vld [vmem:[%s14210_s9 + $0x1bec] sm:$0xf0]  ;;  %v10108_v47 = vld [vmem:[%s14210_s9 + $0xbf0] sm:$0xf0]  ;;  %v1503_v53 = vperm.slane %v16334_v59, 3 }
 0x463   : > { %8236 = vmatpush.bf16.msra.mxu0 %v10103_v4  ;;  %8249 = vmatpush.bf16.msra.mxu1 %v12151_v5  ;;  %v9079_v4 = vor.u32 %v12779_v57, %v9076_v58  ;;  %v11127_v5 = vor.u32 %v13291_v60, %v11124_v62  ;;  %v13548_v48 = vld [vmem:[%s14210_s9 + $0x1af4] sm:$0xf]  ;;  %v12155_v46 = vor.u32 %v13580_v44, %v12154_v43  ;;  %v9850_v12 = vld [vmem:[%s14210_s9 + $0x8f0] sm:$0xf] }
 0x464   : > { %v7959_v6 = vpop.f32.mrf.mxu2  ;;  %v7972_v7 = vpop.f32.mrf.mxu3  ;;  %v11898_v57 = vld [vmem:[%s14210_s9 + $0x18f0] sm:$0xf]  ;;  %v12972_v60 = vld [vmem:[%s14210_s9 + $0x8f4] sm:$0xf] }
 0x465   : > { %v13516_v58 = vld [vmem:[%s14210_s9 + $0x19ec] sm:$0xf0]  ;;  %v9852_v62 = vld [vmem:[%s14210_s9 + $0x9f0] sm:$0xf0] }
 0x466   : > { %8211 = vmatpush.bf16.msrb.mxu2 %v9843_v15  ;;  %8224 = vmatpush.bf16.msrb.mxu3 %v11891_v16  ;;  %v12666_v15 = vld [vmem:[%s14210_s9 + $0x1ef0] sm:$0xf]  ;;  %v11899_v3 = vor.u32 %v13516_v58, %v11898_v57  ;;  %v9855_v8 = vor.u32 %v12972_v60, %v9852_v62  ;;  %v12780_v44 = vld [vmem:[%s14210_s9 + $0x2f4] sm:$0xf] }
 0x467   : > { %8237 = vmatpush.bf16.msra.mxu0 %v9847_v21  ;;  %8250 = vmatpush.bf16.msra.mxu1 %v11895_v23  ;;  %v13708_v16 = vld [vmem:[%s14210_s9 + $0x1fec] sm:$0xf0]  ;;  %v13676_v21 = vld [vmem:[%s14210_s9 + $0x1ef4] sm:$0xf] }
 0x468   : > { %v12668_v23 = vld [vmem:[%s14210_s9 + $0x1ff0] sm:$0xf0]  ;;  %v12667_v22 = vor.u32 %v13708_v16, %v12666_v15  ;;  %v11642_v6 = vld [vmem:[%s14210_s9 + $0x16f0] sm:$0xf]  ;;  %v1502_v16 = vperm.slane %v16334_v59, 2 }
 0x469   : > { %v11644_v15 = vld [vmem:[%s14210_s9 + $0x17f0] sm:$0xf0]  ;;  %v9338_v20 = vld [vmem:[%s14210_s9 + $0x4f0] sm:$0xf] }
 0x46a   : > { %8212 = vmatpush.bf16.msrb.mxu2 %v9587_v30  ;;  %8225 = vmatpush.bf16.msrb.mxu3 %v11635_v31  ;;  %v12671_v30 = vor.u32 %v13676_v21, %v12668_v23  ;;  %v12410_v31 = vld [vmem:[%s14210_s9 + $0x1cf0] sm:$0xf]  ;;  %v12716_v60 = vld [vmem:[%s14210_s9 + $0xf4] sm:$0xf] }
 0x46b   : > { %8238 = vmatpush.bf16.msra.mxu0 %v9591_v36  ;;  %8251 = vmatpush.bf16.msra.mxu1 %v11639_v37  ;;  %v13612_v36 = vld [vmem:[%s14210_s9 + $0x1cf4] sm:$0xf]  ;;  %v12411_v34 = vor.u32 %v13644_v32, %v12410_v31  ;;  %v12876_v21 = vld [vmem:[%s14210_s9 + $0x5ec] sm:$0xf0] }
 0x46c   : > { %v12412_v37 = vld [vmem:[%s14210_s9 + $0x1df0] sm:$0xf0]  ;;  %v11386_v23 = vld [vmem:[%s14210_s9 + $0x14f0] sm:$0xf] }
 0x46d   : > { %v12415_v42 = vor.u32 %v13612_v36, %v12412_v37  ;;  %v13388_v27 = vld [vmem:[%s14210_s9 + $0x15ec] sm:$0xf0]  ;;  %v13356_v31 = vld [vmem:[%s14210_s9 + $0x14f4] sm:$0xf]  ;;  %v9339_v37 = vor.u32 %v12876_v21, %v9338_v20  ;;  %v13645_v20 = vld [vmem:[%s14210_s9 + $0x1df4] sm:$0xf0] }
 0x46e   : > { %8213 = vmatpush.bf16.msrb.mxu2 %v9331_v49  ;;  %8226 = vmatpush.bf16.msrb.mxu3 %v11379_v52  ;;  %v12156_v49 = vld [vmem:[%s14210_s9 + $0x1bf0] sm:$0xf0]  ;;  %v10107_v52 = vor.u32 %v13068_v40, %v10106_v39  ;;  %v12812_v39 = vld [vmem:[%s14210_s9 + $0x3ec] sm:$0xf0]  ;;  %v13101_v21 = vld [vmem:[%s14210_s9 + $0xcfc] sm:$0xf] }
 0x46f   : > { %8239 = vmatpush.bf16.msra.mxu0 %v9335_v54  ;;  %8252 = vmatpush.bf16.msra.mxu1 %v11383_v55  ;;  %v13004_v54 = vld [vmem:[%s14210_s9 + $0x9ec] sm:$0xf0]  ;;  %v10111_v55 = vor.u32 %v13036_v45, %v10108_v47  ;;  %v12159_v56 = vor.u32 %v13548_v48, %v12156_v49  ;;  %v11388_v32 = vld [vmem:[%s14210_s9 + $0x15f0] sm:$0xf0] }
 0x470   : > { %v9851_v2 = vor.u32 %v13004_v54, %v9850_v12  ;;  %v11130_v40 = vld [vmem:[%s14210_s9 + $0x12f0] sm:$0xf]  ;;  %v9084_v45 = vld [vmem:[%s14210_s9 + $0x3f0] sm:$0xf0] }
 0x471   : > { %v13324_v43 = vld [vmem:[%s14210_s9 + $0x13ec] sm:$0xf0]  ;;  %v13292_v47 = vld [vmem:[%s14210_s9 + $0x12f4] sm:$0xf] }
 0x472   : > { %8214 = vmatpush.bf16.msrb.mxu2 %v9075_v0  ;;  %8227 = vmatpush.bf16.msrb.mxu3 %v11123_v1  ;;  %v11900_v0 = vld [vmem:[%s14210_s9 + $0x19f0] sm:$0xf0]  ;;  %v8826_v49 = vld [vmem:[%s14210_s9 + $0xf0] sm:$0xf] }
 0x473   : > { %8240 = vmatpush.bf16.msra.mxu0 %v9079_v4  ;;  %8253 = vmatpush.bf16.msra.mxu1 %v11127_v5  ;;  %v9594_v4 = vld [vmem:[%s14210_s9 + $0x6f0] sm:$0xf]  ;;  %v11903_v10 = vor.u32 %v13484_v63, %v11900_v0  ;;  %v11132_v48 = vld [vmem:[%s14210_s9 + $0x13f0] sm:$0xf0] }
 0x474   : > { %v12940_v5 = vld [vmem:[%s14210_s9 + $0x7ec] sm:$0xf0]  ;;  %v8828_v62 = vld [vmem:[%s14210_s9 + $0x1f0] sm:$0xf0] }
 0x475   : > { %v10874_v12 = vld [vmem:[%s14210_s9 + $0x10f0] sm:$0xf]  ;;  %v13228_v63 = vld [vmem:[%s14210_s9 + $0x10f4] sm:$0xf] }
 0x476   : > { %8215 = vmatpush.bf16.msrb.mxu2 %v8819_v18  ;;  %8228 = vmatpush.bf16.msrb.mxu3 %v10867_v19  ;;  %v9595_v18 = vor.u32 %v12940_v5, %v9594_v4  ;;  %v11643_v19 = vor.u32 %v13452_v11, %v11642_v6  ;;  %v13260_v54 = vld [vmem:[%s14210_s9 + $0x11ec] sm:$0xf0]  ;;  %v10876_v0 = vld [vmem:[%s14210_s9 + $0x11f0] sm:$0xf0]  ;;  %v13165_v4 = vld [vmem:[%s14210_s9 + $0xefc] sm:$0xf]  ;;  %v8831_v11 = vor.u32 %v12716_v60, %v8828_v62 }
 0x477   : > { %8241 = vmatpush.bf16.msra.mxu0 %v8823_v24  ;;  %8254 = vmatpush.bf16.msra.mxu1 %v10871_v25  ;;  %v9599_v24 = vor.u32 %v12908_v13, %v9596_v14  ;;  %v11647_v25 = vor.u32 %v13420_v9, %v11644_v15  ;;  %v10875_v6 = vor.u32 %v13260_v54, %v10874_v12  ;;  %v10370_v15 = vld [vmem:[%s14210_s9 + $0xcf8] sm:$0xf] }
 0x478   : > { %v10879_v13 = vor.u32 %v13228_v63, %v10876_v0  ;;  %v13453_v63 = vld [vmem:[%s14210_s9 + $0x17f4] sm:$0xf0]  ;;  %v12909_v0 = vld [vmem:[%s14210_s9 + $0x6fc] sm:$0xf] }
 0x479   : > { %8216 = vmatmul.bf16.vlgmr.msrb.gmra.mxu2 %v14352_v50  ;;  %8229 = vmatmul.bf16.vlgmr.msrb.gmra.mxu3 %v14354_v51  ;;  %v8035_v1 = vpop.f32.mrf.mxu0  ;;  %v8048_v61 = vpop.f32.mrf.mxu1 }
 0x47a   : > { %8260 = vmatpush.bf16.msra.mxu2 %v10619_v26  ;;  %8273 = vmatpush.bf16.msra.mxu3 %v12667_v22  ;;  %v8036_v7 = vadd.f32 %v8035_v1, %v1503_v53  ;;  %v12748_v53 = vld [vmem:[%s14210_s9 + $0x1ec] sm:$0xf0]  ;;  %v10626_v1 = vld [vmem:[%s14210_s9 + $0xef8] sm:$0xf] }
 0x47b   : > { %8286 = vmatpush.bf16.msrb.mxu0 %v10623_v29  ;;  %8299 = vmatpush.bf16.msrb.mxu1 %v12671_v30  ;;  %v9340_v30 = vld [vmem:[%s14210_s9 + $0x5f0] sm:$0xf0]  ;;  %v8827_v5 = vor.u32 %v12748_v53, %v8826_v49  ;;  %v13485_v49 = vld [vmem:[%s14210_s9 + $0x18fc] sm:$0xf] }
 0x47c   : > { %8242 = vmatmul.bf16.vlgmr.msra.gmra.mxu0 %v14352_v50  ;;  %8255 = vmatmul.bf16.vlgmr.msra.gmra.mxu1 %v14354_v51  ;;  %v8049_v17 = vadd.f32 %v8048_v61, %v8036_v7  ;;  %v8009_v26 = vpop.f32.mrf.mxu2  ;;  %v8022_v22 = vpop.f32.mrf.mxu3  ;;  %v13197_v61 = vld [vmem:[%s14210_s9 + $0xff4] sm:$0xf0]  ;;  %v10628_v7 = vld [vmem:[%s14210_s9 + $0xff8] sm:$0xf0] }
 0x47d   : > { %v8010_v29 = vadd.f32 %v8009_v26, %v1502_v16  ;;  %v10627_v14 = vor.u32 %v13197_v61, %v10626_v1  ;;  %v13133_v16 = vld [vmem:[%s14210_s9 + $0xdf4] sm:$0xf0]  ;;  %v9604_v1 = vld [vmem:[%s14210_s9 + $0x7f8] sm:$0xf0] }
 0x47e   : > { %8261 = vmatpush.bf16.msra.mxu2 %v10363_v38  ;;  %8274 = vmatpush.bf16.msra.mxu3 %v12411_v34  ;;  %8415 = vst [vmem:[%s14676_s10 + $0x198] sm:$0xff] %v8049_v17  ;;  %v11387_v38 = vor.u32 %v13388_v27, %v11386_v23  ;;  %v9082_v34 = vld [vmem:[%s14210_s9 + $0x2f0] sm:$0xf]  ;;  %v10631_v17 = vor.u32 %v13165_v4, %v10628_v7  ;;  %v10372_v23 = vld [vmem:[%s14210_s9 + $0xdf8] sm:$0xf0] }
 0x47f   : > { %8287 = vmatpush.bf16.msrb.mxu0 %v10367_v41  ;;  %8300 = vmatpush.bf16.msrb.mxu1 %v12415_v42  ;;  %v8023_v33 = vadd.f32 %v8022_v22, %v8010_v29  ;;  %v9343_v41 = vor.u32 %v12844_v28, %v9340_v30  ;;  %v11391_v42 = vor.u32 %v13356_v31, %v11388_v32  ;;  %v10114_v27 = vld [vmem:[%s14210_s9 + $0xaf8] sm:$0xf]  ;;  %v13421_v61 = vld [vmem:[%s14210_s9 + $0x16fc] sm:$0xf] }
 0x480   : > { %v10371_v26 = vor.u32 %v13133_v16, %v10370_v15  ;;  %v13069_v28 = vld [vmem:[%s14210_s9 + $0xbf4] sm:$0xf0]  ;;  %v10375_v29 = vor.u32 %v13101_v21, %v10372_v23  ;;  %v12845_v16 = vld [vmem:[%s14210_s9 + $0x4fc] sm:$0xf] }
 0x481   : > { %v8037_v35 = vpop.f32.mrf.mxu0  ;;  %v8050_v36 = vpop.f32.mrf.mxu1  ;;  %8414 = vst [vmem:[%s14676_s10 + $0x190] sm:$0xff] %v8023_v33  ;;  %v12162_v31 = vld [vmem:[%s14210_s9 + $0x1af8] sm:$0xf]  ;;  %v13037_v33 = vld [vmem:[%s14210_s9 + $0xafc] sm:$0xf] }
 0x482   : > { %8262 = vmatpush.bf16.msra.mxu2 %v10107_v52  ;;  %8275 = vmatpush.bf16.msra.mxu3 %v12155_v46  ;;  %v9083_v52 = vor.u32 %v12812_v39, %v9082_v34  ;;  %v11131_v46 = vor.u32 %v13324_v43, %v11130_v40  ;;  %v13581_v32 = vld [vmem:[%s14210_s9 + $0x1bf4] sm:$0xf0]  ;;  %v10116_v35 = vld [vmem:[%s14210_s9 + $0xbf8] sm:$0xf0]  ;;  %v1505_v39 = vperm.slane %v16334_v59, 5 }
 0x483   : > { %8288 = vmatpush.bf16.msrb.mxu0 %v10111_v55  ;;  %8301 = vmatpush.bf16.msrb.mxu1 %v12159_v56  ;;  %v9087_v55 = vor.u32 %v12780_v44, %v9084_v45  ;;  %v11135_v56 = vor.u32 %v13292_v47, %v11132_v48  ;;  %v13549_v36 = vld [vmem:[%s14210_s9 + $0x1afc] sm:$0xf]  ;;  %v12163_v34 = vor.u32 %v13581_v32, %v12162_v31  ;;  %v9858_v40 = vld [vmem:[%s14210_s9 + $0x8f8] sm:$0xf] }
 0x484   : > { %v8011_v57 = vpop.f32.mrf.mxu2  ;;  %v8024_v58 = vpop.f32.mrf.mxu3  ;;  %v11906_v44 = vld [vmem:[%s14210_s9 + $0x18f8] sm:$0xf]  ;;  %v12973_v47 = vld [vmem:[%s14210_s9 + $0x8fc] sm:$0xf] }
 0x485   : > { %v13517_v45 = vld [vmem:[%s14210_s9 + $0x19f4] sm:$0xf0]  ;;  %v9860_v48 = vld [vmem:[%s14210_s9 + $0x9f8] sm:$0xf0] }
 0x486   : > { %8263 = vmatpush.bf16.msra.mxu2 %v9851_v2  ;;  %8276 = vmatpush.bf16.msra.mxu3 %v11899_v3  ;;  %v12674_v2 = vld [vmem:[%s14210_s9 + $0x1ef8] sm:$0xf]  ;;  %v11907_v54 = vor.u32 %v13517_v45, %v11906_v44  ;;  %v9863_v60 = vor.u32 %v12973_v47, %v9860_v48  ;;  %v12781_v32 = vld [vmem:[%s14210_s9 + $0x2fc] sm:$0xf] }
 0x487   : > { %8289 = vmatpush.bf16.msrb.mxu0 %v9855_v8  ;;  %8302 = vmatpush.bf16.msrb.mxu1 %v11903_v10  ;;  %v13709_v3 = vld [vmem:[%s14210_s9 + $0x1ff4] sm:$0xf0]  ;;  %v13677_v8 = vld [vmem:[%s14210_s9 + $0x1efc] sm:$0xf] }
 0x488   : > { %v12676_v10 = vld [vmem:[%s14210_s9 + $0x1ff8] sm:$0xf0]  ;;  %v12675_v9 = vor.u32 %v13709_v3, %v12674_v2  ;;  %v11650_v57 = vld [vmem:[%s14210_s9 + $0x16f8] sm:$0xf]  ;;  %v1504_v3 = vperm.slane %v16334_v59, 4 }
 0x489   : > { %v11652_v2 = vld [vmem:[%s14210_s9 + $0x17f8] sm:$0xf0]  ;;  %v9346_v7 = vld [vmem:[%s14210_s9 + $0x4f8] sm:$0xf] }
 0x48a   : > { %8264 = vmatpush.bf16.msra.mxu2 %v9595_v18  ;;  %8277 = vmatpush.bf16.msra.mxu3 %v11643_v19  ;;  %v12679_v18 = vor.u32 %v13677_v8, %v12676_v10  ;;  %v12418_v19 = vld [vmem:[%s14210_s9 + $0x1cf8] sm:$0xf]  ;;  %v12717_v47 = vld [vmem:[%s14210_s9 + $0xfc] sm:$0xf] }
 0x48b   : > { %8290 = vmatpush.bf16.msrb.mxu0 %v9599_v24  ;;  %8303 = vmatpush.bf16.msrb.mxu1 %v11647_v25  ;;  %v13613_v24 = vld [vmem:[%s14210_s9 + $0x1cfc] sm:$0xf]  ;;  %v12419_v22 = vor.u32 %v13645_v20, %v12418_v19  ;;  %v12877_v8 = vld [vmem:[%s14210_s9 + $0x5f4] sm:$0xf0] }
 0x48c   : > { %v12420_v25 = vld [vmem:[%s14210_s9 + $0x1df8] sm:$0xf0]  ;;  %v11394_v10 = vld [vmem:[%s14210_s9 + $0x14f8] sm:$0xf] }
 0x48d   : > { %v12423_v30 = vor.u32 %v13613_v24, %v12420_v25  ;;  %v13389_v15 = vld [vmem:[%s14210_s9 + $0x15f4] sm:$0xf0]  ;;  %v13357_v19 = vld [vmem:[%s14210_s9 + $0x14fc] sm:$0xf]  ;;  %v9347_v25 = vor.u32 %v12877_v8, %v9346_v7 }
 0x48e   : > { %8265 = vmatpush.bf16.msra.mxu2 %v9339_v37  ;;  %8278 = vmatpush.bf16.msra.mxu3 %v11387_v38  ;;  %v12164_v37 = vld [vmem:[%s14210_s9 + $0x1bf8] sm:$0xf0]  ;;  %v10115_v38 = vor.u32 %v13069_v28, %v10114_v27  ;;  %v12813_v27 = vld [vmem:[%s14210_s9 + $0x3f4] sm:$0xf0] }
 0x48f   : > { %8291 = vmatpush.bf16.msrb.mxu0 %v9343_v41  ;;  %8304 = vmatpush.bf16.msrb.mxu1 %v11391_v42  ;;  %v13005_v41 = vld [vmem:[%s14210_s9 + $0x9f4] sm:$0xf0]  ;;  %v10119_v42 = vor.u32 %v13037_v33, %v10116_v35  ;;  %v12167_v43 = vor.u32 %v13549_v36, %v12164_v37  ;;  %v11396_v20 = vld [vmem:[%s14210_s9 + $0x15f8] sm:$0xf0] }
 0x490   : > { %v9859_v12 = vor.u32 %v13005_v41, %v9858_v40  ;;  %v11138_v28 = vld [vmem:[%s14210_s9 + $0x12f8] sm:$0xf]  ;;  %v9092_v33 = vld [vmem:[%s14210_s9 + $0x3f8] sm:$0xf0] }
 0x491   : > { %v13325_v31 = vld [vmem:[%s14210_s9 + $0x13f4] sm:$0xf0]  ;;  %v13293_v35 = vld [vmem:[%s14210_s9 + $0x12fc] sm:$0xf]  ;;  %v9095_v40 = vor.u32 %v12781_v32, %v9092_v33 }
 0x492   : > { %8266 = vmatpush.bf16.msra.mxu2 %v9083_v52  ;;  %8279 = vmatpush.bf16.msra.mxu3 %v11131_v46  ;;  %v11908_v52 = vld [vmem:[%s14210_s9 + $0x19f8] sm:$0xf0]  ;;  %v10882_v44 = vld [vmem:[%s14210_s9 + $0x10f8] sm:$0xf] }
 0x493   : > { %8292 = vmatpush.bf16.msrb.mxu0 %v9087_v55  ;;  %8305 = vmatpush.bf16.msrb.mxu1 %v11135_v56  ;;  %v9602_v55 = vld [vmem:[%s14210_s9 + $0x6f8] sm:$0xf]  ;;  %v11911_v62 = vor.u32 %v13485_v49, %v11908_v52  ;;  %v11140_v36 = vld [vmem:[%s14210_s9 + $0x13f8] sm:$0xf0] }
 0x494   : > { %v12941_v56 = vld [vmem:[%s14210_s9 + $0x7f4] sm:$0xf0]  ;;  %v11143_v41 = vor.u32 %v13293_v35, %v11140_v36  ;;  %v8836_v48 = vld [vmem:[%s14210_s9 + $0x1f8] sm:$0xf0] }
 0x495   : > { %v13261_v45 = vld [vmem:[%s14210_s9 + $0x11f4] sm:$0xf0]  ;;  %v13229_v49 = vld [vmem:[%s14210_s9 + $0x10fc] sm:$0xf] }
 0x496   : > { %8267 = vmatpush.bf16.msra.mxu2 %v8827_v5  ;;  %8280 = vmatpush.bf16.msra.mxu3 %v10875_v6  ;;  %v9603_v5 = vor.u32 %v12941_v56, %v9602_v55  ;;  %v11651_v6 = vor.u32 %v13453_v63, %v11650_v57  ;;  %v10884_v52 = vld [vmem:[%s14210_s9 + $0x11f8] sm:$0xf0]  ;;  %v1507_v55 = vperm.slane %v16334_v59, 7 }
 0x497   : > { %8293 = vmatpush.bf16.msrb.mxu0 %v8831_v11  ;;  %8306 = vmatpush.bf16.msrb.mxu1 %v10879_v13  ;;  %v9607_v11 = vor.u32 %v12909_v0, %v9604_v1  ;;  %v11655_v13 = vor.u32 %v13421_v61, %v11652_v2 }
 0x499   : > { %8268 = vmatmul.bf16.vlgmr.msra.gmra.mxu2 %v14352_v50  ;;  %8281 = vmatmul.bf16.vlgmr.msra.gmra.mxu3 %v14354_v51  ;;  %v8087_v46 = vpop.f32.mrf.mxu0  ;;  %v8100_v53 = vpop.f32.mrf.mxu1 }
 0x49a   : > { %8312 = vmatpush.bf16.msrb.mxu2 %v10627_v14  ;;  %8325 = vmatpush.bf16.msrb.mxu3 %v12675_v9  ;;  %v8088_v58 = vadd.f32 %v8087_v46, %v1505_v39  ;;  %v12749_v39 = vld [vmem:[%s14210_s9 + $0x1f4] sm:$0xf0] }
 0x49b   : > { %8338 = vmatpush.bf16.msra.mxu0 %v10631_v17  ;;  %8351 = vmatpush.bf16.msra.mxu1 %v12679_v18  ;;  %v9348_v18 = vld [vmem:[%s14210_s9 + $0x5f8] sm:$0xf0] }
 0x49c   : > { %8294 = vmatmul.bf16.vlgmr.msrb.gmra.mxu0 %v14352_v50  ;;  %8307 = vmatmul.bf16.vlgmr.msrb.gmra.mxu1 %v14354_v51  ;;  %v8101_v4 = vadd.f32 %v8100_v53, %v8088_v58  ;;  %v8061_v14 = vpop.f32.mrf.mxu2  ;;  %v8074_v9 = vpop.f32.mrf.mxu3  ;;  %v10883_v53 = vor.u32 %v13261_v45, %v10882_v44 }
 0x49d   : > { %v8062_v17 = vadd.f32 %v8061_v14, %v1504_v3 }
 0x49e   : > { %8313 = vmatpush.bf16.msrb.mxu2 %v10371_v26  ;;  %8326 = vmatpush.bf16.msrb.mxu3 %v12419_v22  ;;  %8417 = vst [vmem:[%s14676_s10 + $0x1a8] sm:$0xff] %v8101_v4  ;;  %v11395_v26 = vor.u32 %v13389_v15, %v11394_v10  ;;  %v9090_v22 = vld [vmem:[%s14210_s9 + $0x2f8] sm:$0xf] }
 0x49f   : > { %8339 = vmatpush.bf16.msra.mxu0 %v10375_v29  ;;  %8352 = vmatpush.bf16.msra.mxu1 %v12423_v30  ;;  %v8075_v21 = vadd.f32 %v8074_v9, %v8062_v17  ;;  %v9351_v29 = vor.u32 %v12845_v16, %v9348_v18  ;;  %v11399_v30 = vor.u32 %v13357_v19, %v11396_v20  ;;  %v16540_v4 = vld [vmem:[%s14643_s30 + $0x38] sm:$0xff] }
 0x4a0   : > { %v9091_v37 = vor.u32 %v12813_v27, %v9090_v22  ;;  %v1508_v8 = vperm.slane %v16540_v4, 0  ;;  %v1511_v19 = vperm.slane %v16540_v4, 3  ;;  %v1513_v33 = vperm.slane %v16540_v4, 5 }
 0x4a1   : > { %v8089_v23 = vpop.f32.mrf.mxu0  ;;  %v8102_v24 = vpop.f32.mrf.mxu1  ;;  %8416 = vst [vmem:[%s14676_s10 + $0x1a0] sm:$0xff] %v8075_v21 }
 0x4a2   : > { %8314 = vmatpush.bf16.msrb.mxu2 %v10115_v38  ;;  %8327 = vmatpush.bf16.msrb.mxu3 %v12163_v34  ;;  %v11139_v38 = vor.u32 %v13325_v31, %v11138_v28  ;;  %v8834_v34 = vld [vmem:[%s14210_s9 + $0xf8] sm:$0xf]  ;;  %v1510_v24 = vperm.slane %v16540_v4, 2 }
 0x4a3   : > { %8340 = vmatpush.bf16.msra.mxu0 %v10119_v42  ;;  %8353 = vmatpush.bf16.msra.mxu1 %v12167_v43  ;;  %v8835_v46 = vor.u32 %v12749_v39, %v8834_v34 }
 0x4a4   : > { %v8063_v42 = vpop.f32.mrf.mxu2  ;;  %v8076_v43 = vpop.f32.mrf.mxu3 }
 0x4a6   : > { %8315 = vmatpush.bf16.msrb.mxu2 %v9859_v12  ;;  %8328 = vmatpush.bf16.msrb.mxu3 %v11907_v54  ;;  %v8839_v12 = vor.u32 %v12717_v47, %v8836_v48  ;;  %v10887_v54 = vor.u32 %v13229_v49, %v10884_v52  ;;  %v1515_v48 = vperm.slane %v16540_v4, 7 }
 0x4a7   : > { %8341 = vmatpush.bf16.msra.mxu0 %v9863_v60  ;;  %8354 = vmatpush.bf16.msra.mxu1 %v11911_v62  ;;  %v1506_v60 = vperm.slane %v16334_v59, 6 }
 0x4aa   : > { %8316 = vmatpush.bf16.msrb.mxu2 %v9603_v5  ;;  %8329 = vmatpush.bf16.msrb.mxu3 %v11651_v6  ;;  %v1509_v5 = vperm.slane %v16540_v4, 1 }
 0x4ab   : > { %8342 = vmatpush.bf16.msra.mxu0 %v9607_v11  ;;  %8355 = vmatpush.bf16.msra.mxu1 %v11655_v13 }
 0x4ae   : > { %8317 = vmatpush.bf16.msrb.mxu2 %v9347_v25  ;;  %8330 = vmatpush.bf16.msrb.mxu3 %v11395_v26 }
 0x4af   : > { %8343 = vmatpush.bf16.msra.mxu0 %v9351_v29  ;;  %8356 = vmatpush.bf16.msra.mxu1 %v11399_v30 }
 0x4b2   : > { %8318 = vmatpush.bf16.msrb.mxu2 %v9091_v37  ;;  %8331 = vmatpush.bf16.msrb.mxu3 %v11139_v38  ;;  %v1512_v38 = vperm.slane %v16540_v4, 4 }
 0x4b3   : > { %8344 = vmatpush.bf16.msra.mxu0 %v9095_v40  ;;  %8357 = vmatpush.bf16.msra.mxu1 %v11143_v41 }
 0x4b6   : > { %8319 = vmatpush.bf16.msrb.mxu2 %v8835_v46  ;;  %8332 = vmatpush.bf16.msrb.mxu3 %v10883_v53  ;;  %v1514_v53 = vperm.slane %v16540_v4, 6 }
 0x4b7   : > { %8345 = vmatpush.bf16.msra.mxu0 %v8839_v12  ;;  %8358 = vmatpush.bf16.msra.mxu1 %v10887_v54 }
 0x4b9   : > { %8320 = vmatmul.bf16.vlgmr.msrb.gmra.mxu2 %v14352_v50  ;;  %8333 = vmatmul.bf16.vlgmr.msrb.gmra.mxu3 %v14354_v51  ;;  %v8139_v56 = vpop.f32.mrf.mxu0  ;;  %v8152_v57 = vpop.f32.mrf.mxu1 }
 0x4ba   : > { %8346 = vmatmul.bf16.vlgmr.msra.gmra.mxu0 %v14352_v50  ;;  %8359 = vmatmul.bf16.vlgmr.msra.gmra.mxu1 %v14354_v51  ;;  %v8140_v58 = vadd.f32 %v8139_v56, %v1507_v55 }
 0x4bc   : > { %v8153_v62 = vadd.f32 %v8152_v57, %v8140_v58  ;;  %v8113_v63 = vpop.f32.mrf.mxu2  ;;  %v8126_v0 = vpop.f32.mrf.mxu3 }
 0x4bd   : > { %v8114_v1 = vadd.f32 %v8113_v63, %v1506_v60 }
 0x4be   : > { %8419 = vst [vmem:[%s14676_s10 + $0x1b8] sm:$0xff] %v8153_v62 }
 0x4bf   : > { %v8127_v61 = vadd.f32 %v8126_v0, %v8114_v1 }
 0x4c1   : > { %v8141_v2 = vpop.f32.mrf.mxu0  ;;  %v8154_v3 = vpop.f32.mrf.mxu1  ;;  %8418 = vst [vmem:[%s14676_s10 + $0x1b0] sm:$0xff] %v8127_v61 }
 0x4c4   : > { %v8115_v50 = vpop.f32.mrf.mxu2  ;;  %v8128_v51 = vpop.f32.mrf.mxu3 }
 0x4d9   : > { %v8191_v6 = vpop.f32.mrf.mxu0  ;;  %v8204_v7 = vpop.f32.mrf.mxu1 }
 0x4da   : > { %v8192_v59 = vadd.f32 %v8191_v6, %v1509_v5 }
 0x4dc   : > { %v8205_v10 = vadd.f32 %v8204_v7, %v8192_v59  ;;  %v8165_v11 = vpop.f32.mrf.mxu2  ;;  %v8178_v13 = vpop.f32.mrf.mxu3 }
 0x4dd   : > { %v8166_v14 = vadd.f32 %v8165_v11, %v1508_v8 }
 0x4de   : > { %8421 = vst [vmem:[%s14676_s10 + $0x1c8] sm:$0xff] %v8205_v10 }
 0x4df   : > { %v8179_v9 = vadd.f32 %v8178_v13, %v8166_v14 }
 0x4e1   : > { %v8193_v15 = vpop.f32.mrf.mxu0  ;;  %v8206_v16 = vpop.f32.mrf.mxu1  ;;  %8420 = vst [vmem:[%s14676_s10 + $0x1c0] sm:$0xff] %v8179_v9 }
 0x4e4   : > { %v8167_v17 = vpop.f32.mrf.mxu2  ;;  %v8180_v18 = vpop.f32.mrf.mxu3 }
 0x4f9   : > { %v8243_v20 = vpop.f32.mrf.mxu0  ;;  %v8256_v21 = vpop.f32.mrf.mxu1 }
 0x4fa   : > { %v8244_v23 = vadd.f32 %v8243_v20, %v1511_v19 }
 0x4fc   : > { %v8257_v25 = vadd.f32 %v8256_v21, %v8244_v23  ;;  %v8217_v26 = vpop.f32.mrf.mxu2  ;;  %v8230_v22 = vpop.f32.mrf.mxu3 }
 0x4fd   : > { %v8218_v27 = vadd.f32 %v8217_v26, %v1510_v24 }
 0x4fe   : > { %8423 = vst [vmem:[%s14676_s10 + $0x1d8] sm:$0xff] %v8257_v25 }
 0x4ff   : > { %v8231_v28 = vadd.f32 %v8230_v22, %v8218_v27 }
 0x501   : > { %v8245_v29 = vpop.f32.mrf.mxu0  ;;  %v8258_v30 = vpop.f32.mrf.mxu1  ;;  %8422 = vst [vmem:[%s14676_s10 + $0x1d0] sm:$0xff] %v8231_v28 }
 0x504   : > { %v8219_v31 = vpop.f32.mrf.mxu2  ;;  %v8232_v32 = vpop.f32.mrf.mxu3 }
 0x519   : > { %v8295_v35 = vpop.f32.mrf.mxu0  ;;  %v8308_v36 = vpop.f32.mrf.mxu1 }
 0x51a   : > { %v8296_v37 = vadd.f32 %v8295_v35, %v1513_v33 }
 0x51c   : > { %v8309_v34 = vadd.f32 %v8308_v36, %v8296_v37  ;;  %v8269_v39 = vpop.f32.mrf.mxu2  ;;  %v8282_v40 = vpop.f32.mrf.mxu3 }
 0x51d   : > { %v8270_v41 = vadd.f32 %v8269_v39, %v1512_v38 }
 0x51e   : > { %8425 = vst [vmem:[%s14676_s10 + $0x1e8] sm:$0xff] %v8309_v34 }
 0x51f   : > { %v8283_v42 = vadd.f32 %v8282_v40, %v8270_v41 }
 0x521   : > { %v8297_v43 = vpop.f32.mrf.mxu0  ;;  %v8310_v44 = vpop.f32.mrf.mxu1  ;;  %8424 = vst [vmem:[%s14676_s10 + $0x1e0] sm:$0xff] %v8283_v42 }
 0x524   : > { %v8271_v45 = vpop.f32.mrf.mxu2  ;;  %v8284_v47 = vpop.f32.mrf.mxu3 }
 0x537   : > { %v8347_v49 = vpop.f32.mrf.mxu0  ;;  %v8360_v52 = vpop.f32.mrf.mxu1 }
 0x538   : > { %v8348_v46 = vadd.f32 %v8347_v49, %v1515_v48 }
 0x53a   : > { %v8361_v12 = vadd.f32 %v8360_v52, %v8348_v46 }
 0x53c   : > { %8427 = vst [vmem:[%s14676_s10 + $0x1f8] sm:$0xff] %v8361_v12  ;;  %v8321_v54 = vpop.f32.mrf.mxu2  ;;  %v8334_v55 = vpop.f32.mrf.mxu3 }
 0x53d   : > { %v8322_v56 = vadd.f32 %v8321_v54, %v1514_v53 }
 0x53f   : > { %v8335_v57 = vadd.f32 %v8334_v55, %v8322_v56  ;;  %v8349_v58 = vpop.f32.mrf.mxu0  ;;  %v8362_v60 = vpop.f32.mrf.mxu1 }
 0x541   : > { %8426 = vst [vmem:[%s14676_s10 + $0x1f0] sm:$0xff] %v8335_v57 }
 0x542   : > { %13973 = shalt.err (!%p13970_p13)
}
 0x543   : > { %13727 = dma.vmem_to_hbm [thread:$0]  (%p14132_p5), %s8443_s28, 8192, %s8445_s16, %s8429_s22  }
 0x544   : > { %v8323_v62 = vpop.f32.mrf.mxu2  ;;  %v8336_v63 = vpop.f32.mrf.mxu3 }
 0x545 PF: > { %p13757_p0 = scmp.ge.s32.totalorder %s14020_s21, 2  ;;  %s8456_s1 = sand.u32 1, %s14008_s18  }
 0x546   : > { %s8457_s11 = scalar_lea.sflag [#allocation4], %s8456_s1 }
 0x547   : > { %p13747_p9 = pnand %p13757_p0, %p14093_p6 }
 0x549   : > { %p13748_p3 = pneg %p13747_p9 }
 0x54b   : > { %14003 = dma.done.wait (%p13748_p3), %s8457_s11, 8192  }
 0x54c   : > { %14005 = vsyncadd (%p13748_p3), %s8457_s11, 4294959104  ;;  %s16619_s9 = sld [smem:[#allocation16_spill]]  ;;  %p20_p5 = scmp.ge.s32.totalorder %s14114_s8, 6  }
 0x54d   : > { %s16620_s18 = smov %s14012_s19  ;;  %s16621_s19 = smov %s14016_s20 }
 0x54e   : > { %s16623_s21 = smov %s14114_s8  ;;  %22 = sbr.rel (!%p20_p5) target bundleno = 11 (0xb), region = 109 }
 0x552   : > { %s16622_s20 = smov %s16619_s9 }
 0x553   :  { %8463 = vsyncpa [#allocation3], 1 }
 0x554   :  { %8465 = vsyncpa [#allocation3 + $0x1], 1 }
 0x555   :  { %8466 = vsyncpa [#allocation6], 1 }
 0x556   :  { %8467 = vsyncpa [#allocation9], 1 }
 0x557   :  { %8469 = vsyncpa [#allocation9 + $0x1], 1 }
 0x558   :  { %8470 = vsyncpa [#allocation4], 1 }
 0x559   :  { %8472 = vsyncpa [#allocation4 + $0x1], 1 }

</bundles_post_ra>
